<compile_context>
chip_gen: v6e
topology: v6e:2x2x1
jax: 0.10.0
libtpu: 0.0.40
codegen_flags: <defaults>
</compile_context>

<pallas_src>
import functools

import jax
import jax.numpy as jnp
import numpy as np
from jax.experimental import pallas as pl
from jax.experimental.pallas import tpu as pltpu

LANES = 128                  # channel lanes (all LeNet channel counts <= 128)
KK = 5                       # conv kernel size

# conv1: 32x32x1 -(5x5, tap-packed)-> 28x28x6 -(2x2 pool)-> 14x14x6
C1_ROWS = 28 * 28            # 784, already a multiple of 8
C1_POOL_PAD = 200            # >= 14*14 = 196 and >= conv2 slice reach (60+140), mult of 8
# conv2: 14x14x6 -(5x5, full-width rows)-> 10x(14)x16 -(pool+extract)-> 5x5x16
C2_W_IN = 14
C2_ROWS_OUT = 10 * 14        # 140 full-width conv2 rows (valid cols picked by pool matrix)
C2_POOL_PAD = 32             # >= 5*5 = 25, mult of 8
HEAD_K = 512                 # 25 spatial x 16 real channels = 400, padded to 4*128 lanes


def _round_up(n, m):
    return ((n + m - 1) // m) * m


# ----------------------------- Pallas kernels ------------------------------

def _conv1_kernel(x_ref, w_ref, b_ref, p_ref, o_ref, *, bt):
    # x_ref: (bt*784, 128) bf16 tap-packed patches (row = h*28+w, lane = tap)
    # w_ref: (128, 128) bf16 packed conv1 weights (tap x out-ch, zero padded)
    # b_ref: (1, 128) f32 bias; p_ref: (200, 784) bf16 avg-pool matrix
    for t in range(bt):
        lhs = x_ref[pl.ds(t * C1_ROWS, C1_ROWS), :]                    # bf16
        y = jnp.dot(lhs, w_ref[...], preferred_element_type=jnp.float32)
        y = jnp.tanh(y + b_ref[...])                                   # f32 epilogue
        pooled = jnp.dot(p_ref[...], y.astype(jnp.bfloat16),
                         preferred_element_type=jnp.float32)
        o_ref[pl.ds(t * C1_POOL_PAD, C1_POOL_PAD), :] = pooled.astype(o_ref.dtype)


def _conv2_kernel(x_ref, w_ref, b_ref, p_ref, o_ref, acc_ref, *, bt):
    # x_ref: (bt*200, 128) bf16 pooled conv1 activations (row = h*14+w, lane = ch)
    # w_ref: (25, 128, 128) bf16 per-tap weights; acc_ref: (140, 128) f32 VMEM scratch
    # p_ref: (32, 140) bf16 pool + valid-column extraction matrix
    for t in range(bt):
        acc_ref[...] = jnp.zeros_like(acc_ref)
        base = t * C1_POOL_PAD
        for kh in range(KK):
            for kw in range(KK):
                off = kh * C2_W_IN + kw
                lhs = x_ref[pl.ds(base + off, C2_ROWS_OUT), :]         # bf16
                acc_ref[...] += jnp.dot(lhs, w_ref[kh * KK + kw],
                                        preferred_element_type=jnp.float32)
        y = jnp.tanh(acc_ref[...] + b_ref[...])                        # f32 epilogue
        pooled = jnp.dot(p_ref[...], y.astype(jnp.bfloat16),
                         preferred_element_type=jnp.float32)
        o_ref[pl.ds(t * C2_POOL_PAD, C2_POOL_PAD), :] = pooled.astype(o_ref.dtype)


def _head_kernel(x_ref, w3_ref, b3_ref, wf_ref, bf_ref, wo_ref, bo_ref, o_ref):
    # conv3 (dense over compacted 5x5x16 feats) -> tanh -> fc -> tanh -> out
    h = jnp.dot(x_ref[...], w3_ref[...], preferred_element_type=jnp.float32)
    h = jnp.tanh(h + b3_ref[...])
    h = jnp.dot(h.astype(jnp.bfloat16), wf_ref[...],
                preferred_element_type=jnp.float32)
    h = jnp.tanh(h + bf_ref[...])
    o = jnp.dot(h.astype(jnp.bfloat16), wo_ref[...],
                preferred_element_type=jnp.float32)
    o_ref[...] = (o + bo_ref[...]).astype(o_ref.dtype)


# ------------------------------ call wrappers -------------------------------

def _conv1(xi, w1, b1, p1, nblocks, bt):
    return pl.pallas_call(
        functools.partial(_conv1_kernel, bt=bt),
        out_shape=jax.ShapeDtypeStruct((nblocks * bt * C1_POOL_PAD, LANES),
                                       jnp.bfloat16),
        grid=(nblocks,),
        in_specs=[
            pl.BlockSpec((bt * C1_ROWS, LANES), lambda i: (i, 0)),
            pl.BlockSpec((LANES, LANES), lambda i: (0, 0)),          # resident consts
            pl.BlockSpec((1, LANES), lambda i: (0, 0)),
            pl.BlockSpec((C1_POOL_PAD, C1_ROWS), lambda i: (0, 0)),
        ],
        out_specs=pl.BlockSpec((bt * C1_POOL_PAD, LANES), lambda i: (i, 0)),
        compiler_params=pltpu.CompilerParams(dimension_semantics=("parallel",)),
    )(xi, w1, b1, p1)


def _conv2(h1, w2, b2, p2, nblocks, bt):
    return pl.pallas_call(
        functools.partial(_conv2_kernel, bt=bt),
        out_shape=jax.ShapeDtypeStruct((nblocks * bt * C2_POOL_PAD, LANES),
                                       jnp.bfloat16),
        grid=(nblocks,),
        in_specs=[
            pl.BlockSpec((bt * C1_POOL_PAD, LANES), lambda i: (i, 0)),
            pl.BlockSpec((KK * KK, LANES, LANES), lambda i: (0, 0, 0)),
            pl.BlockSpec((1, LANES), lambda i: (0, 0)),
            pl.BlockSpec((C2_POOL_PAD, C2_ROWS_OUT), lambda i: (0, 0)),
        ],
        out_specs=pl.BlockSpec((bt * C2_POOL_PAD, LANES), lambda i: (i, 0)),
        scratch_shapes=[pltpu.VMEM((C2_ROWS_OUT, LANES), jnp.float32)],
        compiler_params=pltpu.CompilerParams(dimension_semantics=("parallel",)),
    )(h1, w2, b2, p2)


def _head(feats, w3, b3, wf, bf, wo, bo, tile_b):
    bp = feats.shape[0]
    return pl.pallas_call(
        _head_kernel,
        out_shape=jax.ShapeDtypeStruct((bp, LANES), jnp.float32),
        grid=(bp // tile_b,),
        in_specs=[
            pl.BlockSpec((tile_b, HEAD_K), lambda i: (i, 0)),
            pl.BlockSpec((HEAD_K, LANES), lambda i: (0, 0)),
            pl.BlockSpec((1, LANES), lambda i: (0, 0)),
            pl.BlockSpec((LANES, LANES), lambda i: (0, 0)),
            pl.BlockSpec((1, LANES), lambda i: (0, 0)),
            pl.BlockSpec((LANES, LANES), lambda i: (0, 0)),
            pl.BlockSpec((1, LANES), lambda i: (0, 0)),
        ],
        out_specs=pl.BlockSpec((tile_b, LANES), lambda i: (i, 0)),
        compiler_params=pltpu.CompilerParams(dimension_semantics=("parallel",)),
    )(feats, w3, b3, wf, bf, wo, bo)


# --------------------------- constant / param prep ---------------------------

def _pool_matrix(pool_h, pool_w, row_stride, n_cols, rows_pad):
    """(rows_pad, n_cols) bf16 matrix: 2x2/stride-2 average pool (+ extraction of
    valid columns) over conv rows laid out as h*row_stride + w. Entries are
    exactly 0 or 0.25 so bf16 storage is lossless."""
    m = np.zeros((rows_pad, n_cols), np.float32)
    for i in range(pool_h):
        for j in range(pool_w):
            for dh in (0, 1):
                for dw in (0, 1):
                    m[i * pool_w + j, (2 * i + dh) * row_stride + (2 * j + dw)] = 0.25
    return jnp.asarray(m).astype(jnp.bfloat16)


def pack_params(p):
    """One-time conversion of PyTorch-convention params into padded,
    pre-transposed, bf16 kernel layouts (done outside the forward pass)."""
    def vec(v):                              # (N,) -> (1, 128) f32
        return jnp.pad(v, (0, LANES - v.shape[0])).reshape(1, LANES).astype(jnp.float32)

    def mat(w):                              # torch (out, in) -> (128in, 128out) bf16
        o, i = w.shape
        return jnp.pad(w.T, ((0, LANES - i), (0, LANES - o))).astype(jnp.bfloat16)

    # conv1 (6,1,5,5) -> tap-packed (25 taps, 6 out) -> (128, 128) bf16
    w1 = jnp.transpose(p["conv1_w"], (2, 3, 1, 0)).reshape(KK * KK, 6)
    w1 = jnp.pad(w1, ((0, LANES - KK * KK), (0, LANES - 6))).astype(jnp.bfloat16)
    # conv2 (16,6,5,5) -> per-tap (25, 128in, 128out) bf16
    w2 = jnp.transpose(p["conv2_w"], (2, 3, 1, 0)).reshape(KK * KK, 6, 16)
    w2 = jnp.pad(w2, ((0, 0), (0, LANES - 6), (0, LANES - 16))).astype(jnp.bfloat16)
    # conv3 (120,16,5,5) acts as dense over compacted feats: (400, 120) -> (512, 128)
    w3 = jnp.transpose(p["conv3_w"], (2, 3, 1, 0)).reshape(KK * KK * 16, 120)
    w3 = jnp.pad(w3, ((0, HEAD_K - KK * KK * 16), (0, LANES - 120))).astype(jnp.bfloat16)

    return {
        "w1": w1, "b1": vec(p["conv1_b"]),
        "w2": w2, "b2": vec(p["conv2_b"]),
        "w3": w3, "b3": vec(p["conv3_b"]),
        "wf": mat(p["fc_w"]), "bf": vec(p["fc_b"]),
        "wo": mat(p["out_w"]), "bo": vec(p["out_b"]),
        "p1": _pool_matrix(14, 14, 28, C1_ROWS, C1_POOL_PAD),
        "p2": _pool_matrix(5, 5, C2_W_IN, C2_ROWS_OUT, C2_POOL_PAD),
    }


# --------------------------------- forward ----------------------------------

def lenet5_forward(x, kp):
    # x: (B, 1, 32, 32) f32 NCHW, as in the PyTorch module.
    b = x.shape[0]
    bt = max(1, min(8, -(-b // 2)))           # images per conv grid step (v7x-safe)
    bpad = _round_up(b, bt)

    # Tap-packed im2col for conv1 (single input channel): rows = 28x28 output
    # positions, lanes = 25 taps padded to 128, stored bf16.
    x2 = x[:, 0]                                                     # (B, 32, 32)
    taps = [x2[:, kh:kh + 28, kw:kw + 28]
            for kh in range(KK) for kw in range(KK)]
    patches = jnp.stack(taps, axis=-1).reshape(b, C1_ROWS, KK * KK)
    patches = patches.astype(jnp.bfloat16)
    patches = jnp.pad(patches, ((0, bpad - b), (0, 0), (0, LANES - KK * KK)))
    xi = patches.reshape(bpad * C1_ROWS, LANES)

    nblocks = bpad // bt
    h1 = _conv1(xi, kp["w1"], kp["b1"], kp["p1"], nblocks, bt)       # (bpad*200,128) bf16
    h2 = _conv2(h1, kp["w2"], kp["b2"], kp["p2"], nblocks, bt)       # (bpad*32,128) bf16

    # Compact head features: keep only the 25 real spatial rows x 16 real channels.
    feats = h2.reshape(bpad, C2_POOL_PAD, LANES)[:b, :25, :16].reshape(b, 400)
    tile_b = max(8, _round_up(-(-b // 2), 8))     # >=2 head grid steps when b allows
    bp = _round_up(b, tile_b)
    feats = jnp.pad(feats, ((0, bp - b), (0, HEAD_K - 400)))          # bf16

    logits = _head(feats, kp["w3"], kp["b3"], kp["wf"], kp["bf"],
                   kp["wo"], kp["bo"], tile_b)                        # (bp, 128) f32
    return logits[:b, :10]


def init_params(key):
    # Deterministic synthetic init; shapes follow LeNet5.__init__ (PyTorch
    # conventions: conv weight (O, C, kH, kW), linear weight (out, in)).
    shapes = {
        "conv1_w": (6, 1, 5, 5),    "conv1_b": (6,),
        "conv2_w": (16, 6, 5, 5),   "conv2_b": (16,),
        "conv3_w": (120, 16, 5, 5), "conv3_b": (120,),
        "fc_w": (84, 120),          "fc_b": (84,),
        "out_w": (10, 84),          "out_b": (10,),
    }
    keys = jax.random.split(key, len(shapes))
    params = {}
    for k_, (name, shp) in zip(keys, sorted(shapes.items())):
        params[name] = (0.1 * jax.random.normal(k_, shp)).astype(jnp.float32)
    return params


if __name__ == "__main__":
    key = jax.random.PRNGKey(0)
    pkey, xkey = jax.random.split(key)
    params = init_params(pkey)
    kernel_params = pack_params(params)     # one-time pad/transpose/bf16 cast
    # classic LeNet5 input: 1 channel, 32x32 (required so conv3 output is 1x1)
    x = jax.random.normal(xkey, (2, 1, 32, 32), dtype=jnp.float32)

    out = jax.jit(lenet5_forward)(x, kernel_params)
    out = jax.block_until_ready(out)
    assert out.shape == (2, 10) and out.dtype == jnp.float32
    print("KERNEL_OK")
</pallas_src>

<mosaic_0001>
module attributes {stable_mosaic.version = 11 : i64} {
  func.func @_conv1_kernel(%arg0: i32, %arg1: memref<784x128xbf16, #tpu.memory_space<vmem>>, %arg2: memref<128x128xbf16, #tpu.memory_space<vmem>>, %arg3: memref<1x128xf32, #tpu.memory_space<vmem>>, %arg4: memref<200x784xbf16, #tpu.memory_space<vmem>>, %arg5: memref<200x128xbf16, #tpu.memory_space<vmem>>) attributes {dimension_semantics = [#tpu.dimension_semantics<parallel>], iteration_bounds = array<i64: 2>, scalar_prefetch = 0 : i64, scratch_operands = 0 : i64, tpu.core_type = #tpu.core_type<tc>, window_params = [{transform_indices = @transform_0, window_bounds = array<i64: 784, 128>}, {pipeline_mode = #tpu.pipeline_mode<synchronous>, transform_indices = @transform_1, window_bounds = array<i64: 128, 128>}, {pipeline_mode = #tpu.pipeline_mode<synchronous>, transform_indices = @transform_2, window_bounds = array<i64: 1, 128>}, {pipeline_mode = #tpu.pipeline_mode<synchronous>, transform_indices = @transform_3, window_bounds = array<i64: 200, 784>}, {transform_indices = @transform_4, window_bounds = array<i64: 200, 128>}]} {
    %c0 = arith.constant 0 : index
    %c0_0 = arith.constant 0 : index
    %0 = vector.load %arg1[%c0, %c0_0] : memref<784x128xbf16, #tpu.memory_space<vmem>>, vector<784x128xbf16>
    %c0_1 = arith.constant 0 : index
    %c0_2 = arith.constant 0 : index
    %1 = vector.load %arg2[%c0_1, %c0_2] : memref<128x128xbf16, #tpu.memory_space<vmem>>, vector<128x128xbf16>
    %cst = arith.constant dense<0.000000e+00> : vector<784x128xf32>
    %2 = tpu.matmul %0, %1, %cst {dimension_numbers = #tpu.dot_dimension_numbers<[1], [0], [0], [1], [0, 0, 1, 1], [], []>} : vector<784x128xbf16>, vector<128x128xbf16>, vector<784x128xf32> -> vector<784x128xf32>
    %c0_3 = arith.constant 0 : index
    %c0_4 = arith.constant 0 : index
    %3 = vector.load %arg3[%c0_3, %c0_4] : memref<1x128xf32, #tpu.memory_space<vmem>>, vector<1x128xf32>
    %4 = vector.broadcast %3 : vector<1x128xf32> to vector<784x128xf32>
    %5 = arith.addf %2, %4 : vector<784x128xf32>
    %6 = math.tanh %5 : vector<784x128xf32>
    %c0_5 = arith.constant 0 : index
    %c0_6 = arith.constant 0 : index
    %7 = vector.load %arg4[%c0_5, %c0_6] : memref<200x784xbf16, #tpu.memory_space<vmem>>, vector<200x784xbf16>
    %8 = arith.truncf %6 : vector<784x128xf32> to vector<784x128xbf16>
    %cst_7 = arith.constant dense<0.000000e+00> : vector<200x128xf32>
    %9 = tpu.matmul %7, %8, %cst_7 {dimension_numbers = #tpu.dot_dimension_numbers<[1], [0], [0], [1], [0, 0, 1, 1], [], []>} : vector<200x784xbf16>, vector<784x128xbf16>, vector<200x128xf32> -> vector<200x128xf32>
    %10 = arith.truncf %9 : vector<200x128xf32> to vector<200x128xbf16>
    %c0_8 = arith.constant 0 : index
    %c0_9 = arith.constant 0 : index
    %11 = vector.load %arg5[%c0_8, %c0_9] : memref<200x128xbf16, #tpu.memory_space<vmem>>, vector<200x128xbf16>
    tpu.vector_store %arg5[%c0_8, %c0_9], %10 {strides = array<i32>} : memref<200x128xbf16, #tpu.memory_space<vmem>>, vector<200x128xbf16>,
    return
  }
  func.func @transform_0(%arg0: i32) -> (i32, i32) {
    %c0_i32 = arith.constant 0 : i32
    %c0_i32_0 = arith.constant 0 : i32
    return %arg0, %c0_i32 : i32, i32
  }
  func.func @transform_1(%arg0: i32) -> (i32, i32) {
    %c0_i32 = arith.constant 0 : i32
    %c0_i32_0 = arith.constant 0 : i32
    %c0_i32_1 = arith.constant 0 : i32
    return %c0_i32, %c0_i32_0 : i32, i32
  }
  func.func @transform_2(%arg0: i32) -> (i32, i32) {
    %c0_i32 = arith.constant 0 : i32
    %c0_i32_0 = arith.constant 0 : i32
    %c0_i32_1 = arith.constant 0 : i32
    return %c0_i32, %c0_i32_0 : i32, i32
  }
  func.func @transform_3(%arg0: i32) -> (i32, i32) {
    %c0_i32 = arith.constant 0 : i32
    %c0_i32_0 = arith.constant 0 : i32
    %c0_i32_1 = arith.constant 0 : i32
    return %c0_i32, %c0_i32_0 : i32, i32
  }
  func.func @transform_4(%arg0: i32) -> (i32, i32) {
    %c0_i32 = arith.constant 0 : i32
    %c0_i32_0 = arith.constant 0 : i32
    return %arg0, %c0_i32 : i32, i32
  }
}

module attributes {stable_mosaic.version = 11 : i64} {
  func.func @_conv2_kernel(%arg0: i32, %arg1: memref<200x128xbf16, #tpu.memory_space<vmem>>, %arg2: memref<25x128x128xbf16, #tpu.memory_space<vmem>>, %arg3: memref<1x128xf32, #tpu.memory_space<vmem>>, %arg4: memref<32x140xbf16, #tpu.memory_space<vmem>>, %arg5: memref<32x128xbf16, #tpu.memory_space<vmem>>, %arg6: memref<140x128xf32, #tpu.memory_space<vmem>>) attributes {dimension_semantics = [#tpu.dimension_semantics<parallel>], iteration_bounds = array<i64: 2>, scalar_prefetch = 0 : i64, scratch_operands = 1 : i64, tpu.core_type = #tpu.core_type<tc>, window_params = [{transform_indices = @transform_0, window_bounds = array<i64: 200, 128>}, {pipeline_mode = #tpu.pipeline_mode<synchronous>, transform_indices = @transform_1, window_bounds = array<i64: 25, 128, 128>}, {pipeline_mode = #tpu.pipeline_mode<synchronous>, transform_indices = @transform_2, window_bounds = array<i64: 1, 128>}, {pipeline_mode = #tpu.pipeline_mode<synchronous>, transform_indices = @transform_3, window_bounds = array<i64: 32, 140>}, {transform_indices = @transform_4, window_bounds = array<i64: 32, 128>}]} {
    %cst = arith.constant 0.000000e+00 : f32
    %0 = vector.broadcast %cst : f32 to vector<140x128xf32>
    %c0 = arith.constant 0 : index
    %c0_0 = arith.constant 0 : index
    %1 = vector.load %arg6[%c0, %c0_0] : memref<140x128xf32, #tpu.memory_space<vmem>>, vector<140x128xf32>
    tpu.vector_store %arg6[%c0, %c0_0], %0 {strides = array<i32>} : memref<140x128xf32, #tpu.memory_space<vmem>>, vector<140x128xf32>,
    %c0_1 = arith.constant 0 : index
    %c0_2 = arith.constant 0 : index
    %2 = vector.load %arg1[%c0_1, %c0_2] : memref<200x128xbf16, #tpu.memory_space<vmem>>, vector<140x128xbf16>
    %c0_3 = arith.constant 0 : index
    %c0_4 = arith.constant 0 : index
    %3 = vector.load %arg6[%c0_3, %c0_4] : memref<140x128xf32, #tpu.memory_space<vmem>>, vector<140x128xf32>
    %c0_5 = arith.constant 0 : index
    %c0_6 = arith.constant 0 : index
    %c0_7 = arith.constant 0 : index
    %4 = vector.load %arg2[%c0_5, %c0_6, %c0_7] : memref<25x128x128xbf16, #tpu.memory_space<vmem>>, vector<1x128x128xbf16>
    %5 = vector.shape_cast %4 : vector<1x128x128xbf16> to vector<128x128xbf16>
    %cst_8 = arith.constant dense<0.000000e+00> : vector<140x128xf32>
    %6 = tpu.matmul %2, %5, %cst_8 {dimension_numbers = #tpu.dot_dimension_numbers<[1], [0], [0], [1], [0, 0, 1, 1], [], []>} : vector<140x128xbf16>, vector<128x128xbf16>, vector<140x128xf32> -> vector<140x128xf32>
    %7 = arith.addf %3, %6 : vector<140x128xf32>
    %c0_9 = arith.constant 0 : index
    %c0_10 = arith.constant 0 : index
    %8 = vector.load %arg6[%c0_9, %c0_10] : memref<140x128xf32, #tpu.memory_space<vmem>>, vector<140x128xf32>
    tpu.vector_store %arg6[%c0_9, %c0_10], %7 {strides = array<i32>} : memref<140x128xf32, #tpu.memory_space<vmem>>, vector<140x128xf32>,
    %c1 = arith.constant 1 : index
    %c0_11 = arith.constant 0 : index
    %9 = vector.load %arg1[%c1, %c0_11] : memref<200x128xbf16, #tpu.memory_space<vmem>>, vector<140x128xbf16>
    %c0_12 = arith.constant 0 : index
    %c0_13 = arith.constant 0 : index
    %10 = vector.load %arg6[%c0_12, %c0_13] : memref<140x128xf32, #tpu.memory_space<vmem>>, vector<140x128xf32>
    %c1_14 = arith.constant 1 : index
    %c0_15 = arith.constant 0 : index
    %c0_16 = arith.constant 0 : index
    %11 = vector.load %arg2[%c1_14, %c0_15, %c0_16] : memref<25x128x128xbf16, #tpu.memory_space<vmem>>, vector<1x128x128xbf16>
    %12 = vector.shape_cast %11 : vector<1x128x128xbf16> to vector<128x128xbf16>
    %cst_17 = arith.constant dense<0.000000e+00> : vector<140x128xf32>
    %13 = tpu.matmul %9, %12, %cst_17 {dimension_numbers = #tpu.dot_dimension_numbers<[1], [0], [0], [1], [0, 0, 1, 1], [], []>} : vector<140x128xbf16>, vector<128x128xbf16>, vector<140x128xf32> -> vector<140x128xf32>
    %14 = arith.addf %10, %13 : vector<140x128xf32>
    %c0_18 = arith.constant 0 : index
    %c0_19 = arith.constant 0 : index
    %15 = vector.load %arg6[%c0_18, %c0_19] : memref<140x128xf32, #tpu.memory_space<vmem>>, vector<140x128xf32>
    tpu.vector_store %arg6[%c0_18, %c0_19], %14 {strides = array<i32>} : memref<140x128xf32, #tpu.memory_space<vmem>>, vector<140x128xf32>,
    %c2 = arith.constant 2 : index
    %c0_20 = arith.constant 0 : index
    %16 = vector.load %arg1[%c2, %c0_20] : memref<200x128xbf16, #tpu.memory_space<vmem>>, vector<140x128xbf16>
    %c0_21 = arith.constant 0 : index
    %c0_22 = arith.constant 0 : index
    %17 = vector.load %arg6[%c0_21, %c0_22] : memref<140x128xf32, #tpu.memory_space<vmem>>, vector<140x128xf32>
    %c2_23 = arith.constant 2 : index
    %c0_24 = arith.constant 0 : index
    %c0_25 = arith.constant 0 : index
    %18 = vector.load %arg2[%c2_23, %c0_24, %c0_25] : memref<25x128x128xbf16, #tpu.memory_space<vmem>>, vector<1x128x128xbf16>
    %19 = vector.shape_cast %18 : vector<1x128x128xbf16> to vector<128x128xbf16>
    %cst_26 = arith.constant dense<0.000000e+00> : vector<140x128xf32>
    %20 = tpu.matmul %16, %19, %cst_26 {dimension_numbers = #tpu.dot_dimension_numbers<[1], [0], [0], [1], [0, 0, 1, 1], [], []>} : vector<140x128xbf16>, vector<128x128xbf16>, vector<140x128xf32> -> vector<140x128xf32>
    %21 = arith.addf %17, %20 : vector<140x128xf32>
    %c0_27 = arith.constant 0 : index
    %c0_28 = arith.constant 0 : index
    %22 = vector.load %arg6[%c0_27, %c0_28] : memref<140x128xf32, #tpu.memory_space<vmem>>, vector<140x128xf32>
    tpu.vector_store %arg6[%c0_27, %c0_28], %21 {strides = array<i32>} : memref<140x128xf32, #tpu.memory_space<vmem>>, vector<140x128xf32>,
    %c3 = arith.constant 3 : index
    %c0_29 = arith.constant 0 : index
    %23 = vector.load %arg1[%c3, %c0_29] : memref<200x128xbf16, #tpu.memory_space<vmem>>, vector<140x128xbf16>
    %c0_30 = arith.constant 0 : index
    %c0_31 = arith.constant 0 : index
    %24 = vector.load %arg6[%c0_30, %c0_31] : memref<140x128xf32, #tpu.memory_space<vmem>>, vector<140x128xf32>
    %c3_32 = arith.constant 3 : index
    %c0_33 = arith.constant 0 : index
    %c0_34 = arith.constant 0 : index
    %25 = vector.load %arg2[%c3_32, %c0_33, %c0_34] : memref<25x128x128xbf16, #tpu.memory_space<vmem>>, vector<1x128x128xbf16>
    %26 = vector.shape_cast %25 : vector<1x128x128xbf16> to vector<128x128xbf16>
    %cst_35 = arith.constant dense<0.000000e+00> : vector<140x128xf32>
    %27 = tpu.matmul %23, %26, %cst_35 {dimension_numbers = #tpu.dot_dimension_numbers<[1], [0], [0], [1], [0, 0, 1, 1], [], []>} : vector<140x128xbf16>, vector<128x128xbf16>, vector<140x128xf32> -> vector<140x128xf32>
    %28 = arith.addf %24, %27 : vector<140x128xf32>
    %c0_36 = arith.constant 0 : index
    %c0_37 = arith.constant 0 : index
    %29 = vector.load %arg6[%c0_36, %c0_37] : memref<140x128xf32, #tpu.memory_space<vmem>>, vector<140x128xf32>
    tpu.vector_store %arg6[%c0_36, %c0_37], %28 {strides = array<i32>} : memref<140x128xf32, #tpu.memory_space<vmem>>, vector<140x128xf32>,
    %c4 = arith.constant 4 : index
    %c0_38 = arith.constant 0 : index
    %30 = vector.load %arg1[%c4, %c0_38] : memref<200x128xbf16, #tpu.memory_space<vmem>>, vector<140x128xbf16>
    %c0_39 = arith.constant 0 : index
    %c0_40 = arith.constant 0 : index
    %31 = vector.load %arg6[%c0_39, %c0_40] : memref<140x128xf32, #tpu.memory_space<vmem>>, vector<140x128xf32>
    %c4_41 = arith.constant 4 : index
    %c0_42 = arith.constant 0 : index
    %c0_43 = arith.constant 0 : index
    %32 = vector.load %arg2[%c4_41, %c0_42, %c0_43] : memref<25x128x128xbf16, #tpu.memory_space<vmem>>, vector<1x128x128xbf16>
    %33 = vector.shape_cast %32 : vector<1x128x128xbf16> to vector<128x128xbf16>
    %cst_44 = arith.constant dense<0.000000e+00> : vector<140x128xf32>
    %34 = tpu.matmul %30, %33, %cst_44 {dimension_numbers = #tpu.dot_dimension_numbers<[1], [0], [0], [1], [0, 0, 1, 1], [], []>} : vector<140x128xbf16>, vector<128x128xbf16>, vector<140x128xf32> -> vector<140x128xf32>
    %35 = arith.addf %31, %34 : vector<140x128xf32>
    %c0_45 = arith.constant 0 : index
    %c0_46 = arith.constant 0 : index
    %36 = vector.load %arg6[%c0_45, %c0_46] : memref<140x128xf32, #tpu.memory_space<vmem>>, vector<140x128xf32>
    tpu.vector_store %arg6[%c0_45, %c0_46], %35 {strides = array<i32>} : memref<140x128xf32, #tpu.memory_space<vmem>>, vector<140x128xf32>,
    %c14 = arith.constant 14 : index
    %c0_47 = arith.constant 0 : index
    %37 = vector.load %arg1[%c14, %c0_47] : memref<200x128xbf16, #tpu.memory_space<vmem>>, vector<140x128xbf16>
    %c0_48 = arith.constant 0 : index
    %c0_49 = arith.constant 0 : index
    %38 = vector.load %arg6[%c0_48, %c0_49] : memref<140x128xf32, #tpu.memory_space<vmem>>, vector<140x128xf32>
    %c5 = arith.constant 5 : index
    %c0_50 = arith.constant 0 : index
    %c0_51 = arith.constant 0 : index
    %39 = vector.load %arg2[%c5, %c0_50, %c0_51] : memref<25x128x128xbf16, #tpu.memory_space<vmem>>, vector<1x128x128xbf16>
    %40 = vector.shape_cast %39 : vector<1x128x128xbf16> to vector<128x128xbf16>
    %cst_52 = arith.constant dense<0.000000e+00> : vector<140x128xf32>
    %41 = tpu.matmul %37, %40, %cst_52 {dimension_numbers = #tpu.dot_dimension_numbers<[1], [0], [0], [1], [0, 0, 1, 1], [], []>} : vector<140x128xbf16>, vector<128x128xbf16>, vector<140x128xf32> -> vector<140x128xf32>
    %42 = arith.addf %38, %41 : vector<140x128xf32>
    %c0_53 = arith.constant 0 : index
    %c0_54 = arith.constant 0 : index
    %43 = vector.load %arg6[%c0_53, %c0_54] : memref<140x128xf32, #tpu.memory_space<vmem>>, vector<140x128xf32>
    tpu.vector_store %arg6[%c0_53, %c0_54], %42 {strides = array<i32>} : memref<140x128xf32, #tpu.memory_space<vmem>>, vector<140x128xf32>,
    %c15 = arith.constant 15 : index
    %c0_55 = arith.constant 0 : index
    %44 = vector.load %arg1[%c15, %c0_55] : memref<200x128xbf16, #tpu.memory_space<vmem>>, vector<140x128xbf16>
    %c0_56 = arith.constant 0 : index
    %c0_57 = arith.constant 0 : index
    %45 = vector.load %arg6[%c0_56, %c0_57] : memref<140x128xf32, #tpu.memory_space<vmem>>, vector<140x128xf32>
    %c6 = arith.constant 6 : index
    %c0_58 = arith.constant 0 : index
    %c0_59 = arith.constant 0 : index
    %46 = vector.load %arg2[%c6, %c0_58, %c0_59] : memref<25x128x128xbf16, #tpu.memory_space<vmem>>, vector<1x128x128xbf16>
    %47 = vector.shape_cast %46 : vector<1x128x128xbf16> to vector<128x128xbf16>
    %cst_60 = arith.constant dense<0.000000e+00> : vector<140x128xf32>
    %48 = tpu.matmul %44, %47, %cst_60 {dimension_numbers = #tpu.dot_dimension_numbers<[1], [0], [0], [1], [0, 0, 1, 1], [], []>} : vector<140x128xbf16>, vector<128x128xbf16>, vector<140x128xf32> -> vector<140x128xf32>
    %49 = arith.addf %45, %48 : vector<140x128xf32>
    %c0_61 = arith.constant 0 : index
    %c0_62 = arith.constant 0 : index
    %50 = vector.load %arg6[%c0_61, %c0_62] : memref<140x128xf32, #tpu.memory_space<vmem>>, vector<140x128xf32>
    tpu.vector_store %arg6[%c0_61, %c0_62], %49 {strides = array<i32>} : memref<140x128xf32, #tpu.memory_space<vmem>>, vector<140x128xf32>,
    %c16 = arith.constant 16 : index
    %c0_63 = arith.constant 0 : index
    %51 = vector.load %arg1[%c16, %c0_63] : memref<200x128xbf16, #tpu.memory_space<vmem>>, vector<140x128xbf16>
    %c0_64 = arith.constant 0 : index
    %c0_65 = arith.constant 0 : index
    %52 = vector.load %arg6[%c0_64, %c0_65] : memref<140x128xf32, #tpu.memory_space<vmem>>, vector<140x128xf32>
    %c7 = arith.constant 7 : index
    %c0_66 = arith.constant 0 : index
    %c0_67 = arith.constant 0 : index
    %53 = vector.load %arg2[%c7, %c0_66, %c0_67] : memref<25x128x128xbf16, #tpu.memory_space<vmem>>, vector<1x128x128xbf16>
    %54 = vector.shape_cast %53 : vector<1x128x128xbf16> to vector<128x128xbf16>
    %cst_68 = arith.constant dense<0.000000e+00> : vector<140x128xf32>
    %55 = tpu.matmul %51, %54, %cst_68 {dimension_numbers = #tpu.dot_dimension_numbers<[1], [0], [0], [1], [0, 0, 1, 1], [], []>} : vector<140x128xbf16>, vector<128x128xbf16>, vector<140x128xf32> -> vector<140x128xf32>
    %56 = arith.addf %52, %55 : vector<140x128xf32>
    %c0_69 = arith.constant 0 : index
    %c0_70 = arith.constant 0 : index
    %57 = vector.load %arg6[%c0_69, %c0_70] : memref<140x128xf32, #tpu.memory_space<vmem>>, vector<140x128xf32>
    tpu.vector_store %arg6[%c0_69, %c0_70], %56 {strides = array<i32>} : memref<140x128xf32, #tpu.memory_space<vmem>>, vector<140x128xf32>,
    %c17 = arith.constant 17 : index
    %c0_71 = arith.constant 0 : index
    %58 = vector.load %arg1[%c17, %c0_71] : memref<200x128xbf16, #tpu.memory_space<vmem>>, vector<140x128xbf16>
    %c0_72 = arith.constant 0 : index
    %c0_73 = arith.constant 0 : index
    %59 = vector.load %arg6[%c0_72, %c0_73] : memref<140x128xf32, #tpu.memory_space<vmem>>, vector<140x128xf32>
    %c8 = arith.constant 8 : index
    %c0_74 = arith.constant 0 : index
    %c0_75 = arith.constant 0 : index
    %60 = vector.load %arg2[%c8, %c0_74, %c0_75] : memref<25x128x128xbf16, #tpu.memory_space<vmem>>, vector<1x128x128xbf16>
    %61 = vector.shape_cast %60 : vector<1x128x128xbf16> to vector<128x128xbf16>
    %cst_76 = arith.constant dense<0.000000e+00> : vector<140x128xf32>
    %62 = tpu.matmul %58, %61, %cst_76 {dimension_numbers = #tpu.dot_dimension_numbers<[1], [0], [0], [1], [0, 0, 1, 1], [], []>} : vector<140x128xbf16>, vector<128x128xbf16>, vector<140x128xf32> -> vector<140x128xf32>
    %63 = arith.addf %59, %62 : vector<140x128xf32>
    %c0_77 = arith.constant 0 : index
    %c0_78 = arith.constant 0 : index
    %64 = vector.load %arg6[%c0_77, %c0_78] : memref<140x128xf32, #tpu.memory_space<vmem>>, vector<140x128xf32>
    tpu.vector_store %arg6[%c0_77, %c0_78], %63 {strides = array<i32>} : memref<140x128xf32, #tpu.memory_space<vmem>>, vector<140x128xf32>,
    %c18 = arith.constant 18 : index
    %c0_79 = arith.constant 0 : index
    %65 = vector.load %arg1[%c18, %c0_79] : memref<200x128xbf16, #tpu.memory_space<vmem>>, vector<140x128xbf16>
    %c0_80 = arith.constant 0 : index
    %c0_81 = arith.constant 0 : index
    %66 = vector.load %arg6[%c0_80, %c0_81] : memref<140x128xf32, #tpu.memory_space<vmem>>, vector<140x128xf32>
    %c9 = arith.constant 9 : index
    %c0_82 = arith.constant 0 : index
    %c0_83 = arith.constant 0 : index
    %67 = vector.load %arg2[%c9, %c0_82, %c0_83] : memref<25x128x128xbf16, #tpu.memory_space<vmem>>, vector<1x128x128xbf16>
    %68 = vector.shape_cast %67 : vector<1x128x128xbf16> to vector<128x128xbf16>
    %cst_84 = arith.constant dense<0.000000e+00> : vector<140x128xf32>
    %69 = tpu.matmul %65, %68, %cst_84 {dimension_numbers = #tpu.dot_dimension_numbers<[1], [0], [0], [1], [0, 0, 1, 1], [], []>} : vector<140x128xbf16>, vector<128x128xbf16>, vector<140x128xf32> -> vector<140x128xf32>
    %70 = arith.addf %66, %69 : vector<140x128xf32>
    %c0_85 = arith.constant 0 : index
    %c0_86 = arith.constant 0 : index
    %71 = vector.load %arg6[%c0_85, %c0_86] : memref<140x128xf32, #tpu.memory_space<vmem>>, vector<140x128xf32>
    tpu.vector_store %arg6[%c0_85, %c0_86], %70 {strides = array<i32>} : memref<140x128xf32, #tpu.memory_space<vmem>>, vector<140x128xf32>,
    %c28 = arith.constant 28 : index
    %c0_87 = arith.constant 0 : index
    %72 = vector.load %arg1[%c28, %c0_87] : memref<200x128xbf16, #tpu.memory_space<vmem>>, vector<140x128xbf16>
    %c0_88 = arith.constant 0 : index
    %c0_89 = arith.constant 0 : index
    %73 = vector.load %arg6[%c0_88, %c0_89] : memref<140x128xf32, #tpu.memory_space<vmem>>, vector<140x128xf32>
    %c10 = arith.constant 10 : index
    %c0_90 = arith.constant 0 : index
    %c0_91 = arith.constant 0 : index
    %74 = vector.load %arg2[%c10, %c0_90, %c0_91] : memref<25x128x128xbf16, #tpu.memory_space<vmem>>, vector<1x128x128xbf16>
    %75 = vector.shape_cast %74 : vector<1x128x128xbf16> to vector<128x128xbf16>
    %cst_92 = arith.constant dense<0.000000e+00> : vector<140x128xf32>
    %76 = tpu.matmul %72, %75, %cst_92 {dimension_numbers = #tpu.dot_dimension_numbers<[1], [0], [0], [1], [0, 0, 1, 1], [], []>} : vector<140x128xbf16>, vector<128x128xbf16>, vector<140x128xf32> -> vector<140x128xf32>
    %77 = arith.addf %73, %76 : vector<140x128xf32>
    %c0_93 = arith.constant 0 : index
    %c0_94 = arith.constant 0 : index
    %78 = vector.load %arg6[%c0_93, %c0_94] : memref<140x128xf32, #tpu.memory_space<vmem>>, vector<140x128xf32>
    tpu.vector_store %arg6[%c0_93, %c0_94], %77 {strides = array<i32>} : memref<140x128xf32, #tpu.memory_space<vmem>>, vector<140x128xf32>,
    %c29 = arith.constant 29 : index
    %c0_95 = arith.constant 0 : index
    %79 = vector.load %arg1[%c29, %c0_95] : memref<200x128xbf16, #tpu.memory_space<vmem>>, vector<140x128xbf16>
    %c0_96 = arith.constant 0 : index
    %c0_97 = arith.constant 0 : index
    %80 = vector.load %arg6[%c0_96, %c0_97] : memref<140x128xf32, #tpu.memory_space<vmem>>, vector<140x128xf32>
    %c11 = arith.constant 11 : index
    %c0_98 = arith.constant 0 : index
    %c0_99 = arith.constant 0 : index
    %81 = vector.load %arg2[%c11, %c0_98, %c0_99] : memref<25x128x128xbf16, #tpu.memory_space<vmem>>, vector<1x128x128xbf16>
    %82 = vector.shape_cast %81 : vector<1x128x128xbf16> to vector<128x128xbf16>
    %cst_100 = arith.constant dense<0.000000e+00> : vector<140x128xf32>
    %83 = tpu.matmul %79, %82, %cst_100 {dimension_numbers = #tpu.dot_dimension_numbers<[1], [0], [0], [1], [0, 0, 1, 1], [], []>} : vector<140x128xbf16>, vector<128x128xbf16>, vector<140x128xf32> -> vector<140x128xf32>
    %84 = arith.addf %80, %83 : vector<140x128xf32>
    %c0_101 = arith.constant 0 : index
    %c0_102 = arith.constant 0 : index
    %85 = vector.load %arg6[%c0_101, %c0_102] : memref<140x128xf32, #tpu.memory_space<vmem>>, vector<140x128xf32>
    tpu.vector_store %arg6[%c0_101, %c0_102], %84 {strides = array<i32>} : memref<140x128xf32, #tpu.memory_space<vmem>>, vector<140x128xf32>,
    %c30 = arith.constant 30 : index
    %c0_103 = arith.constant 0 : index
    %86 = vector.load %arg1[%c30, %c0_103] : memref<200x128xbf16, #tpu.memory_space<vmem>>, vector<140x128xbf16>
    %c0_104 = arith.constant 0 : index
    %c0_105 = arith.constant 0 : index
    %87 = vector.load %arg6[%c0_104, %c0_105] : memref<140x128xf32, #tpu.memory_space<vmem>>, vector<140x128xf32>
    %c12 = arith.constant 12 : index
    %c0_106 = arith.constant 0 : index
    %c0_107 = arith.constant 0 : index
    %88 = vector.load %arg2[%c12, %c0_106, %c0_107] : memref<25x128x128xbf16, #tpu.memory_space<vmem>>, vector<1x128x128xbf16>
    %89 = vector.shape_cast %88 : vector<1x128x128xbf16> to vector<128x128xbf16>
    %cst_108 = arith.constant dense<0.000000e+00> : vector<140x128xf32>
    %90 = tpu.matmul %86, %89, %cst_108 {dimension_numbers = #tpu.dot_dimension_numbers<[1], [0], [0], [1], [0, 0, 1, 1], [], []>} : vector<140x128xbf16>, vector<128x128xbf16>, vector<140x128xf32> -> vector<140x128xf32>
    %91 = arith.addf %87, %90 : vector<140x128xf32>
    %c0_109 = arith.constant 0 : index
    %c0_110 = arith.constant 0 : index
    %92 = vector.load %arg6[%c0_109, %c0_110] : memref<140x128xf32, #tpu.memory_space<vmem>>, vector<140x128xf32>
    tpu.vector_store %arg6[%c0_109, %c0_110], %91 {strides = array<i32>} : memref<140x128xf32, #tpu.memory_space<vmem>>, vector<140x128xf32>,
    %c31 = arith.constant 31 : index
    %c0_111 = arith.constant 0 : index
    %93 = vector.load %arg1[%c31, %c0_111] : memref<200x128xbf16, #tpu.memory_space<vmem>>, vector<140x128xbf16>
    %c0_112 = arith.constant 0 : index
    %c0_113 = arith.constant 0 : index
    %94 = vector.load %arg6[%c0_112, %c0_113] : memref<140x128xf32, #tpu.memory_space<vmem>>, vector<140x128xf32>
    %c13 = arith.constant 13 : index
    %c0_114 = arith.constant 0 : index
    %c0_115 = arith.constant 0 : index
    %95 = vector.load %arg2[%c13, %c0_114, %c0_115] : memref<25x128x128xbf16, #tpu.memory_space<vmem>>, vector<1x128x128xbf16>
    %96 = vector.shape_cast %95 : vector<1x128x128xbf16> to vector<128x128xbf16>
    %cst_116 = arith.constant dense<0.000000e+00> : vector<140x128xf32>
    %97 = tpu.matmul %93, %96, %cst_116 {dimension_numbers = #tpu.dot_dimension_numbers<[1], [0], [0], [1], [0, 0, 1, 1], [], []>} : vector<140x128xbf16>, vector<128x128xbf16>, vector<140x128xf32> -> vector<140x128xf32>
    %98 = arith.addf %94, %97 : vector<140x128xf32>
    %c0_117 = arith.constant 0 : index
    %c0_118 = arith.constant 0 : index
    %99 = vector.load %arg6[%c0_117, %c0_118] : memref<140x128xf32, #tpu.memory_space<vmem>>, vector<140x128xf32>
    tpu.vector_store %arg6[%c0_117, %c0_118], %98 {strides = array<i32>} : memref<140x128xf32, #tpu.memory_space<vmem>>, vector<140x128xf32>,
    %c32 = arith.constant 32 : index
    %c0_119 = arith.constant 0 : index
    %100 = vector.load %arg1[%c32, %c0_119] : memref<200x128xbf16, #tpu.memory_space<vmem>>, vector<140x128xbf16>
    %c0_120 = arith.constant 0 : index
    %c0_121 = arith.constant 0 : index
    %101 = vector.load %arg6[%c0_120, %c0_121] : memref<140x128xf32, #tpu.memory_space<vmem>>, vector<140x128xf32>
    %c14_122 = arith.constant 14 : index
    %c0_123 = arith.constant 0 : index
    %c0_124 = arith.constant 0 : index
    %102 = vector.load %arg2[%c14_122, %c0_123, %c0_124] : memref<25x128x128xbf16, #tpu.memory_space<vmem>>, vector<1x128x128xbf16>
    %103 = vector.shape_cast %102 : vector<1x128x128xbf16> to vector<128x128xbf16>
    %cst_125 = arith.constant dense<0.000000e+00> : vector<140x128xf32>
    %104 = tpu.matmul %100, %103, %cst_125 {dimension_numbers = #tpu.dot_dimension_numbers<[1], [0], [0], [1], [0, 0, 1, 1], [], []>} : vector<140x128xbf16>, vector<128x128xbf16>, vector<140x128xf32> -> vector<140x128xf32>
    %105 = arith.addf %101, %104 : vector<140x128xf32>
    %c0_126 = arith.constant 0 : index
    %c0_127 = arith.constant 0 : index
    %106 = vector.load %arg6[%c0_126, %c0_127] : memref<140x128xf32, #tpu.memory_space<vmem>>, vector<140x128xf32>
    tpu.vector_store %arg6[%c0_126, %c0_127], %105 {strides = array<i32>} : memref<140x128xf32, #tpu.memory_space<vmem>>, vector<140x128xf32>,
    %c42 = arith.constant 42 : index
    %c0_128 = arith.constant 0 : index
    %107 = vector.load %arg1[%c42, %c0_128] : memref<200x128xbf16, #tpu.memory_space<vmem>>, vector<140x128xbf16>
    %c0_129 = arith.constant 0 : index
    %c0_130 = arith.constant 0 : index
    %108 = vector.load %arg6[%c0_129, %c0_130] : memref<140x128xf32, #tpu.memory_space<vmem>>, vector<140x128xf32>
    %c15_131 = arith.constant 15 : index
    %c0_132 = arith.constant 0 : index
    %c0_133 = arith.constant 0 : index
    %109 = vector.load %arg2[%c15_131, %c0_132, %c0_133] : memref<25x128x128xbf16, #tpu.memory_space<vmem>>, vector<1x128x128xbf16>
    %110 = vector.shape_cast %109 : vector<1x128x128xbf16> to vector<128x128xbf16>
    %cst_134 = arith.constant dense<0.000000e+00> : vector<140x128xf32>
    %111 = tpu.matmul %107, %110, %cst_134 {dimension_numbers = #tpu.dot_dimension_numbers<[1], [0], [0], [1], [0, 0, 1, 1], [], []>} : vector<140x128xbf16>, vector<128x128xbf16>, vector<140x128xf32> -> vector<140x128xf32>
    %112 = arith.addf %108, %111 : vector<140x128xf32>
    %c0_135 = arith.constant 0 : index
    %c0_136 = arith.constant 0 : index
    %113 = vector.load %arg6[%c0_135, %c0_136] : memref<140x128xf32, #tpu.memory_space<vmem>>, vector<140x128xf32>
    tpu.vector_store %arg6[%c0_135, %c0_136], %112 {strides = array<i32>} : memref<140x128xf32, #tpu.memory_space<vmem>>, vector<140x128xf32>,
    %c43 = arith.constant 43 : index
    %c0_137 = arith.constant 0 : index
    %114 = vector.load %arg1[%c43, %c0_137] : memref<200x128xbf16, #tpu.memory_space<vmem>>, vector<140x128xbf16>
    %c0_138 = arith.constant 0 : index
    %c0_139 = arith.constant 0 : index
    %115 = vector.load %arg6[%c0_138, %c0_139] : memref<140x128xf32, #tpu.memory_space<vmem>>, vector<140x128xf32>
    %c16_140 = arith.constant 16 : index
    %c0_141 = arith.constant 0 : index
    %c0_142 = arith.constant 0 : index
    %116 = vector.load %arg2[%c16_140, %c0_141, %c0_142] : memref<25x128x128xbf16, #tpu.memory_space<vmem>>, vector<1x128x128xbf16>
    %117 = vector.shape_cast %116 : vector<1x128x128xbf16> to vector<128x128xbf16>
    %cst_143 = arith.constant dense<0.000000e+00> : vector<140x128xf32>
    %118 = tpu.matmul %114, %117, %cst_143 {dimension_numbers = #tpu.dot_dimension_numbers<[1], [0], [0], [1], [0, 0, 1, 1], [], []>} : vector<140x128xbf16>, vector<128x128xbf16>, vector<140x128xf32> -> vector<140x128xf32>
    %119 = arith.addf %115, %118 : vector<140x128xf32>
    %c0_144 = arith.constant 0 : index
    %c0_145 = arith.constant 0 : index
    %120 = vector.load %arg6[%c0_144, %c0_145] : memref<140x128xf32, #tpu.memory_space<vmem>>, vector<140x128xf32>
    tpu.vector_store %arg6[%c0_144, %c0_145], %119 {strides = array<i32>} : memref<140x128xf32, #tpu.memory_space<vmem>>, vector<140x128xf32>,
    %c44 = arith.constant 44 : index
    %c0_146 = arith.constant 0 : index
    %121 = vector.load %arg1[%c44, %c0_146] : memref<200x128xbf16, #tpu.memory_space<vmem>>, vector<140x128xbf16>
    %c0_147 = arith.constant 0 : index
    %c0_148 = arith.constant 0 : index
    %122 = vector.load %arg6[%c0_147, %c0_148] : memref<140x128xf32, #tpu.memory_space<vmem>>, vector<140x128xf32>
    %c17_149 = arith.constant 17 : index
    %c0_150 = arith.constant 0 : index
    %c0_151 = arith.constant 0 : index
    %123 = vector.load %arg2[%c17_149, %c0_150, %c0_151] : memref<25x128x128xbf16, #tpu.memory_space<vmem>>, vector<1x128x128xbf16>
    %124 = vector.shape_cast %123 : vector<1x128x128xbf16> to vector<128x128xbf16>
    %cst_152 = arith.constant dense<0.000000e+00> : vector<140x128xf32>
    %125 = tpu.matmul %121, %124, %cst_152 {dimension_numbers = #tpu.dot_dimension_numbers<[1], [0], [0], [1], [0, 0, 1, 1], [], []>} : vector<140x128xbf16>, vector<128x128xbf16>, vector<140x128xf32> -> vector<140x128xf32>
    %126 = arith.addf %122, %125 : vector<140x128xf32>
    %c0_153 = arith.constant 0 : index
    %c0_154 = arith.constant 0 : index
    %127 = vector.load %arg6[%c0_153, %c0_154] : memref<140x128xf32, #tpu.memory_space<vmem>>, vector<140x128xf32>
    tpu.vector_store %arg6[%c0_153, %c0_154], %126 {strides = array<i32>} : memref<140x128xf32, #tpu.memory_space<vmem>>, vector<140x128xf32>,
    %c45 = arith.constant 45 : index
    %c0_155 = arith.constant 0 : index
    %128 = vector.load %arg1[%c45, %c0_155] : memref<200x128xbf16, #tpu.memory_space<vmem>>, vector<140x128xbf16>
    %c0_156 = arith.constant 0 : index
    %c0_157 = arith.constant 0 : index
    %129 = vector.load %arg6[%c0_156, %c0_157] : memref<140x128xf32, #tpu.memory_space<vmem>>, vector<140x128xf32>
    %c18_158 = arith.constant 18 : index
    %c0_159 = arith.constant 0 : index
    %c0_160 = arith.constant 0 : index
    %130 = vector.load %arg2[%c18_158, %c0_159, %c0_160] : memref<25x128x128xbf16, #tpu.memory_space<vmem>>, vector<1x128x128xbf16>
    %131 = vector.shape_cast %130 : vector<1x128x128xbf16> to vector<128x128xbf16>
    %cst_161 = arith.constant dense<0.000000e+00> : vector<140x128xf32>
    %132 = tpu.matmul %128, %131, %cst_161 {dimension_numbers = #tpu.dot_dimension_numbers<[1], [0], [0], [1], [0, 0, 1, 1], [], []>} : vector<140x128xbf16>, vector<128x128xbf16>, vector<140x128xf32> -> vector<140x128xf32>
    %133 = arith.addf %129, %132 : vector<140x128xf32>
    %c0_162 = arith.constant 0 : index
    %c0_163 = arith.constant 0 : index
    %134 = vector.load %arg6[%c0_162, %c0_163] : memref<140x128xf32, #tpu.memory_space<vmem>>, vector<140x128xf32>
    tpu.vector_store %arg6[%c0_162, %c0_163], %133 {strides = array<i32>} : memref<140x128xf32, #tpu.memory_space<vmem>>, vector<140x128xf32>,
    %c46 = arith.constant 46 : index
    %c0_164 = arith.constant 0 : index
    %135 = vector.load %arg1[%c46, %c0_164] : memref<200x128xbf16, #tpu.memory_space<vmem>>, vector<140x128xbf16>
    %c0_165 = arith.constant 0 : index
    %c0_166 = arith.constant 0 : index
    %136 = vector.load %arg6[%c0_165, %c0_166] : memref<140x128xf32, #tpu.memory_space<vmem>>, vector<140x128xf32>
    %c19 = arith.constant 19 : index
    %c0_167 = arith.constant 0 : index
    %c0_168 = arith.constant 0 : index
    %137 = vector.load %arg2[%c19, %c0_167, %c0_168] : memref<25x128x128xbf16, #tpu.memory_space<vmem>>, vector<1x128x128xbf16>
    %138 = vector.shape_cast %137 : vector<1x128x128xbf16> to vector<128x128xbf16>
    %cst_169 = arith.constant dense<0.000000e+00> : vector<140x128xf32>
    %139 = tpu.matmul %135, %138, %cst_169 {dimension_numbers = #tpu.dot_dimension_numbers<[1], [0], [0], [1], [0, 0, 1, 1], [], []>} : vector<140x128xbf16>, vector<128x128xbf16>, vector<140x128xf32> -> vector<140x128xf32>
    %140 = arith.addf %136, %139 : vector<140x128xf32>
    %c0_170 = arith.constant 0 : index
    %c0_171 = arith.constant 0 : index
    %141 = vector.load %arg6[%c0_170, %c0_171] : memref<140x128xf32, #tpu.memory_space<vmem>>, vector<140x128xf32>
    tpu.vector_store %arg6[%c0_170, %c0_171], %140 {strides = array<i32>} : memref<140x128xf32, #tpu.memory_space<vmem>>, vector<140x128xf32>,
    %c56 = arith.constant 56 : index
    %c0_172 = arith.constant 0 : index
    %142 = vector.load %arg1[%c56, %c0_172] : memref<200x128xbf16, #tpu.memory_space<vmem>>, vector<140x128xbf16>
    %c0_173 = arith.constant 0 : index
    %c0_174 = arith.constant 0 : index
    %143 = vector.load %arg6[%c0_173, %c0_174] : memref<140x128xf32, #tpu.memory_space<vmem>>, vector<140x128xf32>
    %c20 = arith.constant 20 : index
    %c0_175 = arith.constant 0 : index
    %c0_176 = arith.constant 0 : index
    %144 = vector.load %arg2[%c20, %c0_175, %c0_176] : memref<25x128x128xbf16, #tpu.memory_space<vmem>>, vector<1x128x128xbf16>
    %145 = vector.shape_cast %144 : vector<1x128x128xbf16> to vector<128x128xbf16>
    %cst_177 = arith.constant dense<0.000000e+00> : vector<140x128xf32>
    %146 = tpu.matmul %142, %145, %cst_177 {dimension_numbers = #tpu.dot_dimension_numbers<[1], [0], [0], [1], [0, 0, 1, 1], [], []>} : vector<140x128xbf16>, vector<128x128xbf16>, vector<140x128xf32> -> vector<140x128xf32>
    %147 = arith.addf %143, %146 : vector<140x128xf32>
    %c0_178 = arith.constant 0 : index
    %c0_179 = arith.constant 0 : index
    %148 = vector.load %arg6[%c0_178, %c0_179] : memref<140x128xf32, #tpu.memory_space<vmem>>, vector<140x128xf32>
    tpu.vector_store %arg6[%c0_178, %c0_179], %147 {strides = array<i32>} : memref<140x128xf32, #tpu.memory_space<vmem>>, vector<140x128xf32>,
    %c57 = arith.constant 57 : index
    %c0_180 = arith.constant 0 : index
    %149 = vector.load %arg1[%c57, %c0_180] : memref<200x128xbf16, #tpu.memory_space<vmem>>, vector<140x128xbf16>
    %c0_181 = arith.constant 0 : index
    %c0_182 = arith.constant 0 : index
    %150 = vector.load %arg6[%c0_181, %c0_182] : memref<140x128xf32, #tpu.memory_space<vmem>>, vector<140x128xf32>
    %c21 = arith.constant 21 : index
    %c0_183 = arith.constant 0 : index
    %c0_184 = arith.constant 0 : index
    %151 = vector.load %arg2[%c21, %c0_183, %c0_184] : memref<25x128x128xbf16, #tpu.memory_space<vmem>>, vector<1x128x128xbf16>
    %152 = vector.shape_cast %151 : vector<1x128x128xbf16> to vector<128x128xbf16>
    %cst_185 = arith.constant dense<0.000000e+00> : vector<140x128xf32>
    %153 = tpu.matmul %149, %152, %cst_185 {dimension_numbers = #tpu.dot_dimension_numbers<[1], [0], [0], [1], [0, 0, 1, 1], [], []>} : vector<140x128xbf16>, vector<128x128xbf16>, vector<140x128xf32> -> vector<140x128xf32>
    %154 = arith.addf %150, %153 : vector<140x128xf32>
    %c0_186 = arith.constant 0 : index
    %c0_187 = arith.constant 0 : index
    %155 = vector.load %arg6[%c0_186, %c0_187] : memref<140x128xf32, #tpu.memory_space<vmem>>, vector<140x128xf32>
    tpu.vector_store %arg6[%c0_186, %c0_187], %154 {strides = array<i32>} : memref<140x128xf32, #tpu.memory_space<vmem>>, vector<140x128xf32>,
    %c58 = arith.constant 58 : index
    %c0_188 = arith.constant 0 : index
    %156 = vector.load %arg1[%c58, %c0_188] : memref<200x128xbf16, #tpu.memory_space<vmem>>, vector<140x128xbf16>
    %c0_189 = arith.constant 0 : index
    %c0_190 = arith.constant 0 : index
    %157 = vector.load %arg6[%c0_189, %c0_190] : memref<140x128xf32, #tpu.memory_space<vmem>>, vector<140x128xf32>
    %c22 = arith.constant 22 : index
    %c0_191 = arith.constant 0 : index
    %c0_192 = arith.constant 0 : index
    %158 = vector.load %arg2[%c22, %c0_191, %c0_192] : memref<25x128x128xbf16, #tpu.memory_space<vmem>>, vector<1x128x128xbf16>
    %159 = vector.shape_cast %158 : vector<1x128x128xbf16> to vector<128x128xbf16>
    %cst_193 = arith.constant dense<0.000000e+00> : vector<140x128xf32>
    %160 = tpu.matmul %156, %159, %cst_193 {dimension_numbers = #tpu.dot_dimension_numbers<[1], [0], [0], [1], [0, 0, 1, 1], [], []>} : vector<140x128xbf16>, vector<128x128xbf16>, vector<140x128xf32> -> vector<140x128xf32>
    %161 = arith.addf %157, %160 : vector<140x128xf32>
    %c0_194 = arith.constant 0 : index
    %c0_195 = arith.constant 0 : index
    %162 = vector.load %arg6[%c0_194, %c0_195] : memref<140x128xf32, #tpu.memory_space<vmem>>, vector<140x128xf32>
    tpu.vector_store %arg6[%c0_194, %c0_195], %161 {strides = array<i32>} : memref<140x128xf32, #tpu.memory_space<vmem>>, vector<140x128xf32>,
    %c59 = arith.constant 59 : index
    %c0_196 = arith.constant 0 : index
    %163 = vector.load %arg1[%c59, %c0_196] : memref<200x128xbf16, #tpu.memory_space<vmem>>, vector<140x128xbf16>
    %c0_197 = arith.constant 0 : index
    %c0_198 = arith.constant 0 : index
    %164 = vector.load %arg6[%c0_197, %c0_198] : memref<140x128xf32, #tpu.memory_space<vmem>>, vector<140x128xf32>
    %c23 = arith.constant 23 : index
    %c0_199 = arith.constant 0 : index
    %c0_200 = arith.constant 0 : index
    %165 = vector.load %arg2[%c23, %c0_199, %c0_200] : memref<25x128x128xbf16, #tpu.memory_space<vmem>>, vector<1x128x128xbf16>
    %166 = vector.shape_cast %165 : vector<1x128x128xbf16> to vector<128x128xbf16>
    %cst_201 = arith.constant dense<0.000000e+00> : vector<140x128xf32>
    %167 = tpu.matmul %163, %166, %cst_201 {dimension_numbers = #tpu.dot_dimension_numbers<[1], [0], [0], [1], [0, 0, 1, 1], [], []>} : vector<140x128xbf16>, vector<128x128xbf16>, vector<140x128xf32> -> vector<140x128xf32>
    %168 = arith.addf %164, %167 : vector<140x128xf32>
    %c0_202 = arith.constant 0 : index
    %c0_203 = arith.constant 0 : index
    %169 = vector.load %arg6[%c0_202, %c0_203] : memref<140x128xf32, #tpu.memory_space<vmem>>, vector<140x128xf32>
    tpu.vector_store %arg6[%c0_202, %c0_203], %168 {strides = array<i32>} : memref<140x128xf32, #tpu.memory_space<vmem>>, vector<140x128xf32>,
    %c60 = arith.constant 60 : index
    %c0_204 = arith.constant 0 : index
    %170 = vector.load %arg1[%c60, %c0_204] : memref<200x128xbf16, #tpu.memory_space<vmem>>, vector<140x128xbf16>
    %c0_205 = arith.constant 0 : index
    %c0_206 = arith.constant 0 : index
    %171 = vector.load %arg6[%c0_205, %c0_206] : memref<140x128xf32, #tpu.memory_space<vmem>>, vector<140x128xf32>
    %c24 = arith.constant 24 : index
    %c0_207 = arith.constant 0 : index
    %c0_208 = arith.constant 0 : index
    %172 = vector.load %arg2[%c24, %c0_207, %c0_208] : memref<25x128x128xbf16, #tpu.memory_space<vmem>>, vector<1x128x128xbf16>
    %173 = vector.shape_cast %172 : vector<1x128x128xbf16> to vector<128x128xbf16>
    %cst_209 = arith.constant dense<0.000000e+00> : vector<140x128xf32>
    %174 = tpu.matmul %170, %173, %cst_209 {dimension_numbers = #tpu.dot_dimension_numbers<[1], [0], [0], [1], [0, 0, 1, 1], [], []>} : vector<140x128xbf16>, vector<128x128xbf16>, vector<140x128xf32> -> vector<140x128xf32>
    %175 = arith.addf %171, %174 : vector<140x128xf32>
    %c0_210 = arith.constant 0 : index
    %c0_211 = arith.constant 0 : index
    %176 = vector.load %arg6[%c0_210, %c0_211] : memref<140x128xf32, #tpu.memory_space<vmem>>, vector<140x128xf32>
    tpu.vector_store %arg6[%c0_210, %c0_211], %175 {strides = array<i32>} : memref<140x128xf32, #tpu.memory_space<vmem>>, vector<140x128xf32>,
    %c0_212 = arith.constant 0 : index
    %c0_213 = arith.constant 0 : index
    %177 = vector.load %arg6[%c0_212, %c0_213] : memref<140x128xf32, #tpu.memory_space<vmem>>, vector<140x128xf32>
    %c0_214 = arith.constant 0 : index
    %c0_215 = arith.constant 0 : index
    %178 = vector.load %arg3[%c0_214, %c0_215] : memref<1x128xf32, #tpu.memory_space<vmem>>, vector<1x128xf32>
    %179 = vector.broadcast %178 : vector<1x128xf32> to vector<140x128xf32>
    %180 = arith.addf %177, %179 : vector<140x128xf32>
    %181 = math.tanh %180 : vector<140x128xf32>
    %c0_216 = arith.constant 0 : index
    %c0_217 = arith.constant 0 : index
    %182 = vector.load %arg4[%c0_216, %c0_217] : memref<32x140xbf16, #tpu.memory_space<vmem>>, vector<32x140xbf16>
    %183 = arith.truncf %181 : vector<140x128xf32> to vector<140x128xbf16>
    %cst_218 = arith.constant dense<0.000000e+00> : vector<32x128xf32>
    %184 = tpu.matmul %182, %183, %cst_218 {dimension_numbers = #tpu.dot_dimension_numbers<[1], [0], [0], [1], [0, 0, 1, 1], [], []>} : vector<32x140xbf16>, vector<140x128xbf16>, vector<32x128xf32> -> vector<32x128xf32>
    %185 = arith.truncf %184 : vector<32x128xf32> to vector<32x128xbf16>
    %c0_219 = arith.constant 0 : index
    %c0_220 = arith.constant 0 : index
    %186 = vector.load %arg5[%c0_219, %c0_220] : memref<32x128xbf16, #tpu.memory_space<vmem>>, vector<32x128xbf16>
    tpu.vector_store %arg5[%c0_219, %c0_220], %185 {strides = array<i32>} : memref<32x128xbf16, #tpu.memory_space<vmem>>, vector<32x128xbf16>,
    return
  }
  func.func @transform_0(%arg0: i32) -> (i32, i32) {
    %c0_i32 = arith.constant 0 : i32
    %c0_i32_0 = arith.constant 0 : i32
    return %arg0, %c0_i32 : i32, i32
  }
  func.func @transform_1(%arg0: i32) -> (i32, i32, i32) {
    %c0_i32 = arith.constant 0 : i32
    %c0_i32_0 = arith.constant 0 : i32
    %c0_i32_1 = arith.constant 0 : i32
    %c0_i32_2 = arith.constant 0 : i32
    return %c0_i32, %c0_i32_0, %c0_i32_1 : i32, i32, i32
  }
  func.func @transform_2(%arg0: i32) -> (i32, i32) {
    %c0_i32 = arith.constant 0 : i32
    %c0_i32_0 = arith.constant 0 : i32
    %c0_i32_1 = arith.constant 0 : i32
    return %c0_i32, %c0_i32_0 : i32, i32
  }
  func.func @transform_3(%arg0: i32) -> (i32, i32) {
    %c0_i32 = arith.constant 0 : i32
    %c0_i32_0 = arith.constant 0 : i32
    %c0_i32_1 = arith.constant 0 : i32
    return %c0_i32, %c0_i32_0 : i32, i32
  }
  func.func @transform_4(%arg0: i32) -> (i32, i32) {
    %c0_i32 = arith.constant 0 : i32
    %c0_i32_0 = arith.constant 0 : i32
    return %arg0, %c0_i32 : i32, i32
  }
}

module attributes {stable_mosaic.version = 11 : i64} {
  func.func @_head_kernel(%arg0: i32, %arg1: memref<8x512xbf16, #tpu.memory_space<vmem>>, %arg2: memref<512x128xbf16, #tpu.memory_space<vmem>>, %arg3: memref<1x128xf32, #tpu.memory_space<vmem>>, %arg4: memref<128x128xbf16, #tpu.memory_space<vmem>>, %arg5: memref<1x128xf32, #tpu.memory_space<vmem>>, %arg6: memref<128x128xbf16, #tpu.memory_space<vmem>>, %arg7: memref<1x128xf32, #tpu.memory_space<vmem>>, %arg8: memref<8x128xf32, #tpu.memory_space<vmem>>) attributes {dimension_semantics = [#tpu.dimension_semantics<parallel>], iteration_bounds = array<i64: 1>, scalar_prefetch = 0 : i64, scratch_operands = 0 : i64, tpu.core_type = #tpu.core_type<tc>, window_params = [{transform_indices = @transform_0, window_bounds = array<i64: 8, 512>}, {pipeline_mode = #tpu.pipeline_mode<synchronous>, transform_indices = @transform_1, window_bounds = array<i64: 512, 128>}, {pipeline_mode = #tpu.pipeline_mode<synchronous>, transform_indices = @transform_2, window_bounds = array<i64: 1, 128>}, {pipeline_mode = #tpu.pipeline_mode<synchronous>, transform_indices = @transform_3, window_bounds = array<i64: 128, 128>}, {pipeline_mode = #tpu.pipeline_mode<synchronous>, transform_indices = @transform_4, window_bounds = array<i64: 1, 128>}, {pipeline_mode = #tpu.pipeline_mode<synchronous>, transform_indices = @transform_5, window_bounds = array<i64: 128, 128>}, {pipeline_mode = #tpu.pipeline_mode<synchronous>, transform_indices = @transform_6, window_bounds = array<i64: 1, 128>}, {transform_indices = @transform_7, window_bounds = array<i64: 8, 128>}]} {
    %c0 = arith.constant 0 : index
    %c0_0 = arith.constant 0 : index
    %0 = vector.load %arg1[%c0, %c0_0] : memref<8x512xbf16, #tpu.memory_space<vmem>>, vector<8x512xbf16>
    %c0_1 = arith.constant 0 : index
    %c0_2 = arith.constant 0 : index
    %1 = vector.load %arg2[%c0_1, %c0_2] : memref<512x128xbf16, #tpu.memory_space<vmem>>, vector<512x128xbf16>
    %cst = arith.constant dense<0.000000e+00> : vector<8x128xf32>
    %2 = tpu.matmul %0, %1, %cst {dimension_numbers = #tpu.dot_dimension_numbers<[1], [0], [0], [1], [0, 0, 1, 1], [], []>} : vector<8x512xbf16>, vector<512x128xbf16>, vector<8x128xf32> -> vector<8x128xf32>
    %c0_3 = arith.constant 0 : index
    %c0_4 = arith.constant 0 : index
    %3 = vector.load %arg3[%c0_3, %c0_4] : memref<1x128xf32, #tpu.memory_space<vmem>>, vector<1x128xf32>
    %4 = vector.broadcast %3 : vector<1x128xf32> to vector<8x128xf32>
    %5 = arith.addf %2, %4 : vector<8x128xf32>
    %6 = math.tanh %5 : vector<8x128xf32>
    %7 = arith.truncf %6 : vector<8x128xf32> to vector<8x128xbf16>
    %c0_5 = arith.constant 0 : index
    %c0_6 = arith.constant 0 : index
    %8 = vector.load %arg4[%c0_5, %c0_6] : memref<128x128xbf16, #tpu.memory_space<vmem>>, vector<128x128xbf16>
    %cst_7 = arith.constant dense<0.000000e+00> : vector<8x128xf32>
    %9 = tpu.matmul %7, %8, %cst_7 {dimension_numbers = #tpu.dot_dimension_numbers<[1], [0], [0], [1], [0, 0, 1, 1], [], []>} : vector<8x128xbf16>, vector<128x128xbf16>, vector<8x128xf32> -> vector<8x128xf32>
    %c0_8 = arith.constant 0 : index
    %c0_9 = arith.constant 0 : index
    %10 = vector.load %arg5[%c0_8, %c0_9] : memref<1x128xf32, #tpu.memory_space<vmem>>, vector<1x128xf32>
    %11 = vector.broadcast %10 : vector<1x128xf32> to vector<8x128xf32>
    %12 = arith.addf %9, %11 : vector<8x128xf32>
    %13 = math.tanh %12 : vector<8x128xf32>
    %14 = arith.truncf %13 : vector<8x128xf32> to vector<8x128xbf16>
    %c0_10 = arith.constant 0 : index
    %c0_11 = arith.constant 0 : index
    %15 = vector.load %arg6[%c0_10, %c0_11] : memref<128x128xbf16, #tpu.memory_space<vmem>>, vector<128x128xbf16>
    %cst_12 = arith.constant dense<0.000000e+00> : vector<8x128xf32>
    %16 = tpu.matmul %14, %15, %cst_12 {dimension_numbers = #tpu.dot_dimension_numbers<[1], [0], [0], [1], [0, 0, 1, 1], [], []>} : vector<8x128xbf16>, vector<128x128xbf16>, vector<8x128xf32> -> vector<8x128xf32>
    %c0_13 = arith.constant 0 : index
    %c0_14 = arith.constant 0 : index
    %17 = vector.load %arg7[%c0_13, %c0_14] : memref<1x128xf32, #tpu.memory_space<vmem>>, vector<1x128xf32>
    %18 = vector.broadcast %17 : vector<1x128xf32> to vector<8x128xf32>
    %19 = arith.addf %16, %18 : vector<8x128xf32>
    %c0_15 = arith.constant 0 : index
    %c0_16 = arith.constant 0 : index
    %20 = vector.load %arg8[%c0_15, %c0_16] : memref<8x128xf32, #tpu.memory_space<vmem>>, vector<8x128xf32>
    tpu.vector_store %arg8[%c0_15, %c0_16], %19 {strides = array<i32>} : memref<8x128xf32, #tpu.memory_space<vmem>>, vector<8x128xf32>,
    return
  }
  func.func @transform_0(%arg0: i32) -> (i32, i32) {
    %c0_i32 = arith.constant 0 : i32
    %c0_i32_0 = arith.constant 0 : i32
    return %arg0, %c0_i32 : i32, i32
  }
  func.func @transform_1(%arg0: i32) -> (i32, i32) {
    %c0_i32 = arith.constant 0 : i32
    %c0_i32_0 = arith.constant 0 : i32
    %c0_i32_1 = arith.constant 0 : i32
    return %c0_i32, %c0_i32_0 : i32, i32
  }
  func.func @transform_2(%arg0: i32) -> (i32, i32) {
    %c0_i32 = arith.constant 0 : i32
    %c0_i32_0 = arith.constant 0 : i32
    %c0_i32_1 = arith.constant 0 : i32
    return %c0_i32, %c0_i32_0 : i32, i32
  }
  func.func @transform_3(%arg0: i32) -> (i32, i32) {
    %c0_i32 = arith.constant 0 : i32
    %c0_i32_0 = arith.constant 0 : i32
    %c0_i32_1 = arith.constant 0 : i32
    return %c0_i32, %c0_i32_0 : i32, i32
  }
  func.func @transform_4(%arg0: i32) -> (i32, i32) {
    %c0_i32 = arith.constant 0 : i32
    %c0_i32_0 = arith.constant 0 : i32
    %c0_i32_1 = arith.constant 0 : i32
    return %c0_i32, %c0_i32_0 : i32, i32
  }
  func.func @transform_5(%arg0: i32) -> (i32, i32) {
    %c0_i32 = arith.constant 0 : i32
    %c0_i32_0 = arith.constant 0 : i32
    %c0_i32_1 = arith.constant 0 : i32
    return %c0_i32, %c0_i32_0 : i32, i32
  }
  func.func @transform_6(%arg0: i32) -> (i32, i32) {
    %c0_i32 = arith.constant 0 : i32
    %c0_i32_0 = arith.constant 0 : i32
    %c0_i32_1 = arith.constant 0 : i32
    return %c0_i32, %c0_i32_0 : i32, i32
  }
  func.func @transform_7(%arg0: i32) -> (i32, i32) {
    %c0_i32 = arith.constant 0 : i32
    %c0_i32_0 = arith.constant 0 : i32
    return %arg0, %c0_i32 : i32, i32
  }
}

</mosaic_0001>

<bundles_post_ra>
// kernel: lenet5_forward.5
= control target key start
LH: loop header
LB: loop body
LE: loop exit
PB: predicated region body
PF: predicated region fallthrough
CT: control target
= control target key end

     0   :  { %v832_v39 = vmov 0.0   ;;  %vm833_vm0 = vmmov 0   ;;  %s1054_s1 = inlined_call_operand.vmem [shape: bf16[512,128], index: 1, kind: input, shape index: {}]   ;;  %s1055_s0 = inlined_call_operand.vmem [shape: bf16[8,512], index: 0, kind: input, shape index: {}]   ;;  %s1056_s3 = inlined_call_operand.vmem [shape: bf16[128,128], index: 3, kind: input, shape index: {}]   ;;  %s1057_s5 = inlined_call_operand.vmem [shape: bf16[128,128], index: 5, kind: input, shape index: {}]   ;;  %s1058_s2 = inlined_call_operand.vmem [shape: f32[1,128], index: 2, kind: input, shape index: {}]   ;;  %s1059_s4 = inlined_call_operand.vmem [shape: f32[1,128], index: 4, kind: input, shape index: {}]   ;;  %s1060_s6 = inlined_call_operand.vmem [shape: f32[1,128], index: 6, kind: input, shape index: {}]   ;;  %s1061_s7 = inlined_call_operand.vmem [shape: f32[8,128], index: 7, kind: output, shape index: {}]  }
   0x1   :  { %v776_v0 = vld [vmem:[%s1054_s1 + $0x78] sm:$0xff]   ;;  %v780_v4 = vld [vmem:[%s1054_s1 + $0x70] sm:$0xff]   ;;  %v784_v8 = vld [vmem:[%s1054_s1 + $0x68] sm:$0xff]  }
   0x2   :  { %v777_v1 = vld [vmem:[%s1054_s1 + $0xf8] sm:$0xff]   ;;  %672 = vmatprep.subr.bf16.mxu0 %v776_v0  ;;  %v781_v5 = vld [vmem:[%s1054_s1 + $0xf0] sm:$0xff]   ;;  %v785_v9 = vld [vmem:[%s1054_s1 + $0xe8] sm:$0xff]  }
   0x3   :  { %v778_v2 = vld [vmem:[%s1054_s1 + $0x38] sm:$0xff]   ;;  %694 = vmatprep.subr.bf16.mxu1 %v777_v1  ;;  %v782_v6 = vld [vmem:[%s1054_s1 + $0x30] sm:$0xff]   ;;  %v786_v10 = vld [vmem:[%s1054_s1 + $0x28] sm:$0xff]  }
   0x4   :  { %v779_v3 = vld [vmem:[%s1054_s1 + $0xb8] sm:$0xff]   ;;  %673 = vmatpush3.bf16.msra.mxu0 %v778_v2  ;;  %v783_v7 = vld [vmem:[%s1054_s1 + $0xb0] sm:$0xff]   ;;  %v787_v11 = vld [vmem:[%s1054_s1 + $0xa8] sm:$0xff]  }
   0x5   :  { %695 = vmatpush3.bf16.msra.mxu1 %v779_v3  ;;  %674 = vmatprep.subr.bf16.mxu0 %v780_v4  ;;  %v788_v12 = vld [vmem:[%s1054_s1 + $0x60] sm:$0xff]   ;;  %v792_v16 = vld [vmem:[%s1054_s1 + $0x58] sm:$0xff]   ;;  %v796_v20 = vld [vmem:[%s1054_s1 + $0x50] sm:$0xff]  }
   0x6   :  { %696 = vmatprep.subr.bf16.mxu1 %v781_v5  ;;  %v789_v13 = vld [vmem:[%s1054_s1 + $0xe0] sm:$0xff]   ;;  %v793_v17 = vld [vmem:[%s1054_s1 + $0xd8] sm:$0xff]   ;;  %v797_v21 = vld [vmem:[%s1054_s1 + $0xd0] sm:$0xff]  }
   0x7   :  { %v790_v14 = vld [vmem:[%s1054_s1 + $0x20] sm:$0xff]   ;;  %v794_v18 = vld [vmem:[%s1054_s1 + $0x18] sm:$0xff]   ;;  %v798_v22 = vld [vmem:[%s1054_s1 + $0x10] sm:$0xff]  }
   0x8   :  { %675 = vmatpush3.bf16.msra.mxu0 %v782_v6  ;;  %v791_v15 = vld [vmem:[%s1054_s1 + $0xa0] sm:$0xff]   ;;  %v795_v19 = vld [vmem:[%s1054_s1 + $0x98] sm:$0xff]   ;;  %v799_v23 = vld [vmem:[%s1054_s1 + $0x90] sm:$0xff]  }
   0x9   :  { %697 = vmatpush3.bf16.msra.mxu1 %v783_v7  ;;  %676 = vmatprep.subr.bf16.mxu0 %v784_v8  ;;  %v800_v24 = vld [vmem:[%s1054_s1 + $0x48] sm:$0xff]   ;;  %v804_v28 = vld [vmem:[%s1054_s1 + $0x40] sm:$0xff]   ;;  %v812_v38 = vld [vmem:[%s1056_s3 + $0x38] sm:$0xff]  }
   0xa   :  { %698 = vmatprep.subr.bf16.mxu1 %v785_v9  ;;  %v801_v25 = vld [vmem:[%s1054_s1 + $0xc8] sm:$0xff]   ;;  %v805_v29 = vld [vmem:[%s1054_s1 + $0xc0] sm:$0xff]   ;;  %v813_v40 = vld [vmem:[%s1056_s3 + $0x30] sm:$0xff]  }
   0xb   :  { %v802_v26 = vld [vmem:[%s1054_s1 + $0x8] sm:$0xff]   ;;  %v806_v30 = vld [vmem:[%s1054_s1] sm:$0xff]   ;;  %v816_v43 = vld [vmem:[%s1056_s3 + $0x18] sm:$0xff]  }
   0xc   :  { %677 = vmatpush3.bf16.msra.mxu0 %v786_v10  ;;  %v803_v27 = vld [vmem:[%s1054_s1 + $0x88] sm:$0xff]   ;;  %v807_v31 = vld [vmem:[%s1054_s1 + $0x80] sm:$0xff]   ;;  %v817_v44 = vld [vmem:[%s1056_s3 + $0x10] sm:$0xff]  }
   0xd   :  { %699 = vmatpush3.bf16.msra.mxu1 %v787_v11  ;;  %678 = vmatprep.subr.bf16.mxu0 %v788_v12  ;;  %v27_v32 = vld [vmem:[%s1055_s0] sm:$0xff]  ;;  %v28_v33 = vld [vmem:[%s1055_s0 + $0x8] sm:$0xff]  ;;  %v820_v47 = vld [vmem:[%s1057_s5 + $0x38] sm:$0xff]  }
   0xe   :  { %700 = vmatprep.subr.bf16.mxu1 %v789_v13  ;;  %v618_v34 = vcombine.low %v27_v32, %v27_v32  ;;  %v619_v35 = vcombine.high %v27_v32, %v27_v32  ;;  %v620_v36 = vcombine.low %v28_v33, %v28_v33  ;;  %v621_v37 = vcombine.high %v28_v33, %v28_v33  ;;  %v814_v41 = vld [vmem:[%s1056_s3 + $0x28] sm:$0xff]   ;;  %v815_v42 = vld [vmem:[%s1056_s3 + $0x20] sm:$0xff]   ;;  %v821_v48 = vld [vmem:[%s1057_s5 + $0x30] sm:$0xff]  }
   0xf   :  { %v818_v45 = vld [vmem:[%s1056_s3 + $0x8] sm:$0xff]   ;;  %v819_v46 = vld [vmem:[%s1056_s3] sm:$0xff]   ;;  %v824_v2 = vld [vmem:[%s1057_s5 + $0x18] sm:$0xff]  }
  0x10   :  { %679 = vmatpush3.bf16.msra.mxu0 %v790_v14  ;;  %338 = vmatprep.mubr.bf16.mxu0 %v619_v35  ;;  %v822_v49 = vld [vmem:[%s1057_s5 + $0x28] sm:$0xff]   ;;  %v617_v52 = vld [vmem:[%s1058_s2] ss:$0 sm:$0xff]  ;;  %v825_v3 = vld [vmem:[%s1057_s5 + $0x10] sm:$0xff]  }
  0x11   :  { %701 = vmatpush3.bf16.msra.mxu1 %v791_v15  ;;  %680 = vmatprep.subr.bf16.mxu0 %v792_v16  ;;  %v823_v1 = vld [vmem:[%s1057_s5 + $0x20] sm:$0xff]   ;;  %v826_v4 = vld [vmem:[%s1057_s5 + $0x8] sm:$0xff]  }
  0x12   :  { %702 = vmatprep.subr.bf16.mxu1 %v793_v17  ;;  %378 = vmatprep.mubr.bf16.mxu1 %v621_v37  ;;  %v827_v5 = vld [vmem:[%s1057_s5] sm:$0xff]  }
  0x13   :  { %v654_v6 = vld [vmem:[%s1059_s4] ss:$0 sm:$0xff] }
  0x14   :  { %681 = vmatpush3.bf16.msra.mxu0 %v794_v18  ;;  %v663_v14 = vld [vmem:[%s1060_s6] ss:$0 sm:$0xff] }
  0x15   :  { %703 = vmatpush3.bf16.msra.mxu1 %v795_v19  ;;  %682 = vmatprep.subr.bf16.mxu0 %v796_v20 }
  0x16   :  { %704 = vmatprep.subr.bf16.mxu1 %v797_v21 }
  0x18   :  { %683 = vmatpush3.bf16.msra.mxu0 %v798_v22 }
  0x19   :  { %705 = vmatpush3.bf16.msra.mxu1 %v799_v23  ;;  %684 = vmatprep.subr.bf16.mxu0 %v800_v24 }
  0x1a   :  { %706 = vmatprep.subr.bf16.mxu1 %v801_v25 }
  0x1c   :  { %685 = vmatpush3.bf16.msra.mxu0 %v802_v26 }
  0x1d   :  { %707 = vmatpush3.bf16.msra.mxu1 %v803_v27  ;;  %686 = vmatprep.subr.bf16.mxu0 %v804_v28 }
  0x1e   :  { %708 = vmatprep.subr.bf16.mxu1 %v805_v29 }
  0x20   :  { %687 = vmatpush3.bf16.msra.mxu0 %v806_v30 }
  0x21   :  { %709 = vmatpush3.bf16.msra.mxu1 %v807_v31  ;;  %734 = vmatprep.subr.bf16.mxu0 %v832_v39 }
  0x22   :  { %754 = vmatprep.subr.bf16.mxu1 %v832_v39 }
  0x23   :  { %339 = vmatmul.mubr.bf16.vlgmr.msra.gmra.mxu0 %v618_v34 }
  0x24   :  { %379 = vmatmul.mubr.bf16.vlgmr.msra.gmra.mxu1 %v620_v36  ;;  %735 = vmatpush3.bf16.msra.mxu0 %v812_v38 }
  0x25   :  { %736 = vmatprep.subr.bf16.mxu0 %v832_v39  ;;  %750 = vmatprep.mubr.msk.bf16.mxu0 %vm833_vm0, %v832_v39 }
  0x26   :  { %770 = vmatprep.mubr.msk.bf16.mxu1 %vm833_vm0, %v832_v39  ;;  %755 = vmatpush3.bf16.msra.mxu1 %v820_v47 }
  0x27   :  { %756 = vmatprep.subr.bf16.mxu1 %v832_v39 }
  0x28   :  { %737 = vmatpush3.bf16.msra.mxu0 %v813_v40 }
  0x29   :  { %738 = vmatprep.subr.bf16.mxu0 %v832_v39 }
  0x2a   :  { %757 = vmatpush3.bf16.msra.mxu1 %v821_v48 }
  0x2b   :  { %758 = vmatprep.subr.bf16.mxu1 %v832_v39 }
  0x2c   :  { %739 = vmatpush3.bf16.msra.mxu0 %v814_v41 }
  0x2d   :  { %740 = vmatprep.subr.bf16.mxu0 %v832_v39 }
  0x2e   :  { %759 = vmatpush3.bf16.msra.mxu1 %v822_v49 }
  0x2f   :  { %760 = vmatprep.subr.bf16.mxu1 %v832_v39 }
  0x30   :  { %741 = vmatpush3.bf16.msra.mxu0 %v815_v42 }
  0x31   :  { %742 = vmatprep.subr.bf16.mxu0 %v832_v39 }
  0x32   :  { %761 = vmatpush3.bf16.msra.mxu1 %v823_v1 }
  0x33   :  { %762 = vmatprep.subr.bf16.mxu1 %v832_v39 }
  0x34   :  { %743 = vmatpush3.bf16.msra.mxu0 %v816_v43 }
  0x35   :  { %744 = vmatprep.subr.bf16.mxu0 %v832_v39 }
  0x36   :  { %763 = vmatpush3.bf16.msra.mxu1 %v824_v2 }
  0x37   :  { %764 = vmatprep.subr.bf16.mxu1 %v832_v39 }
  0x38   :  { %745 = vmatpush3.bf16.msra.mxu0 %v817_v44 }
  0x39   :  { %746 = vmatprep.subr.bf16.mxu0 %v832_v39 }
  0x3a   :  { %765 = vmatpush3.bf16.msra.mxu1 %v825_v3 }
  0x3b   :  { %766 = vmatprep.subr.bf16.mxu1 %v832_v39 }
  0x3c   :  { %747 = vmatpush3.bf16.msra.mxu0 %v818_v45 }
  0x3d   :  { %748 = vmatprep.subr.bf16.mxu0 %v832_v39 }
  0x3e   :  { %767 = vmatpush3.bf16.msra.mxu1 %v826_v4 }
  0x3f   :  { %768 = vmatprep.subr.bf16.mxu1 %v832_v39 }
  0x40   :  { %749 = vmatpush3.bf16.msra.mxu0 %v819_v46 }
  0x42   :  { %769 = vmatpush3.bf16.msra.mxu1 %v827_v5 }
  0xe3   :  { %v688_v50 = vpop.f32.mrf.mxu0 }
  0xe4   :  { %v710_v51 = vpop.f32.mrf.mxu1 }
  0xe5   :  { %v689_v53 = vpop.f32.mrf.mxu0 }
  0xe6   :  { %v711_v54 = vpop.f32.mrf.mxu1  ;;  %v690_v55 = vadd.f32 %v689_v53, %v688_v50 }
  0xe7   :  { %v691_v56 = vpop.f32.mrf.mxu0  ;;  %v712_v59 = vadd.f32 %v711_v54, %v710_v51 }
  0xe8   :  { %v713_v57 = vpop.f32.mrf.mxu1  ;;  %v341_v58 = vadd.f32 %v690_v55, %v617_v52 }
  0xe9   :  { %v692_v60 = vpop.f32.mrf.mxu0 }
  0xea   :  { %v714_v61 = vpop.f32.mrf.mxu1  ;;  %v381_v62 = vadd.f32 %v712_v59, %v341_v58 }
  0xec   :  { %828 = vtanh.f32 %v381_v62 }
  0xf9   :  { %v829_v63 = vpop.eup %828 }
  0xfa   :  { %v387_v0 = vpack.c.bf16 %v829_v63, %v829_v63 }
  0xfc   :  { %751 = vmatmul.mubr.bf16.vlgmr.msra.gmra.mxu0 %v387_v0 }
 0x1bc   :  { %v493_v7 = vpop.f32.mrf.mxu0 }
 0x1bd   :  { %v494_v8 = vadd.f32 %v654_v6, %v493_v7 }
 0x1be   :  { %v752_v9 = vpop.f32.mrf.mxu0 }
 0x1bf   :  { %830 = vtanh.f32 %v494_v8 }
 0x1c0   :  { %v496_v10 = vpop.f32.mrf.mxu0 }
 0x1c2   :  { %v753_v11 = vpop.f32.mrf.mxu0 }
 0x1cc   :  { %v831_v12 = vpop.eup %830 }
 0x1cd   :  { %v500_v13 = vpack.c.bf16 %v831_v12, %v831_v12 }
 0x1cf   :  { %771 = vmatmul.mubr.bf16.vlgmr.msra.gmra.mxu1 %v500_v13 }
 0x28f   :  { %v606_v15 = vpop.f32.mrf.mxu1 }
 0x290   :  { %v607_v16 = vadd.f32 %v663_v14, %v606_v15 }
 0x291   :  { %v772_v17 = vpop.f32.mrf.mxu1 }
 0x292   :  { %612 = vst [vmem:[%s1061_s7] sm:$0xff] %v607_v16 }
 0x293   :  { %v609_v18 = vpop.f32.mrf.mxu1 }
 0x295   :  { %v773_v19 = vpop.f32.mrf.mxu1 }

// kernel: lenet5_forward.3
= control target key start
LH: loop header
LB: loop body
LE: loop exit
PB: predicated region body
PF: predicated region fallthrough
CT: control target
= control target key end

     0   :  { %s3900_s15 = smov 0   ;;  %s5037_s0 = inlined_call_operand.vmem [shape: bf16[1568,128], index: 0, kind: input, shape index: {}]   ;;  %s5038_s1 = inlined_call_operand.vmem [shape: bf16[128,128], index: 1, kind: input, shape index: {}]   ;;  %s5039_s2 = inlined_call_operand.vmem [shape: f32[1,128], index: 2, kind: input, shape index: {}]   ;;  %s5040_s3 = inlined_call_operand.vmem [shape: bf16[200,784], index: 3, kind: input, shape index: {}]   ;;  %s5041_s4 = inlined_call_operand.vmem [shape: bf16[400,128], index: 4, kind: output, shape index: {}]  }
   0x1 LB: > { %s2547_s16 = sadd.s32 4294967295, %s3871_s15   ;;  %p2551_p0 = scmp.ge.s32.totalorder %s3871_s15, 1  ;;  %s3871_s15 = sphi %s3900_s15, %s14_s15  }
   0x2   : > { %p163_p1 = scmp.lt.s32.totalorder %s3871_s15, 3 }
   0x4   : > { %p164_p2 = pnand %p2551_p0, %p163_p1 }
   0x5   : > { %s189_s21 = smul.u32 (!%p164_p2), 98, %s2547_s16 }
   0x6   : > { %167 = sbr.rel (%p164_p2) target bundleno = 1066 (0x42a), region = 36 }
   0x7   : > { %p190_p3 = scmp.lt.s32.totalorder (!%p164_p2), %s189_s21, 195  ;;  %s195_s26 = smul.u32 (!%p164_p2), 25, %s2547_s16 }
   0x9   : > { %p196_p4 = scmp.lt.s32.totalorder (!%p164_p2), %s195_s26, 49 }
   0xb   : > { %v3484_v0 = vld [vmem:[%s5038_s1 + $0x38] sm:$0xff]   ;;  %v3873_v1 = vmov 0.0   ;;  %v3485_v2 = vld [vmem:[%s5038_s1 + $0x30] sm:$0xff]   ;;  %vm3874_vm0 = vmmov 0   ;;  %v3486_v3 = vld [vmem:[%s5038_s1 + $0x28] sm:$0xff]   ;;  %s5043_s21 = smov (!%p190_p3, %s189_s21), 195 }
   0xc   : > { %3192 = vmatprep.subr.bf16.mxu0 %v3873_v1  ;;  %3208 = vmatprep.mubr.msk.bf16.mxu0 %vm3874_vm0, %v3873_v1  ;;  %s2552_s24 = sshll.u32 %s5043_s21, 2  ;;  %v3487_v4 = vld [vmem:[%s5038_s1 + $0x20] sm:$0xff]   ;;  %v3488_v5 = vld [vmem:[%s5038_s1 + $0x18] sm:$0xff]   ;;  %v3489_v6 = vld [vmem:[%s5038_s1 + $0x10] sm:$0xff]   ;;  %vm1781_vm1 = vcmask 130048   ;;  %s5045_s26 = smov (!%p196_p4, %s195_s26), 49 }
   0xd   : > { %3193 = vmatpush3.bf16.msra.mxu0 %v3484_v0  ;;  %s3927_s27 = scalar_lea.vmem %s5037_s0, %s2552_s24  ;;  %v3490_v7 = vld [vmem:[%s5038_s1 + $0x8] sm:$0xff]   ;;  %v3491_v8 = vld [vmem:[%s5038_s1] sm:$0xff]   ;;  %s2553_s28 = sshll.u32 %s5045_s26, 2 }
   0xe   : > { %3194 = vmatprep.subr.bf16.mxu0 %v3873_v1  ;;  %v3492_v9 = vld [vmem:[%s3927_s27] sm:$0xff]   ;;  %v3493_v10 = vld [vmem:[%s3927_s27 + $0x8] sm:$0xff]   ;;  %v3494_v11 = vld [vmem:[%s3927_s27 + $0x10] sm:$0xff]   ;;  %s4996_s30 = scalar_lea.vmem %s5041_s4, %s2553_s28 }
   0xf   : > { %v3495_v12 = vld [vmem:[%s3927_s27 + $0x18] sm:$0xff]   ;;  %v3496_v13 = vld [vmem:[%s3927_s27 + $0x20] sm:$0xff]   ;;  %v3497_v14 = vld [vmem:[%s3927_s27 + $0x28] sm:$0xff]  }
  0x10   : > { %v3498_v15 = vld [vmem:[%s3927_s27 + $0x30] sm:$0xff]   ;;  %v3499_v16 = vld [vmem:[%s3927_s27 + $0x38] sm:$0xff]   ;;  %v3500_v17 = vld [vmem:[%s3927_s27 + $0x40] sm:$0xff]  }
  0x11   : > { %3195 = vmatpush3.bf16.msra.mxu0 %v3485_v2  ;;  %v3501_v18 = vld [vmem:[%s3927_s27 + $0x48] sm:$0xff]   ;;  %v3502_v19 = vld [vmem:[%s3927_s27 + $0x50] sm:$0xff]   ;;  %v3503_v20 = vld [vmem:[%s3927_s27 + $0x58] sm:$0xff]  }
  0x12   : > { %3196 = vmatprep.subr.bf16.mxu0 %v3873_v1  ;;  %v3504_v21 = vld [vmem:[%s3927_s27 + $0x60] sm:$0xff]   ;;  %v3505_v22 = vld [vmem:[%s3927_s27 + $0x68] sm:$0xff]   ;;  %v3506_v23 = vld [vmem:[%s3927_s27 + $0x70] sm:$0xff]  }
  0x13   : > { %v3507_v24 = vld [vmem:[%s3927_s27 + $0x78] sm:$0xff]   ;;  %v3508_v25 = vld [vmem:[%s3927_s27 + $0x80] sm:$0xff]   ;;  %v3509_v26 = vld [vmem:[%s3927_s27 + $0x88] sm:$0xff]  }
  0x14   : > { %v3510_v27 = vld [vmem:[%s3927_s27 + $0x90] sm:$0xff]   ;;  %v3511_v28 = vld [vmem:[%s3927_s27 + $0x98] sm:$0xff]   ;;  %v3512_v29 = vld [vmem:[%s3927_s27 + $0xa0] sm:$0xff]  }
  0x15   : > { %3197 = vmatpush3.bf16.msra.mxu0 %v3486_v3  ;;  %v3513_v30 = vld [vmem:[%s3927_s27 + $0xa8] sm:$0xff]   ;;  %v3514_v31 = vld [vmem:[%s3927_s27 + $0xb0] sm:$0xff]   ;;  %v3515_v32 = vld [vmem:[%s3927_s27 + $0xb8] sm:$0xff]  }
  0x16   : > { %3198 = vmatprep.subr.bf16.mxu0 %v3873_v1  ;;  %v3516_v33 = vld [vmem:[%s3927_s27 + $0xc0] sm:$0xff]   ;;  %v3517_v39 = vld [vmem:[%s3927_s27 + $0xc8] sm:$0xff]   ;;  %v3518_v46 = vld [vmem:[%s3927_s27 + $0xd0] sm:$0xff]  }
  0x17   : > { %v4025_v34 = vld [vmem:[%s5039_s2] ss:$0 sm:$0xff]  ;;  %v3519_v55 = vld [vmem:[%s3927_s27 + $0xd8] sm:$0xff]  }
  0x18   : > { %v3520_v2 = vld [vmem:[%s3927_s27 + $0xe0] sm:$0xff]  }
  0x19   : > { %3199 = vmatpush3.bf16.msra.mxu0 %v3487_v4 }
  0x1a   : > { %3200 = vmatprep.subr.bf16.mxu0 %v3873_v1 }
  0x1d   : > { %3201 = vmatpush3.bf16.msra.mxu0 %v3488_v5 }
  0x1e   : > { %3202 = vmatprep.subr.bf16.mxu0 %v3873_v1 }
  0x21   : > { %3203 = vmatpush3.bf16.msra.mxu0 %v3489_v6 }
  0x22   : > { %3204 = vmatprep.subr.bf16.mxu0 %v3873_v1 }
  0x25   : > { %3205 = vmatpush3.bf16.msra.mxu0 %v3490_v7 }
  0x26   : > { %3206 = vmatprep.subr.bf16.mxu0 %v3873_v1 }
  0x29   : > { %3207 = vmatpush3.bf16.msra.mxu0 %v3491_v8 }
  0x2c   : > { %3209 = vmatmul.mubr.bf16.vlgmr.msra.gmra.mxu0 %v3492_v9 }
  0x2d   : > { %3212 = vmatprep.mubr.msk.bf16.mxu0 %vm3874_vm0, %v3873_v1 }
  0x34   : > { %3213 = vmatmul.mubr.bf16.gmra.mxu0 %v3493_v10 }
  0x35   : > { %3216 = vmatprep.mubr.msk.bf16.mxu0 %vm3874_vm0, %v3873_v1 }
  0x3c   : > { %3217 = vmatmul.mubr.bf16.gmra.mxu0 %v3494_v11 }
  0x3d   : > { %3220 = vmatprep.mubr.msk.bf16.mxu0 %vm3874_vm0, %v3873_v1 }
  0x44   : > { %3221 = vmatmul.mubr.bf16.gmra.mxu0 %v3495_v12  ;;  %v3521_v12 = vld [vmem:[%s3927_s27 + $0xe8] sm:$0xff]  }
  0x45   : > { %3224 = vmatprep.mubr.msk.bf16.mxu0 %vm3874_vm0, %v3873_v1 }
  0x4c   : > { %3225 = vmatmul.mubr.bf16.gmra.mxu0 %v3496_v13 }
  0x4d   : > { %3228 = vmatprep.mubr.msk.bf16.mxu0 %vm3874_vm0, %v3873_v1 }
  0x54   : > { %3229 = vmatmul.mubr.bf16.gmra.mxu0 %v3497_v14 }
  0x55   : > { %3232 = vmatprep.mubr.msk.bf16.mxu0 %vm3874_vm0, %v3873_v1 }
  0x5c   : > { %3233 = vmatmul.mubr.bf16.gmra.mxu0 %v3498_v15 }
  0x5d   : > { %3236 = vmatprep.mubr.msk.bf16.mxu0 %vm3874_vm0, %v3873_v1 }
  0x64   : > { %3237 = vmatmul.mubr.bf16.gmra.mxu0 %v3499_v16 }
  0x65   : > { %3240 = vmatprep.mubr.msk.bf16.mxu0 %vm3874_vm0, %v3873_v1 }
  0x6c   : > { %3241 = vmatmul.mubr.bf16.gmra.mxu0 %v3500_v17 }
  0x6d   : > { %3244 = vmatprep.mubr.msk.bf16.mxu0 %vm3874_vm0, %v3873_v1 }
  0x74   : > { %3245 = vmatmul.mubr.bf16.gmra.mxu0 %v3501_v18 }
  0x75   : > { %3248 = vmatprep.mubr.msk.bf16.mxu0 %vm3874_vm0, %v3873_v1 }
  0x7c   : > { %3249 = vmatmul.mubr.bf16.gmra.mxu0 %v3502_v19 }
  0x7d   : > { %3252 = vmatprep.mubr.msk.bf16.mxu0 %vm3874_vm0, %v3873_v1 }
  0x84   : > { %3253 = vmatmul.mubr.bf16.gmra.mxu0 %v3503_v20 }
  0x85   : > { %3256 = vmatprep.mubr.msk.bf16.mxu0 %vm3874_vm0, %v3873_v1 }
  0x8c   : > { %3257 = vmatmul.mubr.bf16.gmra.mxu0 %v3504_v21 }
  0x8d   : > { %3260 = vmatprep.mubr.msk.bf16.mxu0 %vm3874_vm0, %v3873_v1 }
  0x94   : > { %3261 = vmatmul.mubr.bf16.gmra.mxu0 %v3505_v22  ;;  %v3522_v22 = vld [vmem:[%s3927_s27 + $0xf0] sm:$0xff]  }
  0x95   : > { %3264 = vmatprep.mubr.msk.bf16.mxu0 %vm3874_vm0, %v3873_v1 }
  0x9c   : > { %3265 = vmatmul.mubr.bf16.gmra.mxu0 %v3506_v23 }
  0x9d   : > { %3268 = vmatprep.mubr.msk.bf16.mxu0 %vm3874_vm0, %v3873_v1 }
  0xa4   : > { %3269 = vmatmul.mubr.bf16.gmra.mxu0 %v3507_v24 }
  0xa5   : > { %3272 = vmatprep.mubr.msk.bf16.mxu0 %vm3874_vm0, %v3873_v1 }
  0xac   : > { %3273 = vmatmul.mubr.bf16.gmra.mxu0 %v3508_v25 }
  0xad   : > { %3276 = vmatprep.mubr.msk.bf16.mxu0 %vm3874_vm0, %v3873_v1 }
  0xb4   : > { %3277 = vmatmul.mubr.bf16.gmra.mxu0 %v3509_v26 }
  0xb5   : > { %3280 = vmatprep.mubr.msk.bf16.mxu0 %vm3874_vm0, %v3873_v1 }
  0xbc   : > { %3281 = vmatmul.mubr.bf16.gmra.mxu0 %v3510_v27 }
  0xbd   : > { %3284 = vmatprep.mubr.msk.bf16.mxu0 %vm3874_vm0, %v3873_v1 }
  0xc4   : > { %3285 = vmatmul.mubr.bf16.gmra.mxu0 %v3511_v28 }
  0xc5   : > { %3288 = vmatprep.mubr.msk.bf16.mxu0 %vm3874_vm0, %v3873_v1 }
  0xcc   : > { %3289 = vmatmul.mubr.bf16.gmra.mxu0 %v3512_v29 }
  0xcd   : > { %3292 = vmatprep.mubr.msk.bf16.mxu0 %vm3874_vm0, %v3873_v1 }
  0xd4   : > { %3293 = vmatmul.mubr.bf16.gmra.mxu0 %v3513_v30 }
  0xd5   : > { %3296 = vmatprep.mubr.msk.bf16.mxu0 %vm3874_vm0, %v3873_v1 }
  0xdc   : > { %3297 = vmatmul.mubr.bf16.gmra.mxu0 %v3514_v31 }
  0xdd   : > { %3300 = vmatprep.mubr.msk.bf16.mxu0 %vm3874_vm0, %v3873_v1 }
  0xe4   : > { %3301 = vmatmul.mubr.bf16.gmra.mxu0 %v3515_v32  ;;  %v3523_v32 = vld [vmem:[%s3927_s27 + $0xf8] sm:$0xff]  }
  0xe5   : > { %3304 = vmatprep.mubr.msk.bf16.mxu0 %vm3874_vm0, %v3873_v1 }
  0xec   : > { %v699_v35 = vpop.f32.mrf.mxu0  ;;  %3305 = vmatmul.mubr.bf16.gmra.mxu0 %v3516_v33 }
  0xed   : > { %3308 = vmatprep.mubr.msk.bf16.mxu0 %vm3874_vm0, %v3873_v1  ;;  %v700_v36 = vadd.f32 %v4025_v34, %v699_v35 }
  0xee   : > { %v3210_v37 = vpop.f32.mrf.mxu0 }
  0xef   : > { %3668 = vtanh.f32 %v700_v36 }
  0xf0   : > { %v702_v38 = vpop.f32.mrf.mxu0 }
  0xf1   : > { %v703_v40 = vadd.f32 %v4025_v34, %v702_v38 }
  0xf2   : > { %v3211_v41 = vpop.f32.mrf.mxu0 }
  0xf3   : > { %3670 = vtanh.f32 %v703_v40 }
  0xf4   : > { %v707_v42 = vpop.f32.mrf.mxu0  ;;  %3309 = vmatmul.mubr.bf16.gmra.mxu0 %v3517_v39 }
  0xf5   : > { %3312 = vmatprep.mubr.msk.bf16.mxu0 %vm3874_vm0, %v3873_v1  ;;  %v708_v43 = vadd.f32 %v4025_v34, %v707_v42 }
  0xf6   : > { %v3214_v44 = vpop.f32.mrf.mxu0 }
  0xf7   : > { %3672 = vtanh.f32 %v708_v43  ;;  %v3524_v43 = vld [vmem:[%s3927_s27 + $0x100] sm:$0xff]  }
  0xf8   : > { %v710_v45 = vpop.f32.mrf.mxu0 }
  0xf9   : > { %v711_v47 = vadd.f32 %v4025_v34, %v710_v45 }
  0xfa   : > { %v3215_v48 = vpop.f32.mrf.mxu0 }
  0xfb   : > { %3674 = vtanh.f32 %v711_v47 }
  0xfc   : > { %v715_v49 = vpop.f32.mrf.mxu0  ;;  %3313 = vmatmul.mubr.bf16.gmra.mxu0 %v3518_v46  ;;  %v3669_v52 = vpop.eup %3668 }
  0xfd   : > { %3316 = vmatprep.mubr.msk.bf16.mxu0 %vm3874_vm0, %v3873_v1  ;;  %v716_v50 = vadd.f32 %v4025_v34, %v715_v49 }
  0xfe   : > { %v3218_v51 = vpop.f32.mrf.mxu0 }
  0xff   : > { %3676 = vtanh.f32 %v716_v50 }
 0x100   : > { %v3671_v53 = vpop.eup %3670  ;;  %v718_v54 = vpop.f32.mrf.mxu0 }
 0x101   : > { %v719_v56 = vadd.f32 %v4025_v34, %v718_v54  ;;  %v4042_v57 = vpack.c.bf16 %v3671_v53, %v3669_v52  ;;  %v3525_v53 = vld [vmem:[%s3927_s27 + $0x108] sm:$0xff]  }
 0x102   : > { %v3219_v58 = vpop.f32.mrf.mxu0 }
 0x103   : > { %3678 = vtanh.f32 %v719_v56 }
 0x104   : > { %v723_v59 = vpop.f32.mrf.mxu0  ;;  %3317 = vmatmul.mubr.bf16.gmra.mxu0 %v3519_v55  ;;  %v3673_v62 = vpop.eup %3672 }
 0x105   : > { %3320 = vmatprep.mubr.msk.bf16.mxu0 %vm3874_vm0, %v3873_v1  ;;  %v724_v60 = vadd.f32 %v4025_v34, %v723_v59 }
 0x106   : > { %v3222_v61 = vpop.f32.mrf.mxu0 }
 0x107   : > { %3680 = vtanh.f32 %v724_v60 }
 0x108   : > { %v3675_v63 = vpop.eup %3674  ;;  %v726_v0 = vpop.f32.mrf.mxu0 }
 0x109   : > { %v727_v3 = vadd.f32 %v4025_v34, %v726_v0  ;;  %v4049_v4 = vpack.c.bf16 %v3675_v63, %v3673_v62  ;;  %v3526_v0 = vld [vmem:[%s3927_s27 + $0x110] sm:$0xff]  }
 0x10a   : > { %v3223_v5 = vpop.f32.mrf.mxu0 }
 0x10b   : > { %3682 = vtanh.f32 %v727_v3  ;;  %v3542_v5 = vld [vmem:[%s5040_s3 + $0x3c] ss:$28 sps:$4 sm:$0xff]  }
 0x10c   : > { %v731_v6 = vpop.f32.mrf.mxu0  ;;  %3321 = vmatmul.mubr.bf16.gmra.mxu0 %v3520_v2  ;;  %v3677_v9 = vpop.eup %3676  ;;  %1861 = vmatprep.mubr.bf16.mxu1 %v3542_v5 }
 0x10d   : > { %3324 = vmatprep.mubr.msk.bf16.mxu0 %vm3874_vm0, %v3873_v1  ;;  %v732_v7 = vadd.f32 %v4025_v34, %v731_v6 }
 0x10e   : > { %v3226_v8 = vpop.f32.mrf.mxu0 }
 0x10f   : > { %3684 = vtanh.f32 %v732_v7 }
 0x110   : > { %v3679_v10 = vpop.eup %3678  ;;  %v734_v11 = vpop.f32.mrf.mxu0 }
 0x111   : > { %v735_v13 = vadd.f32 %v4025_v34, %v734_v11  ;;  %v4056_v14 = vpack.c.bf16 %v3679_v10, %v3677_v9 }
 0x112   : > { %v3227_v15 = vpop.f32.mrf.mxu0 }
 0x113   : > { %3686 = vtanh.f32 %v735_v13 }
 0x114   : > { %v739_v16 = vpop.f32.mrf.mxu0  ;;  %3325 = vmatmul.mubr.bf16.gmra.mxu0 %v3521_v12  ;;  %v3681_v19 = vpop.eup %3680  ;;  %v3527_v12 = vld [vmem:[%s3927_s27 + $0x118] sm:$0xff]  }
 0x115   : > { %3328 = vmatprep.mubr.msk.bf16.mxu0 %vm3874_vm0, %v3873_v1  ;;  %v740_v17 = vadd.f32 %v4025_v34, %v739_v16 }
 0x116   : > { %v3230_v18 = vpop.f32.mrf.mxu0 }
 0x117   : > { %3688 = vtanh.f32 %v740_v17 }
 0x118   : > { %v3683_v20 = vpop.eup %3682  ;;  %v742_v21 = vpop.f32.mrf.mxu0 }
 0x119   : > { %v743_v23 = vadd.f32 %v4025_v34, %v742_v21  ;;  %v4063_v24 = vpack.c.bf16 %v3683_v20, %v3681_v19  ;;  %v3528_v21 = vld [vmem:[%s3927_s27 + $0x120] sm:$0xff]  }
 0x11a   : > { %v3231_v25 = vpop.f32.mrf.mxu0 }
 0x11b   : > { %3690 = vtanh.f32 %v743_v23 }
 0x11c   : > { %v747_v26 = vpop.f32.mrf.mxu0  ;;  %3329 = vmatmul.mubr.bf16.gmra.mxu0 %v3522_v22  ;;  %v3685_v29 = vpop.eup %3684 }
 0x11d   : > { %3332 = vmatprep.mubr.msk.bf16.mxu0 %vm3874_vm0, %v3873_v1  ;;  %v748_v27 = vadd.f32 %v4025_v34, %v747_v26 }
 0x11e   : > { %v3234_v28 = vpop.f32.mrf.mxu0 }
 0x11f   : > { %3692 = vtanh.f32 %v748_v27  ;;  %v3529_v28 = vld [vmem:[%s3927_s27 + $0x128] sm:$0xff]  }
 0x120   : > { %v3687_v30 = vpop.eup %3686  ;;  %v750_v31 = vpop.f32.mrf.mxu0 }
 0x121   : > { %v751_v33 = vadd.f32 %v4025_v34, %v750_v31  ;;  %v4070_v35 = vpack.c.bf16 %v3687_v30, %v3685_v29 }
 0x122   : > { %v3235_v36 = vpop.f32.mrf.mxu0 }
 0x123   : > { %3694 = vtanh.f32 %v751_v33  ;;  %v3530_v33 = vld [vmem:[%s3927_s27 + $0x130] sm:$0xff]  }
 0x124   : > { %v755_v37 = vpop.f32.mrf.mxu0  ;;  %3333 = vmatmul.mubr.bf16.gmra.mxu0 %v3523_v32  ;;  %v3689_v40 = vpop.eup %3688 }
 0x125   : > { %3336 = vmatprep.mubr.msk.bf16.mxu0 %vm3874_vm0, %v3873_v1  ;;  %v756_v38 = vadd.f32 %v4025_v34, %v755_v37 }
 0x126   : > { %v3238_v39 = vpop.f32.mrf.mxu0 }
 0x127   : > { %3696 = vtanh.f32 %v756_v38 }
 0x128   : > { %v3691_v41 = vpop.eup %3690  ;;  %v758_v42 = vpop.f32.mrf.mxu0 }
 0x129   : > { %v759_v44 = vadd.f32 %v4025_v34, %v758_v42  ;;  %v4077_v45 = vpack.c.bf16 %v3691_v41, %v3689_v40  ;;  %v3531_v40 = vld [vmem:[%s3927_s27 + $0x138] sm:$0xff]  }
 0x12a   : > { %v3239_v46 = vpop.f32.mrf.mxu0 }
 0x12b   : > { %3698 = vtanh.f32 %v759_v44 }
 0x12c   : > { %v763_v47 = vpop.f32.mrf.mxu0  ;;  %3337 = vmatmul.mubr.bf16.gmra.mxu0 %v3524_v43  ;;  %v3693_v50 = vpop.eup %3692 }
 0x12d   : > { %3340 = vmatprep.mubr.msk.bf16.mxu0 %vm3874_vm0, %v3873_v1  ;;  %v764_v48 = vadd.f32 %v4025_v34, %v763_v47 }
 0x12e   : > { %v3242_v49 = vpop.f32.mrf.mxu0 }
 0x12f   : > { %3700 = vtanh.f32 %v764_v48  ;;  %v3532_v48 = vld [vmem:[%s3927_s27 + $0x140] sm:$0xff]  }
 0x130   : > { %v3695_v51 = vpop.eup %3694  ;;  %v766_v52 = vpop.f32.mrf.mxu0 }
 0x131   : > { %v767_v54 = vadd.f32 %v4025_v34, %v766_v52  ;;  %v4084_v55 = vpack.c.bf16 %v3695_v51, %v3693_v50 }
 0x132   : > { %v3243_v56 = vpop.f32.mrf.mxu0 }
 0x133   : > { %3702 = vtanh.f32 %v767_v54 }
 0x134   : > { %v771_v58 = vpop.f32.mrf.mxu0  ;;  %3341 = vmatmul.mubr.bf16.gmra.mxu0 %v3525_v53  ;;  %v3697_v61 = vpop.eup %3696 }
 0x135   : > { %3344 = vmatprep.mubr.msk.bf16.mxu0 %vm3874_vm0, %v3873_v1  ;;  %v772_v59 = vadd.f32 %v4025_v34, %v771_v58 }
 0x136   : > { %v3246_v60 = vpop.f32.mrf.mxu0 }
 0x137   : > { %3704 = vtanh.f32 %v772_v59 }
 0x138   : > { %v3699_v62 = vpop.eup %3698  ;;  %v774_v63 = vpop.f32.mrf.mxu0 }
 0x139   : > { %v775_v2 = vadd.f32 %v4025_v34, %v774_v63  ;;  %v4091_v3 = vpack.c.bf16 %v3699_v62, %v3697_v61  ;;  %v3533_v61 = vld [vmem:[%s3927_s27 + $0x148] sm:$0xff]  }
 0x13a   : > { %v3247_v6 = vpop.f32.mrf.mxu0 }
 0x13b   : > { %3706 = vtanh.f32 %v775_v2 }
 0x13c   : > { %v4096_v7 = vpop.f32.mrf.mxu0  ;;  %3345 = vmatmul.mubr.bf16.gmra.mxu0 %v3526_v0  ;;  %v3701_v9 = vpop.eup %3700 }
 0x13d   : > { %3348 = vmatprep.mubr.msk.bf16.mxu0 %vm3874_vm0, %v3873_v1 }
 0x13e   : > { %v3250_v8 = vpop.f32.mrf.mxu0 }
 0x140   : > { %v3703_v10 = vpop.eup %3702  ;;  %v4100_v11 = vpop.f32.mrf.mxu0 }
 0x141   : > { %v4103_v13 = vpack.c.bf16 %v3703_v10, %v3701_v9  ;;  %v783_v5 = vadd.f32 %v4025_v34, %v4100_v11  ;;  %v780_v11 = vadd.f32 %v4025_v34, %v4096_v7 }
 0x142   : > { %v3251_v15 = vpop.f32.mrf.mxu0 }
 0x144   : > { %v4105_v16 = vpop.f32.mrf.mxu0  ;;  %3349 = vmatmul.mubr.bf16.gmra.mxu0 %v3527_v12  ;;  %v3705_v18 = vpop.eup %3704 }
 0x145   : > { %3352 = vmatprep.mubr.msk.bf16.mxu0 %vm3874_vm0, %v3873_v1  ;;  %v788_v8 = vadd.f32 %v4025_v34, %v4105_v16 }
 0x146   : > { %v3254_v17 = vpop.f32.mrf.mxu0 }
 0x148   : > { %v3707_v19 = vpop.eup %3706  ;;  %v790_v20 = vpop.f32.mrf.mxu0 }
 0x149   : > { %v4110_v22 = vpack.c.bf16 %v3707_v19, %v3705_v18  ;;  %v791_v2 = vadd.f32 %v4025_v34, %v790_v20  ;;  %v3534_v19 = vld [vmem:[%s3927_s27 + $0x150] sm:$0xff]  }
 0x14a   : > { %v3255_v23 = vpop.f32.mrf.mxu0 }
 0x14c   : > { %v795_v25 = vpop.f32.mrf.mxu0  ;;  %3353 = vmatmul.mubr.bf16.gmra.mxu0 %v3528_v21 }
 0x14d   : > { %3356 = vmatprep.mubr.msk.bf16.mxu0 %vm3874_vm0, %v3873_v1  ;;  %v796_v62 = vadd.f32 %v4025_v34, %v795_v25 }
 0x14e   : > { %v3258_v26 = vpop.f32.mrf.mxu0 }
 0x150   : > { %v798_v27 = vpop.f32.mrf.mxu0 }
 0x151   : > { %v799_v53 = vadd.f32 %v4025_v34, %v798_v27 }
 0x152   : > { %v3259_v29 = vpop.f32.mrf.mxu0 }
 0x154   : > { %v803_v30 = vpop.f32.mrf.mxu0  ;;  %3357 = vmatmul.mubr.bf16.gmra.mxu0 %v3529_v28 }
 0x155   : > { %3360 = vmatprep.mubr.msk.bf16.mxu0 %vm3874_vm0, %v3873_v1  ;;  %v804_v56 = vadd.f32 %v4025_v34, %v803_v30 }
 0x156   : > { %v3262_v31 = vpop.f32.mrf.mxu0 }
 0x158   : > { %v806_v32 = vpop.f32.mrf.mxu0 }
 0x159   : > { %v807_v52 = vadd.f32 %v4025_v34, %v806_v32 }
 0x15a   : > { %v3263_v36 = vpop.f32.mrf.mxu0 }
 0x15c   : > { %v811_v37 = vpop.f32.mrf.mxu0  ;;  %3361 = vmatmul.mubr.bf16.gmra.mxu0 %v3530_v33 }
 0x15d   : > { %3364 = vmatprep.mubr.msk.bf16.mxu0 %vm3874_vm0, %v3873_v1  ;;  %v812_v49 = vadd.f32 %v4025_v34, %v811_v37  ;;  %v3535_v37 = vld [vmem:[%s3927_s27 + $0x158] sm:$0xff]  }
 0x15e   : > { %v3266_v38 = vpop.f32.mrf.mxu0 }
 0x160   : > { %v814_v39 = vpop.f32.mrf.mxu0 }
 0x161   : > { %v815_v43 = vadd.f32 %v4025_v34, %v814_v39 }
 0x162   : > { %v3267_v41 = vpop.f32.mrf.mxu0 }
 0x163   : > { %3708 = vtanh.f32 %v815_v43 }
 0x164   : > { %v819_v42 = vpop.f32.mrf.mxu0  ;;  %3365 = vmatmul.mubr.bf16.gmra.mxu0 %v3531_v40 }
 0x165   : > { %3368 = vmatprep.mubr.msk.bf16.mxu0 %vm3874_vm0, %v3873_v1  ;;  %v820_v44 = vadd.f32 %v4025_v34, %v819_v42 }
 0x166   : > { %v3270_v46 = vpop.f32.mrf.mxu0 }
 0x167   : > { %3710 = vtanh.f32 %v820_v44 }
 0x168   : > { %v822_v47 = vpop.f32.mrf.mxu0 }
 0x169   : > { %v823_v50 = vadd.f32 %v4025_v34, %v822_v47 }
 0x16a   : > { %v3271_v51 = vpop.f32.mrf.mxu0 }
 0x16b   : > { %3712 = vtanh.f32 %v823_v50 }
 0x16c   : > { %v827_v54 = vpop.f32.mrf.mxu0  ;;  %3369 = vmatmul.mubr.bf16.gmra.mxu0 %v3532_v48  ;;  %3714 = vtanh.f32 %v812_v49 }
 0x16d   : > { %3372 = vmatprep.mubr.msk.bf16.mxu0 %vm3874_vm0, %v3873_v1  ;;  %v828_v58 = vadd.f32 %v4025_v34, %v827_v54  ;;  %3716 = vtanh.f32 %v807_v52  ;;  %v3536_v52 = vld [vmem:[%s3927_s27 + $0x160] sm:$0xff]  }
 0x16e   : > { %v3274_v59 = vpop.f32.mrf.mxu0  ;;  %3718 = vtanh.f32 %v799_v53 }
 0x16f   : > { %3720 = vtanh.f32 %v804_v56 }
 0x170   : > { %v830_v60 = vpop.f32.mrf.mxu0  ;;  %3722 = vtanh.f32 %v828_v58  ;;  %v3709_v9 = vpop.eup %3708 }
 0x171   : > { %v831_v63 = vadd.f32 %v4025_v34, %v830_v60 }
 0x172   : > { %v3275_v0 = vpop.f32.mrf.mxu0 }
 0x173   : > { %3724 = vtanh.f32 %v831_v63  ;;  %v3537_v0 = vld [vmem:[%s3927_s27 + $0x168] sm:$0xff]  }
 0x174   : > { %v835_v6 = vpop.f32.mrf.mxu0  ;;  %3373 = vmatmul.mubr.bf16.gmra.mxu0 %v3533_v61  ;;  %3726 = vtanh.f32 %v796_v62  ;;  %v3711_v15 = vpop.eup %3710 }
 0x175   : > { %3376 = vmatprep.mubr.msk.bf16.mxu0 %vm3874_vm0, %v3873_v1  ;;  %v836_v10 = vadd.f32 %v4025_v34, %v835_v6  ;;  %3728 = vtanh.f32 %v791_v2 }
 0x176   : > { %v3278_v12 = vpop.f32.mrf.mxu0  ;;  %3730 = vtanh.f32 %v783_v5 }
 0x177   : > { %3732 = vtanh.f32 %v788_v8 }
 0x178   : > { %v3713_v17 = vpop.eup %3712  ;;  %v838_v18 = vpop.f32.mrf.mxu0  ;;  %3734 = vtanh.f32 %v836_v10 }
 0x179   : > { %v839_v16 = vadd.f32 %v4025_v34, %v838_v18  ;;  %v1303_v20 = vpack.c.bf16 %v3713_v17, %v3711_v15  ;;  %v3715_v21 = vpop.eup %3714 }
 0x17a   : > { %v3279_v23 = vpop.f32.mrf.mxu0  ;;  %v1302_v25 = vpack.c.bf16 %v3709_v9, %v3715_v21  ;;  %v3717_v26 = vpop.eup %3716  ;;  %v3540_v9 = vld [vmem:[%s5040_s3 + $0x38] ss:$28 sps:$4 sm:$0xff]  }
 0x17b   : > { %3736 = vtanh.f32 %v839_v16  ;;  %2896 = vmatprep.subr.bf16.mxu0 %v1303_v20  ;;  %3458 = vmatprep.subr.bf16.mxu1 %v1303_v20  ;;  %v3719_v28 = vpop.eup %3718 }
 0x17c   : > { %v843_v27 = vpop.f32.mrf.mxu0  ;;  %3377 = vmatmul.mubr.bf16.gmra.mxu0 %v3534_v19  ;;  %3466 = vmatpush3.bf16.msra.mxu1 %v4091_v3  ;;  %3738 = vtanh.f32 %v780_v11  ;;  %v3721_v7 = vpop.eup %3720 }
 0x17d   : > { %2897 = vmatpush3.bf16.msra.mxu0 %v4091_v3  ;;  %3459 = vmatprep.subr.bf16.mxu1 %v1302_v25  ;;  %v844_v29 = vadd.f32 %v4025_v34, %v843_v27  ;;  %v4154_v31 = vpop.eup %3722  ;;  %v1301_v32 = vpack.c.bf16 %v3717_v26, %v3721_v7  ;;  %v3546_v26 = vld [vmem:[%s5040_s3 + $0xac] ss:$28 sps:$4 sm:$0xff]  }
 0x17e   : > { %2898 = vmatprep.subr.bf16.mxu0 %v1302_v25  ;;  %v3282_v30 = vpop.f32.mrf.mxu0  ;;  %3380 = vmatprep.mubr.msk.bf16.mxu0 %vm3874_vm0, %v3873_v1  ;;  %v3539_v25 = vld [vmem:[%s3927_s27 + $0x178] sm:$0xff]  }
 0x17f   : > { %3740 = vtanh.f32 %v844_v29 }
 0x180   : > { %v4156_v33 = vpop.eup %3724  ;;  %v846_v36 = vpop.f32.mrf.mxu0  ;;  %3467 = vmatpush3.bf16.msra.mxu1 %v4084_v55 }
 0x181   : > { %v847_v3 = vadd.f32 %v4025_v34, %v846_v36  ;;  %2899 = vmatpush3.bf16.msra.mxu0 %v4084_v55  ;;  %3460 = vmatprep.subr.bf16.mxu1 %v1301_v32  ;;  %v1304_v38 = vpack.c.bf16 %v4156_v33, %v4154_v31  ;;  %v3727_v39 = vpop.eup %3726  ;;  %v3581_v33 = vld [vmem:[%s5040_s3 + $0x40] ss:$28 sps:$4 sm:$0xff]  }
 0x182   : > { %2900 = vmatprep.subr.bf16.mxu0 %v1301_v32  ;;  %v3283_v40 = vpop.f32.mrf.mxu0  ;;  %v1300_v41 = vpack.c.bf16 %v3719_v28, %v3727_v39  ;;  %v3729_v42 = vpop.eup %3728 }
 0x183   : > { %3742 = vtanh.f32 %v847_v3  ;;  %v3731_v44 = vpop.eup %3730  ;;  %v3549_v40 = vld [vmem:[%s5040_s3 + $0xe4] ss:$28 sps:$4 sm:$0xff]  }
 0x184   : > { %v851_v43 = vpop.f32.mrf.mxu0  ;;  %3381 = vmatmul.mubr.bf16.gmra.mxu0 %v3535_v37  ;;  %3468 = vmatpush3.bf16.msra.mxu1 %v4077_v45  ;;  %v3733_v55 = vpop.eup %3732  ;;  %v3548_v37 = vld [vmem:[%s5040_s3 + $0xa8] ss:$28 sps:$4 sm:$0xff]  }
 0x185   : > { %2901 = vmatpush3.bf16.msra.mxu0 %v4077_v45  ;;  %3461 = vmatprep.subr.bf16.mxu1 %v1300_v41  ;;  %v852_v46 = vadd.f32 %v4025_v34, %v851_v43  ;;  %v4169_v48 = vpop.eup %3734  ;;  %v1299_v49 = vpack.c.bf16 %v3729_v42, %v3733_v55  ;;  %v3614_v55 = vld [vmem:[%s5040_s3 + $0x4] ss:$28 sps:$4 sm:$0xff]  }
 0x186   : > { %2902 = vmatprep.subr.bf16.mxu0 %v1300_v41  ;;  %v3286_v47 = vpop.f32.mrf.mxu0  ;;  %3384 = vmatprep.mubr.msk.bf16.mxu0 %vm3874_vm0, %v3873_v1  ;;  %v3570_v41 = vld [vmem:[%s3927_s27 + $0x180] sm:$0xff]  }
 0x187   : > { %3744 = vtanh.f32 %v852_v46 }
 0x188   : > { %v4171_v50 = vpop.eup %3736  ;;  %v854_v51 = vpop.f32.mrf.mxu0  ;;  %3469 = vmatpush3.bf16.msra.mxu1 %v4070_v35 }
 0x189   : > { %v855_v45 = vadd.f32 %v4025_v34, %v854_v51  ;;  %2903 = vmatpush3.bf16.msra.mxu0 %v4070_v35  ;;  %3462 = vmatprep.subr.bf16.mxu1 %v1299_v49  ;;  %v1305_v53 = vpack.c.bf16 %v4171_v50, %v4169_v48  ;;  %v3739_v54 = vpop.eup %3738  ;;  %v3579_v48 = vld [vmem:[%s5040_s3 + $0x44] ss:$28 sps:$4 sm:$0xff]  }
 0x18a   : > { %2904 = vmatprep.subr.bf16.mxu0 %v1299_v49  ;;  %v3287_v56 = vpop.f32.mrf.mxu0  ;;  %v1298_v58 = vpack.c.bf16 %v3731_v44, %v3739_v54 }
 0x18b   : > { %3746 = vtanh.f32 %v855_v45  ;;  %v3552_v56 = vld [vmem:[%s5040_s3 + $0x11c] ss:$28 sps:$4 sm:$0xff]  }
 0x18c   : > { %v859_v59 = vpop.f32.mrf.mxu0  ;;  %3385 = vmatmul.mubr.bf16.gmra.mxu0 %v3536_v52  ;;  %3470 = vmatpush3.bf16.msra.mxu1 %v4063_v24  ;;  %v4184_v61 = vpop.eup %3740  ;;  %v3551_v52 = vld [vmem:[%s5040_s3 + $0xe0] ss:$28 sps:$4 sm:$0xff]  }
 0x18d   : > { %2905 = vmatpush3.bf16.msra.mxu0 %v4063_v24  ;;  %3463 = vmatprep.subr.bf16.mxu1 %v1298_v58  ;;  %v860_v35 = vadd.f32 %v4025_v34, %v859_v59 }
 0x18e   : > { %2906 = vmatprep.subr.bf16.mxu0 %v1298_v58  ;;  %v3290_v60 = vpop.f32.mrf.mxu0  ;;  %3388 = vmatprep.mubr.msk.bf16.mxu0 %vm3874_vm0, %v3873_v1  ;;  %v3612_v58 = vld [vmem:[%s5040_s3] ss:$28 sps:$4 sm:$0xff]  }
 0x18f   : > { %3748 = vtanh.f32 %v860_v35 }
 0x190   : > { %v4186_v62 = vpop.eup %3742  ;;  %v862_v63 = vpop.f32.mrf.mxu0  ;;  %3471 = vmatpush3.bf16.msra.mxu1 %v4056_v14 }
 0x191   : > { %v863_v2 = vadd.f32 %v4025_v34, %v862_v63  ;;  %2907 = vmatpush3.bf16.msra.mxu0 %v4056_v14  ;;  %3464 = vmatprep.subr.bf16.mxu1 %v4110_v22  ;;  %v1306_v24 = vpack.c.bf16 %v4186_v62, %v4184_v61 }
 0x192   : > { %2908 = vmatprep.subr.bf16.mxu0 %v4110_v22  ;;  %v3291_v5 = vpop.f32.mrf.mxu0 }
 0x193   : > { %3750 = vtanh.f32 %v863_v2 }
 0x194   : > { %v867_v6 = vpop.f32.mrf.mxu0  ;;  %3389 = vmatmul.mubr.bf16.gmra.mxu0 %v3537_v0  ;;  %3472 = vmatpush3.bf16.msra.mxu1 %v4049_v4  ;;  %v4203_v22 = vpop.eup %3744 }
 0x195   : > { %2909 = vmatpush3.bf16.msra.mxu0 %v4049_v4  ;;  %3465 = vmatprep.subr.bf16.mxu1 %v4103_v13  ;;  %v868_v14 = vadd.f32 %v4025_v34, %v867_v6  ;;  %v3538_v4 = vld [vmem:[%s3927_s27 + $0x170] sm:$0xff]  }
 0x196   : > { %2910 = vmatprep.subr.bf16.mxu0 %v4103_v13  ;;  %v3294_v8 = vpop.f32.mrf.mxu0  ;;  %3392 = vmatprep.mubr.msk.bf16.mxu0 %vm3874_vm0, %v3873_v1  ;;  %v3543_v13 = vld [vmem:[%s5040_s3 + $0x74] ss:$28 sps:$4 sm:$0xff]  }
 0x197   : > { %3752 = vtanh.f32 %v868_v14  ;;  %v3554_v6 = vld [vmem:[%s5040_s3 + $0x118] ss:$28 sps:$4 sm:$0xff]  }
 0x198   : > { %v4208_v10 = vpop.eup %3746  ;;  %v870_v12 = vpop.f32.mrf.mxu0  ;;  %3473 = vmatpush3.bf16.msra.mxu1 %v4042_v57 }
 0x199   : > { %v871_v15 = vadd.f32 %v4025_v34, %v870_v12  ;;  %2911 = vmatpush3.bf16.msra.mxu0 %v4042_v57  ;;  %v1307_v17 = vpack.c.bf16 %v4208_v10, %v4203_v22  ;;  %v3545_v57 = vld [vmem:[%s5040_s3 + $0x70] ss:$28 sps:$4 sm:$0xff]  }
 0x19a   : > { %v3295_v18 = vpop.f32.mrf.mxu0 }
 0x19b   : > { %3754 = vtanh.f32 %v871_v15  ;;  %1862 = vmatmul.mubr.bf16.vlgmr.msra.gmra.mxu1 %v3540_v9  ;;  %v3555_v9 = vld [vmem:[%s5040_s3 + $0x154] ss:$28 sps:$4 sm:$0xff]  }
 0x19c   : > { %v875_v19 = vpop.f32.mrf.mxu0  ;;  %3393 = vmatmul.mubr.bf16.gmra.mxu0 %v3538_v4  ;;  %1869 = vmatprep.mubr.bf16.mxu1 %v3543_v13  ;;  %v4222_v20 = vpop.eup %3748 }
 0x19d   : > { %3396 = vmatprep.mubr.msk.bf16.mxu0 %vm3874_vm0, %v3873_v1  ;;  %v876_v11 = vadd.f32 %v4025_v34, %v875_v19 }
 0x19e   : > { %v3298_v16 = vpop.f32.mrf.mxu0 }
 0x19f   : > { %3756 = vtanh.f32 %v876_v11  ;;  %v3557_v11 = vld [vmem:[%s5040_s3 + $0x150] ss:$28 sps:$4 sm:$0xff]  }
 0x1a0   : > { %v4227_v21 = vpop.eup %3750  ;;  %v878_v23 = vpop.f32.mrf.mxu0 }
 0x1a1   : > { %v879_v27 = vadd.f32 %v4025_v34, %v878_v23  ;;  %v1308_v28 = vpack.c.bf16 %v4227_v21, %v4222_v20  ;;  %v3558_v23 = vld [vmem:[%s5040_s3 + $0x18c] ss:$28 sps:$4 sm:$0xff]  }
 0x1a2   : > { %v3299_v7 = vpop.f32.mrf.mxu0 }
 0x1a3   : > { %3758 = vtanh.f32 %v879_v27  ;;  %1870 = vmatmul.mubr.bf16.gmra.mxu1 %v3545_v57 }
 0x1a4   : > { %v883_v29 = vpop.f32.mrf.mxu0  ;;  %3397 = vmatmul.mubr.bf16.gmra.mxu0 %v3539_v25  ;;  %1877 = vmatprep.mubr.bf16.mxu1 %v3546_v26  ;;  %v4239_v36 = vpop.eup %3752 }
 0x1a5   : > { %3400 = vmatprep.mubr.msk.bf16.mxu0 %vm3874_vm0, %v3873_v1  ;;  %v884_v30 = vadd.f32 %v4025_v34, %v883_v29 }
 0x1a6   : > { %v3302_v32 = vpop.f32.mrf.mxu0 }
 0x1a7   : > { %3760 = vtanh.f32 %v884_v30  ;;  %v3560_v30 = vld [vmem:[%s5040_s3 + $0x188] ss:$28 sps:$4 sm:$0xff]  }
 0x1a8   : > { %v4244_v3 = vpop.eup %3754  ;;  %v886_v39 = vpop.f32.mrf.mxu0 }
 0x1a9   : > { %v887_v42 = vadd.f32 %v4025_v34, %v886_v39  ;;  %v1309_v43 = vpack.c.bf16 %v4244_v3, %v4239_v36  ;;  %v3561_v39 = vld [vmem:[%s5040_s3 + $0x1c4] ss:$28 sps:$4 sm:$0xff]  }
 0x1aa   : > { %v3303_v44 = vpop.f32.mrf.mxu0 }
 0x1ab   : > { %3762 = vtanh.f32 %v887_v42  ;;  %1878 = vmatmul.mubr.bf16.gmra.mxu1 %v3548_v37 }
 0x1ac   : > { %v891_v46 = vpop.f32.mrf.mxu0  ;;  %1885 = vmatprep.mubr.bf16.mxu1 %v3549_v40  ;;  %3401 = vmatmul.mubr.bf16.gmra.mxu0 %v3570_v41  ;;  %v4257_v51 = vpop.eup %3756 }
 0x1ad   : > { %1853 = vmatprep.mubr.bf16.mxu0 %v3614_v55  ;;  %v892_v47 = vadd.f32 %v4025_v34, %v891_v46  ;;  %v3563_v55 = vld [vmem:[%s5040_s3 + $0x1c0] ss:$28 sps:$4 sm:$0xff]  }
 0x1ae   : > { %v3306_v49 = vpop.f32.mrf.mxu0 }
 0x1af   : > { %3764 = vtanh.f32 %v892_v47  ;;  %v3564_v47 = vld [vmem:[%s5040_s3 + $0x1fc] ss:$28 sps:$4 sm:$0xff]  }
 0x1b0   : > { %v4262_v45 = vpop.eup %3758  ;;  %v894_v54 = vpop.f32.mrf.mxu0 }
 0x1b1   : > { %v895_v59 = vadd.f32 %v4025_v34, %v894_v54  ;;  %v1310_v35 = vpack.c.bf16 %v4262_v45, %v4257_v51 }
 0x1b2   : > { %v3307_v60 = vpop.f32.mrf.mxu0 }
 0x1b3   : > { %3766 = vtanh.f32 %v895_v59  ;;  %1886 = vmatmul.mubr.bf16.gmra.mxu1 %v3551_v52  ;;  %v3567_v59 = vld [vmem:[%s5040_s3 + $0x234] ss:$28 sps:$4 sm:$0xff]  }
 0x1b4   : > { %v899_v63 = vpop.f32.mrf.mxu0  ;;  %1893 = vmatprep.mubr.bf16.mxu1 %v3552_v56  ;;  %1854 = vmatmul.mubr.bf16.vlgmr.msra.gmra.mxu0 %v3612_v58  ;;  %v4274_v5 = vpop.eup %3760  ;;  %v3566_v56 = vld [vmem:[%s5040_s3 + $0x1f8] ss:$28 sps:$4 sm:$0xff]  }
 0x1b5   : > { %v900_v0 = vadd.f32 %v4025_v34, %v899_v63 }
 0x1b6   : > { %v3310_v2 = vpop.f32.mrf.mxu0 }
 0x1b7   : > { %3768 = vtanh.f32 %v900_v0  ;;  %v3569_v2 = vld [vmem:[%s5040_s3 + $0x230] ss:$28 sps:$4 sm:$0xff]  }
 0x1b8   : > { %v4279_v14 = vpop.eup %3762  ;;  %v902_v8 = vpop.f32.mrf.mxu0 }
 0x1b9   : > { %v903_v12 = vadd.f32 %v4025_v34, %v902_v8  ;;  %v1311_v4 = vpack.c.bf16 %v4279_v14, %v4274_v5  ;;  %v3571_v8 = vld [vmem:[%s5040_s3 + $0x26c] ss:$28 sps:$4 sm:$0xff]  }
 0x1ba   : > { %v3311_v13 = vpop.f32.mrf.mxu0 }
 0x1bb   : > { %3770 = vtanh.f32 %v903_v12  ;;  %1894 = vmatmul.mubr.bf16.gmra.mxu1 %v3554_v6 }
 0x1bc   : > { %v4287_v15 = vpop.f32.mrf.mxu0  ;;  %1901 = vmatprep.mubr.bf16.mxu1 %v3555_v9  ;;  %v4289_v19 = vpop.eup %3764 }
 0x1be   : > { %v3314_v18 = vpop.f32.mrf.mxu0 }
 0x1bf   : > { %v1284_v18 = vld [vmem:[%s5040_s3 + $0x2a0] sm:$0xff] }
 0x1c0   : > { %v4294_v16 = vpop.eup %3766  ;;  %v4296_v57 = vpop.f32.mrf.mxu0 }
 0x1c1   : > { %v1312_v25 = vpack.c.bf16 %v4294_v16, %v4289_v19 }
 0x1c2   : > { %v3315_v26 = vpop.f32.mrf.mxu0 }
 0x1c3   : > { %1902 = vmatmul.mubr.bf16.gmra.mxu1 %v3557_v11  ;;  %v3573_v26 = vld [vmem:[%s5040_s3 + $0x268] ss:$28 sps:$4 sm:$0xff]  }
 0x1c4   : > { %v4303_v27 = vpop.f32.mrf.mxu0  ;;  %1909 = vmatprep.mubr.bf16.mxu1 %v3558_v23  ;;  %v4305_v29 = vpop.eup %3768 }
 0x1c6   : > { %v3318_v7 = vpop.f32.mrf.mxu0 }
 0x1c8   : > { %v4310_v32 = vpop.eup %3770  ;;  %v4312_v37 = vpop.f32.mrf.mxu0 }
 0x1c9   : > { %v1313_v40 = vpack.c.bf16 %v4310_v32, %v4305_v29  ;;  %v3576_v29 = vld [vmem:[%s5040_s3 + $0x8] ss:$28 sps:$4 sm:$0xff]  }
 0x1ca   : > { %v3319_v41 = vpop.f32.mrf.mxu0 }
 0x1cb   : > { %1910 = vmatmul.mubr.bf16.gmra.mxu1 %v3560_v30  ;;  %v2697_v30 = vcombine.high %v1284_v18, %v1284_v18 }
 0x1cc   : > { %v923_v42 = vpop.f32.mrf.mxu0  ;;  %1917 = vmatprep.mubr.bf16.mxu1 %v3561_v39 }
 0x1ce   : > { %v3322_v44 = vpop.f32.mrf.mxu0 }
 0x1d0   : > { %v926_v46 = vpop.f32.mrf.mxu0 }
 0x1d2   : > { %v3323_v49 = vpop.f32.mrf.mxu0 }
 0x1d3   : > { %1918 = vmatmul.mubr.bf16.gmra.mxu1 %v3563_v55 }
 0x1d4   : > { %v931_v52 = vpop.f32.mrf.mxu0  ;;  %1925 = vmatprep.mubr.bf16.mxu1 %v3564_v47  ;;  %v927_v47 = vadd.f32 %v4025_v34, %v926_v46 }
 0x1d6   : > { %v3326_v54 = vpop.f32.mrf.mxu0 }
 0x1d7   : > { %v932_v54 = vadd.f32 %v4025_v34, %v931_v52  ;;  %v919_v52 = vadd.f32 %v4025_v34, %v4312_v37 }
 0x1d8   : > { %v934_v58 = vpop.f32.mrf.mxu0 }
 0x1d9   : > { %v935_v55 = vadd.f32 %v4025_v34, %v934_v58  ;;  %v3578_v58 = vld [vmem:[%s5040_s3 + $0xc] ss:$28 sps:$4 sm:$0xff]  }
 0x1da   : > { %v3327_v60 = vpop.f32.mrf.mxu0 }
 0x1db   : > { %1926 = vmatmul.mubr.bf16.gmra.mxu1 %v3566_v56  ;;  %v2696_v60 = vcombine.low %v1284_v18, %v1284_v18 }
 0x1dc   : > { %v939_v63 = vpop.f32.mrf.mxu0  ;;  %1933 = vmatprep.mubr.bf16.mxu1 %v3567_v59 }
 0x1dd   : > { %v940_v39 = vadd.f32 %v4025_v34, %v939_v63 }
 0x1de   : > { %v3330_v0 = vpop.f32.mrf.mxu0 }
 0x1df   : > { %v924_v0 = vadd.f32 %v4025_v34, %v923_v42 }
 0x1e0   : > { %v942_v6 = vpop.f32.mrf.mxu0 }
 0x1e1   : > { %v943_v13 = vadd.f32 %v4025_v34, %v942_v6  ;;  %v911_v6 = vadd.f32 %v4025_v34, %v4296_v57 }
 0x1e2   : > { %v3331_v9 = vpop.f32.mrf.mxu0 }
 0x1e3   : > { %1934 = vmatmul.mubr.bf16.gmra.mxu1 %v3569_v2  ;;  %3772 = vtanh.f32 %v943_v13  ;;  %v916_v9 = vadd.f32 %v4025_v34, %v4303_v27 }
 0x1e4   : > { %v947_v12 = vpop.f32.mrf.mxu0  ;;  %1941 = vmatprep.mubr.bf16.mxu1 %v3571_v8 }
 0x1e5   : > { %v948_v11 = vadd.f32 %v4025_v34, %v947_v12 }
 0x1e6   : > { %v3334_v23 = vpop.f32.mrf.mxu0 }
 0x1e7   : > { %3774 = vtanh.f32 %v948_v11  ;;  %v908_v23 = vadd.f32 %v4025_v34, %v4287_v15 }
 0x1e8   : > { %v950_v7 = vpop.f32.mrf.mxu0 }
 0x1e9   : > { %v951_v41 = vadd.f32 %v4025_v34, %v950_v7 }
 0x1ea   : > { %v3335_v44 = vpop.f32.mrf.mxu0 }
 0x1eb   : > { %3776 = vtanh.f32 %v951_v41  ;;  %1942 = vmatmul.mubr.bf16.gmra.mxu1 %v3573_v26 }
 0x1ec   : > { %v955_v49 = vpop.f32.mrf.mxu0  ;;  %1949 = vmatprep.mubr.bf16.mxu1 %v2697_v30  ;;  %3778 = vtanh.f32 %v940_v39 }
 0x1ed   : > { %v956_v56 = vadd.f32 %v4025_v34, %v955_v49  ;;  %3780 = vtanh.f32 %v935_v55 }
 0x1ee   : > { %v3338_v59 = vpop.f32.mrf.mxu0  ;;  %3782 = vtanh.f32 %v927_v47 }
 0x1ef   : > { %3784 = vtanh.f32 %v932_v54 }
 0x1f0   : > { %v958_v63 = vpop.f32.mrf.mxu0  ;;  %3786 = vtanh.f32 %v956_v56  ;;  %v3773_v42 = vpop.eup %3772 }
 0x1f1   : > { %v959_v46 = vadd.f32 %v4025_v34, %v958_v63 }
 0x1f2   : > { %v3339_v2 = vpop.f32.mrf.mxu0 }
 0x1f3   : > { %3788 = vtanh.f32 %v959_v46  ;;  %1950 = vmatmul.mubr.bf16.gmra.mxu1 %v2696_v60 }
 0x1f4   : > { %v963_v8 = vpop.f32.mrf.mxu0  ;;  %1989 = vmatprep.mubr.bf16.mxu1 %v3578_v58  ;;  %3790 = vtanh.f32 %v924_v0  ;;  %v3775_v18 = vpop.eup %3774 }
 0x1f5   : > { %v964_v12 = vadd.f32 %v4025_v34, %v963_v8  ;;  %3792 = vtanh.f32 %v919_v52 }
 0x1f6   : > { %v3342_v13 = vpop.f32.mrf.mxu0  ;;  %3794 = vtanh.f32 %v911_v6 }
 0x1f7   : > { %3796 = vtanh.f32 %v916_v9 }
 0x1f8   : > { %v3777_v11 = vpop.eup %3776  ;;  %v966_v37 = vpop.f32.mrf.mxu0  ;;  %3798 = vtanh.f32 %v964_v12 }
 0x1f9   : > { %v967_v57 = vadd.f32 %v4025_v34, %v966_v37  ;;  %v1319_v26 = vpack.c.bf16 %v3777_v11, %v3775_v18  ;;  %v3779_v7 = vpop.eup %3778  ;;  %v4372_v34 = vld [vmem:[%s5039_s2] ss:$0 sm:$0xff] }
 0x1fa   : > { %v3343_v27 = vpop.f32.mrf.mxu0  ;;  %v1318_v30 = vpack.c.bf16 %v3773_v42, %v3779_v7  ;;  %v3781_v39 = vpop.eup %3780 }
 0x1fb   : > { %3800 = vtanh.f32 %v967_v57  ;;  %2990 = vmatprep.subr.bf16.mxu1 %v1319_v26  ;;  %v3783_v44 = vpop.eup %3782  ;;  %v3582_v57 = vld [vmem:[%s5040_s3 + $0x7c] ss:$28 sps:$4 sm:$0xff]  }
 0x1fc   : > { %v971_v41 = vpop.f32.mrf.mxu0  ;;  %2991 = vmatpush3.bf16.msra.mxu1 %v1311_v4  ;;  %3802 = vtanh.f32 %v908_v23  ;;  %v3785_v15 = vpop.eup %3784 }
 0x1fd   : > { %2992 = vmatprep.subr.bf16.mxu1 %v1318_v30  ;;  %v972_v55 = vadd.f32 %v4372_v34, %v971_v41  ;;  %v4375_v49 = vpop.eup %3786  ;;  %v1317_v54 = vpack.c.bf16 %v3781_v39, %v3785_v15  ;;  %v3584_v15 = vld [vmem:[%s5040_s3 + $0x78] ss:$28 sps:$4 sm:$0xff]  }
 0x1fe   : > { %v3346_v47 = vpop.f32.mrf.mxu0 }
 0x1ff   : > { %3804 = vtanh.f32 %v972_v55 }
 0x200   : > { %v4377_v56 = vpop.eup %3788  ;;  %v974_v59 = vpop.f32.mrf.mxu0  ;;  %2993 = vmatpush3.bf16.msra.mxu1 %v1310_v35 }
 0x201   : > { %v975_v5 = vadd.f32 %v4372_v34, %v974_v59  ;;  %2994 = vmatprep.subr.bf16.mxu1 %v1317_v54  ;;  %v1320_v14 = vpack.c.bf16 %v4377_v56, %v4375_v49  ;;  %v3791_v4 = vpop.eup %3790  ;;  %v3585_v54 = vld [vmem:[%s5040_s3 + $0xb4] ss:$28 sps:$4 sm:$0xff]   ;;  %v3622_v49 = vld [vmem:[%s5040_s3 + $0x48] ss:$28 sps:$4 sm:$0xff]  }
 0x202   : > { %v3347_v60 = vpop.f32.mrf.mxu0  ;;  %v1316_v63 = vpack.c.bf16 %v3783_v44, %v3791_v4  ;;  %v3793_v58 = vpop.eup %3792 }
 0x203   : > { %3806 = vtanh.f32 %v975_v5  ;;  %v3795_v46 = vpop.eup %3794 }
 0x204   : > { %v979_v0 = vpop.f32.mrf.mxu0  ;;  %2995 = vmatpush3.bf16.msra.mxu1 %v1309_v43  ;;  %v3797_v51 = vpop.eup %3796 }
 0x205   : > { %2996 = vmatprep.subr.bf16.mxu1 %v1316_v63  ;;  %v980_v45 = vadd.f32 %v4372_v34, %v979_v0  ;;  %v4389_v2 = vpop.eup %3798  ;;  %v1315_v52 = vpack.c.bf16 %v3793_v58, %v3797_v51 }
 0x206   : > { %v3350_v35 = vpop.f32.mrf.mxu0 }
 0x207   : > { %3808 = vtanh.f32 %v980_v45  ;;  %v3588_v35 = vld [vmem:[%s5040_s3 + $0xec] ss:$28 sps:$4 sm:$0xff]  }
 0x208   : > { %v4391_v6 = vpop.eup %3800  ;;  %v982_v8 = vpop.f32.mrf.mxu0  ;;  %2997 = vmatpush3.bf16.msra.mxu1 %v1308_v28 }
 0x209   : > { %v983_v9 = vadd.f32 %v4372_v34, %v982_v8  ;;  %2998 = vmatprep.subr.bf16.mxu1 %v1315_v52  ;;  %v1321_v36 = vpack.c.bf16 %v4391_v6, %v4389_v2  ;;  %v3803_v3 = vpop.eup %3802  ;;  %v3620_v2 = vld [vmem:[%s5040_s3 + $0x4c] ss:$28 sps:$4 sm:$0xff]  }
 0x20a   : > { %v3351_v43 = vpop.f32.mrf.mxu0  ;;  %v1314_v42 = vpack.c.bf16 %v3795_v46, %v3803_v3  ;;  %v3587_v46 = vld [vmem:[%s5040_s3 + $0xb0] ss:$28 sps:$4 sm:$0xff]  }
 0x20b   : > { %3810 = vtanh.f32 %v983_v9 }
 0x20c   : > { %v987_v12 = vpop.f32.mrf.mxu0  ;;  %2999 = vmatpush3.bf16.msra.mxu1 %v1307_v17  ;;  %v4403_v28 = vpop.eup %3804 }
 0x20d   : > { %3000 = vmatprep.subr.bf16.mxu1 %v1314_v42  ;;  %v988_v20 = vadd.f32 %v4372_v34, %v987_v12 }
 0x20e   : > { %v3354_v21 = vpop.f32.mrf.mxu0 }
 0x20f   : > { %3812 = vtanh.f32 %v988_v20  ;;  %v3590_v20 = vld [vmem:[%s5040_s3 + $0xe8] ss:$28 sps:$4 sm:$0xff]  }
 0x210   : > { %v4405_v13 = vpop.eup %3806  ;;  %v990_v18 = vpop.f32.mrf.mxu0  ;;  %3001 = vmatpush3.bf16.msra.mxu1 %v1306_v24 }
 0x211   : > { %v991_v11 = vadd.f32 %v4372_v34, %v990_v18  ;;  %3002 = vmatprep.subr.bf16.mxu1 %v1313_v40  ;;  %v1322_v22 = vpack.c.bf16 %v4405_v13, %v4403_v28  ;;  %v3617_v13 = vld [vmem:[%s5040_s3 + $0x10] ss:$28 sps:$4 sm:$0xff]  }
 0x212   : > { %v3355_v10 = vpop.f32.mrf.mxu0 }
 0x213   : > { %3814 = vtanh.f32 %v991_v11  ;;  %v3591_v11 = vld [vmem:[%s5040_s3 + $0x124] ss:$28 sps:$4 sm:$0xff]  }
 0x214   : > { %v995_v17 = vpop.f32.mrf.mxu0  ;;  %3003 = vmatpush3.bf16.msra.mxu1 %v1305_v53  ;;  %v4423_v24 = vpop.eup %3808 }
 0x215   : > { %3004 = vmatprep.subr.bf16.mxu1 %v1312_v25  ;;  %v996_v61 = vadd.f32 %v4372_v34, %v995_v17 }
 0x216   : > { %v3358_v62 = vpop.f32.mrf.mxu0 }
 0x217   : > { %3816 = vtanh.f32 %v996_v61 }
 0x218   : > { %v4428_v32 = vpop.eup %3810  ;;  %v998_v40 = vpop.f32.mrf.mxu0  ;;  %3005 = vmatpush3.bf16.msra.mxu1 %v1304_v38 }
 0x219   : > { %v999_v50 = vadd.f32 %v4372_v34, %v998_v40  ;;  %v1323_v53 = vpack.c.bf16 %v4428_v32, %v4423_v24 }
 0x21a   : > { %v3359_v19 = vpop.f32.mrf.mxu0 }
 0x21b   : > { %3818 = vtanh.f32 %v999_v50  ;;  %1990 = vmatmul.mubr.bf16.vlgmr.msra.gmra.mxu1 %v3576_v29 }
 0x21c   : > { %v1003_v16 = vpop.f32.mrf.mxu0  ;;  %1997 = vmatprep.mubr.bf16.mxu1 %v3579_v48  ;;  %v4440_v31 = vpop.eup %3812  ;;  %v3593_v48 = vld [vmem:[%s5040_s3 + $0x120] ss:$28 sps:$4 sm:$0xff]  }
 0x21d   : > { %v1004_v25 = vadd.f32 %v4372_v34, %v1003_v16  ;;  %v3594_v16 = vld [vmem:[%s5040_s3 + $0x15c] ss:$28 sps:$4 sm:$0xff]  }
 0x21e   : > { %v3362_v37 = vpop.f32.mrf.mxu0 }
 0x21f   : > { %3820 = vtanh.f32 %v1004_v25 }
 0x220   : > { %v4445_v38 = vpop.eup %3814  ;;  %v1006_v23 = vpop.f32.mrf.mxu0 }
 0x221   : > { %v1007_v26 = vadd.f32 %v4372_v34, %v1006_v23  ;;  %v1324_v7 = vpack.c.bf16 %v4445_v38, %v4440_v31 }
 0x222   : > { %v3363_v27 = vpop.f32.mrf.mxu0 }
 0x223   : > { %3822 = vtanh.f32 %v1007_v26  ;;  %1998 = vmatmul.mubr.bf16.gmra.mxu1 %v3581_v33  ;;  %v3596_v26 = vld [vmem:[%s5040_s3 + $0x158] ss:$28 sps:$4 sm:$0xff]  }
 0x224   : > { %v1011_v30 = vpop.f32.mrf.mxu0  ;;  %2005 = vmatprep.mubr.bf16.mxu1 %v3582_v57  ;;  %v4454_v44 = vpop.eup %3816 }
 0x225   : > { %v1012_v39 = vadd.f32 %v4372_v34, %v1011_v30 }
 0x226   : > { %v3366_v41 = vpop.f32.mrf.mxu0 }
 0x227   : > { %3824 = vtanh.f32 %v1012_v39  ;;  %v3597_v39 = vld [vmem:[%s5040_s3 + $0x194] ss:$28 sps:$4 sm:$0xff]  }
 0x228   : > { %v4459_v55 = vpop.eup %3818  ;;  %v1014_v47 = vpop.f32.mrf.mxu0 }
 0x229   : > { %v1015_v59 = vadd.f32 %v4372_v34, %v1014_v47  ;;  %v1325_v5 = vpack.c.bf16 %v4459_v55, %v4454_v44 }
 0x22a   : > { %v3367_v4 = vpop.f32.mrf.mxu0 }
 0x22b   : > { %3826 = vtanh.f32 %v1015_v59  ;;  %2006 = vmatmul.mubr.bf16.gmra.mxu1 %v3584_v15  ;;  %v3599_v59 = vld [vmem:[%s5040_s3 + $0x190] ss:$28 sps:$4 sm:$0xff]  }
 0x22c   : > { %v1019_v60 = vpop.f32.mrf.mxu0  ;;  %2013 = vmatprep.mubr.bf16.mxu1 %v3585_v54  ;;  %v4468_v0 = vpop.eup %3820 }
 0x22d   : > { %v1020_v63 = vadd.f32 %v4372_v34, %v1019_v60  ;;  %v3600_v60 = vld [vmem:[%s5040_s3 + $0x1cc] ss:$28 sps:$4 sm:$0xff]  }
 0x22e   : > { %v3370_v58 = vpop.f32.mrf.mxu0 }
 0x22f   : > { %3828 = vtanh.f32 %v1020_v63 }
 0x230   : > { %v4473_v51 = vpop.eup %3822  ;;  %v1022_v45 = vpop.f32.mrf.mxu0 }
 0x231   : > { %v1023_v52 = vadd.f32 %v4372_v34, %v1022_v45  ;;  %v1326_v8 = vpack.c.bf16 %v4473_v51, %v4468_v0  ;;  %v3602_v45 = vld [vmem:[%s5040_s3 + $0x1c8] ss:$28 sps:$4 sm:$0xff]  }
 0x232   : > { %v3371_v9 = vpop.f32.mrf.mxu0 }
 0x233   : > { %3830 = vtanh.f32 %v1023_v52  ;;  %2014 = vmatmul.mubr.bf16.gmra.mxu1 %v3587_v46  ;;  %v3603_v52 = vld [vmem:[%s5040_s3 + $0x204] ss:$28 sps:$4 sm:$0xff]  }
 0x234   : > { %v1027_v3 = vpop.f32.mrf.mxu0  ;;  %2021 = vmatprep.mubr.bf16.mxu1 %v3588_v35  ;;  %v4482_v12 = vpop.eup %3824 }
 0x235   : > { %v1028_v43 = vadd.f32 %v4372_v34, %v1027_v3 }
 0x236   : > { %v3374_v42 = vpop.f32.mrf.mxu0 }
 0x237   : > { %3832 = vtanh.f32 %v1028_v43 }
 0x238   : > { %v4487_v21 = vpop.eup %3826  ;;  %v1030_v18 = vpop.f32.mrf.mxu0 }
 0x239   : > { %v1031_v10 = vadd.f32 %v4372_v34, %v1030_v18  ;;  %v1327_v17 = vpack.c.bf16 %v4487_v21, %v4482_v12 }
 0x23a   : > { %v3375_v61 = vpop.f32.mrf.mxu0 }
 0x23b   : > { %3834 = vtanh.f32 %v1031_v10  ;;  %2022 = vmatmul.mubr.bf16.gmra.mxu1 %v3590_v20 }
 0x23c   : > { %v4495_v62 = vpop.f32.mrf.mxu0  ;;  %2029 = vmatprep.mubr.bf16.mxu1 %v3591_v11  ;;  %v4497_v40 = vpop.eup %3828  ;;  %v3605_v11 = vld [vmem:[%s5040_s3 + $0x200] ss:$28 sps:$4 sm:$0xff]  }
 0x23e   : > { %v3378_v29 = vpop.f32.mrf.mxu0 }
 0x23f   : > { %v3606_v29 = vld [vmem:[%s5040_s3 + $0x23c] ss:$28 sps:$4 sm:$0xff]  }
 0x240   : > { %v4502_v50 = vpop.eup %3830  ;;  %v4504_v19 = vpop.f32.mrf.mxu0 }
 0x241   : > { %v1328_v25 = vpack.c.bf16 %v4502_v50, %v4497_v40 }
 0x242   : > { %v3379_v37 = vpop.f32.mrf.mxu0 }
 0x243   : > { %2030 = vmatmul.mubr.bf16.gmra.mxu1 %v3593_v48 }
 0x244   : > { %v4511_v33 = vpop.f32.mrf.mxu0  ;;  %2037 = vmatprep.mubr.bf16.mxu1 %v3594_v16  ;;  %v4513_v57 = vpop.eup %3832 }
 0x246   : > { %v3382_v23 = vpop.f32.mrf.mxu0 }
 0x248   : > { %v4518_v27 = vpop.eup %3834  ;;  %v4520_v30 = vpop.f32.mrf.mxu0 }
 0x249   : > { %v1329_v41 = vpack.c.bf16 %v4518_v27, %v4513_v57 }
 0x24a   : > { %v3383_v15 = vpop.f32.mrf.mxu0 }
 0x24b   : > { %2038 = vmatmul.mubr.bf16.gmra.mxu1 %v3596_v26 }
 0x24c   : > { %v4527_v47 = vpop.f32.mrf.mxu0  ;;  %2045 = vmatprep.mubr.bf16.mxu1 %v3597_v39 }
 0x24e   : > { %v3386_v54 = vpop.f32.mrf.mxu0 }
 0x250   : > { %v1054_v4 = vpop.f32.mrf.mxu0 }
 0x252   : > { %v3387_v63 = vpop.f32.mrf.mxu0 }
 0x253   : > { %2046 = vmatmul.mubr.bf16.gmra.mxu1 %v3599_v59 }
 0x254   : > { %v1059_v58 = vpop.f32.mrf.mxu0  ;;  %2053 = vmatprep.mubr.bf16.mxu1 %v3600_v60  ;;  %v3608_v60 = vld [vmem:[%s5040_s3 + $0x238] ss:$28 sps:$4 sm:$0xff]  }
 0x256   : > { %v3390_v46 = vpop.f32.mrf.mxu0 }
 0x258   : > { %v1062_v35 = vpop.f32.mrf.mxu0 }
 0x25a   : > { %v3391_v9 = vpop.f32.mrf.mxu0 }
 0x25b   : > { %2054 = vmatmul.mubr.bf16.gmra.mxu1 %v3602_v45  ;;  %v2918_v3 = vpop.f32.mrf.mxu1  ;;  %v3609_v45 = vld [vmem:[%s5040_s3 + $0x274] ss:$28 sps:$4 sm:$0xff]  }
 0x25c   : > { %v1067_v43 = vpop.f32.mrf.mxu0  ;;  %2061 = vmatprep.mubr.bf16.mxu1 %v3603_v52 }
 0x25d   : > { %v2919_v42 = vpop.f32.mrf.mxu1  ;;  %v1068_v52 = vadd.f32 %v4372_v34, %v1067_v43  ;;  %v1285_v43 = vld [vmem:[%s5040_s3 + $0x2a8] sm:$0xff] }
 0x25e   : > { %v3394_v20 = vpop.f32.mrf.mxu0  ;;  %v4541_v18 = vadd.f32 %v2919_v42, %v2918_v3 }
 0x25f   : > { %v4546_v10 = vpop.f32.mrf.mxu1  ;;  %v1063_v20 = vadd.f32 %v4372_v34, %v1062_v35  ;;  %v3611_v35 = vld [vmem:[%s5040_s3 + $0x270] ss:$28 sps:$4 sm:$0xff]  }
 0x260   : > { %v1070_v61 = vpop.f32.mrf.mxu0 }
 0x261   : > { %v4551_v48 = vpop.f32.mrf.mxu1  ;;  %v1071_v26 = vadd.f32 %v4372_v34, %v1070_v61 }
 0x262   : > { %v3395_v16 = vpop.f32.mrf.mxu0 }
 0x263   : > { %2062 = vmatmul.mubr.bf16.gmra.mxu1 %v3605_v11  ;;  %v2924_v37 = vpop.f32.mrf.mxu1  ;;  %3836 = vtanh.f32 %v1071_v26  ;;  %v1055_v26 = vadd.f32 %v4372_v34, %v1054_v4 }
 0x264   : > { %v1075_v23 = vpop.f32.mrf.mxu0  ;;  %2069 = vmatprep.mubr.bf16.mxu1 %v3606_v29  ;;  %v1060_v29 = vadd.f32 %v4372_v34, %v1059_v58 }
 0x265   : > { %v2925_v39 = vpop.f32.mrf.mxu1  ;;  %v1076_v15 = vadd.f32 %v4372_v34, %v1075_v23 }
 0x266   : > { %v3398_v54 = vpop.f32.mrf.mxu0  ;;  %v4555_v59 = vadd.f32 %v2925_v39, %v2924_v37 }
 0x267   : > { %v4560_v63 = vpop.f32.mrf.mxu1  ;;  %3838 = vtanh.f32 %v1076_v15  ;;  %v2699_v15 = vcombine.high %v1285_v43, %v1285_v43  ;;  %v1052_v54 = vadd.f32 %v4372_v34, %v4527_v47 }
 0x268   : > { %v1078_v46 = vpop.f32.mrf.mxu0 }
 0x269   : > { %v1079_v9 = vadd.f32 %v4372_v34, %v1078_v46  ;;  %v4567_v3 = vpop.f32.mrf.mxu1 }
 0x26a   : > { %v3399_v42 = vpop.f32.mrf.mxu0 }
 0x26b   : > { %3840 = vtanh.f32 %v1079_v9  ;;  %2070 = vmatmul.mubr.bf16.gmra.mxu1 %v3608_v60  ;;  %v2930_v11 = vpop.f32.mrf.mxu1 }
 0x26c   : > { %2077 = vmatprep.mubr.bf16.mxu1 %v3609_v45  ;;  %v1083_v61 = vpop.f32.mrf.mxu0  ;;  %3842 = vtanh.f32 %v1068_v52  ;;  %v1047_v45 = vadd.f32 %v4372_v34, %v4520_v30  ;;  %v1044_v52 = vadd.f32 %v4372_v34, %v4511_v33  ;;  %v1036_v33 = vadd.f32 %v4372_v34, %v4495_v62 }
 0x26d   : > { %v2931_v16 = vpop.f32.mrf.mxu1  ;;  %3844 = vtanh.f32 %v1063_v20 }
 0x26e   : > { %v4574_v37 = vadd.f32 %v2931_v16, %v2930_v11  ;;  %v3402_v23 = vpop.f32.mrf.mxu0  ;;  %3846 = vtanh.f32 %v1060_v29  ;;  %v1039_v11 = vadd.f32 %v4372_v34, %v4504_v19  ;;  %v2698_v29 = vcombine.low %v1285_v43, %v1285_v43 }
 0x26f   : > { %v4580_v39 = vpop.f32.mrf.mxu1  ;;  %3848 = vtanh.f32 %v1055_v26  ;;  %v3619_v23 = vld [vmem:[%s5040_s3 + $0x14] ss:$28 sps:$4 sm:$0xff]  }
 0x270   : > { %v1086_v58 = vpop.f32.mrf.mxu0  ;;  %3850 = vtanh.f32 %v1052_v54  ;;  %v3837_v42 = vpop.eup %3836 }
 0x271   : > { %v4584_v60 = vpop.f32.mrf.mxu1  ;;  %3852 = vtanh.f32 %v1047_v45 }
 0x272   : > { %v3403_v46 = vpop.f32.mrf.mxu0  ;;  %3854 = vtanh.f32 %v1044_v52 }
 0x273   : > { %2078 = vmatmul.mubr.bf16.gmra.mxu1 %v3611_v35  ;;  %v2936_v4 = vpop.f32.mrf.mxu1  ;;  %3856 = vtanh.f32 %v1039_v11 }
 0x274   : > { %2085 = vmatprep.mubr.bf16.mxu1 %v2699_v15  ;;  %v3839_v47 = vpop.eup %3838  ;;  %3858 = vtanh.f32 %v1036_v33 }
 0x275   : > { %v2937_v9 = vpop.f32.mrf.mxu1 }
 0x276   : > { %v4590_v20 = vadd.f32 %v2937_v9, %v2936_v4 }
 0x277   : > { %v4594_v16 = vpop.f32.mrf.mxu1 }
 0x278   : > { %v3841_v30 = vpop.eup %3840 }
 0x279   : > { %v1335_v26 = vpack.c.bf16 %v3841_v30, %v3839_v47  ;;  %v4601_v35 = vpop.f32.mrf.mxu1  ;;  %v3843_v15 = vpop.eup %3842  ;;  %v1084_v47 = vadd.f32 %v4372_v34, %v1083_v61 }
 0x27a   : > { %v1334_v19 = vpack.c.bf16 %v3837_v42, %v3843_v15  ;;  %v3845_v54 = vpop.eup %3844  ;;  %v3625_v15 = vld [vmem:[%s5040_s3 + $0x80] ss:$28 sps:$4 sm:$0xff]  }
 0x27b   : > { %2086 = vmatmul.mubr.bf16.gmra.mxu1 %v2698_v29  ;;  %3084 = vmatprep.subr.bf16.mxu1 %v1335_v26  ;;  %v2942_v43 = vpop.f32.mrf.mxu1  ;;  %v3847_v62 = vpop.eup %3846  ;;  %v1087_v29 = vadd.f32 %v4372_v34, %v1086_v58  ;;  %3860 = vtanh.f32 %v1084_v47 }
 0x27c   : > { %3085 = vmatpush3.bf16.msra.mxu1 %v1327_v17  ;;  %2125 = vmatprep.mubr.bf16.mxu1 %v3619_v23  ;;  %v1333_v4 = vpack.c.bf16 %v3845_v54, %v3847_v62  ;;  %v3849_v9 = vpop.eup %3848 }
 0x27d   : > { %3086 = vmatprep.subr.bf16.mxu1 %v1334_v19  ;;  %v2943_v46 = vpop.f32.mrf.mxu1  ;;  %v3851_v12 = vpop.eup %3850  ;;  %3862 = vtanh.f32 %v1087_v29 }
 0x27e   : > { %v4606_v45 = vadd.f32 %v2943_v46, %v2942_v43  ;;  %v1332_v21 = vpack.c.bf16 %v3849_v9, %v3851_v12  ;;  %v3853_v11 = vpop.eup %3852  ;;  %v3628_v43 = vld [vmem:[%s5040_s3 + $0xbc] ss:$28 sps:$4 sm:$0xff]  }
 0x27f   : > { %v4608_v52 = vpop.f32.mrf.mxu1  ;;  %v3855_v23 = vpop.eup %3854  ;;  %v3626_v9 = vld [vmem:[%s5040_s3 + $0xb8] ss:$28 sps:$4 sm:$0xff]  }
 0x280   : > { %3087 = vmatpush3.bf16.msra.mxu1 %v1326_v8  ;;  %v1331_v51 = vpack.c.bf16 %v3853_v11, %v3855_v23  ;;  %v3857_v33 = vpop.eup %3856 }
 0x281   : > { %3088 = vmatprep.subr.bf16.mxu1 %v1333_v4  ;;  %v4613_v42 = vpop.f32.mrf.mxu1  ;;  %v3859_v55 = vpop.eup %3858 }
 0x282   : > { %v1330_v34 = vpack.c.bf16 %v3857_v33, %v3859_v55  ;;  %v3632_v55 = vld [vmem:[%s5040_s3 + $0x128] ss:$28 sps:$4 sm:$0xff]  }
 0x283   : > { %v2948_v17 = vpop.f32.mrf.mxu1 }
 0x284   : > { %3089 = vmatpush3.bf16.msra.mxu1 %v1325_v5 }
 0x285   : > { %3090 = vmatprep.subr.bf16.mxu1 %v1332_v21  ;;  %v2949_v30 = vpop.f32.mrf.mxu1  ;;  %v3631_v21 = vld [vmem:[%s5040_s3 + $0xf4] ss:$28 sps:$4 sm:$0xff]  }
 0x286   : > { %v4620_v0 = vadd.f32 %v2949_v30, %v2948_v17  ;;  %v3629_v30 = vld [vmem:[%s5040_s3 + $0xf0] ss:$28 sps:$4 sm:$0xff]  }
 0x287   : > { %v4622_v8 = vpop.f32.mrf.mxu1 }
 0x288   : > { %3091 = vmatpush3.bf16.msra.mxu1 %v1324_v7  ;;  %v3861_v7 = vpop.eup %3860 }
 0x289   : > { %3092 = vmatprep.subr.bf16.mxu1 %v1331_v51  ;;  %v4627_v44 = vpop.f32.mrf.mxu1  ;;  %v3634_v51 = vld [vmem:[%s5040_s3 + $0x12c] ss:$28 sps:$4 sm:$0xff]  }
 0x28a   : > { %v3863_v24 = vpop.eup %3862 }
 0x28b   : > { %v2954_v5 = vpop.f32.mrf.mxu1  ;;  %v1336_v6 = vpack.c.bf16 %v3863_v24, %v3861_v7  ;;  %v3643_v7 = vld [vmem:[%s5040_s3 + $0x1d4] ss:$28 sps:$4 sm:$0xff]  }
 0x28c   : > { %3093 = vmatpush3.bf16.msra.mxu1 %v1323_v53  ;;  %v3641_v24 = vld [vmem:[%s5040_s3 + $0x1d0] ss:$28 sps:$4 sm:$0xff]  }
 0x28d   : > { %3094 = vmatprep.subr.bf16.mxu1 %v1330_v34  ;;  %v2955_v61 = vpop.f32.mrf.mxu1  ;;  %v3637_v34 = vld [vmem:[%s5040_s3 + $0x164] ss:$28 sps:$4 sm:$0xff]  }
 0x28e   : > { %v4632_v58 = vadd.f32 %v2955_v61, %v2954_v5  ;;  %v3635_v5 = vld [vmem:[%s5040_s3 + $0x160] ss:$28 sps:$4 sm:$0xff]  }
 0x28f   : > { %v4634_v26 = vpop.f32.mrf.mxu1  ;;  %v3640_v61 = vld [vmem:[%s5040_s3 + $0x19c] ss:$28 sps:$4 sm:$0xff]  }
 0x290   : > { %3095 = vmatpush3.bf16.msra.mxu1 %v1322_v22 }
 0x291   : > { %3096 = vmatprep.subr.bf16.mxu1 %v1329_v41  ;;  %v4642_v31 = vpop.f32.mrf.mxu1 }
 0x293   : > { %v2960_v38 = vpop.f32.mrf.mxu1 }
 0x294   : > { %3097 = vmatpush3.bf16.msra.mxu1 %v1321_v36 }
 0x295   : > { %3098 = vmatprep.subr.bf16.mxu1 %v1328_v25  ;;  %v2961_v32 = vpop.f32.mrf.mxu1 }
 0x296   : > { %v4650_v28 = vadd.f32 %v2961_v32, %v2960_v38  ;;  %v3638_v38 = vld [vmem:[%s5040_s3 + $0x198] ss:$28 sps:$4 sm:$0xff]   ;;  %v3646_v32 = vld [vmem:[%s5040_s3 + $0x20c] ss:$28 sps:$4 sm:$0xff]  }
 0x297   : > { %v4655_v22 = vpop.f32.mrf.mxu1 }
 0x298   : > { %3099 = vmatpush3.bf16.msra.mxu1 %v1320_v14  ;;  %v3623_v14 = vld [vmem:[%s5040_s3 + $0x84] ss:$28 sps:$4 sm:$0xff]  }
 0x299   : > { %v4663_v36 = vpop.f32.mrf.mxu1  ;;  %3404 = vmatprep.subr.bf16.mxu1 %v3873_v1 }
 0x29b   : > { %2126 = vmatmul.mubr.bf16.vlgmr.msra.gmra.mxu1 %v3617_v13  ;;  %v2966_v53 = vpop.f32.mrf.mxu1 }
 0x29c   : > { %2133 = vmatprep.mubr.bf16.mxu1 %v3620_v2  ;;  %3405 = vmatpush3.bf16.msra.mxu1 %v1336_v6 }
 0x29d   : > { %v2967_v40 = vpop.f32.mrf.mxu1 }
 0x29e   : > { %v4666_v50 = vadd.f32 %v2967_v40, %v2966_v53  ;;  %v3644_v40 = vld [vmem:[%s5040_s3 + $0x208] ss:$28 sps:$4 sm:$0xff]  }
 0x29f   : > { %v4671_v56 = vpop.f32.mrf.mxu1 }
 0x2a1   : > { %v4676_v25 = vpop.f32.mrf.mxu1 }
 0x2a3   : > { %2134 = vmatmul.mubr.bf16.gmra.mxu1 %v3622_v49  ;;  %v2972_v57 = vpop.f32.mrf.mxu1  ;;  %v3649_v49 = vld [vmem:[%s5040_s3 + $0x244] ss:$28 sps:$4 sm:$0xff]  }
 0x2a4   : > { %2141 = vmatprep.mubr.bf16.mxu1 %v3623_v14 }
 0x2a5   : > { %v2973_v27 = vpop.f32.mrf.mxu1 }
 0x2a6   : > { %v4678_v41 = vadd.f32 %v2973_v27, %v2972_v57 }
 0x2a7   : > { %v4683_v19 = vpop.f32.mrf.mxu1 }
 0x2a9   : > { %v4688_v54 = vpop.f32.mrf.mxu1 }
 0x2ab   : > { %2142 = vmatmul.mubr.bf16.gmra.mxu1 %v3625_v15  ;;  %v2978_v46 = vpop.f32.mrf.mxu1 }
 0x2ac   : > { %2149 = vmatprep.mubr.bf16.mxu1 %v3628_v43 }
 0x2ad   : > { %v2979_v62 = vpop.f32.mrf.mxu1 }
 0x2ae   : > { %v4690_v4 = vadd.f32 %v2979_v62, %v2978_v46  ;;  %v3647_v62 = vld [vmem:[%s5040_s3 + $0x240] ss:$28 sps:$4 sm:$0xff]  }
 0x2af   : > { %v4695_v12 = vpop.f32.mrf.mxu1 }
 0x2b1   : > { %v4700_v17 = vpop.f32.mrf.mxu1 }
 0x2b3   : > { %2150 = vmatmul.mubr.bf16.gmra.mxu1 %v3626_v9  ;;  %v2984_v47 = vpop.f32.mrf.mxu1 }
 0x2b4   : > { %2157 = vmatprep.mubr.bf16.mxu1 %v3631_v21  ;;  %v3652_v21 = vld [vmem:[%s5040_s3 + $0x27c] ss:$28 sps:$4 sm:$0xff]  }
 0x2b5   : > { %v2985_v11 = vpop.f32.mrf.mxu1 }
 0x2b6   : > { %v4702_v29 = vadd.f32 %v2985_v11, %v2984_v47  ;;  %v2923_v11 = vadd.f32 %v4551_v48, %v4546_v10 }
 0x2b7   : > { %v2987_v23 = vpop.f32.mrf.mxu1 }
 0x2b9   : > { %v2988_v33 = vpop.f32.mrf.mxu1 }
 0x2bb   : > { %2158 = vmatmul.mubr.bf16.gmra.mxu1 %v3629_v30 }
 0x2bc   : > { %2165 = vmatprep.mubr.bf16.mxu1 %v3634_v51 }
 0x2c3   : > { %2166 = vmatmul.mubr.bf16.gmra.mxu1 %v3632_v55 }
 0x2c4   : > { %2173 = vmatprep.mubr.bf16.mxu1 %v3637_v34 }
 0x2cb   : > { %2174 = vmatmul.mubr.bf16.gmra.mxu1 %v3635_v5  ;;  %v3650_v5 = vld [vmem:[%s5040_s3 + $0x278] ss:$28 sps:$4 sm:$0xff]  }
 0x2cc   : > { %2181 = vmatprep.mubr.bf16.mxu1 %v3640_v61 }
 0x2d3   : > { %2182 = vmatmul.mubr.bf16.gmra.mxu1 %v3638_v38  ;;  %v2929_v38 = vadd.f32 %v4567_v3, %v4560_v63 }
 0x2d4   : > { %2189 = vmatprep.mubr.bf16.mxu1 %v3643_v7 }
 0x2db   : > { %v3006_v13 = vpop.f32.mrf.mxu1  ;;  %2190 = vmatmul.mubr.bf16.gmra.mxu1 %v3641_v24 }
 0x2dc   : > { %2197 = vmatprep.mubr.bf16.mxu1 %v3646_v32 }
 0x2dd   : > { %v3007_v2 = vpop.f32.mrf.mxu1 }
 0x2de   : > { %v4734_v6 = vadd.f32 %v3007_v2, %v3006_v13 }
 0x2df   : > { %v3009_v53 = vpop.f32.mrf.mxu1 }
 0x2e1   : > { %v3010_v14 = vpop.f32.mrf.mxu1 }
 0x2e2   : > { %v4742_v57 = vadd.f32 %v3010_v14, %v3009_v53  ;;  %v2935_v14 = vadd.f32 %v4584_v60, %v4580_v39  ;;  %v2941_v60 = vadd.f32 %v4601_v35, %v4594_v16  ;;  %v2947_v35 = vadd.f32 %v4613_v42, %v4608_v52 }
 0x2e3   : > { %v3012_v27 = vpop.f32.mrf.mxu1  ;;  %2198 = vmatmul.mubr.bf16.gmra.mxu1 %v3644_v40  ;;  %v2953_v42 = vadd.f32 %v4627_v44, %v4622_v8  ;;  %v2959_v44 = vadd.f32 %v4642_v31, %v4634_v26  ;;  %v2965_v31 = vadd.f32 %v4663_v36, %v4655_v22  ;;  %v2971_v36 = vadd.f32 %v4676_v25, %v4671_v56 }
 0x2e4   : > { %2205 = vmatprep.mubr.bf16.mxu1 %v3649_v49  ;;  %v2977_v25 = vadd.f32 %v4688_v54, %v4683_v19  ;;  %v2983_v54 = vadd.f32 %v4700_v17, %v4695_v12  ;;  %v3664_v17 = vld [vmem:[%s5040_s3 + $0x210] ss:$28 sps:$4 sm:$0xff]  }
 0x2e5   : > { %v3013_v15 = vpop.f32.mrf.mxu1 }
 0x2e6   : > { %v3014_v43 = vadd.f32 %v3013_v15, %v3012_v27 }
 0x2e7   : > { %v3015_v46 = vpop.f32.mrf.mxu1 }
 0x2e8   : > { %v4748_v9 = vadd.f32 %v3014_v43, %v4541_v18  ;;  %v1286_v18 = vld [vmem:[%s5040_s3 + $0x2b0] sm:$0xff] }
 0x2e9   : > { %v3016_v47 = vpop.f32.mrf.mxu1  ;;  %v2701_v10 = vcombine.high %v1286_v18, %v1286_v18  ;;  %v2700_v40 = vcombine.low %v1286_v18, %v1286_v18 }
 0x2ea   : > { %v3017_v30 = vadd.f32 %v3016_v47, %v3015_v46 }
 0x2eb   : > { %v3018_v23 = vpop.f32.mrf.mxu1  ;;  %2206 = vmatmul.mubr.bf16.gmra.mxu1 %v3647_v62 }
 0x2ec   : > { %v4755_v51 = vadd.f32 %v3017_v30, %v2923_v11  ;;  %2213 = vmatprep.mubr.bf16.mxu1 %v3652_v21 }
 0x2ed   : > { %v3019_v33 = vpop.f32.mrf.mxu1 }
 0x2ee   : > { %v3020_v55 = vadd.f32 %v3019_v33, %v3018_v23 }
 0x2ef   : > { %v3021_v34 = vpop.f32.mrf.mxu1 }
 0x2f0   : > { %v4764_v61 = vadd.f32 %v3020_v55, %v4555_v59 }
 0x2f1   : > { %v3022_v48 = vpop.f32.mrf.mxu1 }
 0x2f2   : > { %v3023_v7 = vadd.f32 %v3022_v48, %v3021_v34 }
 0x2f3   : > { %v3024_v24 = vpop.f32.mrf.mxu1  ;;  %2214 = vmatmul.mubr.bf16.gmra.mxu1 %v3650_v5 }
 0x2f4   : > { %v4768_v32 = vadd.f32 %v3023_v7, %v2929_v38  ;;  %2221 = vmatprep.mubr.bf16.mxu1 %v2701_v10 }
 0x2f5   : > { %v3025_v13 = vpop.f32.mrf.mxu1 }
 0x2f6   : > { %v3026_v2 = vadd.f32 %v3025_v13, %v3024_v24 }
 0x2f7   : > { %v3027_v53 = vpop.f32.mrf.mxu1 }
 0x2f8   : > { %v4771_v49 = vadd.f32 %v3026_v2, %v4574_v37  ;;  %v3655_v37 = vld [vmem:[%s5040_s3 + $0x18] ss:$28 sps:$4 sm:$0xff]  }
 0x2f9   : > { %v3028_v59 = vpop.f32.mrf.mxu1 }
 0x2fa   : > { %v3029_v27 = vadd.f32 %v3028_v59, %v3027_v53 }
 0x2fb   : > { %v3030_v15 = vpop.f32.mrf.mxu1  ;;  %2222 = vmatmul.mubr.bf16.gmra.mxu1 %v2700_v40 }
 0x2fc   : > { %v4775_v63 = vadd.f32 %v3029_v27, %v2935_v14  ;;  %3406 = vmatprep.mubr.msk.bf16.mxu1 %vm3874_vm0, %v3873_v1 }
 0x2fd   : > { %v3031_v3 = vpop.f32.mrf.mxu1 }
 0x2fe   : > { %v3032_v43 = vadd.f32 %v3031_v3, %v3030_v15 }
 0x2ff   : > { %v3033_v46 = vpop.f32.mrf.mxu1 }
 0x300   : > { %v4783_v62 = vadd.f32 %v3032_v43, %v4590_v20  ;;  %v3656_v20 = vld [vmem:[%s5040_s3 + $0x50] ss:$28 sps:$4 sm:$0xff]  }
 0x301   : > { %v3034_v39 = vpop.f32.mrf.mxu1 }
 0x302   : > { %v3035_v21 = vadd.f32 %v3034_v39, %v3033_v46 }
 0x303   : > { %v3036_v47 = vpop.f32.mrf.mxu1  ;;  %3407 = vmatmul.mubr.msk.bf16.vlgmr.msra.gmra.mxu1 %vm1781_vm1, %v3655_v37 }
 0x304   : > { %v4788_v11 = vadd.f32 %v3035_v21, %v2941_v60  ;;  %3410 = vmatprep.mubr.msk.bf16.mxu1 %vm3874_vm0, %v3873_v1 }
 0x305   : > { %v3037_v30 = vpop.f32.mrf.mxu1 }
 0x306   : > { %v3038_v23 = vadd.f32 %v3037_v30, %v3036_v47 }
 0x307   : > { %v3039_v33 = vpop.f32.mrf.mxu1 }
 0x308   : > { %v4796_v18 = vadd.f32 %v3038_v23, %v4606_v45  ;;  %v3657_v45 = vld [vmem:[%s5040_s3 + $0x88] ss:$28 sps:$4 sm:$0xff]  }
 0x309   : > { %v3040_v16 = vpop.f32.mrf.mxu1 }
 0x30a   : > { %v3041_v55 = vadd.f32 %v3040_v16, %v3039_v33 }
 0x30b   : > { %v3042_v34 = vpop.f32.mrf.mxu1  ;;  %3411 = vmatmul.mubr.msk.bf16.gmra.mxu1 %vm1781_vm1, %v3656_v20 }
 0x30c   : > { %v4801_v5 = vadd.f32 %v3041_v55, %v2947_v35  ;;  %3414 = vmatprep.mubr.msk.bf16.mxu1 %vm3874_vm0, %v3873_v1 }
 0x30d   : > { %v3043_v10 = vpop.f32.mrf.mxu1 }
 0x30e   : > { %v3044_v48 = vadd.f32 %v3043_v10, %v3042_v34 }
 0x30f   : > { %v3045_v38 = vpop.f32.mrf.mxu1 }
 0x310   : > { %v4809_v7 = vadd.f32 %v3044_v48, %v4620_v0  ;;  %v3658_v0 = vld [vmem:[%s5040_s3 + $0xc0] ss:$28 sps:$4 sm:$0xff]  }
 0x311   : > { %v3046_v52 = vpop.f32.mrf.mxu1 }
 0x312   : > { %v3047_v24 = vadd.f32 %v3046_v52, %v3045_v38 }
 0x313   : > { %v3048_v13 = vpop.f32.mrf.mxu1  ;;  %3415 = vmatmul.mubr.msk.bf16.gmra.mxu1 %vm1781_vm1, %v3657_v45 }
 0x314   : > { %v4814_v2 = vadd.f32 %v3047_v24, %v2953_v42  ;;  %3418 = vmatprep.mubr.msk.bf16.mxu1 %vm3874_vm0, %v3873_v1 }
 0x315   : > { %v3049_v53 = vpop.f32.mrf.mxu1 }
 0x316   : > { %v3050_v40 = vadd.f32 %v3049_v53, %v3048_v13 }
 0x317   : > { %v3051_v59 = vpop.f32.mrf.mxu1 }
 0x318   : > { %v4822_v14 = vadd.f32 %v3050_v40, %v4632_v58  ;;  %v3659_v58 = vld [vmem:[%s5040_s3 + $0xf8] ss:$28 sps:$4 sm:$0xff]  }
 0x319   : > { %v3052_v8 = vpop.f32.mrf.mxu1 }
 0x31a   : > { %v3053_v27 = vadd.f32 %v3052_v8, %v3051_v59 }
 0x31b   : > { %v3054_v15 = vpop.f32.mrf.mxu1  ;;  %3419 = vmatmul.mubr.msk.bf16.gmra.mxu1 %vm1781_vm1, %v3658_v0 }
 0x31c   : > { %v4827_v3 = vadd.f32 %v3053_v27, %v2959_v44  ;;  %3422 = vmatprep.mubr.msk.bf16.mxu1 %vm3874_vm0, %v3873_v1 }
 0x31d   : > { %v3055_v43 = vpop.f32.mrf.mxu1 }
 0x31e   : > { %v3056_v46 = vadd.f32 %v3055_v43, %v3054_v15 }
 0x31f   : > { %v3057_v37 = vpop.f32.mrf.mxu1 }
 0x320   : > { %v4835_v39 = vadd.f32 %v3056_v46, %v4650_v28  ;;  %v3660_v28 = vld [vmem:[%s5040_s3 + $0x130] ss:$28 sps:$4 sm:$0xff]   ;;  %v2912_v46 = vpop.f32.mrf.mxu0 }
 0x321   : > { %v3058_v26 = vpop.f32.mrf.mxu1 }
 0x322   : > { %v3059_v60 = vadd.f32 %v3058_v26, %v3057_v37  ;;  %v2913_v37 = vpop.f32.mrf.mxu0  ;;  %v3666_v26 = vld [vmem:[%s5040_s3 + $0x280] ss:$28 sps:$4 sm:$0xff]  }
 0x323   : > { %v3060_v21 = vpop.f32.mrf.mxu1  ;;  %3423 = vmatmul.mubr.msk.bf16.gmra.mxu1 %vm1781_vm1, %v3659_v58 }
 0x324   : > { %v4840_v47 = vadd.f32 %v3059_v60, %v2965_v31  ;;  %3426 = vmatprep.mubr.msk.bf16.mxu1 %vm3874_vm0, %v3873_v1  ;;  %v2915_v58 = vpop.f32.mrf.mxu0  ;;  %v2914_v31 = vadd.f32 %v2913_v37, %v2912_v46 }
 0x325   : > { %v3061_v30 = vpop.f32.mrf.mxu1 }
 0x326   : > { %v3062_v23 = vadd.f32 %v3061_v30, %v3060_v21  ;;  %v2916_v60 = vpop.f32.mrf.mxu0 }
 0x327   : > { %v3063_v33 = vpop.f32.mrf.mxu1 }
 0x328   : > { %v4848_v20 = vadd.f32 %v3062_v23, %v4666_v50  ;;  %v3661_v50 = vld [vmem:[%s5040_s3 + $0x168] ss:$28 sps:$4 sm:$0xff]   ;;  %v1992_v23 = vadd.f32 %v4734_v6, %v2914_v31 }
 0x329   : > { %v3064_v22 = vpop.f32.mrf.mxu1 }
 0x32a   : > { %v3065_v16 = vadd.f32 %v3064_v22, %v3063_v33  ;;  %v2917_v33 = vadd.f32 %v2916_v60, %v2915_v58 }
 0x32b   : > { %v3066_v35 = vpop.f32.mrf.mxu1  ;;  %3427 = vmatmul.mubr.msk.bf16.gmra.mxu1 %vm1781_vm1, %v3660_v28 }
 0x32c   : > { %v4853_v55 = vadd.f32 %v3065_v16, %v2971_v36  ;;  %3430 = vmatprep.mubr.msk.bf16.mxu1 %vm3874_vm0, %v3873_v1  ;;  %v3667_v36 = vld [vmem:[%s5040_s3 + $0x2b8] ss:$0 sps:$4 sm:$0xff]  }
 0x32d   : > { %v3067_v34 = vpop.f32.mrf.mxu1 }
 0x32e   : > { %v3068_v10 = vadd.f32 %v3067_v34, %v3066_v35  ;;  %v1995_v34 = vadd.f32 %v4742_v57, %v2917_v33 }
 0x32f   : > { %v3069_v48 = vpop.f32.mrf.mxu1 }
 0x330   : > { %v4861_v38 = vadd.f32 %v3068_v10, %v4678_v41  ;;  %v3662_v41 = vld [vmem:[%s5040_s3 + $0x1a0] ss:$28 sps:$4 sm:$0xff]  }
 0x331   : > { %v3070_v56 = vpop.f32.mrf.mxu1 }
 0x332   : > { %v3071_v45 = vadd.f32 %v3070_v56, %v3069_v48 }
 0x333   : > { %v3072_v52 = vpop.f32.mrf.mxu1  ;;  %3431 = vmatmul.mubr.msk.bf16.gmra.mxu1 %vm1781_vm1, %v3661_v50 }
 0x334   : > { %v4866_v42 = vadd.f32 %v3071_v45, %v2977_v25  ;;  %3434 = vmatprep.mubr.msk.bf16.mxu1 %vm3874_vm0, %v3873_v1 }
 0x335   : > { %v3073_v24 = vpop.f32.mrf.mxu1 }
 0x336   : > { %v3074_v13 = vadd.f32 %v3073_v24, %v3072_v52 }
 0x337   : > { %v3075_v53 = vpop.f32.mrf.mxu1 }
 0x338   : > { %v4874_v40 = vadd.f32 %v3074_v13, %v4690_v4  ;;  %v3663_v4 = vld [vmem:[%s5040_s3 + $0x1d8] ss:$28 sps:$4 sm:$0xff]  }
 0x339   : > { %v3076_v19 = vpop.f32.mrf.mxu1 }
 0x33a   : > { %v3077_v59 = vadd.f32 %v3076_v19, %v3075_v53 }
 0x33b   : > { %v3078_v0 = vpop.f32.mrf.mxu1  ;;  %3435 = vmatmul.mubr.msk.bf16.gmra.mxu1 %vm1781_vm1, %v3662_v41 }
 0x33c   : > { %v4879_v8 = vadd.f32 %v3077_v59, %v2983_v54  ;;  %3438 = vmatprep.mubr.msk.bf16.mxu1 %vm3874_vm0, %v3873_v1 }
 0x33d   : > { %v3079_v44 = vpop.f32.mrf.mxu1 }
 0x33e   : > { %v3080_v27 = vadd.f32 %v3079_v44, %v3078_v0 }
 0x33f   : > { %v3081_v15 = vpop.f32.mrf.mxu1 }
 0x340   : > { %v4887_v43 = vadd.f32 %v3080_v27, %v4702_v29  ;;  %v3665_v29 = vld [vmem:[%s5040_s3 + $0x248] ss:$28 sps:$4 sm:$0xff]  }
 0x341   : > { %v3082_v12 = vpop.f32.mrf.mxu1 }
 0x343   : > { %3439 = vmatmul.mubr.msk.bf16.gmra.mxu1 %vm1781_vm1, %v3663_v4 }
 0x344   : > { %3442 = vmatprep.mubr.msk.bf16.mxu1 %vm3874_vm0, %v3873_v1 }
 0x34b   : > { %3443 = vmatmul.mubr.msk.bf16.gmra.mxu1 %vm1781_vm1, %v3664_v17 }
 0x34c   : > { %3446 = vmatprep.mubr.msk.bf16.mxu1 %vm3874_vm0, %v3873_v1 }
 0x353   : > { %3447 = vmatmul.mubr.msk.bf16.gmra.mxu1 %vm1781_vm1, %v3665_v29 }
 0x354   : > { %3450 = vmatprep.mubr.msk.bf16.mxu1 %vm3874_vm0, %v3873_v1 }
 0x35b   : > { %v3100_v21 = vpop.f32.mrf.mxu1  ;;  %3451 = vmatmul.mubr.msk.bf16.gmra.mxu1 %vm1781_vm1, %v3666_v26 }
 0x35c   : > { %3454 = vmatprep.mubr.msk.bf16.mxu1 %vm3874_vm0, %v3873_v1 }
 0x35d   : > { %v3101_v30 = vpop.f32.mrf.mxu1 }
 0x35e   : > { %v3102_v28 = vadd.f32 %v3101_v30, %v3100_v21 }
 0x35f   : > { %v3103_v22 = vpop.f32.mrf.mxu1 }
 0x360   : > { %v4914_v16 = vadd.f32 %v3102_v28, %v1992_v23 }
 0x361   : > { %v3104_v35 = vpop.f32.mrf.mxu1 }
 0x362   : > { %v3105_v10 = vadd.f32 %v3104_v35, %v3103_v22 }
 0x363   : > { %v3106_v48 = vpop.f32.mrf.mxu1  ;;  %3455 = vmatmul.mubr.msk.bf16.gmra.mxu1 %vm1781_vm1, %v3667_v36 }
 0x364   : > { %v4918_v1 = vadd.f32 %v3105_v10, %v1995_v34 }
 0x365   : > { %v3107_v50 = vpop.f32.mrf.mxu1 }
 0x366   : > { %v3108_v6 = vadd.f32 %v3107_v50, %v3106_v48 }
 0x367   : > { %v3109_v56 = vpop.f32.mrf.mxu1 }
 0x368   : > { %v4921_v25 = vadd.f32 %v3108_v6, %v4748_v9 }
 0x369   : > { %v3110_v45 = vpop.f32.mrf.mxu1 }
 0x36a   : > { %v3111_v52 = vadd.f32 %v3110_v45, %v3109_v56 }
 0x36b   : > { %v3112_v24 = vpop.f32.mrf.mxu1 }
 0x36c   : > { %v4924_v13 = vadd.f32 %v3111_v52, %v4755_v51 }
 0x36d   : > { %v3113_v53 = vpop.f32.mrf.mxu1 }
 0x36e   : > { %v3114_v57 = vadd.f32 %v3113_v53, %v3112_v24 }
 0x36f   : > { %v3115_v41 = vpop.f32.mrf.mxu1 }
 0x370   : > { %v4927_v19 = vadd.f32 %v3114_v57, %v4764_v61 }
 0x371   : > { %v3116_v54 = vpop.f32.mrf.mxu1 }
 0x372   : > { %v3117_v59 = vadd.f32 %v3116_v54, %v3115_v41 }
 0x373   : > { %v3118_v0 = vpop.f32.mrf.mxu1 }
 0x374   : > { %v4930_v44 = vadd.f32 %v3117_v59, %v4768_v32 }
 0x375   : > { %v3119_v9 = vpop.f32.mrf.mxu1 }
 0x376   : > { %v3120_v27 = vadd.f32 %v3119_v9, %v3118_v0 }
 0x377   : > { %v3121_v4 = vpop.f32.mrf.mxu1 }
 0x378   : > { %v4933_v15 = vadd.f32 %v3120_v27, %v4771_v49 }
 0x379   : > { %v3122_v51 = vpop.f32.mrf.mxu1 }
 0x37a   : > { %v3123_v12 = vadd.f32 %v3122_v51, %v3121_v4 }
 0x37b   : > { %v3124_v17 = vpop.f32.mrf.mxu1 }
 0x37c   : > { %v4936_v46 = vadd.f32 %v3123_v12, %v4775_v63 }
 0x37d   : > { %v3125_v61 = vpop.f32.mrf.mxu1 }
 0x37e   : > { %v3126_v29 = vadd.f32 %v3125_v61, %v3124_v17 }
 0x37f   : > { %v3127_v37 = vpop.f32.mrf.mxu1 }
 0x380   : > { %v4939_v58 = vadd.f32 %v3126_v29, %v4783_v62 }
 0x381   : > { %v3128_v32 = vpop.f32.mrf.mxu1 }
 0x382   : > { %v3129_v26 = vadd.f32 %v3128_v32, %v3127_v37 }
 0x383   : > { %v3130_v31 = vpop.f32.mrf.mxu1 }
 0x384   : > { %v4942_v60 = vadd.f32 %v3129_v26, %v4788_v11 }
 0x385   : > { %v3131_v49 = vpop.f32.mrf.mxu1 }
 0x386   : > { %v3132_v21 = vadd.f32 %v3131_v49, %v3130_v31 }
 0x387   : > { %v3133_v30 = vpop.f32.mrf.mxu1 }
 0x388   : > { %v4945_v23 = vadd.f32 %v3132_v21, %v4796_v18 }
 0x389   : > { %v3134_v63 = vpop.f32.mrf.mxu1 }
 0x38a   : > { %v3135_v33 = vadd.f32 %v3134_v63, %v3133_v30 }
 0x38b   : > { %v3136_v28 = vpop.f32.mrf.mxu1 }
 0x38c   : > { %v4948_v22 = vadd.f32 %v3135_v33, %v4801_v5 }
 0x38d   : > { %v3137_v62 = vpop.f32.mrf.mxu1 }
 0x38e   : > { %v3138_v36 = vadd.f32 %v3137_v62, %v3136_v28 }
 0x38f   : > { %v3139_v35 = vpop.f32.mrf.mxu1 }
 0x390   : > { %v4951_v34 = vadd.f32 %v3138_v36, %v4809_v7 }
 0x391   : > { %v3140_v11 = vpop.f32.mrf.mxu1 }
 0x392   : > { %v3141_v10 = vadd.f32 %v3140_v11, %v3139_v35 }
 0x393   : > { %v3142_v48 = vpop.f32.mrf.mxu1 }
 0x394   : > { %v4954_v50 = vadd.f32 %v3141_v10, %v4814_v2 }
 0x395   : > { %v3143_v18 = vpop.f32.mrf.mxu1 }
 0x396   : > { %v3144_v6 = vadd.f32 %v3143_v18, %v3142_v48 }
 0x397   : > { %v3145_v56 = vpop.f32.mrf.mxu1 }
 0x398   : > { %v4957_v45 = vadd.f32 %v3144_v6, %v4822_v14 }
 0x399   : > { %v3146_v5 = vpop.f32.mrf.mxu1 }
 0x39a   : > { %v3147_v52 = vadd.f32 %v3146_v5, %v3145_v56 }
 0x39b   : > { %v3148_v24 = vpop.f32.mrf.mxu1 }
 0x39c   : > { %v4960_v53 = vadd.f32 %v3147_v52, %v4827_v3 }
 0x39d   : > { %v3149_v7 = vpop.f32.mrf.mxu1 }
 0x39e   : > { %v3150_v57 = vadd.f32 %v3149_v7, %v3148_v24 }
 0x39f   : > { %v3151_v41 = vpop.f32.mrf.mxu1 }
 0x3a0   : > { %v4963_v54 = vadd.f32 %v3150_v57, %v4835_v39 }
 0x3a1   : > { %v3152_v2 = vpop.f32.mrf.mxu1 }
 0x3a2   : > { %v3153_v59 = vadd.f32 %v3152_v2, %v3151_v41 }
 0x3a3   : > { %v3154_v0 = vpop.f32.mrf.mxu1 }
 0x3a4   : > { %v4966_v9 = vadd.f32 %v3153_v59, %v4840_v47 }
 0x3a5   : > { %v3155_v14 = vpop.f32.mrf.mxu1 }
 0x3a6   : > { %v3156_v27 = vadd.f32 %v3155_v14, %v3154_v0 }
 0x3a7   : > { %v3157_v4 = vpop.f32.mrf.mxu1 }
 0x3a8   : > { %v4969_v51 = vadd.f32 %v3156_v27, %v4848_v20 }
 0x3a9   : > { %v3158_v3 = vpop.f32.mrf.mxu1 }
 0x3aa   : > { %v3159_v12 = vadd.f32 %v3158_v3, %v3157_v4 }
 0x3ab   : > { %v3160_v17 = vpop.f32.mrf.mxu1 }
 0x3ac   : > { %v4972_v61 = vadd.f32 %v3159_v12, %v4853_v55 }
 0x3ad   : > { %v3161_v39 = vpop.f32.mrf.mxu1 }
 0x3ae   : > { %v3162_v29 = vadd.f32 %v3161_v39, %v3160_v17 }
 0x3af   : > { %v3163_v37 = vpop.f32.mrf.mxu1 }
 0x3b0   : > { %v4975_v32 = vadd.f32 %v3162_v29, %v4861_v38 }
 0x3b1   : > { %v3164_v47 = vpop.f32.mrf.mxu1 }
 0x3b2   : > { %v3165_v26 = vadd.f32 %v3164_v47, %v3163_v37 }
 0x3b3   : > { %v3166_v31 = vpop.f32.mrf.mxu1 }
 0x3b4   : > { %v4978_v49 = vadd.f32 %v3165_v26, %v4866_v42 }
 0x3b5   : > { %v3167_v20 = vpop.f32.mrf.mxu1 }
 0x3b6   : > { %v3168_v21 = vadd.f32 %v3167_v20, %v3166_v31 }
 0x3b7   : > { %v3169_v30 = vpop.f32.mrf.mxu1 }
 0x3b8   : > { %v4981_v63 = vadd.f32 %v3168_v21, %v4874_v40 }
 0x3b9   : > { %v3170_v55 = vpop.f32.mrf.mxu1 }
 0x3ba   : > { %v3171_v33 = vadd.f32 %v3170_v55, %v3169_v30 }
 0x3bb   : > { %v3172_v28 = vpop.f32.mrf.mxu1 }
 0x3bc   : > { %v4986_v38 = vadd.f32 %v3171_v33, %v4879_v8 }
 0x3bd   : > { %v3173_v62 = vpop.f32.mrf.mxu1 }
 0x3be   : > { %v3174_v36 = vadd.f32 %v3173_v62, %v3172_v28 }
 0x3bf   : > { %v3175_v35 = vpop.f32.mrf.mxu1 }
 0x3c0   : > { %v4989_v42 = vadd.f32 %v3174_v36, %v4887_v43 }
 0x3c1   : > { %v3176_v11 = vpop.f32.mrf.mxu1 }
 0x3c3   : > { %v2263_v10 = vpop.f32.mrf.mxu1 }
 0x3c4   : > { %v2264_v18 = vadd.f32 %v2263_v10, %v4914_v16 }
 0x3c5   : > { %v3408_v40 = vpop.f32.mrf.mxu1 }
 0x3c7   : > { %v2266_v48 = vpop.f32.mrf.mxu1 }
 0x3c8   : > { %v2267_v6 = vadd.f32 %v2266_v48, %v4918_v1 }
 0x3c9   : > { %v3409_v8 = vpop.f32.mrf.mxu1 }
 0x3ca   : > { %v2771_v43 = vpack.c.bf16 %v2267_v6, %v2264_v18 }
 0x3cb   : > { %v2271_v56 = vpop.f32.mrf.mxu1 }
 0x3cc   : > { %2772 = vst [vmem:[%s4996_s30] sm:$0xff] %v2771_v43   ;;  %v2272_v24 = vadd.f32 %v2271_v56, %v4921_v25 }
 0x3cd   : > { %v3412_v5 = vpop.f32.mrf.mxu1 }
 0x3cf   : > { %v2274_v52 = vpop.f32.mrf.mxu1 }
 0x3d0   : > { %v2275_v16 = vadd.f32 %v2274_v52, %v4924_v13 }
 0x3d1   : > { %v3413_v7 = vpop.f32.mrf.mxu1 }
 0x3d2   : > { %v2776_v1 = vpack.c.bf16 %v2275_v16, %v2272_v24 }
 0x3d3   : > { %v2279_v57 = vpop.f32.mrf.mxu1 }
 0x3d4   : > { %2828 = vst [vmem:[%s4996_s30 + $0x8] sm:$0xff] %v2776_v1   ;;  %v2280_v59 = vadd.f32 %v2279_v57, %v4927_v19 }
 0x3d5   : > { %v3416_v41 = vpop.f32.mrf.mxu1 }
 0x3d7   : > { %v2282_v2 = vpop.f32.mrf.mxu1 }
 0x3d8   : > { %v2283_v0 = vadd.f32 %v2282_v2, %v4930_v44 }
 0x3d9   : > { %v3417_v14 = vpop.f32.mrf.mxu1 }
 0x3da   : > { %v2781_v27 = vpack.c.bf16 %v2283_v0, %v2280_v59 }
 0x3db   : > { %v2287_v4 = vpop.f32.mrf.mxu1 }
 0x3dc   : > { %2829 = vst [vmem:[%s4996_s30 + $0x10] sm:$0xff] %v2781_v27   ;;  %v2288_v13 = vadd.f32 %v2287_v4, %v4933_v15 }
 0x3dd   : > { %v3420_v3 = vpop.f32.mrf.mxu1 }
 0x3df   : > { %v2290_v25 = vpop.f32.mrf.mxu1 }
 0x3e0   : > { %v2291_v12 = vadd.f32 %v2290_v25, %v4936_v46 }
 0x3e1   : > { %v3421_v17 = vpop.f32.mrf.mxu1 }
 0x3e2   : > { %v2786_v39 = vpack.c.bf16 %v2291_v12, %v2288_v13 }
 0x3e3   : > { %v2295_v29 = vpop.f32.mrf.mxu1 }
 0x3e4   : > { %2830 = vst [vmem:[%s4996_s30 + $0x18] sm:$0xff] %v2786_v39   ;;  %v2296_v44 = vadd.f32 %v2295_v29, %v4939_v58 }
 0x3e5   : > { %v3424_v37 = vpop.f32.mrf.mxu1 }
 0x3e7   : > { %v2298_v19 = vpop.f32.mrf.mxu1 }
 0x3e8   : > { %v2299_v47 = vadd.f32 %v2298_v19, %v4942_v60 }
 0x3e9   : > { %v3425_v26 = vpop.f32.mrf.mxu1 }
 0x3ea   : > { %v2791_v31 = vpack.c.bf16 %v2299_v47, %v2296_v44 }
 0x3eb   : > { %v2303_v20 = vpop.f32.mrf.mxu1 }
 0x3ec   : > { %2831 = vst [vmem:[%s4996_s30 + $0x20] sm:$0xff] %v2791_v31   ;;  %v2304_v46 = vadd.f32 %v2303_v20, %v4945_v23 }
 0x3ed   : > { %v3428_v21 = vpop.f32.mrf.mxu1 }
 0x3ef   : > { %v2306_v15 = vpop.f32.mrf.mxu1 }
 0x3f0   : > { %v2307_v30 = vadd.f32 %v2306_v15, %v4948_v22 }
 0x3f1   : > { %v3429_v55 = vpop.f32.mrf.mxu1 }
 0x3f2   : > { %v2796_v33 = vpack.c.bf16 %v2307_v30, %v2304_v46 }
 0x3f3   : > { %v2311_v28 = vpop.f32.mrf.mxu1 }
 0x3f4   : > { %2832 = vst [vmem:[%s4996_s30 + $0x28] sm:$0xff] %v2796_v33   ;;  %v2312_v60 = vadd.f32 %v2311_v28, %v4951_v34 }
 0x3f5   : > { %v3432_v62 = vpop.f32.mrf.mxu1 }
 0x3f7   : > { %v2314_v58 = vpop.f32.mrf.mxu1 }
 0x3f8   : > { %v2315_v36 = vadd.f32 %v2314_v58, %v4954_v50 }
 0x3f9   : > { %v3433_v35 = vpop.f32.mrf.mxu1 }
 0x3fa   : > { %v2801_v11 = vpack.c.bf16 %v2315_v36, %v2312_v60 }
 0x3fb   : > { %v2319_v10 = vpop.f32.mrf.mxu1 }
 0x3fc   : > { %2833 = vst [vmem:[%s4996_s30 + $0x30] sm:$0xff] %v2801_v11   ;;  %v2320_v22 = vadd.f32 %v2319_v10, %v4957_v45 }
 0x3fd   : > { %v3436_v40 = vpop.f32.mrf.mxu1 }
 0x3ff   : > { %v2322_v23 = vpop.f32.mrf.mxu1 }
 0x400   : > { %v2323_v48 = vadd.f32 %v2322_v23, %v4960_v53 }
 0x401   : > { %v3437_v18 = vpop.f32.mrf.mxu1 }
 0x402   : > { %v2806_v6 = vpack.c.bf16 %v2323_v48, %v2320_v22 }
 0x403   : > { %v2327_v8 = vpop.f32.mrf.mxu1 }
 0x404   : > { %2834 = vst [vmem:[%s4996_s30 + $0x38] sm:$0xff] %v2806_v6   ;;  %v2328_v50 = vadd.f32 %v2327_v8, %v4963_v54 }
 0x405   : > { %v3440_v43 = vpop.f32.mrf.mxu1 }
 0x407   : > { %v2330_v34 = vpop.f32.mrf.mxu1 }
 0x408   : > { %v2331_v56 = vadd.f32 %v2330_v34, %v4966_v9 }
 0x409   : > { %v3441_v5 = vpop.f32.mrf.mxu1 }
 0x40a   : > { %v2811_v52 = vpack.c.bf16 %v2331_v56, %v2328_v50 }
 0x40b   : > { %v2335_v24 = vpop.f32.mrf.mxu1 }
 0x40c   : > { %2835 = vst [vmem:[%s4996_s30 + $0x40] sm:$0xff] %v2811_v52   ;;  %v2336_v53 = vadd.f32 %v2335_v24, %v4969_v51 }
 0x40d   : > { %v3444_v16 = vpop.f32.mrf.mxu1 }
 0x40f   : > { %v2338_v45 = vpop.f32.mrf.mxu1 }
 0x410   : > { %v2339_v7 = vadd.f32 %v2338_v45, %v4972_v61 }
 0x411   : > { %v3445_v1 = vpop.f32.mrf.mxu1 }
 0x412   : > { %v2816_v57 = vpack.c.bf16 %v2339_v7, %v2336_v53 }
 0x413   : > { %v2343_v41 = vpop.f32.mrf.mxu1 }
 0x414   : > { %2836 = vst [vmem:[%s4996_s30 + $0x48] sm:$0xff] %v2816_v57   ;;  %v2344_v9 = vadd.f32 %v2343_v41, %v4975_v32 }
 0x415   : > { %v3448_v2 = vpop.f32.mrf.mxu1 }
 0x417   : > { %v2346_v54 = vpop.f32.mrf.mxu1 }
 0x418   : > { %v2347_v59 = vadd.f32 %v2346_v54, %v4978_v49 }
 0x419   : > { %v3449_v0 = vpop.f32.mrf.mxu1 }
 0x41a   : > { %v2821_v14 = vpack.c.bf16 %v2347_v59, %v2344_v9 }
 0x41b   : > { %v2351_v27 = vpop.f32.mrf.mxu1 }
 0x41c   : > { %2837 = vst [vmem:[%s4996_s30 + $0x50] sm:$0xff] %v2821_v14   ;;  %v2352_v61 = vadd.f32 %v2351_v27, %v4981_v63 }
 0x41d   : > { %v3452_v4 = vpop.f32.mrf.mxu1 }
 0x41f   : > { %v2354_v51 = vpop.f32.mrf.mxu1 }
 0x420   : > { %v2355_v3 = vadd.f32 %v2354_v51, %v4986_v38 }
 0x421   : > { %v3453_v25 = vpop.f32.mrf.mxu1 }
 0x422   : > { %v2826_v13 = vpack.c.bf16 %v2355_v3, %v2352_v61 }
 0x423   : > { %v2359_v12 = vpop.f32.mrf.mxu1 }
 0x424   : > { %2838 = vst [vmem:[%s4996_s30 + $0x58] sm:$0xff] %v2826_v13   ;;  %v2360_v17 = vadd.f32 %v2359_v12, %v4989_v42 }
 0x425   : > { %v3456_v32 = vpop.f32.mrf.mxu1 }
 0x426   : > { %v2767_v39 = vpack.c.bf16 %v2360_v17, %v2360_v17 }
 0x427   : > { %v2362_v49 = vpop.f32.mrf.mxu1 }
 0x428   : > { %2490 = vst [vmem:[%s4996_s30 + $0x60] sm:$0xf] %v2767_v39 }
 0x429   : > { %v3457_v29 = vpop.f32.mrf.mxu1 }
 0x42a PF: > { %s14_s15 = sadd.s32 1, %s3871_s15  }
 0x42b   : > { %p11_p5 = scmp.ge.s32.totalorder %s14_s15, 4  }
 0x42d   :  { %13 = sbr.rel (!%p11_p5) target bundleno = 1 (0x1), region = 66 }

// kernel: lenet5_forward.4
= control target key start
LH: loop header
LB: loop body
LE: loop exit
PB: predicated region body
PF: predicated region fallthrough
CT: control target
= control target key end

     0   :  { %s11990_s15 = smov 0   ;;  %s14512_s0 = inlined_call_operand.vmem [shape: bf16[400,128], index: 0, kind: input, shape index: {}]   ;;  %s14513_s1 = inlined_call_operand.vmem [shape: bf16[25,128,128], index: 1, kind: input, shape index: {}]   ;;  %s14514_s2 = inlined_call_operand.vmem [shape: f32[1,128], index: 2, kind: input, shape index: {}]   ;;  %s14515_s3 = inlined_call_operand.vmem [shape: bf16[32,140], index: 3, kind: input, shape index: {}]   ;;  %s14516_s4 = inlined_call_operand.vmem [shape: bf16[64,128], index: 4, kind: output, shape index: {}]  }
   0x1 LB: > { %s8876_s16 = sadd.s32 4294967295, %s11960_s15   ;;  %p8880_p0 = scmp.ge.s32.totalorder %s11960_s15, 1  ;;  %s11960_s15 = sphi %s11990_s15, %s14_s15  }
   0x2   : > { %p163_p1 = scmp.lt.s32.totalorder %s11960_s15, 3 }
   0x4   : > { %p164_p2 = pnand %p8880_p0, %p163_p1 }
   0x5   : > { %s189_s21 = smul.u32 (!%p164_p2), 25, %s8876_s16  ;;  %s8882_s14 = sshll.u32 (!%p164_p2), %s8876_s16, 2 }
   0x6   : > { %167 = sbr.rel (%p164_p2) target bundleno = 1394 (0x572), region = 36  ;;  %p196_p4 = scmp.lt.s32.totalorder (!%p164_p2), %s8882_s14, 7 }
   0x7   : > { %p190_p3 = scmp.lt.s32.totalorder (!%p164_p2), %s189_s21, 49 }
   0xb   : > { %v11480_v0 = vld [vmem:[%s14513_s1 + $0x38] sm:$0xff]   ;;  %v11962_v1 = vmov 0.0   ;;  %v11481_v2 = vld [vmem:[%s14513_s1 + $0x30] sm:$0xff]   ;;  %vm11963_vm0 = vmmov 0   ;;  %v11482_v3 = vld [vmem:[%s14513_s1 + $0x28] sm:$0xff]   ;;  %s14518_s21 = smov (!%p190_p3, %s189_s21), 49 }
   0xc   : > { %11453 = vmatprep.subr.bf16.mxu1 %v11962_v1  ;;  %219 = vst [vmem:[#allocation2 + $0x60] sm:$0xf] %v11962_v1  ;;  %10153 = vmatprep.subr.bf16.mxu0 %v11962_v1  ;;  %s8881_s24 = sshll.u32 %s14518_s21, 2  ;;  %v11483_v4 = vld [vmem:[%s14513_s1 + $0x20] sm:$0xff]   ;;  %v11484_v5 = vld [vmem:[%s14513_s1 + $0x18] sm:$0xff]   ;;  %v11485_v6 = vld [vmem:[%s14513_s1 + $0x10] sm:$0xff]  }
   0xd   : > { %11461 = vmatpush3.bf16.msra.mxu1 %v11480_v0  ;;  %10154 = vmatpush3.bf16.msra.mxu0 %v11480_v0  ;;  %s12023_s27 = scalar_lea.vmem %s14512_s0, %s8881_s24  ;;  %v11486_v7 = vld [vmem:[%s14513_s1 + $0x8] sm:$0xff]   ;;  %v11487_v8 = vld [vmem:[%s14513_s1] sm:$0xff]   ;;  %v11490_v11 = vld [vmem:[%s14513_s1 + $0x78] sm:$0xff]   ;;  %vm981_vm1 = vcmask 1046528   ;;  %vm613_vm2 = vsmask.f32 7424 }
   0xe   : > { %11454 = vmatprep.subr.bf16.mxu1 %v11962_v1  ;;  %10155 = vmatprep.subr.bf16.mxu0 %v11962_v1  ;;  %v11488_v9 = vld [vmem:[%s12023_s27 + $0x20] sm:$0xff]   ;;  %v11493_v12 = vld [vmem:[%s14513_s1 + $0xb8] sm:$0xff]   ;;  %v11492_v13 = vld [vmem:[%s14513_s1 + $0x70] sm:$0xff]   ;;  %vm1672_vm3 = vcmask 1045504   ;;  %vm1295_vm4 = vsmask.f32 6400 }
   0xf   : > { %10185 = vmatprep.mubr.msk.bf16.mxu1 %vm11963_vm0, %v11962_v1  ;;  %10169 = vmatprep.mubr.msk.bf16.mxu0 %vm11963_vm0, %v11962_v1  ;;  %v11491_v10 = vld [vmem:[%s12023_s27] sm:$0xff]   ;;  %v11496_v14 = vld [vmem:[%s14513_s1 + $0xb0] sm:$0xff]   ;;  %v11489_v15 = vld [vmem:[%s12023_s27 + $0x28] sm:$0xff]   ;;  %vm2310_vm5 = vsmask.f32 4352  ;;  %vm1990_vm6 = vcmask 1044480  }
  0x10   : > { %v11497_v16 = vld [vmem:[%s12023_s27 + $0x8] sm:$0xff]   ;;  %v11498_v19 = vld [vmem:[%s14513_s1 + $0x60] sm:$0xff]   ;;  %v11494_v21 = vld [vmem:[%s12023_s27 + $0x30] sm:$0xff]   ;;  %vm3989_vm7 = vsmask.f32 5376  ;;  %vm8740_vm8 = vcmask 97280  }
  0x11   : > { %11462 = vmatpush3.bf16.msra.mxu1 %v11481_v2  ;;  %10156 = vmatpush3.bf16.msra.mxu0 %v11481_v2  ;;  %v11495_v17 = vld [vmem:[%s14513_s1 + $0x68] sm:$0xff]   ;;  %v11502_v20 = vld [vmem:[%s14513_s1 + $0xa0] sm:$0xff]   ;;  %v11503_v22 = vld [vmem:[%s12023_s27 + $0x10] sm:$0xff]   ;;  %s14520_s14 = smov (!%p196_p4, %s8882_s14), 7 }
  0x12   : > { %11455 = vmatprep.subr.bf16.mxu1 %v11962_v1  ;;  %10157 = vmatprep.subr.bf16.mxu0 %v11962_v1  ;;  %v11499_v18 = vld [vmem:[%s14513_s1 + $0xa8] sm:$0xff]   ;;  %v11501_v23 = vld [vmem:[%s14513_s1 + $0x58] sm:$0xff]   ;;  %v11504_v25 = vld [vmem:[%s14513_s1 + $0x50] sm:$0xff]   ;;  %s8883_s17 = sshll.u32 %s14520_s14, 2 }
  0x13   : > { %v11505_v24 = vld [vmem:[%s14513_s1 + $0x98] sm:$0xff]   ;;  %v11508_v27 = vld [vmem:[%s14513_s1 + $0x90] sm:$0xff]   ;;  %v11507_v28 = vld [vmem:[%s14513_s1 + $0x48] sm:$0xff]   ;;  %s199_s20 = scalar_lea.vmem %s14516_s4, %s8883_s17 }
  0x14   : > { %v11500_v26 = vld [vmem:[%s12023_s27 + $0x38] sm:$0xff]   ;;  %v11511_v30 = vld [vmem:[%s14513_s1 + $0x88] sm:$0xff]   ;;  %v11512_v31 = vld [vmem:[%s12023_s27] sm:$0xff]  }
  0x15   : > { %11463 = vmatpush3.bf16.msra.mxu1 %v11482_v3  ;;  %10158 = vmatpush3.bf16.msra.mxu0 %v11482_v3  ;;  %v11509_v29 = vld [vmem:[%s12023_s27 + $0x18] sm:$0xff]   ;;  %v11516_v32 = vld [vmem:[%s12023_s27 + $0x8] sm:$0xff]   ;;  %v11515_v33 = vld [vmem:[%s12023_s27] sm:$0xfe]   ;;  %v617_v36 = vshll.u32 %v11512_v31, 16  ;;  %v615_v41 = vshrl.u32 %v11512_v31, 16 }
  0x16   : > { %11456 = vmatprep.subr.bf16.mxu1 %v11962_v1  ;;  %10159 = vmatprep.subr.bf16.mxu0 %v11962_v1  ;;  %v11510_v34 = vld [vmem:[%s14513_s1 + $0x40] sm:$0xff]   ;;  %v11513_v35 = vld [vmem:[%s12023_s27 + $0x8] sm:$0xff]   ;;  %v982_v38 = vrot.slane %v11515_v33, 1  ;;  %v983_v39 = vrot.slane %v11516_v32, 1  ;;  %v11518_v44 = vld [vmem:[%s12023_s27 + $0x10] sm:$0xff]  }
  0x17   : > { %v11514_v37 = vld [vmem:[%s14513_s1 + $0x80] sm:$0xff]   ;;  %v622_v42 = vshll.u32 %v11513_v35, 16  ;;  %v619_v43 = vrot.slane %v617_v36, 1  ;;  %v11529_v46 = vld [vmem:[%s14513_s1 + $0x138] sm:$0xff]   ;;  %v11517_v49 = vld [vmem:[%s12023_s27 + $0x10] sm:$0xff]   ;;  %v985_v50 = vrot.slane %v11518_v44, 1 }
  0x18   : > { %v11506_v40 = vld [vmem:[%s12023_s27 + $0x40] sm:$0x3f]   ;;  %v984_v45 = vsel %vm981_vm1, %v982_v38, %v983_v39  ;;  %v11532_v51 = vld [vmem:[%s14513_s1 + $0x130] sm:$0xff]   ;;  %v626_v53 = vshrl.u32 %v11513_v35, 16  ;;  %v630_v54 = vshll.u32 %v11517_v49, 16  ;;  %v11520_v55 = vld [vmem:[%s12023_s27 + $0x18] sm:$0xff]  }
  0x19   : > { %11464 = vmatpush3.bf16.msra.mxu1 %v11483_v4  ;;  %10160 = vmatpush3.bf16.msra.mxu0 %v11483_v4  ;;  %v620_v47 = vor.u32 %v619_v43, %v615_v41  ;;  %v624_v48 = vrot.slane %v622_v42, 1  ;;  %v986_v56 = vsel %vm981_vm1, %v983_v39, %v985_v50  ;;  %v11525_v57 = vld [vmem:[%s14513_s1 + $0xf8] sm:$0xff]   ;;  %v11535_v58 = vld [vmem:[%s14513_s1 + $0x128] sm:$0xff]   ;;  %v987_v62 = vrot.slane %v11520_v55, 1  ;;  %v11528_v63 = vld [vmem:[%s14513_s1 + $0xf0] sm:$0xff]  }
  0x1a   : > { %11457 = vmatprep.subr.bf16.mxu1 %v11962_v1  ;;  %10161 = vmatprep.subr.bf16.mxu0 %v11962_v1  ;;  %v632_v60 = vrot.slane %v630_v54, 1  ;;  %v11519_v61 = vld [vmem:[%s12023_s27 + $0x18] sm:$0xff]   ;;  %v11538_v0 = vld [vmem:[%s14513_s1 + $0x120] sm:$0xff]   ;;  %v634_v2 = vshrl.u32 %v11517_v49, 16  ;;  %v11542_v33 = vld [vmem:[%s14513_s1 + $0xc8] sm:$0xff]  }
  0x1b   : > { %v625_v52 = vsel %vm613_vm2, %v620_v47, %v624_v48  ;;  %v628_v59 = vor.u32 %v626_v53, %v624_v48  ;;  %v638_v4 = vshll.u32 %v11519_v61, 16  ;;  %v11544_v38 = vld [vmem:[%s14513_s1 + $0xc0] sm:$0xff]   ;;  %v11533_v43 = vld [vmem:[%s12023_s27 + $0x38] sm:$0xff]  }
  0x1c   : > { %v995_v47 = vrot.slane %v11533_v43, 1  ;;  %v11536_v55 = vld [vmem:[%s12023_s27 + $0x40] sm:$0x7f]  }
  0x1d   : > { %11465 = vmatpush3.bf16.msra.mxu1 %v11484_v5  ;;  %10162 = vmatpush3.bf16.msra.mxu0 %v11484_v5  ;;  %v633_v3 = vsel %vm613_vm2, %v628_v59, %v632_v60  ;;  %v11522_v5 = vld [vmem:[%s12023_s27 + $0x20] sm:$0xff]   ;;  %v678_v59 = vshll.u32 %v11536_v55, 16 }
  0x1e   : > { %11458 = vmatprep.subr.bf16.mxu1 %v11962_v1  ;;  %10163 = vmatprep.subr.bf16.mxu0 %v11962_v1  ;;  %v11556_v43 = vld [vmem:[%s12023_s27 + $0x20] sm:$0xff]  }
  0x21   : > { %11466 = vmatpush3.bf16.msra.mxu1 %v11485_v6  ;;  %10164 = vmatpush3.bf16.msra.mxu0 %v11485_v6  ;;  %v988_v6 = vsel %vm981_vm1, %v985_v50, %v987_v62 }
  0x22   : > { %11459 = vmatprep.subr.bf16.mxu1 %v11962_v1  ;;  %10165 = vmatprep.subr.bf16.mxu0 %v11962_v1 }
  0x25   : > { %11467 = vmatpush3.bf16.msra.mxu1 %v11486_v7  ;;  %10166 = vmatpush3.bf16.msra.mxu0 %v11486_v7  ;;  %v11531_v7 = vld [vmem:[%s14513_s1 + $0xe8] sm:$0xff]  }
  0x26   : > { %11460 = vmatprep.subr.bf16.mxu1 %v11962_v1  ;;  %10167 = vmatprep.subr.bf16.mxu0 %v11962_v1 }
  0x29   : > { %11468 = vmatpush3.bf16.msra.mxu1 %v11487_v8  ;;  %10168 = vmatpush3.bf16.msra.mxu0 %v11487_v8  ;;  %v11541_v8 = vld [vmem:[%s14513_s1 + $0x118] sm:$0xff]  }
  0x2a   : > { %10205 = vmatprep.subr.bf16.mxu1 %v11962_v1  ;;  %10257 = vmatprep.subr.bf16.mxu0 %v11962_v1 }
  0x2c   : > { %10186 = vmatmul.mubr.bf16.vlgmr.msra.gmra.mxu1 %v11488_v9  ;;  %10170 = vmatmul.mubr.bf16.vlgmr.msra.gmra.mxu0 %v11491_v10  ;;  %v11521_v9 = vld [vmem:[%s12023_s27 + $0x20] sm:$0xff]   ;;  %v636_v10 = vor.u32 %v634_v2, %v632_v60 }
  0x2d   : > { %10189 = vmatprep.mubr.msk.bf16.mxu1 %vm11963_vm0, %v11962_v1  ;;  %10206 = vmatpush3.bf16.msra.mxu1 %v11490_v11  ;;  %v640_v11 = vrot.slane %v638_v4, 1  ;;  %v682_v4 = vshrl.u32 %v11536_v55, 16  ;;  %v11558_v55 = vld [vmem:[%s12023_s27 + $0x28] sm:$0xff]  }
  0x2e   : > { %10207 = vmatprep.subr.bf16.mxu1 %v11962_v1  ;;  %10258 = vmatpush3.bf16.msra.mxu0 %v11493_v12  ;;  %v989_v12 = vrot.slane %v11522_v5, 1  ;;  %v11550_v5 = vld [vmem:[%s12023_s27 + $0x8] sm:$0xff]  }
  0x2f   : > { %10259 = vmatprep.subr.bf16.mxu0 %v11962_v1  ;;  %10173 = vmatprep.mubr.msk.bf16.mxu0 %vm11963_vm0, %v11962_v1 }
  0x31   : > { %10208 = vmatpush3.bf16.msra.mxu1 %v11492_v13  ;;  %v11534_v13 = vld [vmem:[%s14513_s1 + $0xe0] sm:$0xff]  }
  0x32   : > { %10209 = vmatprep.subr.bf16.mxu1 %v11962_v1  ;;  %10260 = vmatpush3.bf16.msra.mxu0 %v11496_v14  ;;  %v11543_v14 = vld [vmem:[%s14513_s1 + $0x110] sm:$0xff]  }
  0x33   : > { %10261 = vmatprep.subr.bf16.mxu0 %v11962_v1 }
  0x34   : > { %10190 = vmatmul.mubr.bf16.gmra.mxu1 %v11489_v15  ;;  %10174 = vmatmul.mubr.bf16.gmra.mxu0 %v11497_v16  ;;  %v646_v15 = vshll.u32 %v11521_v9, 16  ;;  %v641_v16 = vsel %vm613_vm2, %v636_v10, %v640_v11 }
  0x35   : > { %10193 = vmatprep.mubr.msk.bf16.mxu1 %vm11963_vm0, %v11962_v1  ;;  %10210 = vmatpush3.bf16.msra.mxu1 %v11495_v17  ;;  %v642_v17 = vshrl.u32 %v11519_v61, 16 }
  0x36   : > { %10211 = vmatprep.subr.bf16.mxu1 %v11962_v1  ;;  %10262 = vmatpush3.bf16.msra.mxu0 %v11499_v18  ;;  %v11524_v18 = vld [vmem:[%s12023_s27 + $0x28] sm:$0xff]  }
  0x37   : > { %10263 = vmatprep.subr.bf16.mxu0 %v11962_v1  ;;  %10177 = vmatprep.mubr.msk.bf16.mxu0 %vm11963_vm0, %v11962_v1 }
  0x39   : > { %10212 = vmatpush3.bf16.msra.mxu1 %v11498_v19  ;;  %v990_v19 = vsel %vm981_vm1, %v987_v62, %v989_v12  ;;  %v680_v62 = vrot.slane %v678_v59, 1 }
  0x3a   : > { %10213 = vmatprep.subr.bf16.mxu1 %v11962_v1  ;;  %10264 = vmatpush3.bf16.msra.mxu0 %v11502_v20  ;;  %v11537_v20 = vld [vmem:[%s14513_s1 + $0xd8] sm:$0xff]  }
  0x3b   : > { %10265 = vmatprep.subr.bf16.mxu0 %v11962_v1 }
  0x3c   : > { %10194 = vmatmul.mubr.bf16.gmra.mxu1 %v11494_v21  ;;  %10178 = vmatmul.mubr.bf16.gmra.mxu0 %v11503_v22  ;;  %v11545_v21 = vld [vmem:[%s14513_s1 + $0x108] sm:$0xff]   ;;  %v648_v22 = vrot.slane %v646_v15, 1 }
  0x3d   : > { %10197 = vmatprep.mubr.msk.bf16.mxu1 %vm11963_vm0, %v11962_v1  ;;  %10214 = vmatpush3.bf16.msra.mxu1 %v11501_v23  ;;  %v11523_v23 = vld [vmem:[%s12023_s27 + $0x28] sm:$0xff]  }
  0x3e   : > { %10215 = vmatprep.subr.bf16.mxu1 %v11962_v1  ;;  %10266 = vmatpush3.bf16.msra.mxu0 %v11505_v24  ;;  %v644_v24 = vor.u32 %v642_v17, %v640_v11  ;;  %v658_v41 = vshrl.u32 %v11523_v23, 16  ;;  %v1674_v11 = vrot.slane %v11550_v5, 2 }
  0x3f   : > { %10267 = vmatprep.subr.bf16.mxu0 %v11962_v1  ;;  %10181 = vmatprep.mubr.msk.bf16.mxu0 %vm11963_vm0, %v11962_v1 }
  0x40   : > { %v649_v31 = vsel %vm613_vm2, %v644_v24, %v648_v22 }
  0x41   : > { %10216 = vmatpush3.bf16.msra.mxu1 %v11504_v25  ;;  %v991_v25 = vrot.slane %v11524_v18, 1  ;;  %v11552_v18 = vld [vmem:[%s12023_s27 + $0x10] sm:$0xff]  }
  0x42   : > { %10217 = vmatprep.subr.bf16.mxu1 %v11962_v1  ;;  %10268 = vmatpush3.bf16.msra.mxu0 %v11508_v27  ;;  %v11548_v27 = vld [vmem:[%s14513_s1 + $0x100] sm:$0xff]  }
  0x43   : > { %10269 = vmatprep.subr.bf16.mxu0 %v11962_v1  ;;  %v992_v32 = vsel %vm981_vm1, %v989_v12, %v991_v25  ;;  %v11551_v12 = vld [vmem:[%s12023_s27 + $0x10] sm:$0xff]  }
  0x44   : > { %10198 = vmatmul.mubr.bf16.gmra.mxu1 %v11500_v26  ;;  %10182 = vmatmul.mubr.bf16.gmra.mxu0 %v11509_v29  ;;  %v11540_v26 = vld [vmem:[%s14513_s1 + $0xd0] sm:$0xff]   ;;  %v654_v29 = vshll.u32 %v11523_v23, 16 }
  0x45   : > { %10201 = vmatprep.mubr.msk.bf16.mxu1 %vm11963_vm0, %v11962_v1  ;;  %10218 = vmatpush3.bf16.msra.mxu1 %v11507_v28  ;;  %v650_v28 = vshrl.u32 %v11521_v9, 16 }
  0x46   : > { %10219 = vmatprep.subr.bf16.mxu1 %v11962_v1  ;;  %10270 = vmatpush3.bf16.msra.mxu0 %v11511_v30  ;;  %v11527_v30 = vld [vmem:[%s12023_s27 + $0x30] sm:$0xff]   ;;  %v656_v36 = vrot.slane %v654_v29, 1 }
  0x47   : > { %10271 = vmatprep.subr.bf16.mxu0 %v11962_v1  ;;  %10273 = vmatprep.mubr.msk.bf16.mxu0 %vm11963_vm0, %v11962_v1  ;;  %v652_v35 = vor.u32 %v650_v28, %v648_v22  ;;  %v1317_v22 = vshll.u32 %v11551_v12, 16 }
  0x49   : > { %10220 = vmatpush3.bf16.msra.mxu1 %v11510_v34  ;;  %v11526_v34 = vld [vmem:[%s12023_s27 + $0x30] sm:$0xff]  }
  0x4a   : > { %10272 = vmatpush3.bf16.msra.mxu0 %v11514_v37  ;;  %10309 = vmatprep.subr.bf16.mxu1 %v11962_v1  ;;  %v993_v37 = vrot.slane %v11527_v30, 1  ;;  %v662_v39 = vshll.u32 %v11526_v34, 16  ;;  %v666_v50 = vshrl.u32 %v11526_v34, 16  ;;  %v1319_v30 = vrot.slane %v1317_v22, 2 }
  0x4b   : > { %10361 = vmatprep.subr.bf16.mxu0 %v11962_v1 }
  0x4c   : > { %10202 = vmatmul.mubr.bf16.gmra.mxu1 %v11506_v40  ;;  %v657_v40 = vsel %vm613_vm2, %v652_v35, %v656_v36  ;;  %v994_v42 = vsel %vm981_vm1, %v991_v25, %v993_v37  ;;  %v664_v44 = vrot.slane %v662_v39, 1  ;;  %v1676_v25 = vrot.slane %v11552_v18, 2  ;;  %v11562_v39 = vld [vmem:[%s14513_s1 + $0x170] sm:$0xff]  }
  0x4d   : > { %10221 = vmatprep.mubr.msk.bf16.mxu1 %vm11963_vm0, %v11962_v1  ;;  %10274 = vmatmul.mubr.bf16.vlgmr.msra.gmra.mxu0 %v984_v45  ;;  %v11530_v45 = vld [vmem:[%s12023_s27 + $0x38] sm:$0xff]  }
  0x4e   : > { %10277 = vmatprep.mubr.msk.bf16.mxu0 %vm11963_vm0, %v11962_v1  ;;  %10362 = vmatpush3.bf16.msra.mxu0 %v11529_v46  ;;  %v660_v46 = vor.u32 %v658_v41, %v656_v36  ;;  %v670_v48 = vshll.u32 %v11530_v45, 16  ;;  %v668_v54 = vor.u32 %v666_v50, %v664_v44  ;;  %v11569_v36 = vld [vmem:[%s14513_s1 + $0x1a8] sm:$0xff]   ;;  %v11572_v41 = vld [vmem:[%s14513_s1 + $0x1a0] sm:$0xff]   ;;  %v11575_v50 = vld [vmem:[%s14513_s1 + $0x198] sm:$0xff]  }
  0x4f   : > { %10363 = vmatprep.subr.bf16.mxu0 %v11962_v1 }
  0x50   : > { %v665_v49 = vsel %vm613_vm2, %v660_v46, %v664_v44  ;;  %v672_v53 = vrot.slane %v670_v48, 1  ;;  %v11565_v46 = vld [vmem:[%s14513_s1 + $0x168] sm:$0xff]  }
  0x52   : > { %10364 = vmatpush3.bf16.msra.mxu0 %v11532_v51  ;;  %v996_v51 = vsel %vm981_vm1, %v993_v37, %v995_v47 }
  0x53   : > { %10365 = vmatprep.subr.bf16.mxu0 %v11962_v1 }
  0x54   : > { %10222 = vmatmul.mubr.bf16.vlgmr.msra.gmra.mxu1 %v625_v52  ;;  %v11539_v52 = vld [vmem:[%s12023_s27 + $0x40] sm:$0x7f]  }
  0x55   : > { %10225 = vmatprep.mubr.msk.bf16.mxu1 %vm11963_vm0, %v11962_v1  ;;  %10278 = vmatmul.mubr.bf16.gmra.mxu0 %v986_v56  ;;  %v997_v56 = vrot.slane %v11539_v52, 1  ;;  %v11568_v52 = vld [vmem:[%s14513_s1 + $0x160] sm:$0xff]  }
  0x56   : > { %10281 = vmatprep.mubr.msk.bf16.mxu0 %vm11963_vm0, %v11962_v1  ;;  %10310 = vmatpush3.bf16.msra.mxu1 %v11525_v57  ;;  %v673_v57 = vsel %vm613_vm2, %v668_v54, %v672_v53  ;;  %v1680_v54 = vrot.slane %v11556_v43, 2 }
  0x57   : > { %10311 = vmatprep.subr.bf16.mxu1 %v11962_v1  ;;  %10366 = vmatpush3.bf16.msra.mxu0 %v11535_v58  ;;  %v674_v58 = vshrl.u32 %v11530_v45, 16  ;;  %v998_v60 = vsel %vm981_vm1, %v995_v47, %v997_v56 }
  0x58   : > { %10367 = vmatprep.subr.bf16.mxu0 %v11962_v1 }
  0x59   : > { %v676_v61 = vor.u32 %v674_v58, %v672_v53 }
  0x5a   : > { %10312 = vmatpush3.bf16.msra.mxu1 %v11528_v63  ;;  %v11546_v63 = vld [vmem:[%s12023_s27] sm:$0xfe]  }
  0x5b   : > { %10313 = vmatprep.subr.bf16.mxu1 %v11962_v1  ;;  %10368 = vmatpush3.bf16.msra.mxu0 %v11538_v0  ;;  %v11547_v0 = vld [vmem:[%s12023_s27 + $0x8] sm:$0xff]   ;;  %v681_v2 = vsel %vm613_vm2, %v676_v61, %v680_v62 }
  0x5c   : > { %10226 = vmatmul.mubr.bf16.gmra.mxu1 %v633_v3  ;;  %10369 = vmatprep.subr.bf16.mxu0 %v11962_v1  ;;  %v11549_v3 = vld [vmem:[%s12023_s27] sm:$0xfc]   ;;  %v1308_v9 = vshll.u32 %v11547_v0, 16 }
  0x5d   : > { %10229 = vmatprep.mubr.msk.bf16.mxu1 %vm11963_vm0, %v11962_v1  ;;  %10282 = vmatmul.mubr.bf16.gmra.mxu0 %v988_v6  ;;  %v1297_v6 = vshrl.u32 %v11546_v63, 16  ;;  %v1673_v10 = vrot.slane %v11549_v3, 2  ;;  %v11579_v3 = vld [vmem:[%s14513_s1 + $0x188] sm:$0xff]  }
  0x5e   : > { %10285 = vmatprep.mubr.msk.bf16.mxu0 %vm11963_vm0, %v11962_v1  ;;  %10314 = vmatpush3.bf16.msra.mxu1 %v11531_v7  ;;  %v1300_v7 = vshll.u32 %v11546_v63, 16  ;;  %v1310_v17 = vrot.slane %v1308_v9, 2  ;;  %v11571_v63 = vld [vmem:[%s14513_s1 + $0x158] sm:$0xff]  }
  0x5f   : > { %10315 = vmatprep.subr.bf16.mxu1 %v11962_v1  ;;  %10370 = vmatpush3.bf16.msra.mxu0 %v11541_v8  ;;  %v1305_v8 = vshrl.u32 %v11547_v0, 16  ;;  %v1682_v0 = vrot.slane %v11558_v55, 2  ;;  %v11580_v55 = vld [vmem:[%s12023_s27 + $0x4] sm:$0xf8]  }
  0x60   : > { %10371 = vmatprep.subr.bf16.mxu0 %v11962_v1  ;;  %v1302_v15 = vrot.slane %v1300_v7, 2  ;;  %v11561_v7 = vld [vmem:[%s12023_s27 + $0x30] sm:$0xff]  }
  0x62   : > { %10316 = vmatpush3.bf16.msra.mxu1 %v11534_v13  ;;  %v684_v13 = vor.u32 %v682_v4, %v680_v62  ;;  %v11574_v4 = vld [vmem:[%s14513_s1 + $0x150] sm:$0xff]  }
  0x63   : > { %10317 = vmatprep.subr.bf16.mxu1 %v11962_v1  ;;  %10372 = vmatpush3.bf16.msra.mxu0 %v11543_v14  ;;  %v1299_v14 = vrot.slane %v1297_v6, 1 }
  0x64   : > { %10230 = vmatmul.mubr.bf16.gmra.mxu1 %v641_v16  ;;  %10373 = vmatprep.subr.bf16.mxu0 %v11962_v1  ;;  %v1307_v16 = vrot.slane %v1305_v8, 1  ;;  %v11582_v8 = vld [vmem:[%s14513_s1 + $0x180] sm:$0xff]  }
  0x65   : > { %10233 = vmatprep.mubr.msk.bf16.mxu1 %vm11963_vm0, %v11962_v1  ;;  %10286 = vmatmul.mubr.bf16.gmra.mxu0 %v990_v19  ;;  %v11563_v19 = vld [vmem:[%s14513_s1 + $0x1b8] sm:$0xff]   ;;  %v1303_v23 = vor.u32 %v1302_v15, %v1299_v14  ;;  %v1684_v15 = vrot.slane %v11561_v7, 2  ;;  %v11600_v7 = vld [vmem:[%s14513_s1 + $0x230] sm:$0xff]  }
  0x66   : > { %10289 = vmatprep.mubr.msk.bf16.mxu0 %vm11963_vm0, %v11962_v1  ;;  %10318 = vmatpush3.bf16.msra.mxu1 %v11537_v20  ;;  %v1675_v20 = vsel %vm1672_vm3, %v1673_v10, %v1674_v11  ;;  %v1311_v24 = vor.u32 %v1310_v17, %v1307_v16  ;;  %v11564_v16 = vld [vmem:[%s12023_s27 + $0x38] sm:$0xff]  }
  0x67   : > { %10319 = vmatprep.subr.bf16.mxu1 %v11962_v1  ;;  %10374 = vmatpush3.bf16.msra.mxu0 %v11545_v21  ;;  %v1314_v21 = vshrl.u32 %v11551_v12, 16  ;;  %v1683_v12 = vsel %vm1672_vm3, %v1680_v54, %v1682_v0 }
  0x68   : > { %10375 = vmatprep.subr.bf16.mxu0 %v11962_v1  ;;  %v1312_v28 = vsel %vm1295_vm4, %v1303_v23, %v1311_v24  ;;  %v11570_v23 = vld [vmem:[%s12023_s27 + $0x40] sm:$0xff]  }
  0x69   : > { %v1316_v29 = vrot.slane %v1314_v21, 1 }
  0x6a   : > { %10320 = vmatpush3.bf16.msra.mxu1 %v11540_v26  ;;  %v11566_v26 = vld [vmem:[%s14513_s1 + $0x1b0] sm:$0xff]  }
  0x6b   : > { %10321 = vmatprep.subr.bf16.mxu1 %v11962_v1  ;;  %10376 = vmatpush3.bf16.msra.mxu0 %v11548_v27  ;;  %v11553_v27 = vld [vmem:[%s12023_s27 + $0x18] sm:$0xff]   ;;  %v1320_v37 = vor.u32 %v1319_v30, %v1316_v29  ;;  %v1368_v29 = vshrl.u32 %v11570_v23, 16  ;;  %v11573_v30 = vld [vmem:[%s12023_s27 + $0x40] sm:$0xff]  }
  0x6c   : > { %10234 = vmatmul.mubr.bf16.gmra.mxu1 %v649_v31  ;;  %10465 = vmatprep.subr.bf16.mxu0 %v11962_v1  ;;  %v11554_v31 = vld [vmem:[%s12023_s27 + $0x18] sm:$0xff]   ;;  %v1323_v34 = vshrl.u32 %v11553_v27, 16  ;;  %v1326_v35 = vshll.u32 %v11553_v27, 16 }
  0x6d   : > { %10237 = vmatprep.mubr.msk.bf16.mxu1 %vm11963_vm0, %v11962_v1  ;;  %10290 = vmatmul.mubr.bf16.gmra.mxu0 %v992_v32  ;;  %v11559_v32 = vld [vmem:[%s14513_s1 + $0x178] sm:$0xff]   ;;  %v1321_v44 = vsel %vm1295_vm4, %v1311_v24, %v1320_v37  ;;  %v1685_v24 = vsel %vm1672_vm3, %v1682_v0, %v1684_v15 }
  0x6e   : > { %10293 = vmatprep.mubr.msk.bf16.mxu0 %vm11963_vm0, %v11962_v1  ;;  %10322 = vmatpush3.bf16.msra.mxu1 %v11542_v33  ;;  %v1677_v33 = vsel %vm1672_vm3, %v1674_v11, %v1676_v25  ;;  %v1328_v45 = vrot.slane %v1326_v35, 2  ;;  %v1371_v35 = vshll.u32 %v11570_v23, 16 }
  0x6f   : > { %10323 = vmatprep.subr.bf16.mxu1 %v11962_v1 }
  0x72   : > { %10324 = vmatpush3.bf16.msra.mxu1 %v11544_v38  ;;  %v1678_v38 = vrot.slane %v11554_v31, 2 }
  0x73   : > { %10413 = vmatprep.subr.bf16.mxu1 %v11962_v1 }
  0x74   : > { %10238 = vmatmul.mubr.bf16.gmra.mxu1 %v657_v40  ;;  %v11555_v40 = vld [vmem:[%s12023_s27 + $0x20] sm:$0xff]   ;;  %v1679_v47 = vsel %vm1672_vm3, %v1676_v25, %v1678_v38  ;;  %v1681_v61 = vsel %vm1672_vm3, %v1678_v38, %v1680_v54  ;;  %v1359_v25 = vshrl.u32 %v11564_v16, 16 }
  0x75   : > { %10241 = vmatprep.mubr.msk.bf16.mxu1 %vm11963_vm0, %v11962_v1  ;;  %10294 = vmatmul.mubr.bf16.gmra.mxu0 %v994_v42  ;;  %v1325_v42 = vrot.slane %v1323_v34, 1  ;;  %v1332_v48 = vshrl.u32 %v11555_v40, 16 }
  0x76   : > { %10297 = vmatprep.mubr.msk.bf16.mxu0 %vm11963_vm0, %v11962_v1 }
  0x77   : > { %v1329_v53 = vor.u32 %v1328_v45, %v1325_v42  ;;  %v11584_v42 = vld [vmem:[%s12023_s27 + $0xc] sm:$0xff]  }
  0x79   : > { %v1330_v58 = vsel %vm1295_vm4, %v1320_v37, %v1329_v53  ;;  %v1688_v37 = vrot.slane %v11573_v30, 2  ;;  %v12463_v30 = vld [vmem:[%s12023_s27 + $0x24] sm:$0xff]  }
  0x7c   : > { %10242 = vmatmul.mubr.bf16.gmra.mxu1 %v665_v49  ;;  %v11557_v49 = vld [vmem:[%s12023_s27 + $0x28] sm:$0xff]  }
  0x7d   : > { %10245 = vmatprep.mubr.msk.bf16.mxu1 %vm11963_vm0, %v11962_v1  ;;  %10298 = vmatmul.mubr.bf16.gmra.mxu0 %v996_v51  ;;  %v1335_v51 = vshll.u32 %v11555_v40, 16  ;;  %v1344_v62 = vshll.u32 %v11557_v49, 16 }
  0x7e   : > { %10301 = vmatprep.mubr.msk.bf16.mxu0 %vm11963_vm0, %v11962_v1 }
  0x7f   : > { %v1337_v59 = vrot.slane %v1335_v51, 2  ;;  %v1346_v10 = vrot.slane %v1344_v62, 2 }
  0x84   : > { %10246 = vmatmul.mubr.bf16.gmra.mxu1 %v673_v57  ;;  %v11577_v57 = vld [vmem:[%s14513_s1 + $0x190] sm:$0xff]  }
  0x85   : > { %10249 = vmatprep.mubr.msk.bf16.mxu1 %vm11963_vm0, %v11962_v1  ;;  %10302 = vmatmul.mubr.bf16.gmra.mxu0 %v998_v60  ;;  %v1341_v60 = vshrl.u32 %v11557_v49, 16 }
  0x86   : > { %10305 = vmatprep.mubr.msk.bf16.mxu0 %vm11963_vm0, %v11962_v1 }
  0x87   : > { %v1343_v6 = vrot.slane %v1341_v60, 1  ;;  %v11581_v60 = vld [vmem:[%s12023_s27 + $0xc] sm:$0xff]  }
  0x89   : > { %v1347_v17 = vor.u32 %v1346_v10, %v1343_v6 }
  0x8c   : > { %10250 = vmatmul.mubr.bf16.gmra.mxu1 %v681_v2  ;;  %v11560_v2 = vld [vmem:[%s12023_s27 + $0x30] sm:$0xff]  }
  0x8d   : > { %10253 = vmatprep.mubr.msk.bf16.mxu1 %vm11963_vm0, %v11962_v1  ;;  %10306 = vmatmul.mubr.bf16.gmra.mxu0 %v997_v56  ;;  %v1334_v56 = vrot.slane %v1332_v48, 1  ;;  %v1350_v11 = vshrl.u32 %v11560_v2, 16  ;;  %v1353_v14 = vshll.u32 %v11560_v2, 16  ;;  %v2323_v48 = vshll.u32 %v11584_v42, 16  ;;  %v11597_v2 = vld [vmem:[%s14513_s1 + $0x238] sm:$0xff]  }
  0x8e   : > { %10377 = vmatprep.mubr.msk.bf16.mxu0 %vm11963_vm0, %v11962_v1 }
  0x8f   : > { %v1338_v5 = vor.u32 %v1337_v59, %v1334_v56  ;;  %v1352_v18 = vrot.slane %v1350_v11, 1  ;;  %v1355_v22 = vrot.slane %v1353_v14, 2  ;;  %v2325_v54 = vrot.slane %v2323_v48, 4  ;;  %v11590_v11 = vld [vmem:[%s12023_s27 + $0x24] sm:$0xff]  }
  0x91   : > { %v1339_v9 = vsel %vm1295_vm4, %v1329_v53, %v1338_v5  ;;  %v1348_v21 = vsel %vm1295_vm4, %v1338_v5, %v1347_v17 }
  0x94   : > { %10254 = vmatmul.mubr.bf16.gmra.mxu1 %v684_v13  ;;  %v11576_v13 = vld [vmem:[%s14513_s1 + $0x148] sm:$0xff]  }
  0x95   : > { %10325 = vmatprep.mubr.msk.bf16.mxu1 %vm11963_vm0, %v11962_v1  ;;  %10378 = vmatmul.mubr.bf16.vlgmr.msra.gmra.mxu0 %v1675_v20  ;;  %v11578_v20 = vld [vmem:[%s14513_s1 + $0x140] sm:$0xff]  }
  0x96   : > { %10381 = vmatprep.mubr.msk.bf16.mxu0 %vm11963_vm0, %v11962_v1  ;;  %10466 = vmatpush3.bf16.msra.mxu0 %v11563_v19  ;;  %v11567_v19 = vld [vmem:[%s12023_s27 + $0x38] sm:$0xff]  }
  0x97   : > { %10467 = vmatprep.subr.bf16.mxu0 %v11962_v1  ;;  %v1686_v27 = vrot.slane %v11567_v19, 2  ;;  %v2350_v19 = vshll.u32 %v11590_v11, 16 }
  0x99   : > { %v1687_v34 = vsel %vm1672_vm3, %v1684_v15, %v1686_v27  ;;  %v1689_v43 = vsel %vm1672_vm3, %v1686_v27, %v1688_v37  ;;  %v11593_v15 = vld [vmem:[%s14513_s1 + $0x1f8] sm:$0xff]  }
  0x9a   : > { %10468 = vmatpush3.bf16.msra.mxu0 %v11566_v26  ;;  %v1362_v26 = vshll.u32 %v11564_v16, 16 }
  0x9b   : > { %10469 = vmatprep.subr.bf16.mxu0 %v11962_v1 }
  0x9c   : > { %10326 = vmatmul.mubr.bf16.vlgmr.msra.gmra.mxu1 %v1312_v28  ;;  %v1356_v28 = vor.u32 %v1355_v22, %v1352_v18  ;;  %v11603_v18 = vld [vmem:[%s14513_s1 + $0x228] sm:$0xff]   ;;  %v12449_v22 = vld [vmem:[%s12023_s27 + $0x1c] sm:$0xff]  }
  0x9d   : > { %10329 = vmatprep.mubr.msk.bf16.mxu1 %vm11963_vm0, %v11962_v1  ;;  %10382 = vmatmul.mubr.bf16.gmra.mxu0 %v1677_v33  ;;  %v1364_v33 = vrot.slane %v1362_v26, 2 }
  0x9e   : > { %10385 = vmatprep.mubr.msk.bf16.mxu0 %vm11963_vm0, %v11962_v1  ;;  %10414 = vmatpush3.bf16.msra.mxu1 %v11559_v32  ;;  %v1357_v31 = vsel %vm1295_vm4, %v1347_v17, %v1356_v28  ;;  %v1361_v32 = vrot.slane %v1359_v25, 1  ;;  %v2347_v17 = vshrl.u32 %v11590_v11, 16  ;;  %v11606_v25 = vld [vmem:[%s14513_s1 + $0x220] sm:$0xff]  }
  0x9f   : > { %10415 = vmatprep.subr.bf16.mxu1 %v11962_v1  ;;  %10470 = vmatpush3.bf16.msra.mxu0 %v11569_v36  ;;  %v1370_v36 = vrot.slane %v1368_v29, 1  ;;  %v11599_v29 = vld [vmem:[%s14513_s1 + $0x1e8] sm:$0xff]  }
  0xa0   : > { %10471 = vmatprep.subr.bf16.mxu0 %v11962_v1  ;;  %v1365_v38 = vor.u32 %v1364_v33, %v1361_v32  ;;  %v2349_v23 = vrot.slane %v2347_v17, 3  ;;  %v11609_v32 = vld [vmem:[%s14513_s1 + $0x218] sm:$0xff]  }
  0xa2   : > { %10416 = vmatpush3.bf16.msra.mxu1 %v11562_v39  ;;  %v11583_v39 = vld [vmem:[%s12023_s27 + $0x4] sm:$0xf8]   ;;  %v1366_v40 = vsel %vm1295_vm4, %v1356_v28, %v1365_v38  ;;  %v2352_v28 = vrot.slane %v2350_v19, 4 }
  0xa3   : > { %10417 = vmatprep.subr.bf16.mxu1 %v11962_v1  ;;  %10472 = vmatpush3.bf16.msra.mxu0 %v11572_v41  ;;  %v1373_v41 = vrot.slane %v1371_v35, 2  ;;  %v2315_v45 = vshll.u32 %v11583_v39, 16  ;;  %v1996_v35 = vrot.slane %v12449_v22, 3 }
  0xa4   : > { %10330 = vmatmul.mubr.bf16.gmra.mxu1 %v1321_v44  ;;  %10473 = vmatprep.subr.bf16.mxu0 %v11962_v1  ;;  %v2312_v44 = vshrl.u32 %v11583_v39, 16  ;;  %v2353_v39 = vor.u32 %v2352_v28, %v2349_v23 }
  0xa5   : > { %10333 = vmatprep.mubr.msk.bf16.mxu1 %vm11963_vm0, %v11962_v1  ;;  %10386 = vmatmul.mubr.bf16.gmra.mxu0 %v1679_v47  ;;  %v2320_v47 = vshrl.u32 %v11584_v42, 16  ;;  %v2317_v51 = vrot.slane %v2315_v45, 4 }
  0xa6   : > { %10389 = vmatprep.mubr.msk.bf16.mxu0 %vm11963_vm0, %v11962_v1  ;;  %10418 = vmatpush3.bf16.msra.mxu1 %v11565_v46  ;;  %v1374_v46 = vor.u32 %v1373_v41, %v1370_v36  ;;  %v1998_v41 = vrot.slane %v12463_v30, 3 }
  0xa7   : > { %10419 = vmatprep.subr.bf16.mxu1 %v11962_v1  ;;  %10474 = vmatpush3.bf16.msra.mxu0 %v11575_v50  ;;  %v2314_v50 = vrot.slane %v2312_v44, 3  ;;  %v2322_v53 = vrot.slane %v2320_v47, 3  ;;  %v11612_v44 = vld [vmem:[%s14513_s1 + $0x210] sm:$0xff]  }
  0xa8   : > { %10475 = vmatprep.subr.bf16.mxu0 %v11962_v1  ;;  %v1375_v49 = vsel %vm1295_vm4, %v1365_v38, %v1374_v46 }
  0xa9   : > { %v2326_v59 = vor.u32 %v2325_v54, %v2322_v53  ;;  %v11615_v54 = vld [vmem:[%s14513_s1 + $0x208] sm:$0xff]  }
  0xaa   : > { %10420 = vmatpush3.bf16.msra.mxu1 %v11568_v52  ;;  %v11586_v52 = vld [vmem:[%s12023_s27 + $0x14] sm:$0xff]  }
  0xab   : > { %10421 = vmatprep.subr.bf16.mxu1 %v11962_v1  ;;  %10476 = vmatpush3.bf16.msra.mxu0 %v11577_v57  ;;  %v2329_v56 = vshrl.u32 %v11586_v52, 16  ;;  %v2332_v57 = vshll.u32 %v11586_v52, 16 }
  0xac   : > { %10334 = vmatmul.mubr.bf16.gmra.mxu1 %v1330_v58  ;;  %10477 = vmatprep.subr.bf16.mxu0 %v11962_v1  ;;  %v2318_v58 = vor.u32 %v2317_v51, %v2314_v50 }
  0xad   : > { %10337 = vmatprep.mubr.msk.bf16.mxu1 %vm11963_vm0, %v11962_v1  ;;  %10390 = vmatmul.mubr.bf16.gmra.mxu0 %v1681_v61  ;;  %v11588_v61 = vld [vmem:[%s12023_s27 + $0x1c] sm:$0xff]   ;;  %v2331_v62 = vrot.slane %v2329_v56, 3  ;;  %v2334_v0 = vrot.slane %v2332_v57, 4  ;;  %v12510_v57 = vld [vmem:[%s12023_s27 + $0x2c] sm:$0xff]  }
  0xae   : > { %10393 = vmatprep.mubr.msk.bf16.mxu0 %vm11963_vm0, %v11962_v1  ;;  %10422 = vmatpush3.bf16.msra.mxu1 %v11571_v63  ;;  %v2327_v63 = vsel %vm2310_vm5, %v2318_v58, %v2326_v59  ;;  %v2338_v5 = vshrl.u32 %v11588_v61, 16  ;;  %v2341_v6 = vshll.u32 %v11588_v61, 16  ;;  %v2000_v11 = vrot.slane %v12510_v57, 3 }
  0xaf   : > { %10423 = vmatprep.subr.bf16.mxu1 %v11962_v1  ;;  %10478 = vmatpush3.bf16.msra.mxu0 %v11579_v3  ;;  %v1991_v3 = vrot.slane %v11580_v55, 3 }
  0xb0   : > { %10479 = vmatprep.subr.bf16.mxu0 %v11962_v1  ;;  %v2340_v10 = vrot.slane %v2338_v5, 3  ;;  %v2343_v14 = vrot.slane %v2341_v6, 4  ;;  %v1999_v5 = vsel %vm1990_vm6, %v1996_v35, %v1998_v41 }
  0xb2   : > { %10424 = vmatpush3.bf16.msra.mxu1 %v11574_v4  ;;  %v1992_v4 = vrot.slane %v11581_v60, 3  ;;  %v11608_v60 = vld [vmem:[%s14513_s1 + $0x1d0] sm:$0xff]  }
  0xb3   : > { %10425 = vmatprep.subr.bf16.mxu1 %v11962_v1  ;;  %10480 = vmatpush3.bf16.msra.mxu0 %v11582_v8  ;;  %v2335_v8 = vor.u32 %v2334_v0, %v2331_v62 }
  0xb4   : > { %10338 = vmatmul.mubr.bf16.gmra.mxu1 %v1339_v9  ;;  %10569 = vmatprep.subr.bf16.mxu0 %v11962_v1  ;;  %v12427_v9 = vld [vmem:[%s12023_s27 + $0x14] sm:$0xff]  }
  0xb5   : > { %10341 = vmatprep.mubr.msk.bf16.mxu1 %vm11963_vm0, %v11962_v1  ;;  %10394 = vmatmul.mubr.bf16.gmra.mxu0 %v1683_v12  ;;  %v1993_v12 = vsel %vm1990_vm6, %v1991_v3, %v1992_v4  ;;  %v1994_v16 = vrot.slane %v12427_v9, 3 }
  0xb6   : > { %10397 = vmatprep.mubr.msk.bf16.mxu0 %vm11963_vm0, %v11962_v1  ;;  %10426 = vmatpush3.bf16.msra.mxu1 %v11576_v13  ;;  %v2336_v13 = vsel %vm2310_vm5, %v2326_v59, %v2335_v8  ;;  %v11601_v59 = vld [vmem:[%s12023_s27 + $0x3c] sm:$0xff]  }
  0xb7   : > { %10427 = vmatprep.subr.bf16.mxu1 %v11962_v1  ;;  %v1995_v26 = vsel %vm1990_vm6, %v1992_v4, %v1994_v16  ;;  %v1997_v47 = vsel %vm1990_vm6, %v1994_v16, %v1996_v35  ;;  %v11614_v16 = vld [vmem:[%s14513_s1 + $0x1c0] sm:$0xff]  }
  0xba   : > { %10428 = vmatpush3.bf16.msra.mxu1 %v11578_v20  ;;  %v11596_v20 = vld [vmem:[%s14513_s1 + $0x1f0] sm:$0xff]  }
  0xbb   : > { %10517 = vmatprep.subr.bf16.mxu1 %v11962_v1 }
  0xbc   : > { %10342 = vmatmul.mubr.bf16.gmra.mxu1 %v1348_v21  ;;  %v2344_v21 = vor.u32 %v2343_v14, %v2340_v10 }
  0xbd   : > { %10345 = vmatprep.mubr.msk.bf16.mxu1 %vm11963_vm0, %v11962_v1  ;;  %10398 = vmatmul.mubr.bf16.gmra.mxu0 %v1685_v24  ;;  %v11592_v24 = vld [vmem:[%s12023_s27 + $0x2c] sm:$0xff]  }
  0xbe   : > { %10401 = vmatprep.mubr.msk.bf16.mxu0 %vm11963_vm0, %v11962_v1  ;;  %v2345_v27 = vsel %vm2310_vm5, %v2335_v8, %v2344_v21  ;;  %v2359_v36 = vshll.u32 %v11592_v24, 16  ;;  %v2354_v52 = vsel %vm2310_vm5, %v2344_v21, %v2353_v39 }
  0xc0   : > { %v2361_v48 = vrot.slane %v2359_v36, 4 }
  0xc4   : > { %10346 = vmatmul.mubr.bf16.gmra.mxu1 %v1357_v31  ;;  %v2356_v31 = vshrl.u32 %v11592_v24, 16  ;;  %v2001_v24 = vsel %vm1990_vm6, %v1998_v41, %v2000_v11  ;;  %v11598_v41 = vld [vmem:[%s12023_s27 + $0x3c] sm:$0xff]  }
  0xc5   : > { %10349 = vmatprep.mubr.msk.bf16.mxu1 %vm11963_vm0, %v11962_v1  ;;  %10402 = vmatmul.mubr.bf16.gmra.mxu0 %v1687_v34  ;;  %v2004_v57 = vrot.slane %v11598_v41, 3 }
  0xc6   : > { %10405 = vmatprep.mubr.msk.bf16.mxu0 %vm11963_vm0, %v11962_v1  ;;  %v2358_v42 = vrot.slane %v2356_v31, 3 }
  0xcc   : > { %10350 = vmatmul.mubr.bf16.gmra.mxu1 %v1366_v40  ;;  %v11602_v40 = vld [vmem:[%s14513_s1 + $0x1e0] sm:$0xff]  }
  0xcd   : > { %10353 = vmatprep.mubr.msk.bf16.mxu1 %vm11963_vm0, %v11962_v1  ;;  %10406 = vmatmul.mubr.bf16.gmra.mxu0 %v1689_v43  ;;  %v11595_v43 = vld [vmem:[%s12023_s27 + $0x34] sm:$0xff]  }
  0xce   : > { %10409 = vmatprep.mubr.msk.bf16.mxu0 %vm11963_vm0, %v11962_v1  ;;  %v2365_v53 = vshrl.u32 %v11595_v43, 16  ;;  %v2368_v58 = vshll.u32 %v11595_v43, 16 }
  0xd0   : > { %v2367_v0 = vrot.slane %v2365_v53, 3  ;;  %v2370_v6 = vrot.slane %v2368_v58, 4 }
  0xd2   : > { %v2371_v19 = vor.u32 %v2370_v6, %v2367_v0 }
  0xd4   : > { %10354 = vmatmul.mubr.bf16.gmra.mxu1 %v1375_v49  ;;  %v11605_v49 = vld [vmem:[%s14513_s1 + $0x1d8] sm:$0xff]  }
  0xd5   : > { %10357 = vmatprep.mubr.msk.bf16.mxu1 %vm11963_vm0, %v11962_v1  ;;  %10410 = vmatmul.mubr.bf16.gmra.mxu0 %v1688_v37 }
  0xd6   : > { %10481 = vmatprep.mubr.msk.bf16.mxu0 %vm11963_vm0, %v11962_v1 }
  0xdc   : > { %10358 = vmatmul.mubr.bf16.gmra.mxu1 %v1374_v46 }
  0xdd   : > { %10429 = vmatprep.mubr.msk.bf16.mxu1 %vm11963_vm0, %v11962_v1  ;;  %10482 = vmatmul.mubr.bf16.vlgmr.msra.gmra.mxu0 %v2327_v63  ;;  %v2362_v63 = vor.u32 %v2361_v48, %v2358_v42 }
  0xde   : > { %10485 = vmatprep.mubr.msk.bf16.mxu0 %vm11963_vm0, %v11962_v1  ;;  %10570 = vmatpush3.bf16.msra.mxu0 %v11597_v2  ;;  %v11617_v2 = vld [vmem:[%s14513_s1 + $0x200] sm:$0xff]  }
  0xdf   : > { %10571 = vmatprep.subr.bf16.mxu0 %v11962_v1  ;;  %v2363_v10 = vsel %vm2310_vm5, %v2353_v39, %v2362_v63 }
  0xe2   : > { %10572 = vmatpush3.bf16.msra.mxu0 %v11600_v7  ;;  %v11611_v7 = vld [vmem:[%s14513_s1 + $0x1c8] sm:$0xff]  }
  0xe3   : > { %10573 = vmatprep.subr.bf16.mxu0 %v11962_v1 }
  0xe4   : > { %10430 = vmatmul.mubr.bf16.vlgmr.msra.gmra.mxu1 %v1993_v12  ;;  %v2374_v12 = vshrl.u32 %v11601_v59, 16 }
  0xe5   : > { %10433 = vmatprep.mubr.msk.bf16.mxu1 %vm11963_vm0, %v11962_v1  ;;  %10486 = vmatmul.mubr.bf16.gmra.mxu0 %v2336_v13 }
  0xe6   : > { %10489 = vmatprep.mubr.msk.bf16.mxu0 %vm11963_vm0, %v11962_v1  ;;  %10518 = vmatpush3.bf16.msra.mxu1 %v11593_v15  ;;  %v2377_v15 = vshll.u32 %v11601_v59, 16  ;;  %v2376_v21 = vrot.slane %v2374_v12, 3 }
  0xe7   : > { %10519 = vmatprep.subr.bf16.mxu1 %v11962_v1  ;;  %10574 = vmatpush3.bf16.msra.mxu0 %v11603_v18 }
  0xe8   : > { %10575 = vmatprep.subr.bf16.mxu0 %v11962_v1 }
  0xea   : > { %10520 = vmatpush3.bf16.msra.mxu1 %v11596_v20  ;;  %v11594_v20 = vld [vmem:[%s12023_s27 + $0x34] sm:$0xff]  }
  0xeb   : > { %10521 = vmatprep.subr.bf16.mxu1 %v11962_v1  ;;  %10576 = vmatpush3.bf16.msra.mxu0 %v11606_v25  ;;  %v2379_v25 = vrot.slane %v2377_v15, 4  ;;  %v2002_v31 = vrot.slane %v11594_v20, 3 }
  0xec   : > { %v12469_v33 = vpop.f32.mrf.mxu1  ;;  %10434 = vmatmul.mubr.bf16.gmra.mxu1 %v1995_v26  ;;  %v12471_v34 = vpop.f32.mrf.mxu0  ;;  %10577 = vmatprep.subr.bf16.mxu0 %v11962_v1  ;;  %v11607_v26 = vld [vmem:[%s12023_s27 + $0x44] sm:$0xff]  }
  0xed   : > { %10437 = vmatprep.mubr.msk.bf16.mxu1 %vm11963_vm0, %v11962_v1  ;;  %10490 = vmatmul.mubr.bf16.gmra.mxu0 %v2345_v27  ;;  %v2383_v30 = vshrl.u32 %v11607_v26, 16  ;;  %v2386_v36 = vshll.u32 %v11607_v26, 16  ;;  %v2005_v6 = vsel %vm1990_vm6, %v2002_v31, %v2004_v57 }
  0xee   : > { %v10187_v37 = vpop.f32.mrf.mxu1  ;;  %v10171_v38 = vpop.f32.mrf.mxu0  ;;  %10493 = vmatprep.mubr.msk.bf16.mxu0 %vm11963_vm0, %v11962_v1  ;;  %10522 = vmatpush3.bf16.msra.mxu1 %v11599_v29  ;;  %v2372_v29 = vsel %vm2310_vm5, %v2362_v63, %v2371_v19  ;;  %v11604_v63 = vld [vmem:[%s12023_s27 + $0x44] sm:$0xff]  }
  0xef   : > { %10523 = vmatprep.subr.bf16.mxu1 %v11962_v1  ;;  %10578 = vmatpush3.bf16.msra.mxu0 %v11609_v32  ;;  %v11613_v37 = vld [vmem:[%s12023_s27 + $0x4c] ss:$0 sps:$4 sm:$0x33]   ;;  %v2388_v48 = vrot.slane %v2386_v36, 4  ;;  %v2006_v12 = vrot.slane %v11604_v63, 3  ;;  %v11632_v63 = vld [vmem:[%s14513_s1 + $0x2b8] sm:$0xff]  }
  0xf0   : > { %v12488_v45 = vpop.f32.mrf.mxu1  ;;  %v12490_v46 = vpop.f32.mrf.mxu0  ;;  %10579 = vmatprep.subr.bf16.mxu0 %v11962_v1  ;;  %v2395_v59 = vshll.u32 %v11613_v37, 16 }
  0xf2   : > { %v10188_v50 = vpop.f32.mrf.mxu1  ;;  %v10172_v51 = vpop.f32.mrf.mxu0  ;;  %10524 = vmatpush3.bf16.msra.mxu1 %v11602_v40  ;;  %v2380_v40 = vor.u32 %v2379_v25, %v2376_v21 }
  0xf3   : > { %10525 = vmatprep.subr.bf16.mxu1 %v11962_v1  ;;  %10580 = vmatpush3.bf16.msra.mxu0 %v11612_v44  ;;  %v2003_v44 = vsel %vm1990_vm6, %v2000_v11, %v2002_v31 }
  0xf4   : > { %v12502_v55 = vpop.f32.mrf.mxu1  ;;  %10438 = vmatmul.mubr.bf16.gmra.mxu1 %v1997_v47  ;;  %v12504_v56 = vpop.f32.mrf.mxu0  ;;  %10581 = vmatprep.subr.bf16.mxu0 %v11962_v1  ;;  %v2385_v47 = vrot.slane %v2383_v30, 3  ;;  %v2381_v51 = vsel %vm2310_vm5, %v2371_v19, %v2380_v40  ;;  %v11619_v19 = vld [vmem:[%s12023_s27 + $0x10] sm:$0xff]  }
  0xf5   : > { %10441 = vmatprep.mubr.msk.bf16.mxu1 %vm11963_vm0, %v11962_v1  ;;  %10494 = vmatmul.mubr.bf16.gmra.mxu0 %v2354_v52  ;;  %v2392_v52 = vshrl.u32 %v11613_v37, 16  ;;  %v3000_v30 = vshll.u32 %v11619_v19, 16 }
  0xf6   : > { %v10191_v61 = vpop.f32.mrf.mxu1  ;;  %v10175_v62 = vpop.f32.mrf.mxu0  ;;  %10497 = vmatprep.mubr.msk.bf16.mxu0 %vm11963_vm0, %v11962_v1  ;;  %10526 = vmatpush3.bf16.msra.mxu1 %v11605_v49 }
  0xf7   : > { %10527 = vmatprep.subr.bf16.mxu1 %v11962_v1  ;;  %10582 = vmatpush3.bf16.msra.mxu0 %v11615_v54  ;;  %v255_v54 = vld [vmem:[#allocation2 + $0x60] sm:$0xf]  ;;  %v2389_v61 = vor.u32 %v2388_v48, %v2385_v47  ;;  %v2394_v0 = vrot.slane %v2392_v52, 3 }
  0xf8   : > { %v12522_v3 = vpop.f32.mrf.mxu1  ;;  %v12524_v4 = vpop.f32.mrf.mxu0  ;;  %10583 = vmatprep.subr.bf16.mxu0 %v11962_v1 }
  0xf9   : > { %v2390_v11 = vsel %vm2310_vm5, %v2380_v40, %v2389_v61 }
  0xfa   : > { %v10192_v8 = vpop.f32.mrf.mxu1  ;;  %v10176_v9 = vpop.f32.mrf.mxu0  ;;  %10528 = vmatpush3.bf16.msra.mxu1 %v11608_v60 }
  0xfb   : > { %10529 = vmatprep.subr.bf16.mxu1 %v11962_v1  ;;  %10584 = vmatpush3.bf16.msra.mxu0 %v11617_v2  ;;  %v2397_v8 = vrot.slane %v2395_v59, 4  ;;  %v11618_v9 = vld [vmem:[%s12023_s27 + $0x8] sm:$0xff]  }
  0xfc   : > { %v12536_v13 = vpop.f32.mrf.mxu1  ;;  %10442 = vmatmul.mubr.bf16.gmra.mxu1 %v1999_v5  ;;  %v12538_v14 = vpop.f32.mrf.mxu0  ;;  %10673 = vmatprep.subr.bf16.mxu0 %v11962_v1  ;;  %v2995_v20 = vshll.u32 %v11618_v9, 16 }
  0xfd   : > { %10445 = vmatprep.mubr.msk.bf16.mxu1 %vm11963_vm0, %v11962_v1  ;;  %10498 = vmatmul.mubr.bf16.gmra.mxu0 %v2363_v10 }
  0xfe   : > { %v10195_v17 = vpop.f32.mrf.mxu1  ;;  %v10179_v18 = vpop.f32.mrf.mxu0  ;;  %10501 = vmatprep.mubr.msk.bf16.mxu0 %vm11963_vm0, %v11962_v1  ;;  %10530 = vmatpush3.bf16.msra.mxu1 %v11611_v7 }
  0xff   : > { %10531 = vmatprep.subr.bf16.mxu1 %v11962_v1 }
 0x100   : > { %v12550_v22 = vpop.f32.mrf.mxu1  ;;  %v12552_v23 = vpop.f32.mrf.mxu0 }
 0x102   : > { %v10196_v27 = vpop.f32.mrf.mxu1  ;;  %v10180_v28 = vpop.f32.mrf.mxu0  ;;  %10532 = vmatpush3.bf16.msra.mxu1 %v11614_v16 }
 0x103   : > { %10621 = vmatprep.subr.bf16.mxu1 %v11962_v1  ;;  %v11610_v27 = vld [vmem:[%s12023_s27 + $0x4c] ss:$0 sps:$4 sm:$0x11]  }
 0x104   : > { %v12560_v32 = vpop.f32.mrf.mxu1  ;;  %10446 = vmatmul.mubr.bf16.gmra.mxu1 %v2001_v24  ;;  %v12562_v35 = vpop.f32.mrf.mxu0  ;;  %v2398_v24 = vor.u32 %v2397_v8, %v2394_v0  ;;  %v2008_v41 = vrot.slane %v11610_v27, 3 }
 0x105   : > { %10449 = vmatprep.mubr.msk.bf16.mxu1 %vm11963_vm0, %v11962_v1  ;;  %10502 = vmatmul.mubr.bf16.gmra.mxu0 %v2372_v29 }
 0x106   : > { %v10199_v38 = vpop.f32.mrf.mxu1  ;;  %v10183_v39 = vpop.f32.mrf.mxu0  ;;  %10505 = vmatprep.mubr.msk.bf16.mxu0 %vm11963_vm0, %v11962_v1  ;;  %v2399_v37 = vsel %vm2310_vm5, %v2389_v61, %v2398_v24 }
 0x107   : > { %v2993_v38 = vshrl.u32 %v11618_v9, 16  ;;  %v2997_v39 = vrot.slane %v2995_v20, 1 }
 0x108   : > { %v12570_v42 = vpop.f32.mrf.mxu1  ;;  %v12572_v43 = vpop.f32.mrf.mxu0 }
 0x109   : > { %v2998_v52 = vor.u32 %v2997_v39, %v2993_v38 }
 0x10a   : > { %v10200_v49 = vpop.f32.mrf.mxu1  ;;  %v10184_v50 = vpop.f32.mrf.mxu0 }
 0x10b   : > { %v3002_v49 = vrot.slane %v3000_v30, 1  ;;  %v11621_v50 = vld [vmem:[%s12023_s27 + $0x18] sm:$0xff]   ;;  %v12640_v30 = vld [vmem:[%s12023_s27 + $0x28] sm:$0xff]  }
 0x10c   : > { %v12576_v53 = vpop.f32.mrf.mxu1  ;;  %10450 = vmatmul.mubr.bf16.gmra.mxu1 %v2003_v44  ;;  %v3012_v24 = vshrl.u32 %v11621_v50, 16 }
 0x10d   : > { %10453 = vmatprep.mubr.msk.bf16.mxu1 %vm11963_vm0, %v11962_v1  ;;  %v1090_v58 = vpop.f32.mrf.mxu0  ;;  %10506 = vmatmul.mubr.bf16.gmra.mxu0 %v2381_v51 }
 0x10e   : > { %v10203_v60 = vpop.f32.mrf.mxu1  ;;  %10509 = vmatprep.mubr.msk.bf16.mxu0 %vm11963_vm0, %v11962_v1 }
 0x10f   : > { %v10275_v62 = vpop.f32.mrf.mxu0  ;;  %v2009_v60 = vsel %vm1990_vm6, %v2006_v12, %v2008_v41 }
 0x110   : > { %v475_v2 = vpop.f32.mrf.mxu1  ;;  %v3008_v62 = vshll.u32 %v11621_v50, 16  ;;  %v3024_v50 = vshll.u32 %v12640_v30, 16 }
 0x111   : > { %v496_v5 = vadd.f32 %v475_v2, %v255_v54  ;;  %v1093_v7 = vpop.f32.mrf.mxu0  ;;  %v3003_v2 = vsel %vm613_vm2, %v2998_v52, %v3002_v49  ;;  %v11634_v52 = vld [vmem:[%s14513_s1 + $0x268] sm:$0xff]  }
 0x112   : > { %v10204_v10 = vpop.f32.mrf.mxu1 }
 0x113   : > { %514 = vst [vmem:[#allocation2 + $0x60] sm:$0xf] %v496_v5  ;;  %v10276_v15 = vpop.f32.mrf.mxu0  ;;  %v3010_v10 = vrot.slane %v3008_v62, 1  ;;  %v11644_v62 = vld [vmem:[%s14513_s1 + $0x298] sm:$0xff]  }
 0x114   : > { %v776_v16 = vpop.f32.mrf.mxu1  ;;  %10454 = vmatmul.mubr.bf16.gmra.mxu1 %v2005_v6 }
 0x115   : > { %v847_v17 = vadd.f32 %v776_v16, %v12471_v34  ;;  %10457 = vmatprep.mubr.msk.bf16.mxu1 %vm11963_vm0, %v11962_v1  ;;  %v1098_v18 = vpop.f32.mrf.mxu0  ;;  %10510 = vmatmul.mubr.bf16.gmra.mxu0 %v2390_v11  ;;  %v2007_v34 = vsel %vm1990_vm6, %v2004_v57, %v2006_v12  ;;  %v11635_v11 = vld [vmem:[%s14513_s1 + $0x2b0] sm:$0xff]  }
 0x116   : > { %v10223_v21 = vpop.f32.mrf.mxu1  ;;  %10513 = vmatprep.mubr.msk.bf16.mxu0 %vm11963_vm0, %v11962_v1 }
 0x117   : > { %v12592_v25 = vadd.f32 %v1090_v58, %v847_v17  ;;  %v10279_v26 = vpop.f32.mrf.mxu0  ;;  %v3004_v58 = vshrl.u32 %v11619_v19, 16 }
 0x118   : > { %v779_v28 = vpop.f32.mrf.mxu1  ;;  %v11628_v26 = vld [vmem:[%s14513_s1 + $0x278] sm:$0xff]  }
 0x119   : > { %v848_v29 = vadd.f32 %v779_v28, %v12490_v46  ;;  %v1101_v31 = vpop.f32.mrf.mxu0  ;;  %v3006_v15 = vor.u32 %v3004_v58, %v3002_v49 }
 0x11a   : > { %v10224_v36 = vpop.f32.mrf.mxu1 }
 0x11b   : > { %v12598_v40 = vadd.f32 %v1093_v7, %v848_v29  ;;  %v10280_v44 = vpop.f32.mrf.mxu0  ;;  %v12617_v7 = vld [vmem:[%s12023_s27 + $0x20] sm:$0xff]   ;;  %v3011_v28 = vsel %vm613_vm2, %v3006_v15, %v3010_v10 }
 0x11c   : > { %v784_v47 = vpop.f32.mrf.mxu1  ;;  %10458 = vmatmul.mubr.bf16.gmra.mxu1 %v2007_v34  ;;  %v3014_v44 = vor.u32 %v3012_v24, %v3010_v10  ;;  %v3020_v49 = vshrl.u32 %v12617_v7, 16  ;;  %v11647_v10 = vld [vmem:[%s14513_s1 + $0x290] sm:$0xff]  }
 0x11d   : > { %v849_v48 = vadd.f32 %v784_v47, %v12504_v56  ;;  %10461 = vmatprep.mubr.msk.bf16.mxu1 %vm11963_vm0, %v11962_v1  ;;  %v1106_v46 = vpop.f32.mrf.mxu0  ;;  %10514 = vmatmul.mubr.bf16.gmra.mxu0 %v2399_v37  ;;  %v11631_v37 = vld [vmem:[%s14513_s1 + $0x270] sm:$0xff]  }
 0x11e   : > { %v10227_v51 = vpop.f32.mrf.mxu1  ;;  %10585 = vmatprep.mubr.msk.bf16.mxu0 %vm11963_vm0, %v11962_v1 }
 0x11f   : > { %v12606_v54 = vadd.f32 %v1098_v18, %v849_v48  ;;  %v10283_v57 = vpop.f32.mrf.mxu0  ;;  %v3016_v18 = vshll.u32 %v12617_v7, 16  ;;  %v11620_v48 = vld [vmem:[%s12023_s27 + $0x10] sm:$0xff]  }
 0x120   : > { %v787_v59 = vpop.f32.mrf.mxu1 }
 0x121   : > { %v850_v56 = vadd.f32 %v787_v59, %v12524_v4  ;;  %v1109_v61 = vpop.f32.mrf.mxu0 }
 0x122   : > { %v10228_v0 = vpop.f32.mrf.mxu1 }
 0x123   : > { %v12614_v5 = vadd.f32 %v1101_v31, %v850_v56  ;;  %v10284_v6 = vpop.f32.mrf.mxu0  ;;  %v3018_v31 = vrot.slane %v3016_v18, 1  ;;  %v12676_v0 = vld [vmem:[%s12023_s27 + $0x30] sm:$0xff]  }
 0x124   : > { %v792_v8 = vpop.f32.mrf.mxu1  ;;  %10462 = vmatmul.mubr.bf16.gmra.mxu1 %v2009_v60  ;;  %v3032_v15 = vshll.u32 %v12676_v0, 16 }
 0x125   : > { %v851_v4 = vadd.f32 %v792_v8, %v12538_v14  ;;  %10533 = vmatprep.mubr.msk.bf16.mxu1 %vm11963_vm0, %v11962_v1  ;;  %v1114_v9 = vpop.f32.mrf.mxu0  ;;  %10586 = vmatmul.mubr.bf16.vlgmr.msra.gmra.mxu0 %v3003_v2  ;;  %v11616_v14 = vld [vmem:[%s12023_s27 + $0x8] sm:$0xff]   ;;  %v3019_v56 = vsel %vm613_vm2, %v3014_v44, %v3018_v31  ;;  %v3022_v7 = vor.u32 %v3020_v49, %v3018_v31  ;;  %v3026_v8 = vrot.slane %v3024_v50, 1 }
 0x126   : > { %v10231_v12 = vpop.f32.mrf.mxu1  ;;  %10589 = vmatprep.mubr.msk.bf16.mxu0 %vm11963_vm0, %v11962_v1  ;;  %10674 = vmatpush3.bf16.msra.mxu0 %v11632_v63  ;;  %v11646_v49 = vld [vmem:[%s14513_s1 + $0x248] sm:$0xff]  }
 0x127   : > { %v12627_v16 = vadd.f32 %v1106_v46, %v851_v4  ;;  %v10287_v17 = vpop.f32.mrf.mxu0  ;;  %10675 = vmatprep.subr.bf16.mxu0 %v11962_v1  ;;  %v11637_v4 = vld [vmem:[%s14513_s1 + $0x260] sm:$0xff]   ;;  %v11622_v12 = vld [vmem:[%s12023_s27 + $0x18] sm:$0xff]  }
 0x128   : > { %v795_v19 = vpop.f32.mrf.mxu1 }
 0x129   : > { %v852_v20 = vadd.f32 %v795_v19, %v12552_v23  ;;  %v1117_v21 = vpop.f32.mrf.mxu0  ;;  %v11638_v23 = vld [vmem:[%s14513_s1 + $0x2a8] sm:$0xff]   ;;  %v3027_v19 = vsel %vm613_vm2, %v3022_v7, %v3026_v8 }
 0x12a   : > { %v10232_v27 = vpop.f32.mrf.mxu1  ;;  %10676 = vmatpush3.bf16.msra.mxu0 %v11635_v11 }
 0x12b   : > { %v12637_v29 = vadd.f32 %v1109_v61, %v852_v20  ;;  %v10288_v34 = vpop.f32.mrf.mxu0  ;;  %10677 = vmatprep.subr.bf16.mxu0 %v11962_v1  ;;  %v3028_v20 = vshrl.u32 %v12640_v30, 16  ;;  %v12705_v27 = vld [vmem:[%s12023_s27 + $0x38] sm:$0xff]   ;;  %v3034_v30 = vrot.slane %v3032_v15, 1 }
 0x12c   : > { %v800_v36 = vpop.f32.mrf.mxu1  ;;  %10534 = vmatmul.mubr.bf16.vlgmr.msra.gmra.mxu1 %v11616_v14  ;;  %v3040_v44 = vshll.u32 %v12705_v27, 16  ;;  %v3044_v7 = vshrl.u32 %v12705_v27, 16 }
 0x12d   : > { %v853_v38 = vadd.f32 %v800_v36, %v12562_v35  ;;  %10537 = vmatprep.mubr.msk.bf16.mxu1 %vm11963_vm0, %v11962_v1  ;;  %v1122_v39 = vpop.f32.mrf.mxu0  ;;  %10590 = vmatmul.mubr.bf16.gmra.mxu0 %v3011_v28  ;;  %v11641_v35 = vld [vmem:[%s14513_s1 + $0x2a0] sm:$0xff]   ;;  %v11643_v36 = vld [vmem:[%s14513_s1 + $0x250] sm:$0xff]  }
 0x12e   : > { %v10235_v41 = vpop.f32.mrf.mxu1  ;;  %10593 = vmatprep.mubr.msk.bf16.mxu0 %vm11963_vm0, %v11962_v1  ;;  %10622 = vmatpush3.bf16.msra.mxu1 %v11628_v26 }
 0x12f   : > { %v12654_v47 = vadd.f32 %v1114_v9, %v853_v38  ;;  %v10291_v46 = vpop.f32.mrf.mxu0  ;;  %10623 = vmatprep.subr.bf16.mxu1 %v11962_v1  ;;  %10678 = vmatpush3.bf16.msra.mxu0 %v11638_v23  ;;  %v3036_v23 = vshrl.u32 %v12676_v0, 16  ;;  %v11624_v38 = vld [vmem:[%s12023_s27 + $0x20] sm:$0xff]  }
 0x130   : > { %v803_v51 = vpop.f32.mrf.mxu1  ;;  %10679 = vmatprep.subr.bf16.mxu0 %v11962_v1 }
 0x131   : > { %v854_v57 = vadd.f32 %v803_v51, %v12572_v43  ;;  %v1125_v58 = vpop.f32.mrf.mxu0 }
 0x132   : > { %v10236_v59 = vpop.f32.mrf.mxu1  ;;  %10624 = vmatpush3.bf16.msra.mxu1 %v11631_v37 }
 0x133   : > { %v12669_v60 = vadd.f32 %v1117_v21, %v854_v57  ;;  %v10292_v61 = vpop.f32.mrf.mxu0  ;;  %10625 = vmatprep.subr.bf16.mxu1 %v11962_v1  ;;  %10680 = vmatpush3.bf16.msra.mxu0 %v11641_v35  ;;  %v11640_v21 = vld [vmem:[%s14513_s1 + $0x258] sm:$0xff]   ;;  %v12738_v59 = vld [vmem:[%s12023_s27 + $0x40] sm:$0xff]  }
 0x134   : > { %v808_v63 = vpop.f32.mrf.mxu1  ;;  %10538 = vmatmul.mubr.bf16.gmra.mxu1 %v11620_v48  ;;  %10681 = vmatprep.subr.bf16.mxu0 %v11962_v1  ;;  %v11652_v48 = vld [vmem:[%s14513_s1 + $0x280] sm:$0xff]  }
 0x135   : > { %v855_v43 = vadd.f32 %v808_v63, %v12469_v33  ;;  %10541 = vmatprep.mubr.msk.bf16.mxu1 %vm11963_vm0, %v11962_v1  ;;  %v1130_v2 = vpop.f32.mrf.mxu0  ;;  %10594 = vmatmul.mubr.bf16.gmra.mxu0 %v3019_v56  ;;  %v11648_v63 = vld [vmem:[%s14513_s1 + $0x240] sm:$0xff]  }
 0x136   : > { %v10239_v6 = vpop.f32.mrf.mxu1  ;;  %10597 = vmatprep.mubr.msk.bf16.mxu0 %vm11963_vm0, %v11962_v1  ;;  %10626 = vmatpush3.bf16.msra.mxu1 %v11634_v52 }
 0x137   : > { %v12687_v9 = vadd.f32 %v1122_v39, %v855_v43  ;;  %v10295_v33 = vpop.f32.mrf.mxu0  ;;  %10627 = vmatprep.subr.bf16.mxu1 %v11962_v1  ;;  %10682 = vmatpush3.bf16.msra.mxu0 %v11644_v62  ;;  %v3030_v39 = vor.u32 %v3028_v20, %v3026_v8  ;;  %v3042_v62 = vrot.slane %v3040_v44, 1  ;;  %v11626_v43 = vld [vmem:[%s12023_s27 + $0x28] sm:$0xff]   ;;  %v3048_v8 = vshll.u32 %v12738_v59, 16 }
 0x138   : > { %v811_v11 = vpop.f32.mrf.mxu1  ;;  %10683 = vmatprep.subr.bf16.mxu0 %v11962_v1 }
 0x139   : > { %v856_v14 = vadd.f32 %v811_v11, %v12488_v45  ;;  %v1133_v17 = vpop.f32.mrf.mxu0  ;;  %v11649_v45 = vld [vmem:[%s14513_s1 + $0x288] sm:$0xff]   ;;  %v3035_v52 = vsel %vm613_vm2, %v3030_v39, %v3034_v30  ;;  %v3050_v20 = vrot.slane %v3048_v8, 1  ;;  %v3046_v27 = vor.u32 %v3044_v7, %v3042_v62  ;;  %v11639_v7 = vld [vmem:[%s12023_s27 + $0x40] sm:$0xff]  }
 0x13a   : > { %v10240_v18 = vpop.f32.mrf.mxu1  ;;  %10628 = vmatpush3.bf16.msra.mxu1 %v11637_v4 }
 0x13b   : > { %v12702_v24 = vadd.f32 %v1125_v58, %v856_v14  ;;  %v10296_v26 = vpop.f32.mrf.mxu0  ;;  %10629 = vmatprep.subr.bf16.mxu1 %v11962_v1  ;;  %10684 = vmatpush3.bf16.msra.mxu0 %v11647_v10 }
 0x13c   : > { %v816_v28 = vpop.f32.mrf.mxu1  ;;  %10542 = vmatmul.mubr.bf16.gmra.mxu1 %v11622_v12  ;;  %10685 = vmatprep.subr.bf16.mxu0 %v11962_v1  ;;  %v11629_v26 = vld [vmem:[%s12023_s27 + $0x30] sm:$0xff]  }
 0x13d   : > { %v857_v34 = vadd.f32 %v816_v28, %v12502_v55  ;;  %10545 = vmatprep.mubr.msk.bf16.mxu1 %vm11963_vm0, %v11962_v1  ;;  %v1138_v31 = vpop.f32.mrf.mxu0  ;;  %10598 = vmatmul.mubr.bf16.gmra.mxu0 %v3027_v19 }
 0x13e   : > { %v10243_v37 = vpop.f32.mrf.mxu1  ;;  %10601 = vmatprep.mubr.msk.bf16.mxu0 %vm11963_vm0, %v11962_v1  ;;  %10630 = vmatpush3.bf16.msra.mxu1 %v11640_v21 }
 0x13f   : > { %v12722_v55 = vadd.f32 %v1130_v2, %v857_v34  ;;  %v10299_v41 = vpop.f32.mrf.mxu0  ;;  %10631 = vmatprep.subr.bf16.mxu1 %v11962_v1  ;;  %10686 = vmatpush3.bf16.msra.mxu0 %v11649_v45  ;;  %v3038_v2 = vor.u32 %v3036_v23, %v3034_v30  ;;  %v3052_v34 = vshrl.u32 %v12738_v59, 16  ;;  %v3051_v37 = vsel %vm613_vm2, %v3046_v27, %v3050_v20 }
 0x140   : > { %v819_v46 = vpop.f32.mrf.mxu1  ;;  %10687 = vmatprep.subr.bf16.mxu0 %v11962_v1 }
 0x141   : > { %v858_v50 = vadd.f32 %v819_v46, %v12522_v3  ;;  %v1141_v35 = vpop.f32.mrf.mxu0  ;;  %v3043_v12 = vsel %vm613_vm2, %v3038_v2, %v3042_v62 }
 0x142   : > { %v10244_v51 = vpop.f32.mrf.mxu1  ;;  %10632 = vmatpush3.bf16.msra.mxu1 %v11643_v36 }
 0x143   : > { %v12735_v57 = vadd.f32 %v1133_v17, %v858_v50  ;;  %v10300_v58 = vpop.f32.mrf.mxu0  ;;  %10633 = vmatprep.subr.bf16.mxu1 %v11962_v1  ;;  %10688 = vmatpush3.bf16.msra.mxu0 %v11652_v48  ;;  %v11642_v17 = vld [vmem:[%s12023_s27 + $0x48] sm:$0x7f]   ;;  %v11633_v50 = vld [vmem:[%s12023_s27 + $0x38] sm:$0xff]  }
 0x144   : > { %v824_v56 = vpop.f32.mrf.mxu1  ;;  %10546 = vmatmul.mubr.bf16.gmra.mxu1 %v11624_v38  ;;  %10777 = vmatprep.subr.bf16.mxu0 %v11962_v1 }
 0x145   : > { %v859_v3 = vadd.f32 %v824_v56, %v12536_v13  ;;  %10549 = vmatprep.mubr.msk.bf16.mxu1 %vm11963_vm0, %v11962_v1  ;;  %v1146_v61 = vpop.f32.mrf.mxu0  ;;  %10602 = vmatmul.mubr.bf16.gmra.mxu0 %v3035_v52 }
 0x146   : > { %v10247_v0 = vpop.f32.mrf.mxu1  ;;  %10605 = vmatprep.mubr.msk.bf16.mxu0 %vm11963_vm0, %v11962_v1  ;;  %10634 = vmatpush3.bf16.msra.mxu1 %v11646_v49 }
 0x147   : > { %v12751_v6 = vadd.f32 %v1138_v31, %v859_v3  ;;  %v10303_v13 = vpop.f32.mrf.mxu0  ;;  %10635 = vmatprep.subr.bf16.mxu1 %v11962_v1  ;;  %v3056_v31 = vshll.u32 %v11642_v17, 16 }
 0x148   : > { %v827_v4 = vpop.f32.mrf.mxu1 }
 0x149   : > { %v860_v33 = vadd.f32 %v827_v4, %v12550_v22  ;;  %v1149_v10 = vpop.f32.mrf.mxu0  ;;  %v3058_v46 = vrot.slane %v3056_v31, 1  ;;  %v11653_v4 = vld [vmem:[%s12023_s27 + $0xc] sm:$0xfc]  }
 0x14a   : > { %v10248_v11 = vpop.f32.mrf.mxu1  ;;  %10636 = vmatpush3.bf16.msra.mxu1 %v11648_v63 }
 0x14b   : > { %v12758_v15 = vadd.f32 %v1141_v35, %v860_v33  ;;  %v10304_v14 = vpop.f32.mrf.mxu0  ;;  %10725 = vmatprep.subr.bf16.mxu1 %v11962_v1  ;;  %v550_v35 = vld [vmem:[#allocation2 + $0x60] sm:$0xf] }
 0x14c   : > { %v832_v18 = vpop.f32.mrf.mxu1  ;;  %10550 = vmatmul.mubr.bf16.gmra.mxu1 %v11626_v43  ;;  %v3060_v43 = vshrl.u32 %v11642_v17, 16 }
 0x14d   : > { %v861_v19 = vadd.f32 %v832_v18, %v12560_v32  ;;  %10553 = vmatprep.mubr.msk.bf16.mxu1 %vm11963_vm0, %v11962_v1  ;;  %v1154_v22 = vpop.f32.mrf.mxu0  ;;  %10606 = vmatmul.mubr.bf16.gmra.mxu0 %v3043_v12  ;;  %v11654_v12 = vld [vmem:[%s12023_s27 + $0x14] sm:$0xff]  }
 0x14e   : > { %v10251_v21 = vpop.f32.mrf.mxu1  ;;  %10609 = vmatprep.mubr.msk.bf16.mxu0 %vm11963_vm0, %v11962_v1  ;;  %v3673_v27 = vrot.slane %v11654_v12, 2 }
 0x14f   : > { %v12768_v45 = vadd.f32 %v1146_v61, %v861_v19  ;;  %v10307_v28 = vpop.f32.mrf.mxu0 }
 0x150   : > { %v835_v32 = vpop.f32.mrf.mxu1 }
 0x151   : > { %v862_v30 = vadd.f32 %v835_v32, %v12570_v42  ;;  %v1157_v23 = vpop.f32.mrf.mxu0  ;;  %v3054_v42 = vor.u32 %v3052_v34, %v3050_v20  ;;  %v11645_v34 = vld [vmem:[%s12023_s27 + $0x48] sm:$0x3f]  }
 0x152   : > { %v10252_v36 = vpop.f32.mrf.mxu1 }
 0x153   : > { %v12773_v38 = vadd.f32 %v1149_v10, %v862_v30  ;;  %v10308_v39 = vpop.f32.mrf.mxu0  ;;  %v3059_v3 = vsel %vm613_vm2, %v3054_v42, %v3058_v46  ;;  %v11650_v30 = vld [vmem:[%s12023_s27 + $0x8] sm:$0xfe]  }
 0x154   : > { %v840_v41 = vpop.f32.mrf.mxu1  ;;  %10554 = vmatmul.mubr.bf16.gmra.mxu1 %v11629_v26  ;;  %v3672_v26 = vrot.slane %v11653_v4, 2 }
 0x155   : > { %v863_v44 = vadd.f32 %v840_v41, %v12576_v53  ;;  %10557 = vmatprep.mubr.msk.bf16.mxu1 %vm11963_vm0, %v11962_v1  ;;  %v1781_v48 = vpop.f32.mrf.mxu0  ;;  %10610 = vmatmul.mubr.bf16.gmra.mxu0 %v3051_v37  ;;  %v11667_v37 = vld [vmem:[%s14513_s1 + $0x338] sm:$0xff]  }
 0x156   : > { %v10255_v49 = vpop.f32.mrf.mxu1  ;;  %10613 = vmatprep.mubr.msk.bf16.mxu0 %vm11963_vm0, %v11962_v1 }
 0x157   : > { %v12781_v51 = vadd.f32 %v1154_v22, %v863_v44  ;;  %v10379_v52 = vpop.f32.mrf.mxu0 }
 0x158   : > { %v843_v58 = vpop.f32.mrf.mxu1 }
 0x159   : > { %v864_v59 = vadd.f32 %v843_v58, %v550_v35  ;;  %v1784_v53 = vpop.f32.mrf.mxu0  ;;  %v3359_v35 = vrot.slane %v11650_v30, 1 }
 0x15a   : > { %v10256_v56 = vpop.f32.mrf.mxu1 }
 0x15b   : > { %882 = vst [vmem:[#allocation2 + $0x60] sm:$0xf] %v864_v59  ;;  %v10380_v61 = vpop.f32.mrf.mxu0 }
 0x15c   : > { %v1467_v62 = vpop.f32.mrf.mxu1  ;;  %10558 = vmatmul.mubr.bf16.gmra.mxu1 %v11633_v50  ;;  %v12835_v61 = vld [vmem:[%s12023_s27 + $0x24] sm:$0xff]  }
 0x15d   : > { %v1538_v63 = vadd.f32 %v1467_v62, %v12592_v25  ;;  %10561 = vmatprep.mubr.msk.bf16.mxu1 %vm11963_vm0, %v11962_v1  ;;  %v1789_v0 = vpop.f32.mrf.mxu0  ;;  %10614 = vmatmul.mubr.bf16.gmra.mxu0 %v3059_v3  ;;  %v3062_v25 = vor.u32 %v3060_v43, %v3058_v46  ;;  %v12832_v3 = vld [vmem:[%s12023_s27 + $0x18] sm:$0xff]  }
 0x15e   : > { %v10327_v2 = vpop.f32.mrf.mxu1  ;;  %10617 = vmatprep.mubr.msk.bf16.mxu0 %vm11963_vm0, %v11962_v1 }
 0x15f   : > { %v12789_v13 = vadd.f32 %v1781_v48, %v1538_v63  ;;  %v10383_v8 = vpop.f32.mrf.mxu0  ;;  %v3674_v48 = vsel %vm1672_vm3, %v3672_v26, %v3673_v27  ;;  %v11663_v63 = vld [vmem:[%s14513_s1 + $0x2f8] sm:$0xff]   ;;  %v12870_v26 = vld [vmem:[%s12023_s27 + $0x2c] sm:$0xff]  }
 0x160   : > { %v1470_v33 = vpop.f32.mrf.mxu1 }
 0x161   : > { %v1539_v10 = vadd.f32 %v1470_v33, %v12598_v40  ;;  %v1792_v11 = vpop.f32.mrf.mxu0 }
 0x162   : > { %v918_v14 = vld [vmem:[#allocation2 + $0x60] sm:$0xf]  ;;  %v10328_v18 = vpop.f32.mrf.mxu1 }
 0x163   : > { %v1178_v19 = vadd.f32 %v1157_v23, %v918_v14  ;;  %v12795_v17 = vadd.f32 %v1784_v53, %v1539_v10  ;;  %v10384_v22 = vpop.f32.mrf.mxu0  ;;  %v12807_v23 = vld [vmem:[%s12023_s27 + $0x10] sm:$0xff]   ;;  %v11673_v10 = vld [vmem:[%s14513_s1 + $0x328] sm:$0xff]   ;;  %v3677_v14 = vrot.slane %v12835_v61, 2 }
 0x164   : > { %v1475_v20 = vpop.f32.mrf.mxu1  ;;  %10562 = vmatmul.mubr.bf16.gmra.mxu1 %v11639_v7  ;;  %v3360_v52 = vrot.slane %v12807_v23, 1  ;;  %v11670_v53 = vld [vmem:[%s14513_s1 + $0x330] sm:$0xff]  }
 0x165   : > { %1196 = vst [vmem:[#allocation2 + $0x60] sm:$0xf] %v1178_v19  ;;  %v1540_v21 = vadd.f32 %v1475_v20, %v12606_v54  ;;  %10565 = vmatprep.mubr.msk.bf16.mxu1 %vm11963_vm0, %v11962_v1  ;;  %v1797_v40 = vpop.f32.mrf.mxu0  ;;  %10618 = vmatmul.mubr.bf16.gmra.mxu0 %v3062_v25  ;;  %v12810_v54 = vld [vmem:[%s12023_s27 + $0x1c] sm:$0xff]   ;;  %v3362_v25 = vrot.slane %v12832_v3, 1  ;;  %v11666_v18 = vld [vmem:[%s14513_s1 + $0x2f0] sm:$0xff]  }
 0x166   : > { %v10331_v28 = vpop.f32.mrf.mxu1  ;;  %10689 = vmatprep.mubr.msk.bf16.mxu0 %vm11963_vm0, %v11962_v1  ;;  %v3675_v59 = vrot.slane %v12810_v54, 2  ;;  %v3361_v43 = vsel %vm981_vm1, %v3359_v35, %v3360_v52  ;;  %v12863_v20 = vld [vmem:[%s12023_s27 + $0x20] sm:$0xff]   ;;  %v12899_v35 = vld [vmem:[%s12023_s27 + $0x28] sm:$0xff]  }
 0x167   : > { %v12803_v31 = vadd.f32 %v1789_v0, %v1540_v21  ;;  %v10387_v32 = vpop.f32.mrf.mxu0  ;;  %v11676_v21 = vld [vmem:[%s14513_s1 + $0x320] sm:$0xff]   ;;  %v3363_v28 = vsel %vm981_vm1, %v3360_v52, %v3362_v25  ;;  %v11681_v52 = vld [vmem:[%s14513_s1 + $0x310] sm:$0xff]  }
 0x168   : > { %v1478_v36 = vpop.f32.mrf.mxu1  ;;  %v3676_v8 = vsel %vm1672_vm3, %v3673_v27, %v3675_v59  ;;  %v11669_v32 = vld [vmem:[%s14513_s1 + $0x2e8] sm:$0xff]   ;;  %v3678_v23 = vsel %vm1672_vm3, %v3675_v59, %v3677_v14  ;;  %v11675_v59 = vld [vmem:[%s14513_s1 + $0x2d8] sm:$0xff]  }
 0x169   : > { %v1541_v39 = vadd.f32 %v1478_v36, %v12614_v5  ;;  %v1800_v41 = vpop.f32.mrf.mxu0 }
 0x16a   : > { %v10332_v44 = vpop.f32.mrf.mxu1 }
 0x16b   : > { %v12817_v46 = vadd.f32 %v1792_v11, %v1541_v39  ;;  %v10388_v49 = vpop.f32.mrf.mxu0 }
 0x16c   : > { %v1483_v50 = vpop.f32.mrf.mxu1  ;;  %10566 = vmatmul.mubr.bf16.gmra.mxu1 %v11645_v34  ;;  %v3679_v49 = vrot.slane %v12870_v26, 2 }
 0x16d   : > { %v1542_v42 = vadd.f32 %v1483_v50, %v12627_v16  ;;  %10637 = vmatprep.mubr.msk.bf16.mxu1 %vm11963_vm0, %v11962_v1  ;;  %v1805_v5 = vpop.f32.mrf.mxu0  ;;  %10690 = vmatmul.mubr.bf16.vlgmr.msra.gmra.mxu0 %v3674_v48  ;;  %v11672_v50 = vld [vmem:[%s14513_s1 + $0x2e0] sm:$0xff]  }
 0x16e   : > { %v10335_v58 = vpop.f32.mrf.mxu1  ;;  %10693 = vmatprep.mubr.msk.bf16.mxu0 %vm11963_vm0, %v11962_v1  ;;  %10778 = vmatpush3.bf16.msra.mxu0 %v11667_v37 }
 0x16f   : > { %v12829_v16 = vadd.f32 %v1797_v40, %v1542_v42  ;;  %v10391_v56 = vpop.f32.mrf.mxu0  ;;  %10779 = vmatprep.subr.bf16.mxu0 %v11962_v1  ;;  %v12906_v58 = vld [vmem:[%s12023_s27 + $0x34] sm:$0xff]  }
 0x170   : > { %v1486_v62 = vpop.f32.mrf.mxu1 }
 0x171   : > { %v1543_v0 = vadd.f32 %v1486_v62, %v12637_v29  ;;  %v1808_v2 = vpop.f32.mrf.mxu0  ;;  %v3680_v62 = vsel %vm1672_vm3, %v3677_v14, %v3679_v49 }
 0x172   : > { %v10336_v7 = vpop.f32.mrf.mxu1  ;;  %10780 = vmatpush3.bf16.msra.mxu0 %v11670_v53 }
 0x173   : > { %v12844_v4 = vadd.f32 %v1800_v41, %v1543_v0  ;;  %v10392_v33 = vpop.f32.mrf.mxu0  ;;  %10781 = vmatprep.subr.bf16.mxu0 %v11962_v1  ;;  %v3364_v41 = vrot.slane %v12863_v20, 1  ;;  %v3366_v7 = vrot.slane %v12899_v35, 1 }
 0x174   : > { %v1491_v11 = vpop.f32.mrf.mxu1  ;;  %10638 = vmatmul.mubr.bf16.vlgmr.msra.gmra.mxu1 %v3361_v43  ;;  %v11683_v43 = vld [vmem:[%s14513_s1 + $0x308] sm:$0xff]  }
 0x175   : > { %v1544_v29 = vadd.f32 %v1491_v11, %v12654_v47  ;;  %10641 = vmatprep.mubr.msk.bf16.mxu1 %vm11963_vm0, %v11962_v1  ;;  %v1813_v12 = vpop.f32.mrf.mxu0  ;;  %10694 = vmatmul.mubr.bf16.gmra.mxu0 %v3676_v8  ;;  %v3365_v56 = vsel %vm981_vm1, %v3362_v25, %v3364_v41  ;;  %v11678_v11 = vld [vmem:[%s14513_s1 + $0x2d0] sm:$0xff]   ;;  %v3367_v20 = vsel %vm981_vm1, %v3364_v41, %v3366_v7 }
 0x176   : > { %v10339_v19 = vpop.f32.mrf.mxu1  ;;  %10697 = vmatprep.mubr.msk.bf16.mxu0 %vm11963_vm0, %v11962_v1  ;;  %10726 = vmatpush3.bf16.msra.mxu1 %v11663_v63  ;;  %v12935_v25 = vld [vmem:[%s12023_s27 + $0x30] sm:$0xff]  }
 0x177   : > { %v12860_v47 = vadd.f32 %v1805_v5, %v1544_v29  ;;  %v10395_v22 = vpop.f32.mrf.mxu0  ;;  %10727 = vmatprep.subr.bf16.mxu1 %v11962_v1  ;;  %10782 = vmatpush3.bf16.msra.mxu0 %v11673_v10  ;;  %v3681_v10 = vrot.slane %v12906_v58, 2  ;;  %v11680_v19 = vld [vmem:[%s14513_s1 + $0x2c8] sm:$0xff]  }
 0x178   : > { %v1494_v40 = vpop.f32.mrf.mxu1  ;;  %10783 = vmatprep.subr.bf16.mxu0 %v11962_v1 }
 0x179   : > { %v1545_v27 = vadd.f32 %v1494_v40, %v12669_v60  ;;  %v1816_v34 = vpop.f32.mrf.mxu0  ;;  %v11679_v60 = vld [vmem:[%s14513_s1 + $0x318] sm:$0xff]   ;;  %v3682_v26 = vsel %vm1672_vm3, %v3679_v49, %v3681_v10 }
 0x17a   : > { %v10340_v30 = vpop.f32.mrf.mxu1  ;;  %10728 = vmatpush3.bf16.msra.mxu1 %v11666_v18  ;;  %v11665_v18 = vld [vmem:[%s12023_s27 + $0x3c] sm:$0xff]  }
 0x17b   : > { %v12879_v36 = vadd.f32 %v1808_v2, %v1545_v27  ;;  %v10396_v54 = vpop.f32.mrf.mxu0  ;;  %10729 = vmatprep.subr.bf16.mxu1 %v11962_v1  ;;  %10784 = vmatpush3.bf16.msra.mxu0 %v11676_v21 }
 0x17c   : > { %v1499_v37 = vpop.f32.mrf.mxu1  ;;  %10642 = vmatmul.mubr.bf16.gmra.mxu1 %v3363_v28  ;;  %10785 = vmatprep.subr.bf16.mxu0 %v11962_v1  ;;  %v3683_v54 = vrot.slane %v11665_v18, 2 }
 0x17d   : > { %v1546_v39 = vadd.f32 %v1499_v37, %v12687_v9  ;;  %10645 = vmatprep.mubr.msk.bf16.mxu1 %vm11963_vm0, %v11962_v1  ;;  %v1821_v44 = vpop.f32.mrf.mxu0  ;;  %10698 = vmatmul.mubr.bf16.gmra.mxu0 %v3678_v23 }
 0x17e   : > { %v10343_v48 = vpop.f32.mrf.mxu1  ;;  %10701 = vmatprep.mubr.msk.bf16.mxu0 %vm11963_vm0, %v11962_v1  ;;  %10730 = vmatpush3.bf16.msra.mxu1 %v11669_v32  ;;  %v3368_v32 = vrot.slane %v12935_v25, 1  ;;  %v3684_v35 = vsel %vm1672_vm3, %v3681_v10, %v3683_v54 }
 0x17f   : > { %v12896_v9 = vadd.f32 %v1813_v12, %v1546_v39  ;;  %v10399_v42 = vpop.f32.mrf.mxu0  ;;  %10731 = vmatprep.subr.bf16.mxu1 %v11962_v1  ;;  %10786 = vmatpush3.bf16.msra.mxu0 %v11679_v60  ;;  %v11686_v12 = vld [vmem:[%s14513_s1 + $0x300] sm:$0xff]   ;;  %v11664_v39 = vld [vmem:[%s12023_s27 + $0x38] sm:$0xff]  }
 0x180   : > { %v1502_v5 = vpop.f32.mrf.mxu1  ;;  %10787 = vmatprep.subr.bf16.mxu0 %v11962_v1  ;;  %v11682_v60 = vld [vmem:[%s14513_s1 + $0x2c0] sm:$0xff]   ;;  %v3369_v49 = vsel %vm981_vm1, %v3366_v7, %v3368_v32 }
 0x181   : > { %v1547_v53 = vadd.f32 %v1502_v5, %v12702_v24  ;;  %v1824_v3 = vpop.f32.mrf.mxu0 }
 0x182   : > { %v10344_v61 = vpop.f32.mrf.mxu1  ;;  %10732 = vmatpush3.bf16.msra.mxu1 %v11672_v50 }
 0x183   : > { %v12915_v63 = vadd.f32 %v1816_v34, %v1547_v53  ;;  %v10400_v0 = vpop.f32.mrf.mxu0  ;;  %10733 = vmatprep.subr.bf16.mxu1 %v11962_v1  ;;  %10788 = vmatpush3.bf16.msra.mxu0 %v11681_v52 }
 0x184   : > { %v1507_v2 = vpop.f32.mrf.mxu1  ;;  %10646 = vmatmul.mubr.bf16.gmra.mxu1 %v3365_v56  ;;  %10789 = vmatprep.subr.bf16.mxu0 %v11962_v1  ;;  %v11668_v0 = vld [vmem:[%s12023_s27 + $0x40] sm:$0xff]  }
 0x185   : > { %v1548_v24 = vadd.f32 %v1507_v2, %v12722_v55  ;;  %10649 = vmatprep.mubr.msk.bf16.mxu1 %vm11963_vm0, %v11962_v1  ;;  %v1829_v8 = vpop.f32.mrf.mxu0  ;;  %10702 = vmatmul.mubr.bf16.gmra.mxu0 %v3680_v62  ;;  %v11677_v2 = vld [vmem:[%s12023_s27 + $0x4c] sm:$0xff]  }
 0x186   : > { %v10347_v33 = vpop.f32.mrf.mxu1  ;;  %10705 = vmatprep.mubr.msk.bf16.mxu0 %vm11963_vm0, %v11962_v1  ;;  %10734 = vmatpush3.bf16.msra.mxu1 %v11675_v59  ;;  %v3687_v18 = vrot.slane %v11677_v2, 2 }
 0x187   : > { %v12932_v55 = vadd.f32 %v1821_v44, %v1548_v24  ;;  %v10403_v29 = vpop.f32.mrf.mxu0  ;;  %10735 = vmatprep.subr.bf16.mxu1 %v11962_v1  ;;  %10790 = vmatpush3.bf16.msra.mxu0 %v11683_v43  ;;  %v11671_v44 = vld [vmem:[%s12023_s27 + $0x44] sm:$0xff]  }
 0x188   : > { %v1510_v14 = vpop.f32.mrf.mxu1  ;;  %10791 = vmatprep.subr.bf16.mxu0 %v11962_v1 }
 0x189   : > { %v1549_v22 = vadd.f32 %v1510_v14, %v12735_v57  ;;  %v1832_v21 = vpop.f32.mrf.mxu0 }
 0x18a   : > { %v10348_v40 = vpop.f32.mrf.mxu1  ;;  %10736 = vmatpush3.bf16.msra.mxu1 %v11678_v11 }
 0x18b   : > { %v12949_v27 = vadd.f32 %v1824_v3, %v1549_v22  ;;  %v10404_v28 = vpop.f32.mrf.mxu0  ;;  %10737 = vmatprep.subr.bf16.mxu1 %v11962_v1  ;;  %10792 = vmatpush3.bf16.msra.mxu0 %v11686_v12  ;;  %v3685_v3 = vrot.slane %v11671_v44, 2  ;;  %v3372_v12 = vrot.slane %v11668_v0, 1 }
 0x18c   : > { %v1515_v34 = vpop.f32.mrf.mxu1  ;;  %10650 = vmatmul.mubr.bf16.gmra.mxu1 %v3367_v20  ;;  %10881 = vmatprep.subr.bf16.mxu0 %v11962_v1  ;;  %v11674_v28 = vld [vmem:[%s12023_s27 + $0x48] sm:$0x7f]  }
 0x18d   : > { %v1550_v57 = vadd.f32 %v1515_v34, %v12751_v6  ;;  %10653 = vmatprep.mubr.msk.bf16.mxu1 %vm11963_vm0, %v11962_v1  ;;  %v1837_v30 = vpop.f32.mrf.mxu0  ;;  %10706 = vmatmul.mubr.bf16.gmra.mxu0 %v3682_v26  ;;  %v3686_v33 = vsel %vm1672_vm3, %v3683_v54, %v3685_v3  ;;  %v3374_v54 = vrot.slane %v11674_v28, 1 }
 0x18e   : > { %v10351_v23 = vpop.f32.mrf.mxu1  ;;  %10709 = vmatprep.mubr.msk.bf16.mxu0 %vm11963_vm0, %v11962_v1  ;;  %10738 = vmatpush3.bf16.msra.mxu1 %v11680_v19  ;;  %v1232_v19 = vld [vmem:[#allocation2 + $0x60] sm:$0xf] }
 0x18f   : > { %v12962_v37 = vadd.f32 %v1829_v8, %v1550_v57  ;;  %v10407_v6 = vpop.f32.mrf.mxu0  ;;  %10739 = vmatprep.subr.bf16.mxu1 %v11962_v1  ;;  %v3688_v57 = vsel %vm1672_vm3, %v3685_v3, %v3687_v18 }
 0x190   : > { %v1518_v41 = vpop.f32.mrf.mxu1 }
 0x191   : > { %v1551_v48 = vadd.f32 %v1518_v41, %v12758_v15  ;;  %v1840_v50 = vpop.f32.mrf.mxu0  ;;  %v3370_v15 = vrot.slane %v11664_v39, 1 }
 0x192   : > { %v10352_v42 = vpop.f32.mrf.mxu1  ;;  %10740 = vmatpush3.bf16.msra.mxu1 %v11682_v60 }
 0x193   : > { %v12970_v52 = vadd.f32 %v1832_v21, %v1551_v48  ;;  %v10408_v5 = vpop.f32.mrf.mxu0  ;;  %10829 = vmatprep.subr.bf16.mxu1 %v11962_v1  ;;  %v3373_v26 = vsel %vm981_vm1, %v3370_v15, %v3372_v12  ;;  %v11684_v48 = vld [vmem:[%s12023_s27 + $0xc] sm:$0xfc]   ;;  %v11685_v42 = vld [vmem:[%s12023_s27 + $0x14] sm:$0xff]  }
 0x194   : > { %v1523_v58 = vpop.f32.mrf.mxu1  ;;  %10654 = vmatmul.mubr.bf16.gmra.mxu1 %v3369_v49  ;;  %v3994_v0 = vshll.u32 %v11684_v48, 16  ;;  %v3999_v2 = vshrl.u32 %v11685_v42, 16 }
 0x195   : > { %v1552_v59 = vadd.f32 %v1523_v58, %v12768_v45  ;;  %10657 = vmatprep.mubr.msk.bf16.mxu1 %vm11963_vm0, %v11962_v1  ;;  %v1845_v53 = vpop.f32.mrf.mxu0  ;;  %10710 = vmatmul.mubr.bf16.gmra.mxu0 %v3684_v35  ;;  %v3371_v45 = vsel %vm981_vm1, %v3368_v32, %v3370_v15  ;;  %v11687_v58 = vld [vmem:[%s12023_s27 + $0xc] sm:$0xf8]  }
 0x196   : > { %v10355_v56 = vpop.f32.mrf.mxu1  ;;  %10713 = vmatprep.mubr.msk.bf16.mxu0 %vm11963_vm0, %v11962_v1 }
 0x197   : > { %v12978_v61 = vadd.f32 %v1837_v30, %v1552_v59  ;;  %v10411_v62 = vpop.f32.mrf.mxu0  ;;  %v13010_v59 = vld [vmem:[%s12023_s27 + $0x14] sm:$0xff]  }
 0x198   : > { %v1526_v43 = vpop.f32.mrf.mxu1  ;;  %v3991_v62 = vshrl.u32 %v11684_v48, 16 }
 0x199   : > { %v1553_v24 = vadd.f32 %v1526_v43, %v12773_v38  ;;  %v1848_v7 = vpop.f32.mrf.mxu0 }
 0x19a   : > { %v10356_v8 = vpop.f32.mrf.mxu1 }
 0x19b   : > { %v12985_v10 = vadd.f32 %v1840_v50, %v1553_v24  ;;  %v10412_v11 = vpop.f32.mrf.mxu0  ;;  %v4002_v24 = vshll.u32 %v11685_v42, 16  ;;  %v4376_v8 = vrot.slane %v13010_v59, 3 }
 0x19c   : > { %v1531_v29 = vpop.f32.mrf.mxu1  ;;  %10658 = vmatmul.mubr.bf16.gmra.mxu1 %v3371_v45 }
 0x19d   : > { %v1554_v25 = vadd.f32 %v1531_v29, %v12781_v51  ;;  %10661 = vmatprep.mubr.msk.bf16.mxu1 %vm11963_vm0, %v11962_v1  ;;  %v2491_v14 = vpop.f32.mrf.mxu0  ;;  %10714 = vmatmul.mubr.bf16.gmra.mxu0 %v3686_v33  ;;  %v3993_v29 = vrot.slane %v3991_v62, 2 }
 0x19e   : > { %v10359_v38 = vpop.f32.mrf.mxu1  ;;  %10717 = vmatprep.mubr.msk.bf16.mxu0 %vm11963_vm0, %v11962_v1 }
 0x19f   : > { %v12992_v22 = vadd.f32 %v1845_v53, %v1554_v25  ;;  %v10483_v20 = vpop.f32.mrf.mxu0  ;;  %v3996_v25 = vrot.slane %v3994_v0, 3  ;;  %v4001_v38 = vrot.slane %v3999_v2, 2 }
 0x1a0   : > { %v1534_v21 = vpop.f32.mrf.mxu1 }
 0x1a1   : > { %v1555_v40 = vadd.f32 %v1534_v21, %v1232_v19  ;;  %v2494_v51 = vpop.f32.mrf.mxu0  ;;  %v11689_v19 = vld [vmem:[%s12023_s27 + $0x1c] sm:$0xff]  }
 0x1a2   : > { %v10360_v34 = vpop.f32.mrf.mxu1 }
 0x1a3   : > { %1573 = vst [vmem:[#allocation2 + $0x60] sm:$0xf] %v1555_v40  ;;  %v10484_v32 = vpop.f32.mrf.mxu0  ;;  %v13026_v40 = vld [vmem:[%s12023_s27 + $0x1c] sm:$0xff]  }
 0x1a4   : > { %v2101_v30 = vpop.f32.mrf.mxu1  ;;  %10662 = vmatmul.mubr.bf16.gmra.mxu1 %v3373_v26  ;;  %v11701_v26 = vld [vmem:[%s14513_s1 + $0x3b8] sm:$0xff]  }
 0x1a5   : > { %v2172_v23 = vadd.f32 %v2101_v30, %v12789_v13  ;;  %10665 = vmatprep.mubr.msk.bf16.mxu1 %vm11963_vm0, %v11962_v1  ;;  %v2499_v60 = vpop.f32.mrf.mxu0  ;;  %10718 = vmatmul.mubr.bf16.gmra.mxu0 %v3688_v57  ;;  %v3375_v13 = vsel %vm981_vm1, %v3372_v12, %v3374_v54  ;;  %v3997_v57 = vor.u32 %v3996_v25, %v3993_v29  ;;  %v11710_v29 = vld [vmem:[%s14513_s1 + $0x3a0] sm:$0xff]  }
 0x1a6   : > { %v10431_v6 = vpop.f32.mrf.mxu1  ;;  %10721 = vmatprep.mubr.msk.bf16.mxu0 %vm11963_vm0, %v11962_v1 }
 0x1a7   : > { %v13002_v39 = vadd.f32 %v2491_v14, %v2172_v23  ;;  %v10487_v41 = vpop.f32.mrf.mxu0  ;;  %v4008_v23 = vshrl.u32 %v11689_v19, 16 }
 0x1a8   : > { %v2104_v44 = vpop.f32.mrf.mxu1 }
 0x1a9   : > { %v2173_v49 = vadd.f32 %v2104_v44, %v12795_v17  ;;  %v2502_v50 = vpop.f32.mrf.mxu0  ;;  %v4010_v42 = vrot.slane %v4008_v23, 2 }
 0x1aa   : > { %v1609_v35 = vld [vmem:[#allocation2 + $0x60] sm:$0xf]  ;;  %v10432_v5 = vpop.f32.mrf.mxu1 }
 0x1ab   : > { %v1869_v15 = vadd.f32 %v1848_v7, %v1609_v35  ;;  %v13012_v53 = vadd.f32 %v2494_v51, %v2173_v49  ;;  %v10488_v56 = vpop.f32.mrf.mxu0  ;;  %v4375_v7 = vrot.slane %v11687_v58, 3  ;;  %v11691_v5 = vld [vmem:[%s12023_s27 + $0x24] sm:$0xff]  }
 0x1ac   : > { %v2109_v3 = vpop.f32.mrf.mxu1  ;;  %10666 = vmatmul.mubr.bf16.gmra.mxu1 %v3375_v13  ;;  %v11697_v56 = vld [vmem:[%s14513_s1 + $0x378] sm:$0xff]  }
 0x1ad   : > { %1887 = vst [vmem:[#allocation2 + $0x60] sm:$0xf] %v1869_v15  ;;  %v2174_v17 = vadd.f32 %v2109_v3, %v12803_v31  ;;  %10669 = vmatprep.mubr.msk.bf16.mxu1 %vm11963_vm0, %v11962_v1  ;;  %v2507_v43 = vpop.f32.mrf.mxu0  ;;  %10722 = vmatmul.mubr.bf16.gmra.mxu0 %v3687_v18  ;;  %v4004_v18 = vrot.slane %v4002_v24, 3  ;;  %v4377_v21 = vsel %vm1990_vm6, %v4375_v7, %v4376_v8  ;;  %v13050_v15 = vld [vmem:[%s12023_s27 + $0x24] sm:$0xff]   ;;  %v4017_v24 = vshrl.u32 %v11691_v5, 16 }
 0x1ae   : > { %v10435_v45 = vpop.f32.mrf.mxu1  ;;  %10793 = vmatprep.mubr.msk.bf16.mxu0 %vm11963_vm0, %v11962_v1 }
 0x1af   : > { %v13020_v33 = vadd.f32 %v2499_v60, %v2174_v17  ;;  %v10491_v11 = vpop.f32.mrf.mxu0  ;;  %v4005_v32 = vor.u32 %v4004_v18, %v4001_v38  ;;  %v4011_v60 = vshll.u32 %v11689_v19, 16  ;;  %v4020_v45 = vshll.u32 %v11691_v5, 16 }
 0x1b0   : > { %v2112_v31 = vpop.f32.mrf.mxu1  ;;  %v4019_v18 = vrot.slane %v4017_v24, 2 }
 0x1b1   : > { %v2175_v12 = vadd.f32 %v2112_v31, %v12817_v46  ;;  %v2510_v14 = vpop.f32.mrf.mxu0  ;;  %v4006_v13 = vsel %vm3989_vm7, %v3997_v57, %v4005_v32  ;;  %v4013_v35 = vrot.slane %v4011_v60, 3  ;;  %v4022_v19 = vrot.slane %v4020_v45, 3 }
 0x1b2   : > { %v10436_v20 = vpop.f32.mrf.mxu1 }
 0x1b3   : > { %v13031_v51 = vadd.f32 %v2502_v50, %v2175_v12  ;;  %v10492_v28 = vpop.f32.mrf.mxu0  ;;  %v11693_v20 = vld [vmem:[%s12023_s27 + $0x2c] sm:$0xff]  }
 0x1b4   : > { %v2117_v34 = vpop.f32.mrf.mxu1  ;;  %10670 = vmatmul.mubr.bf16.gmra.mxu1 %v3374_v54  ;;  %v4378_v54 = vrot.slane %v13026_v40, 3  ;;  %v11703_v28 = vld [vmem:[%s14513_s1 + $0x368] sm:$0xff]   ;;  %v4026_v60 = vshrl.u32 %v11693_v20, 16 }
 0x1b5   : > { %v2176_v46 = vadd.f32 %v2117_v34, %v12829_v16  ;;  %10741 = vmatprep.mubr.msk.bf16.mxu1 %vm11963_vm0, %v11962_v1  ;;  %v2515_v30 = vpop.f32.mrf.mxu0  ;;  %10794 = vmatmul.mubr.bf16.vlgmr.msra.gmra.mxu0 %v4377_v21  ;;  %v11704_v16 = vld [vmem:[%s14513_s1 + $0x3b0] sm:$0xff]  }
 0x1b6   : > { %v10439_v6 = vpop.f32.mrf.mxu1  ;;  %10797 = vmatprep.mubr.msk.bf16.mxu0 %vm11963_vm0, %v11962_v1  ;;  %10882 = vmatpush3.bf16.msra.mxu0 %v11701_v26  ;;  %v4379_v59 = vsel %vm1990_vm6, %v4376_v8, %v4378_v54  ;;  %v4380_v8 = vrot.slane %v13050_v15, 3  ;;  %v13082_v26 = vld [vmem:[%s12023_s27 + $0x2c] sm:$0xff]   ;;  %v4028_v5 = vrot.slane %v4026_v60, 2 }
 0x1b7   : > { %v13042_v41 = vadd.f32 %v2507_v43, %v2176_v46  ;;  %v10495_v44 = vpop.f32.mrf.mxu0  ;;  %10883 = vmatprep.subr.bf16.mxu0 %v11962_v1  ;;  %v4014_v43 = vor.u32 %v4013_v35, %v4010_v42  ;;  %v4029_v6 = vshll.u32 %v11693_v20, 16 }
 0x1b8   : > { %v2120_v48 = vpop.f32.mrf.mxu1  ;;  %v4381_v40 = vsel %vm1990_vm6, %v4378_v54, %v4380_v8 }
 0x1b9   : > { %v2177_v49 = vadd.f32 %v2120_v48, %v12844_v4  ;;  %v2518_v50 = vpop.f32.mrf.mxu0  ;;  %v11707_v4 = vld [vmem:[%s14513_s1 + $0x3a8] sm:$0xff]  }
 0x1ba   : > { %v10440_v58 = vpop.f32.mrf.mxu1  ;;  %10884 = vmatpush3.bf16.msra.mxu0 %v11704_v16  ;;  %v4382_v16 = vrot.slane %v13082_v26, 3 }
 0x1bb   : > { %v13055_v3 = vadd.f32 %v2510_v14, %v2177_v49  ;;  %v10496_v62 = vpop.f32.mrf.mxu0  ;;  %10885 = vmatprep.subr.bf16.mxu0 %v11962_v1  ;;  %v4015_v14 = vsel %vm3989_vm7, %v4005_v32, %v4014_v43  ;;  %v11716_v49 = vld [vmem:[%s14513_s1 + $0x390] sm:$0xff]   ;;  %v4031_v58 = vrot.slane %v4029_v6, 3 }
 0x1bc   : > { %v2125_v0 = vpop.f32.mrf.mxu1  ;;  %10742 = vmatmul.mubr.bf16.vlgmr.msra.gmra.mxu1 %v4006_v13  ;;  %v13115_v62 = vld [vmem:[%s12023_s27 + $0x34] sm:$0xff]  }
 0x1bd   : > { %v2178_v17 = vadd.f32 %v2125_v0, %v12860_v47  ;;  %10745 = vmatprep.mubr.msk.bf16.mxu1 %vm11963_vm0, %v11962_v1  ;;  %v2523_v2 = vpop.f32.mrf.mxu0  ;;  %10798 = vmatmul.mubr.bf16.gmra.mxu0 %v4379_v59  ;;  %v11700_v47 = vld [vmem:[%s14513_s1 + $0x370] sm:$0xff]   ;;  %v4032_v24 = vor.u32 %v4031_v58, %v4028_v5 }
 0x1be   : > { %v10443_v7 = vpop.f32.mrf.mxu1  ;;  %10801 = vmatprep.mubr.msk.bf16.mxu0 %vm11963_vm0, %v11962_v1  ;;  %10830 = vmatpush3.bf16.msra.mxu1 %v11697_v56  ;;  %v11695_v59 = vld [vmem:[%s12023_s27 + $0x34] sm:$0xff]   ;;  %v4383_v56 = vsel %vm1990_vm6, %v4380_v8, %v4382_v16 }
 0x1bf   : > { %v13070_v11 = vadd.f32 %v2515_v30, %v2178_v17  ;;  %v10499_v31 = vpop.f32.mrf.mxu0  ;;  %10831 = vmatprep.subr.bf16.mxu1 %v11962_v1  ;;  %10886 = vmatpush3.bf16.msra.mxu0 %v11707_v4  ;;  %v4023_v30 = vor.u32 %v4022_v19, %v4019_v18  ;;  %v11709_v4 = vld [vmem:[%s14513_s1 + $0x358] sm:$0xff]   ;;  %v4035_v7 = vshrl.u32 %v11695_v59, 16  ;;  %v4038_v8 = vshll.u32 %v11695_v59, 16  ;;  %v11702_v59 = vld [vmem:[%s12023_s27 + $0x44] sm:$0xff]  }
 0x1c0   : > { %v2128_v25 = vpop.f32.mrf.mxu1  ;;  %10887 = vmatprep.subr.bf16.mxu0 %v11962_v1  ;;  %v4384_v31 = vrot.slane %v13115_v62, 3  ;;  %v11705_v62 = vld [vmem:[%s12023_s27 + $0x44] sm:$0xff]  }
 0x1c1   : > { %v2179_v12 = vadd.f32 %v2128_v25, %v12879_v36  ;;  %v2526_v38 = vpop.f32.mrf.mxu0  ;;  %v11713_v36 = vld [vmem:[%s14513_s1 + $0x398] sm:$0xff]   ;;  %v4024_v42 = vsel %vm3989_vm7, %v4014_v43, %v4023_v30  ;;  %v4033_v18 = vsel %vm3989_vm7, %v4023_v30, %v4032_v24  ;;  %v4037_v20 = vrot.slane %v4035_v7, 2 }
 0x1c2   : > { %v10444_v21 = vpop.f32.mrf.mxu1  ;;  %10832 = vmatpush3.bf16.msra.mxu1 %v11700_v47 }
 0x1c3   : > { %v13087_v34 = vadd.f32 %v2518_v50, %v2179_v12  ;;  %v10500_v57 = vpop.f32.mrf.mxu0  ;;  %10833 = vmatprep.subr.bf16.mxu1 %v11962_v1  ;;  %10888 = vmatpush3.bf16.msra.mxu0 %v11710_v29  ;;  %v11722_v12 = vld [vmem:[%s14513_s1 + $0x380] sm:$0xff]   ;;  %v4040_v21 = vrot.slane %v4038_v8, 3  ;;  %v4388_v8 = vrot.slane %v11705_v62, 3  ;;  %v11714_v62 = vld [vmem:[%s12023_s27 + $0x54] ss:$0 sps:$4 sm:$0x11]  }
 0x1c4   : > { %v2133_v46 = vpop.f32.mrf.mxu1  ;;  %10746 = vmatmul.mubr.bf16.gmra.mxu1 %v4015_v14  ;;  %10889 = vmatprep.subr.bf16.mxu0 %v11962_v1  ;;  %v13148_v57 = vld [vmem:[%s12023_s27 + $0x3c] sm:$0xff]  }
 0x1c5   : > { %v2180_v32 = vadd.f32 %v2133_v46, %v12896_v9  ;;  %10749 = vmatprep.mubr.msk.bf16.mxu1 %vm11963_vm0, %v11962_v1  ;;  %v2531_v23 = vpop.f32.mrf.mxu0  ;;  %10802 = vmatmul.mubr.bf16.gmra.mxu0 %v4381_v40  ;;  %v11706_v9 = vld [vmem:[%s14513_s1 + $0x360] sm:$0xff]  }
 0x1c6   : > { %v10447_v54 = vpop.f32.mrf.mxu1  ;;  %10805 = vmatprep.mubr.msk.bf16.mxu0 %vm11963_vm0, %v11962_v1  ;;  %10834 = vmatpush3.bf16.msra.mxu1 %v11703_v28  ;;  %v11698_v40 = vld [vmem:[%s12023_s27 + $0x3c] sm:$0xff]   ;;  %v4385_v28 = vsel %vm1990_vm6, %v4382_v16, %v4384_v31 }
 0x1c7   : > { %v13103_v44 = vadd.f32 %v2523_v2, %v2180_v32  ;;  %v10503_v48 = vpop.f32.mrf.mxu0  ;;  %10835 = vmatprep.subr.bf16.mxu1 %v11962_v1  ;;  %10890 = vmatpush3.bf16.msra.mxu0 %v11713_v36  ;;  %v11715_v36 = vld [vmem:[%s14513_s1 + $0x348] sm:$0xff]   ;;  %v4044_v6 = vshrl.u32 %v11698_v40, 16  ;;  %v4047_v54 = vshll.u32 %v11698_v40, 16 }
 0x1c8   : > { %v2136_v13 = vpop.f32.mrf.mxu1  ;;  %10891 = vmatprep.subr.bf16.mxu0 %v11962_v1 }
 0x1c9   : > { %v2181_v50 = vadd.f32 %v2136_v13, %v12915_v63  ;;  %v2534_v35 = vpop.f32.mrf.mxu0  ;;  %v11719_v63 = vld [vmem:[%s14513_s1 + $0x388] sm:$0xff]   ;;  %v4046_v5 = vrot.slane %v4044_v6, 2  ;;  %v4049_v58 = vrot.slane %v4047_v54, 3  ;;  %v1924_v54 = vld [vmem:[#allocation2 + $0x60] sm:$0xf] }
 0x1ca   : > { %v10448_v15 = vpop.f32.mrf.mxu1  ;;  %10836 = vmatpush3.bf16.msra.mxu1 %v11706_v9  ;;  %v4386_v9 = vrot.slane %v13148_v57, 3 }
 0x1cb   : > { %v13120_v0 = vadd.f32 %v2526_v38, %v2181_v50  ;;  %v10504_v17 = vpop.f32.mrf.mxu0  ;;  %10837 = vmatprep.subr.bf16.mxu1 %v11962_v1  ;;  %10892 = vmatpush3.bf16.msra.mxu0 %v11716_v49 }
 0x1cc   : > { %v2141_v43 = vpop.f32.mrf.mxu1  ;;  %10750 = vmatmul.mubr.bf16.gmra.mxu1 %v4024_v42  ;;  %10893 = vmatprep.subr.bf16.mxu0 %v11962_v1 }
 0x1cd   : > { %v2182_v2 = vadd.f32 %v2141_v43, %v12932_v55  ;;  %10753 = vmatprep.mubr.msk.bf16.mxu1 %vm11963_vm0, %v11962_v1  ;;  %v2539_v45 = vpop.f32.mrf.mxu0  ;;  %10806 = vmatmul.mubr.bf16.gmra.mxu0 %v4383_v56  ;;  %v11712_v55 = vld [vmem:[%s14513_s1 + $0x350] sm:$0xff]   ;;  %v4387_v56 = vsel %vm1990_vm6, %v4384_v31, %v4386_v9  ;;  %v4050_v43 = vor.u32 %v4049_v58, %v4046_v5 }
 0x1ce   : > { %v10451_v47 = vpop.f32.mrf.mxu1  ;;  %10809 = vmatprep.mubr.msk.bf16.mxu0 %vm11963_vm0, %v11962_v1  ;;  %10838 = vmatpush3.bf16.msra.mxu1 %v11709_v4 }
 0x1cf   : > { %v13136_v29 = vadd.f32 %v2531_v23, %v2182_v2  ;;  %v10507_v25 = vpop.f32.mrf.mxu0  ;;  %10839 = vmatprep.subr.bf16.mxu1 %v11962_v1  ;;  %10894 = vmatpush3.bf16.msra.mxu0 %v11719_v63  ;;  %v4041_v23 = vor.u32 %v4040_v21, %v4037_v20  ;;  %v4389_v20 = vsel %vm1990_vm6, %v4386_v9, %v4388_v8  ;;  %v11711_v21 = vld [vmem:[%s12023_s27 + $0x4c] sm:$0xff]  }
 0x1d0   : > { %v2144_v14 = vpop.f32.mrf.mxu1  ;;  %10895 = vmatprep.subr.bf16.mxu0 %v11962_v1 }
 0x1d1   : > { %v2183_v38 = vadd.f32 %v2144_v14, %v12949_v27  ;;  %v2542_v19 = vpop.f32.mrf.mxu0  ;;  %v4042_v42 = vsel %vm3989_vm7, %v4032_v24, %v4041_v23  ;;  %v4053_v24 = vshrl.u32 %v11702_v59, 16  ;;  %v4051_v25 = vsel %vm3989_vm7, %v4041_v23, %v4050_v43 }
 0x1d2   : > { %v10452_v26 = vpop.f32.mrf.mxu1  ;;  %10840 = vmatpush3.bf16.msra.mxu1 %v11712_v55  ;;  %v4390_v23 = vrot.slane %v11711_v21, 3 }
 0x1d3   : > { %v13153_v46 = vadd.f32 %v2534_v35, %v2183_v38  ;;  %v10508_v32 = vpop.f32.mrf.mxu0  ;;  %10841 = vmatprep.subr.bf16.mxu1 %v11962_v1  ;;  %10896 = vmatpush3.bf16.msra.mxu0 %v11722_v12  ;;  %v4055_v14 = vrot.slane %v4053_v24, 2  ;;  %v11720_v24 = vld [vmem:[%s12023_s27 + $0xc] sm:$0xf8]  }
 0x1d4   : > { %v2149_v27 = vpop.f32.mrf.mxu1  ;;  %10754 = vmatmul.mubr.bf16.gmra.mxu1 %v4033_v18  ;;  %10985 = vmatprep.subr.bf16.mxu0 %v11962_v1  ;;  %v11708_v18 = vld [vmem:[%s12023_s27 + $0x4c] sm:$0xff]   ;;  %v4698_v21 = vshll.u32 %v11720_v24, 16 }
 0x1d5   : > { %v2184_v30 = vadd.f32 %v2149_v27, %v12962_v37  ;;  %10757 = vmatprep.mubr.msk.bf16.mxu1 %vm11963_vm0, %v11962_v1  ;;  %v2547_v60 = vpop.f32.mrf.mxu0  ;;  %10810 = vmatmul.mubr.bf16.gmra.mxu0 %v4385_v28  ;;  %v11718_v37 = vld [vmem:[%s14513_s1 + $0x340] sm:$0xff]   ;;  %v4062_v32 = vshrl.u32 %v11708_v18, 16  ;;  %v4065_v27 = vshll.u32 %v11708_v18, 16 }
 0x1d6   : > { %v10455_v16 = vpop.f32.mrf.mxu1  ;;  %10813 = vmatprep.mubr.msk.bf16.mxu0 %vm11963_vm0, %v11962_v1  ;;  %10842 = vmatpush3.bf16.msra.mxu1 %v11715_v36 }
 0x1d7   : > { %v13166_v48 = vadd.f32 %v2539_v45, %v2184_v30  ;;  %v10511_v49 = vpop.f32.mrf.mxu0  ;;  %10843 = vmatprep.subr.bf16.mxu1 %v11962_v1  ;;  %v4056_v45 = vshll.u32 %v11702_v59, 16 }
 0x1d8   : > { %v2152_v13 = vpop.f32.mrf.mxu1  ;;  %v4064_v49 = vrot.slane %v4062_v32, 2 }
 0x1d9   : > { %v2185_v50 = vadd.f32 %v2152_v13, %v12970_v52  ;;  %v2550_v35 = vpop.f32.mrf.mxu0  ;;  %v4058_v38 = vrot.slane %v4056_v45, 3  ;;  %v4067_v13 = vrot.slane %v4065_v27, 3 }
 0x1da   : > { %v10456_v15 = vpop.f32.mrf.mxu1  ;;  %10844 = vmatpush3.bf16.msra.mxu1 %v11718_v37 }
 0x1db   : > { %v13174_v4 = vadd.f32 %v2542_v19, %v2185_v50  ;;  %v10512_v17 = vpop.f32.mrf.mxu0  ;;  %10933 = vmatprep.subr.bf16.mxu1 %v11962_v1  ;;  %v4068_v15 = vor.u32 %v4067_v13, %v4064_v49  ;;  %v11736_v13 = vld [vmem:[%s14513_s1 + $0x438] sm:$0xff]  }
 0x1dc   : > { %v2157_v63 = vpop.f32.mrf.mxu1  ;;  %10758 = vmatmul.mubr.bf16.gmra.mxu1 %v4042_v42  ;;  %v4391_v42 = vsel %vm1990_vm6, %v4388_v8, %v4390_v23  ;;  %v4071_v8 = vshll.u32 %v11714_v62, 16 }
 0x1dd   : > { %v2186_v52 = vadd.f32 %v2157_v63, %v12978_v61  ;;  %10761 = vmatprep.mubr.msk.bf16.mxu1 %vm11963_vm0, %v11962_v1  ;;  %v2555_v2 = vpop.f32.mrf.mxu0  ;;  %10814 = vmatmul.mubr.bf16.gmra.mxu0 %v4387_v56 }
 0x1de   : > { %v10459_v7 = vpop.f32.mrf.mxu1  ;;  %10817 = vmatprep.mubr.msk.bf16.mxu0 %vm11963_vm0, %v11962_v1 }
 0x1df   : > { %v13182_v47 = vadd.f32 %v2547_v60, %v2186_v52  ;;  %v10515_v31 = vpop.f32.mrf.mxu0 }
 0x1e0   : > { %v2160_v55 = vpop.f32.mrf.mxu1  ;;  %v11721_v31 = vld [vmem:[%s12023_s27 + $0x14] sm:$0xff]  }
 0x1e1   : > { %v2187_v61 = vadd.f32 %v2160_v55, %v12985_v10  ;;  %v2558_v12 = vpop.f32.mrf.mxu0  ;;  %v4059_v10 = vor.u32 %v4058_v38, %v4055_v14 }
 0x1e2   : > { %v10460_v19 = vpop.f32.mrf.mxu1 }
 0x1e3   : > { %v13189_v40 = vadd.f32 %v2550_v35, %v2187_v61  ;;  %v10516_v26 = vpop.f32.mrf.mxu0  ;;  %v4060_v9 = vsel %vm3989_vm7, %v4050_v43, %v4059_v10  ;;  %v11717_v35 = vld [vmem:[%s12023_s27 + $0x54] ss:$0 sps:$4 sm:$0x11]   ;;  %v4069_v45 = vsel %vm3989_vm7, %v4059_v10, %v4068_v15 }
 0x1e4   : > { %v2165_v28 = vpop.f32.mrf.mxu1  ;;  %10762 = vmatmul.mubr.bf16.gmra.mxu1 %v4051_v25  ;;  %v4392_v63 = vrot.slane %v11717_v35, 3  ;;  %v4073_v26 = vrot.slane %v4071_v8, 3  ;;  %v11725_v8 = vld [vmem:[%s12023_s27 + $0x18] sm:$0xff]  }
 0x1e5   : > { %v2188_v57 = vadd.f32 %v2165_v28, %v12992_v22  ;;  %10765 = vmatprep.mubr.msk.bf16.mxu1 %vm11963_vm0, %v11962_v1  ;;  %v3154_v36 = vpop.f32.mrf.mxu0  ;;  %10818 = vmatmul.mubr.bf16.gmra.mxu0 %v4389_v20  ;;  %v4695_v20 = vshrl.u32 %v11720_v24, 16 }
 0x1e6   : > { %v10463_v30 = vpop.f32.mrf.mxu1  ;;  %10821 = vmatprep.mubr.msk.bf16.mxu0 %vm11963_vm0, %v11962_v1  ;;  %v4393_v25 = vsel %vm1990_vm6, %v4390_v23, %v4392_v63 }
 0x1e7   : > { %v13196_v60 = vadd.f32 %v2555_v2, %v2188_v57  ;;  %v10587_v6 = vpop.f32.mrf.mxu0  ;;  %v4703_v57 = vshrl.u32 %v11721_v31, 16  ;;  %v4697_v30 = vrot.slane %v4695_v20, 3 }
 0x1e8   : > { %v2168_v16 = vpop.f32.mrf.mxu1  ;;  %v4074_v6 = vsel %vm3989_vm7, %v4068_v15, %v4073_v26 }
 0x1e9   : > { %v2189_v22 = vadd.f32 %v2168_v16, %v1924_v54  ;;  %v3157_v37 = vpop.f32.mrf.mxu0  ;;  %v4705_v16 = vrot.slane %v4703_v57, 3  ;;  %v11735_v57 = vld [vmem:[%s14513_s1 + $0x3f0] sm:$0xff]  }
 0x1ea   : > { %v10464_v50 = vpop.f32.mrf.mxu1 }
 0x1eb   : > { %2207 = vst [vmem:[#allocation2 + $0x60] sm:$0xf] %v2189_v22  ;;  %v10588_v5 = vpop.f32.mrf.mxu0 }
 0x1ec   : > { %v2787_v58 = vpop.f32.mrf.mxu1  ;;  %10766 = vmatmul.mubr.bf16.gmra.mxu1 %v4060_v9  ;;  %v11723_v9 = vld [vmem:[%s12023_s27 + $0x10] sm:$0xff]  }
 0x1ed   : > { %v2858_v59 = vadd.f32 %v2787_v58, %v13002_v39  ;;  %10769 = vmatprep.mubr.msk.bf16.mxu1 %vm11963_vm0, %v11962_v1  ;;  %v3162_v56 = vpop.f32.mrf.mxu0  ;;  %10822 = vmatmul.mubr.bf16.gmra.mxu0 %v4391_v42 }
 0x1ee   : > { %v10535_v17 = vpop.f32.mrf.mxu1  ;;  %10825 = vmatprep.mubr.msk.bf16.mxu0 %vm11963_vm0, %v11962_v1 }
 0x1ef   : > { %v13207_v52 = vadd.f32 %v3154_v36, %v2858_v59  ;;  %v10591_v43 = vpop.f32.mrf.mxu0  ;;  %v11739_v17 = vld [vmem:[%s14513_s1 + $0x430] sm:$0xff]  }
 0x1f0   : > { %v2790_v2 = vpop.f32.mrf.mxu1 }
 0x1f1   : > { %v2859_v39 = vadd.f32 %v2790_v2, %v13012_v53  ;;  %v3165_v7 = vpop.f32.mrf.mxu0 }
 0x1f2   : > { %v2244_v55 = vld [vmem:[#allocation2 + $0x60] sm:$0xf]  ;;  %v10536_v61 = vpop.f32.mrf.mxu1 }
 0x1f3   : > { %v2579_v14 = vadd.f32 %v2558_v12, %v2244_v55  ;;  %v13214_v38 = vadd.f32 %v3157_v37, %v2859_v39  ;;  %v10592_v18 = vpop.f32.mrf.mxu0  ;;  %v4706_v12 = vshll.u32 %v11721_v31, 16  ;;  %v11724_v37 = vld [vmem:[%s12023_s27 + $0x1c] sm:$0xff]   ;;  %v11726_v31 = vld [vmem:[%s12023_s27 + $0x24] sm:$0xff]  }
 0x1f4   : > { %v2795_v19 = vpop.f32.mrf.mxu1  ;;  %10770 = vmatmul.mubr.bf16.gmra.mxu1 %v4069_v45  ;;  %v4712_v15 = vshrl.u32 %v11724_v37, 16  ;;  %v11732_v61 = vld [vmem:[%s14513_s1 + $0x3f8] sm:$0xff]   ;;  %v4724_v26 = vshll.u32 %v11726_v31, 16 }
 0x1f5   : > { %2597 = vst [vmem:[#allocation2 + $0x60] sm:$0xf] %v2579_v14  ;;  %v2860_v53 = vadd.f32 %v2795_v19, %v13020_v33  ;;  %10773 = vmatprep.mubr.msk.bf16.mxu1 %vm11963_vm0, %v11962_v1  ;;  %v3170_v28 = vpop.f32.mrf.mxu0  ;;  %10826 = vmatmul.mubr.bf16.gmra.mxu0 %v4393_v25  ;;  %v4700_v33 = vrot.slane %v4698_v21, 4  ;;  %v4708_v22 = vrot.slane %v4706_v12, 4 }
 0x1f6   : > { %v10539_v10 = vpop.f32.mrf.mxu1  ;;  %10897 = vmatprep.mubr.msk.bf16.mxu0 %vm11963_vm0, %v11962_v1  ;;  %v4714_v45 = vrot.slane %v4712_v15, 3  ;;  %v11741_v15 = vld [vmem:[%s14513_s1 + $0x3e0] sm:$0xff]  }
 0x1f7   : > { %v13221_v36 = vadd.f32 %v3162_v56, %v2860_v53  ;;  %v10595_v32 = vpop.f32.mrf.mxu0  ;;  %v4701_v5 = vor.u32 %v4700_v33, %v4697_v30  ;;  %v4709_v58 = vor.u32 %v4708_v22, %v4705_v16  ;;  %v4715_v56 = vshll.u32 %v11724_v37, 16  ;;  %v11745_v10 = vld [vmem:[%s14513_s1 + $0x420] sm:$0xff]   ;;  %v11728_v16 = vld [vmem:[%s12023_s27 + $0x2c] sm:$0xff]  }
 0x1f8   : > { %v2798_v27 = vpop.f32.mrf.mxu1  ;;  %v4721_v53 = vshrl.u32 %v11726_v31, 16  ;;  %v11744_v31 = vld [vmem:[%s14513_s1 + $0x3d8] sm:$0xff]  }
 0x1f9   : > { %v2861_v23 = vadd.f32 %v2798_v27, %v13031_v51  ;;  %v3173_v54 = vpop.f32.mrf.mxu0  ;;  %v4710_v24 = vsel %vm2310_vm5, %v4701_v5, %v4709_v58 }
 0x1fa   : > { %v10540_v49 = vpop.f32.mrf.mxu1 }
 0x1fb   : > { %v13230_v50 = vadd.f32 %v3165_v7, %v2861_v23  ;;  %v10596_v42 = vpop.f32.mrf.mxu0  ;;  %v4717_v7 = vrot.slane %v4715_v56, 4  ;;  %v4723_v23 = vrot.slane %v4721_v53, 3 }
 0x1fc   : > { %v2803_v35 = vpop.f32.mrf.mxu1  ;;  %10774 = vmatmul.mubr.bf16.gmra.mxu1 %v4074_v6  ;;  %v4726_v6 = vrot.slane %v4724_v26, 4  ;;  %v11747_v26 = vld [vmem:[%s14513_s1 + $0x3d0] sm:$0xff]  }
 0x1fd   : > { %v2862_v51 = vadd.f32 %v2803_v35, %v13042_v41  ;;  %10845 = vmatprep.mubr.msk.bf16.mxu1 %vm11963_vm0, %v11962_v1  ;;  %v3178_v59 = vpop.f32.mrf.mxu0  ;;  %10898 = vmatmul.mubr.bf16.vlgmr.msra.gmra.mxu0 %v11723_v9  ;;  %v4718_v20 = vor.u32 %v4717_v7, %v4714_v45  ;;  %v11738_v9 = vld [vmem:[%s14513_s1 + $0x3e8] sm:$0xff]   ;;  %v11730_v7 = vld [vmem:[%s12023_s27 + $0x34] sm:$0xff]  }
 0x1fe   : > { %v10543_v62 = vpop.f32.mrf.mxu1  ;;  %10901 = vmatprep.mubr.msk.bf16.mxu0 %vm11963_vm0, %v11962_v1  ;;  %10986 = vmatpush3.bf16.msra.mxu0 %v11736_v13  ;;  %v4727_v35 = vor.u32 %v4726_v6, %v4723_v23  ;;  %v11729_v45 = vld [vmem:[%s12023_s27 + $0x28] sm:$0xff]   ;;  %v11731_v23 = vld [vmem:[%s12023_s27 + $0x30] sm:$0xff]   ;;  %v11733_v6 = vld [vmem:[%s12023_s27 + $0x3c] sm:$0xff]  }
 0x1ff   : > { %v13240_v41 = vadd.f32 %v3170_v28, %v2862_v51  ;;  %v10599_v63 = vpop.f32.mrf.mxu0  ;;  %10987 = vmatprep.subr.bf16.mxu0 %v11962_v1  ;;  %v4719_v30 = vsel %vm2310_vm5, %v4709_v58, %v4718_v20  ;;  %v4730_v51 = vshrl.u32 %v11728_v16, 16  ;;  %v4733_v58 = vshll.u32 %v11728_v16, 16  ;;  %v11751_v62 = vld [vmem:[%s14513_s1 + $0x410] sm:$0xff]   ;;  %v11750_v16 = vld [vmem:[%s14513_s1 + $0x3c8] sm:$0xff]  }
 0x200   : > { %v2806_v43 = vpop.f32.mrf.mxu1 }
 0x201   : > { %v2863_v2 = vadd.f32 %v2806_v43, %v13055_v3  ;;  %v3181_v39 = vpop.f32.mrf.mxu0  ;;  %v11742_v3 = vld [vmem:[%s14513_s1 + $0x428] sm:$0xff]   ;;  %v4728_v43 = vsel %vm2310_vm5, %v4718_v20, %v4727_v35  ;;  %v4739_v20 = vshrl.u32 %v11730_v7, 16 }
 0x202   : > { %v10544_v55 = vpop.f32.mrf.mxu1  ;;  %10988 = vmatpush3.bf16.msra.mxu0 %v11739_v17 }
 0x203   : > { %v13250_v25 = vadd.f32 %v3173_v54, %v2863_v2  ;;  %v10600_v14 = vpop.f32.mrf.mxu0  ;;  %10989 = vmatprep.subr.bf16.mxu0 %v11962_v1  ;;  %v11727_v54 = vld [vmem:[%s12023_s27 + $0x20] sm:$0xff]  }
 0x204   : > { %v2811_v18 = vpop.f32.mrf.mxu1  ;;  %10846 = vmatmul.mubr.bf16.vlgmr.msra.gmra.mxu1 %v4710_v24  ;;  %v4732_v24 = vrot.slane %v4730_v51, 3  ;;  %v11753_v51 = vld [vmem:[%s14513_s1 + $0x3c0] sm:$0xff]  }
 0x205   : > { %v2864_v19 = vadd.f32 %v2811_v18, %v13070_v11  ;;  %10849 = vmatprep.mubr.msk.bf16.mxu1 %vm11963_vm0, %v11962_v1  ;;  %v3186_v21 = vpop.f32.mrf.mxu0  ;;  %10902 = vmatmul.mubr.bf16.gmra.mxu0 %v11725_v8 }
 0x206   : > { %v10547_v28 = vpop.f32.mrf.mxu1  ;;  %10905 = vmatprep.mubr.msk.bf16.mxu0 %vm11963_vm0, %v11962_v1  ;;  %10934 = vmatpush3.bf16.msra.mxu1 %v11732_v61 }
 0x207   : > { %v13264_v11 = vadd.f32 %v3178_v59, %v2864_v19  ;;  %v10603_v12 = vpop.f32.mrf.mxu0  ;;  %10935 = vmatprep.subr.bf16.mxu1 %v11962_v1  ;;  %10990 = vmatpush3.bf16.msra.mxu0 %v11742_v3 }
 0x208   : > { %v2814_v32 = vpop.f32.mrf.mxu1  ;;  %10991 = vmatprep.subr.bf16.mxu0 %v11962_v1 }
 0x209   : > { %v2865_v27 = vadd.f32 %v2814_v32, %v13087_v34  ;;  %v3189_v33 = vpop.f32.mrf.mxu0  ;;  %v11748_v34 = vld [vmem:[%s14513_s1 + $0x418] sm:$0xff]  }
 0x20a   : > { %v10548_v22 = vpop.f32.mrf.mxu1  ;;  %10936 = vmatpush3.bf16.msra.mxu1 %v11735_v57  ;;  %v11757_v57 = vld [vmem:[%s14513_s1 + $0x400] sm:$0xff]  }
 0x20b   : > { %v13278_v37 = vadd.f32 %v3181_v39, %v2865_v27  ;;  %v10604_v49 = vpop.f32.mrf.mxu0  ;;  %10937 = vmatprep.subr.bf16.mxu1 %v11962_v1  ;;  %10992 = vmatpush3.bf16.msra.mxu0 %v11745_v10  ;;  %v4735_v39 = vrot.slane %v4733_v58, 4 }
 0x20c   : > { %v2819_v13 = vpop.f32.mrf.mxu1  ;;  %10850 = vmatmul.mubr.bf16.gmra.mxu1 %v4719_v30  ;;  %10993 = vmatprep.subr.bf16.mxu0 %v11962_v1  ;;  %v4741_v30 = vrot.slane %v4739_v20, 3  ;;  %v11743_v20 = vld [vmem:[%s12023_s27 + $0x4c] sm:$0xff]  }
 0x20d   : > { %v2866_v42 = vadd.f32 %v2819_v13, %v13103_v44  ;;  %10853 = vmatprep.mubr.msk.bf16.mxu1 %vm11963_vm0, %v11962_v1  ;;  %v3194_v5 = vpop.f32.mrf.mxu0  ;;  %10906 = vmatmul.mubr.bf16.gmra.mxu0 %v11727_v54  ;;  %v4736_v18 = vor.u32 %v4735_v39, %v4732_v24 }
 0x20e   : > { %v10551_v59 = vpop.f32.mrf.mxu1  ;;  %10909 = vmatprep.mubr.msk.bf16.mxu0 %vm11963_vm0, %v11962_v1  ;;  %10938 = vmatpush3.bf16.msra.mxu1 %v11738_v9 }
 0x20f   : > { %v13293_v44 = vadd.f32 %v3186_v21, %v2866_v42  ;;  %v10607_v56 = vpop.f32.mrf.mxu0  ;;  %10939 = vmatprep.subr.bf16.mxu1 %v11962_v1  ;;  %10994 = vmatpush3.bf16.msra.mxu0 %v11748_v34  ;;  %v4742_v21 = vshll.u32 %v11730_v7, 16  ;;  %v4737_v32 = vsel %vm2310_vm5, %v4727_v35, %v4736_v18  ;;  %v4748_v42 = vshrl.u32 %v11733_v6, 16 }
 0x210   : > { %v2822_v17 = vpop.f32.mrf.mxu1  ;;  %10995 = vmatprep.subr.bf16.mxu0 %v11962_v1  ;;  %v4751_v35 = vshll.u32 %v11733_v6, 16 }
 0x211   : > { %v2867_v63 = vadd.f32 %v2822_v17, %v13120_v0  ;;  %v3197_v2 = vpop.f32.mrf.mxu0  ;;  %v11754_v0 = vld [vmem:[%s14513_s1 + $0x408] sm:$0xff]   ;;  %v4750_v17 = vrot.slane %v4748_v42, 3 }
 0x212   : > { %v10552_v8 = vpop.f32.mrf.mxu1  ;;  %10940 = vmatpush3.bf16.msra.mxu1 %v11741_v15 }
 0x213   : > { %v13307_v55 = vadd.f32 %v3189_v33, %v2867_v63  ;;  %v10608_v61 = vpop.f32.mrf.mxu0  ;;  %10941 = vmatprep.subr.bf16.mxu1 %v11962_v1  ;;  %10996 = vmatpush3.bf16.msra.mxu0 %v11751_v62  ;;  %v4744_v33 = vrot.slane %v4742_v21, 4  ;;  %v4753_v63 = vrot.slane %v4751_v35, 4 }
 0x214   : > { %v2827_v14 = vpop.f32.mrf.mxu1  ;;  %10854 = vmatmul.mubr.bf16.gmra.mxu1 %v4728_v43  ;;  %10997 = vmatprep.subr.bf16.mxu0 %v11962_v1  ;;  %v11734_v43 = vld [vmem:[%s12023_s27 + $0x38] sm:$0xff]  }
 0x215   : > { %v2868_v3 = vadd.f32 %v2827_v14, %v13136_v29  ;;  %10857 = vmatprep.mubr.msk.bf16.mxu1 %vm11963_vm0, %v11962_v1  ;;  %v3202_v19 = vpop.f32.mrf.mxu0  ;;  %10910 = vmatmul.mubr.bf16.gmra.mxu0 %v11729_v45  ;;  %v4745_v34 = vor.u32 %v4744_v33, %v4741_v30  ;;  %v4766_v30 = vshrl.u32 %v11743_v20, 16  ;;  %v4769_v33 = vshll.u32 %v11743_v20, 16 }
 0x216   : > { %v10555_v53 = vpop.f32.mrf.mxu1  ;;  %10913 = vmatprep.mubr.msk.bf16.mxu0 %vm11963_vm0, %v11962_v1  ;;  %10942 = vmatpush3.bf16.msra.mxu1 %v11744_v31 }
 0x217   : > { %v13322_v29 = vadd.f32 %v3194_v5, %v2868_v3  ;;  %v10611_v28 = vpop.f32.mrf.mxu0  ;;  %10943 = vmatprep.subr.bf16.mxu1 %v11962_v1  ;;  %10998 = vmatpush3.bf16.msra.mxu0 %v11754_v0  ;;  %v4746_v56 = vsel %vm2310_vm5, %v4736_v18, %v4745_v34 }
 0x218   : > { %v2830_v12 = vpop.f32.mrf.mxu1  ;;  %10999 = vmatprep.subr.bf16.mxu0 %v11962_v1 }
 0x219   : > { %v2869_v10 = vadd.f32 %v2830_v12, %v13153_v46  ;;  %v3205_v27 = vpop.f32.mrf.mxu0 }
 0x21a   : > { %v10556_v54 = vpop.f32.mrf.mxu1  ;;  %10944 = vmatpush3.bf16.msra.mxu1 %v11747_v26 }
 0x21b   : > { %v13336_v22 = vadd.f32 %v3197_v2, %v2869_v10  ;;  %v10612_v9 = vpop.f32.mrf.mxu0  ;;  %10945 = vmatprep.subr.bf16.mxu1 %v11962_v1  ;;  %11000 = vmatpush3.bf16.msra.mxu0 %v11757_v57  ;;  %v11737_v2 = vld [vmem:[%s12023_s27 + $0x44] sm:$0xff]  }
 0x21c   : > { %v2835_v46 = vpop.f32.mrf.mxu1  ;;  %10858 = vmatmul.mubr.bf16.gmra.mxu1 %v4737_v32  ;;  %11089 = vmatprep.subr.bf16.mxu0 %v11962_v1  ;;  %v4757_v61 = vshrl.u32 %v11737_v2, 16  ;;  %v4760_v0 = vshll.u32 %v11737_v2, 16  ;;  %v11740_v57 = vld [vmem:[%s12023_s27 + $0x40] sm:$0xff]  }
 0x21d   : > { %v2870_v49 = vadd.f32 %v2835_v46, %v13166_v48  ;;  %10861 = vmatprep.mubr.msk.bf16.mxu1 %vm11963_vm0, %v11962_v1  ;;  %v3210_v13 = vpop.f32.mrf.mxu0  ;;  %10914 = vmatmul.mubr.bf16.gmra.mxu0 %v11731_v23  ;;  %v2633_v46 = vld [vmem:[#allocation2 + $0x60] sm:$0xf] }
 0x21e   : > { %v10559_v5 = vpop.f32.mrf.mxu1  ;;  %10917 = vmatprep.mubr.msk.bf16.mxu0 %vm11963_vm0, %v11962_v1  ;;  %10946 = vmatpush3.bf16.msra.mxu1 %v11750_v16  ;;  %v4759_v26 = vrot.slane %v4757_v61, 3  ;;  %v4762_v28 = vrot.slane %v4760_v0, 4 }
 0x21f   : > { %v13348_v48 = vadd.f32 %v3202_v19, %v2870_v49  ;;  %v10615_v58 = vpop.f32.mrf.mxu0  ;;  %10947 = vmatprep.subr.bf16.mxu1 %v11962_v1  ;;  %v11746_v5 = vld [vmem:[%s12023_s27 + $0x48] sm:$0xff]  }
 0x220   : > { %v2838_v59 = vpop.f32.mrf.mxu1  ;;  %v11758_v58 = vld [vmem:[%s12023_s27 + $0x14] sm:$0xfe]  }
 0x221   : > { %v2871_v15 = vadd.f32 %v2838_v59, %v13174_v4  ;;  %v3213_v62 = vpop.f32.mrf.mxu0  ;;  %v4754_v4 = vor.u32 %v4753_v63, %v4750_v17 }
 0x222   : > { %v10560_v24 = vpop.f32.mrf.mxu1  ;;  %10948 = vmatpush3.bf16.msra.mxu1 %v11753_v51  ;;  %v11749_v51 = vld [vmem:[%s12023_s27 + $0x54] ss:$0 sps:$4 sm:$0x33]  }
 0x223   : > { %v13355_v39 = vadd.f32 %v3205_v27, %v2871_v15  ;;  %v10616_v45 = vpop.f32.mrf.mxu0  ;;  %11037 = vmatprep.subr.bf16.mxu1 %v11962_v1  ;;  %v4755_v21 = vsel %vm2310_vm5, %v4745_v34, %v4754_v4  ;;  %v4771_v34 = vrot.slane %v4769_v33, 4  ;;  %v11759_v15 = vld [vmem:[%s12023_s27 + $0x1c] sm:$0xff]   ;;  %v4775_v2 = vshrl.u32 %v11749_v51, 16 }
 0x224   : > { %v2843_v7 = vpop.f32.mrf.mxu1  ;;  %10862 = vmatmul.mubr.bf16.gmra.mxu1 %v4746_v56  ;;  %v4778_v24 = vshll.u32 %v11749_v51, 16  ;;  %v5689_v45 = vshrl.u32 %v11758_v58, 16 }
 0x225   : > { %v2872_v8 = vadd.f32 %v2843_v7, %v13182_v47  ;;  %10865 = vmatprep.mubr.msk.bf16.mxu1 %vm11963_vm0, %v11962_v1  ;;  %v3218_v31 = vpop.f32.mrf.mxu0  ;;  %10918 = vmatmul.mubr.bf16.gmra.mxu0 %v11734_v43  ;;  %v4777_v20 = vrot.slane %v4775_v2, 3  ;;  %v11763_v2 = vld [vmem:[%s12023_s27 + $0x2c] sm:$0xff]  }
 0x226   : > { %v10563_v14 = vpop.f32.mrf.mxu1  ;;  %10921 = vmatprep.mubr.msk.bf16.mxu0 %vm11963_vm0, %v11962_v1 }
 0x227   : > { %v13363_v3 = vadd.f32 %v3210_v13, %v2872_v8  ;;  %v10619_v18 = vpop.f32.mrf.mxu0  ;;  %v5692_v8 = vshll.u32 %v11758_v58, 16  ;;  %v11755_v58 = vld [vmem:[%s12023_s27 + $0x14] sm:$0xfe]  }
 0x228   : > { %v2846_v19 = vpop.f32.mrf.mxu1 }
 0x229   : > { %v2873_v47 = vadd.f32 %v2846_v19, %v13189_v40  ;;  %v13368_v53 = vpop.f32.mrf.mxu0  ;;  %v4763_v40 = vor.u32 %v4762_v28, %v4759_v26  ;;  %v5691_v26 = vrot.slane %v5689_v45, 1 }
 0x22a   : > { %v10564_v12 = vpop.f32.mrf.mxu1 }
 0x22b   : > { %v13371_v10 = vadd.f32 %v3213_v62, %v2873_v47  ;;  %v10620_v32 = vpop.f32.mrf.mxu0  ;;  %v4764_v42 = vsel %vm2310_vm5, %v4754_v4, %v4763_v40  ;;  %v5697_v4 = vshrl.u32 %v11759_v15, 16  ;;  %v4780_v47 = vrot.slane %v4778_v24, 4 }
 0x22c   : > { %v2851_v27 = vpop.f32.mrf.mxu1  ;;  %10866 = vmatmul.mubr.bf16.gmra.mxu1 %v4755_v21  ;;  %v11752_v21 = vld [vmem:[%s12023_s27 + $0x50] sm:$0x3f]   ;;  %v5694_v12 = vrot.slane %v5692_v8, 2 }
 0x22d   : > { %v2874_v23 = vadd.f32 %v2851_v27, %v13196_v60  ;;  %10869 = vmatprep.mubr.msk.bf16.mxu1 %vm11963_vm0, %v11962_v1  ;;  %v3780_v6 = vpop.f32.mrf.mxu0  ;;  %10922 = vmatmul.mubr.bf16.gmra.mxu0 %v11740_v57  ;;  %v4768_v60 = vrot.slane %v4766_v30, 3  ;;  %v5699_v32 = vrot.slane %v5697_v4, 1  ;;  %v11761_v30 = vld [vmem:[%s12023_s27 + $0x24] sm:$0xff]  }
 0x22e   : > { %v10567_v54 = vpop.f32.mrf.mxu1  ;;  %10925 = vmatprep.mubr.msk.bf16.mxu0 %vm11963_vm0, %v11962_v1 }
 0x22f   : > { %v13378_v16 = vadd.f32 %v3218_v31, %v2874_v23  ;;  %v10691_v9 = vpop.f32.mrf.mxu0  ;;  %v4772_v17 = vor.u32 %v4771_v34, %v4768_v60  ;;  %v5700_v31 = vshll.u32 %v11759_v15, 16  ;;  %v5706_v60 = vshrl.u32 %v11761_v30, 16 }
 0x230   : > { %v2854_v49 = vpop.f32.mrf.mxu1  ;;  %v5709_v34 = vshll.u32 %v11761_v30, 16  ;;  %v11765_v30 = vld [vmem:[%s12023_s27 + $0x34] sm:$0xff]  }
 0x231   : > { %v2875_v13 = vadd.f32 %v2854_v49, %v2633_v46  ;;  %v3783_v35 = vpop.f32.mrf.mxu0  ;;  %v4773_v14 = vsel %vm2310_vm5, %v4763_v40, %v4772_v17  ;;  %v5702_v27 = vrot.slane %v5700_v31, 2  ;;  %v4781_v40 = vor.u32 %v4780_v47, %v4777_v20 }
 0x232   : > { %v10568_v59 = vpop.f32.mrf.mxu1 }
 0x233   : > { %2893 = vst [vmem:[#allocation2 + $0x60] sm:$0xf] %v2875_v13  ;;  %v10692_v56 = vpop.f32.mrf.mxu0  ;;  %v5703_v49 = vor.u32 %v5702_v27, %v5699_v32  ;;  %v13410_v59 = vld [vmem:[%s12023_s27 + $0x1c] sm:$0xff]  }
 0x234   : > { %v3467_v62 = vpop.f32.mrf.mxu1  ;;  %10870 = vmatmul.mubr.bf16.gmra.mxu1 %v4764_v42  ;;  %v5376_v8 = vrot.slane %v13410_v59, 1 }
 0x235   : > { %v3538_v63 = vadd.f32 %v3467_v62, %v13207_v52  ;;  %10873 = vmatprep.mubr.msk.bf16.mxu1 %vm11963_vm0, %v11962_v1  ;;  %v3788_v43 = vpop.f32.mrf.mxu0  ;;  %10926 = vmatmul.mubr.bf16.gmra.mxu0 %v11746_v5  ;;  %v4782_v5 = vsel %vm2310_vm5, %v4772_v17, %v4781_v40  ;;  %v5708_v62 = vrot.slane %v5706_v60, 1  ;;  %v5724_v60 = vshrl.u32 %v11765_v30, 16 }
 0x236   : > { %v10639_v7 = vpop.f32.mrf.mxu1  ;;  %10929 = vmatprep.mubr.msk.bf16.mxu0 %vm11963_vm0, %v11962_v1 }
 0x237   : > { %v13390_v61 = vadd.f32 %v3780_v6, %v3538_v63  ;;  %v10695_v52 = vpop.f32.mrf.mxu0  ;;  %v5711_v63 = vrot.slane %v5709_v34, 2  ;;  %v5375_v7 = vrot.slane %v11755_v58, 1  ;;  %v5727_v34 = vshll.u32 %v11765_v30, 16 }
 0x238   : > { %v3470_v0 = vpop.f32.mrf.mxu1 }
 0x239   : > { %v3539_v18 = vadd.f32 %v3470_v0, %v13214_v38  ;;  %v3791_v19 = vpop.f32.mrf.mxu0  ;;  %v5712_v52 = vor.u32 %v5711_v63, %v5708_v62  ;;  %v5715_v0 = vshrl.u32 %v11763_v2, 16  ;;  %v5726_v63 = vrot.slane %v5724_v60, 1 }
 0x23a   : > { %v2929_v28 = vld [vmem:[#allocation2 + $0x60] sm:$0xf]  ;;  %v10640_v57 = vpop.f32.mrf.mxu1 }
 0x23b   : > { %v3242_v33 = vadd.f32 %v13368_v53, %v2929_v28  ;;  %v13397_v23 = vadd.f32 %v3783_v35, %v3539_v18  ;;  %v10696_v6 = vpop.f32.mrf.mxu0  ;;  %v5695_v53 = vor.u32 %v5694_v12, %v5691_v26  ;;  %v13434_v28 = vld [vmem:[%s12023_s27 + $0x24] sm:$0xff]   ;;  %v5713_v12 = vsel %vm1295_vm4, %v5703_v49, %v5712_v52 }
 0x23c   : > { %v3475_v54 = vpop.f32.mrf.mxu1  ;;  %10874 = vmatmul.mubr.bf16.gmra.mxu1 %v4773_v14  ;;  %v5718_v14 = vshll.u32 %v11763_v2, 16  ;;  %v5717_v32 = vrot.slane %v5715_v0, 1  ;;  %v5729_v2 = vrot.slane %v5727_v34, 2 }
 0x23d   : > { %3260 = vst [vmem:[#allocation2 + $0x60] sm:$0xf] %v3242_v33  ;;  %v3540_v38 = vadd.f32 %v3475_v54, %v13221_v36  ;;  %10877 = vmatprep.mubr.msk.bf16.mxu1 %vm11963_vm0, %v11962_v1  ;;  %v3796_v9 = vpop.f32.mrf.mxu0  ;;  %10930 = vmatmul.mubr.bf16.gmra.mxu0 %v11752_v21  ;;  %v5704_v56 = vsel %vm1295_vm4, %v5695_v53, %v5703_v49  ;;  %v11768_v33 = vld [vmem:[%s14513_s1 + $0x478] sm:$0xff]  }
 0x23e   : > { %v10643_v46 = vpop.f32.mrf.mxu1  ;;  %11001 = vmatprep.mubr.msk.bf16.mxu0 %vm11963_vm0, %v11962_v1  ;;  %v5377_v21 = vsel %vm981_vm1, %v5375_v7, %v5376_v8  ;;  %v5720_v27 = vrot.slane %v5718_v14, 2  ;;  %v5730_v0 = vor.u32 %v5729_v2, %v5726_v63 }
 0x23f   : > { %v13404_v13 = vadd.f32 %v3788_v43, %v3540_v38  ;;  %v10699_v36 = vpop.f32.mrf.mxu0  ;;  %v11772_v43 = vld [vmem:[%s14513_s1 + $0x4b8] sm:$0xff]  }
 0x240   : > { %v3478_v42 = vpop.f32.mrf.mxu1  ;;  %v5721_v49 = vor.u32 %v5720_v27, %v5717_v32 }
 0x241   : > { %v3541_v35 = vadd.f32 %v3478_v42, %v13230_v50  ;;  %v3799_v51 = vpop.f32.mrf.mxu0 }
 0x242   : > { %v10644_v15 = vpop.f32.mrf.mxu1  ;;  %v5722_v62 = vsel %vm1295_vm4, %v5712_v52, %v5721_v49  ;;  %v5731_v27 = vsel %vm1295_vm4, %v5721_v49, %v5730_v0 }
 0x243   : > { %v13417_v24 = vadd.f32 %v3791_v19, %v3541_v35  ;;  %v10700_v45 = vpop.f32.mrf.mxu0  ;;  %v11781_v35 = vld [vmem:[%s14513_s1 + $0x4a0] sm:$0xff]   ;;  %v13466_v15 = vld [vmem:[%s12023_s27 + $0x2c] sm:$0xff]  }
 0x244   : > { %v3483_v50 = vpop.f32.mrf.mxu1  ;;  %10878 = vmatmul.mubr.bf16.gmra.mxu1 %v4782_v5  ;;  %v11774_v45 = vld [vmem:[%s14513_s1 + $0x468] sm:$0xff]  }
 0x245   : > { %v3542_v17 = vadd.f32 %v3483_v50, %v13240_v41  ;;  %10949 = vmatprep.mubr.msk.bf16.mxu1 %vm11963_vm0, %v11962_v1  ;;  %v3804_v4 = vpop.f32.mrf.mxu0  ;;  %11002 = vmatmul.mubr.bf16.vlgmr.msra.gmra.mxu0 %v5704_v56  ;;  %v11775_v41 = vld [vmem:[%s14513_s1 + $0x4b0] sm:$0xff]  }
 0x246   : > { %v10647_v31 = vpop.f32.mrf.mxu1  ;;  %11005 = vmatprep.mubr.msk.bf16.mxu0 %vm11963_vm0, %v11962_v1  ;;  %11090 = vmatpush3.bf16.msra.mxu0 %v11772_v43  ;;  %v11767_v43 = vld [vmem:[%s12023_s27 + $0x3c] sm:$0xff]  }
 0x247   : > { %v13428_v18 = vadd.f32 %v3796_v9, %v3542_v17  ;;  %v10703_v19 = vpop.f32.mrf.mxu0  ;;  %11091 = vmatprep.subr.bf16.mxu0 %v11962_v1  ;;  %v5378_v9 = vrot.slane %v13434_v28, 1  ;;  %v5733_v14 = vshrl.u32 %v11767_v43, 16 }
 0x248   : > { %v3486_v20 = vpop.f32.mrf.mxu1 }
 0x249   : > { %v3543_v47 = vadd.f32 %v3486_v20, %v13250_v25  ;;  %v3807_v26 = vpop.f32.mrf.mxu0  ;;  %v11778_v25 = vld [vmem:[%s14513_s1 + $0x4a8] sm:$0xff]   ;;  %v5379_v58 = vsel %vm981_vm1, %v5376_v8, %v5378_v9  ;;  %v5735_v30 = vrot.slane %v5733_v14, 1 }
 0x24a   : > { %v10648_v57 = vpop.f32.mrf.mxu1  ;;  %11092 = vmatpush3.bf16.msra.mxu0 %v11775_v41  ;;  %v5736_v41 = vshll.u32 %v11767_v43, 16 }
 0x24b   : > { %v13441_v6 = vadd.f32 %v3799_v51, %v3543_v47  ;;  %v10704_v54 = vpop.f32.mrf.mxu0  ;;  %11093 = vmatprep.subr.bf16.mxu0 %v11962_v1  ;;  %v11786_v47 = vld [vmem:[%s14513_s1 + $0x490] sm:$0xff]  }
 0x24c   : > { %v3491_v38 = vpop.f32.mrf.mxu1  ;;  %10950 = vmatmul.mubr.bf16.vlgmr.msra.gmra.mxu1 %v5377_v21  ;;  %v11770_v54 = vld [vmem:[%s12023_s27 + $0x44] sm:$0xff]  }
 0x24d   : > { %v3544_v40 = vadd.f32 %v3491_v38, %v13264_v11  ;;  %10953 = vmatprep.mubr.msk.bf16.mxu1 %vm11963_vm0, %v11962_v1  ;;  %v3812_v46 = vpop.f32.mrf.mxu0  ;;  %11006 = vmatmul.mubr.bf16.gmra.mxu0 %v5713_v12  ;;  %v11771_v11 = vld [vmem:[%s14513_s1 + $0x470] sm:$0xff]  }
 0x24e   : > { %v10651_v53 = vpop.f32.mrf.mxu1  ;;  %11009 = vmatprep.mubr.msk.bf16.mxu0 %vm11963_vm0, %v11962_v1  ;;  %11038 = vmatpush3.bf16.msra.mxu1 %v11768_v33  ;;  %v13499_v12 = vld [vmem:[%s12023_s27 + $0x34] sm:$0xff]   ;;  %v5738_v33 = vrot.slane %v5736_v41, 2 }
 0x24f   : > { %v13456_v36 = vadd.f32 %v3804_v4, %v3544_v40  ;;  %v10707_v42 = vpop.f32.mrf.mxu0  ;;  %11039 = vmatprep.subr.bf16.mxu1 %v11962_v1  ;;  %11094 = vmatpush3.bf16.msra.mxu0 %v11778_v25  ;;  %v5380_v4 = vrot.slane %v13466_v15, 1  ;;  %v11780_v25 = vld [vmem:[%s14513_s1 + $0x458] sm:$0xff]   ;;  %v5382_v53 = vrot.slane %v13499_v12, 1  ;;  %v11769_v12 = vld [vmem:[%s12023_s27 + $0x44] sm:$0xff]  }
 0x250   : > { %v3494_v5 = vpop.f32.mrf.mxu1  ;;  %11095 = vmatprep.subr.bf16.mxu0 %v11962_v1  ;;  %v5739_v34 = vor.u32 %v5738_v33, %v5735_v30  ;;  %v5745_v42 = vshll.u32 %v11770_v54, 16 }
 0x251   : > { %v3545_v51 = vadd.f32 %v3494_v5, %v13278_v37  ;;  %v3815_v59 = vpop.f32.mrf.mxu0  ;;  %v11784_v37 = vld [vmem:[%s14513_s1 + $0x498] sm:$0xff]   ;;  %v5381_v28 = vsel %vm981_vm1, %v5378_v9, %v5380_v4  ;;  %v5383_v15 = vsel %vm981_vm1, %v5380_v4, %v5382_v53 }
 0x252   : > { %v10652_v56 = vpop.f32.mrf.mxu1  ;;  %11040 = vmatpush3.bf16.msra.mxu1 %v11771_v11  ;;  %v5742_v11 = vshrl.u32 %v11770_v54, 16  ;;  %v5740_v2 = vsel %vm1295_vm4, %v5730_v0, %v5739_v34  ;;  %v11782_v54 = vld [vmem:[%s12023_s27 + $0x54] sm:$0xff]  }
 0x253   : > { %v13473_v50 = vadd.f32 %v3807_v26, %v3545_v51  ;;  %v10708_v17 = vpop.f32.mrf.mxu0  ;;  %11041 = vmatprep.subr.bf16.mxu1 %v11962_v1  ;;  %11096 = vmatpush3.bf16.msra.mxu0 %v11781_v35  ;;  %v11791_v51 = vld [vmem:[%s14513_s1 + $0x480] sm:$0xff]  }
 0x254   : > { %v3499_v7 = vpop.f32.mrf.mxu1  ;;  %10954 = vmatmul.mubr.bf16.gmra.mxu1 %v5379_v58  ;;  %11097 = vmatprep.subr.bf16.mxu0 %v11962_v1  ;;  %v5744_v43 = vrot.slane %v5742_v11, 1  ;;  %v11776_v17 = vld [vmem:[%s12023_s27 + $0x4c] sm:$0xff]  }
 0x255   : > { %v3546_v8 = vadd.f32 %v3499_v7, %v13293_v44  ;;  %10957 = vmatprep.mubr.msk.bf16.mxu1 %vm11963_vm0, %v11962_v1  ;;  %v3820_v31 = vpop.f32.mrf.mxu0  ;;  %11010 = vmatmul.mubr.bf16.gmra.mxu0 %v5722_v62  ;;  %v11777_v44 = vld [vmem:[%s14513_s1 + $0x460] sm:$0xff]   ;;  %v5751_v41 = vshrl.u32 %v11776_v17, 16 }
 0x256   : > { %v10655_v52 = vpop.f32.mrf.mxu1  ;;  %11013 = vmatprep.mubr.msk.bf16.mxu0 %vm11963_vm0, %v11962_v1  ;;  %11042 = vmatpush3.bf16.msra.mxu1 %v11774_v45  ;;  %v11766_v62 = vld [vmem:[%s12023_s27 + $0x3c] sm:$0xff]   ;;  %v5747_v45 = vrot.slane %v5745_v42, 2 }
 0x257   : > { %v13489_v19 = vadd.f32 %v3812_v46, %v3546_v8  ;;  %v10711_v20 = vpop.f32.mrf.mxu0  ;;  %11043 = vmatprep.subr.bf16.mxu1 %v11962_v1  ;;  %11098 = vmatpush3.bf16.msra.mxu0 %v11784_v37  ;;  %v11785_v37 = vld [vmem:[%s14513_s1 + $0x448] sm:$0xff]   ;;  %v5753_v30 = vrot.slane %v5751_v41, 1  ;;  %v13582_v41 = vld [vmem:[%s12023_s27 + $0x54] sm:$0x7f]  }
 0x258   : > { %v3502_v21 = vpop.f32.mrf.mxu1  ;;  %11099 = vmatprep.subr.bf16.mxu0 %v11962_v1  ;;  %v5748_v14 = vor.u32 %v5747_v45, %v5744_v43 }
 0x259   : > { %v3547_v26 = vadd.f32 %v3502_v21, %v13307_v55  ;;  %v3823_v57 = vpop.f32.mrf.mxu0  ;;  %v11788_v55 = vld [vmem:[%s14513_s1 + $0x488] sm:$0xff]  }
 0x25a   : > { %v10656_v32 = vpop.f32.mrf.mxu1  ;;  %11044 = vmatpush3.bf16.msra.mxu1 %v11777_v44  ;;  %v5754_v44 = vshll.u32 %v11776_v17, 16 }
 0x25b   : > { %v13506_v38 = vadd.f32 %v3815_v59, %v3547_v26  ;;  %v10712_v40 = vpop.f32.mrf.mxu0  ;;  %11045 = vmatprep.subr.bf16.mxu1 %v11962_v1  ;;  %11100 = vmatpush3.bf16.msra.mxu0 %v11786_v47 }
 0x25c   : > { %v3507_v9 = vpop.f32.mrf.mxu1  ;;  %10958 = vmatmul.mubr.bf16.gmra.mxu1 %v5381_v28  ;;  %11101 = vmatprep.subr.bf16.mxu0 %v11962_v1  ;;  %v5756_v33 = vrot.slane %v5754_v44, 2  ;;  %v11792_v44 = vld [vmem:[%s12023_s27 + $0x14] sm:$0xfc]  }
 0x25d   : > { %v3548_v46 = vadd.f32 %v3507_v9, %v13322_v29  ;;  %10961 = vmatprep.mubr.msk.bf16.mxu1 %vm11963_vm0, %v11962_v1  ;;  %v3828_v49 = vpop.f32.mrf.mxu0  ;;  %11014 = vmatmul.mubr.bf16.gmra.mxu0 %v5731_v27  ;;  %v11783_v29 = vld [vmem:[%s14513_s1 + $0x450] sm:$0xff]   ;;  %v5749_v27 = vsel %vm1295_vm4, %v5739_v34, %v5748_v14  ;;  %v5386_v9 = vrot.slane %v11769_v12, 1  ;;  %v5763_v34 = vshll.u32 %v11782_v54, 16 }
 0x25e   : > { %v10659_v60 = vpop.f32.mrf.mxu1  ;;  %11017 = vmatprep.mubr.msk.bf16.mxu0 %vm11963_vm0, %v11962_v1  ;;  %11046 = vmatpush3.bf16.msra.mxu1 %v11780_v25  ;;  %v5390_v12 = vrot.slane %v13582_v41, 1 }
 0x25f   : > { %v13522_v35 = vadd.f32 %v3820_v31, %v3548_v46  ;;  %v10715_v5 = vpop.f32.mrf.mxu0  ;;  %11047 = vmatprep.subr.bf16.mxu1 %v11962_v1  ;;  %11102 = vmatpush3.bf16.msra.mxu0 %v11788_v55  ;;  %v5384_v31 = vrot.slane %v11766_v62, 1  ;;  %v5760_v60 = vshrl.u32 %v11782_v54, 16  ;;  %v5765_v62 = vrot.slane %v5763_v34, 2 }
 0x260   : > { %v3510_v58 = vpop.f32.mrf.mxu1  ;;  %11103 = vmatprep.subr.bf16.mxu0 %v11962_v1 }
 0x261   : > { %v3549_v59 = vadd.f32 %v3510_v58, %v13336_v22  ;;  %v3831_v56 = vpop.f32.mrf.mxu0  ;;  %v5385_v28 = vsel %vm981_vm1, %v5382_v53, %v5384_v31  ;;  %v5387_v5 = vsel %vm981_vm1, %v5384_v31, %v5386_v9  ;;  %v11773_v58 = vld [vmem:[%s12023_s27 + $0x4c] sm:$0xff]   ;;  %v3296_v31 = vld [vmem:[#allocation2 + $0x60] sm:$0xf] }
 0x262   : > { %v10660_v63 = vpop.f32.mrf.mxu1  ;;  %11048 = vmatpush3.bf16.msra.mxu1 %v11783_v29 }
 0x263   : > { %v13537_v7 = vadd.f32 %v3823_v57, %v3549_v59  ;;  %v10716_v8 = vpop.f32.mrf.mxu0  ;;  %11049 = vmatprep.subr.bf16.mxu1 %v11962_v1  ;;  %11104 = vmatpush3.bf16.msra.mxu0 %v11791_v51 }
 0x264   : > { %v3515_v22 = vpop.f32.mrf.mxu1  ;;  %10962 = vmatmul.mubr.bf16.gmra.mxu1 %v5383_v15  ;;  %11193 = vmatprep.subr.bf16.mxu0 %v11962_v1 }
 0x265   : > { %v3550_v4 = vadd.f32 %v3515_v22, %v13348_v48  ;;  %10965 = vmatprep.mubr.msk.bf16.mxu1 %vm11963_vm0, %v11962_v1  ;;  %v3836_v52 = vpop.f32.mrf.mxu0  ;;  %11018 = vmatmul.mubr.bf16.gmra.mxu0 %v5740_v2  ;;  %v11787_v48 = vld [vmem:[%s14513_s1 + $0x440] sm:$0xff]  }
 0x266   : > { %v10663_v0 = vpop.f32.mrf.mxu1  ;;  %11021 = vmatprep.mubr.msk.bf16.mxu0 %vm11963_vm0, %v11962_v1  ;;  %11050 = vmatpush3.bf16.msra.mxu1 %v11785_v37 }
 0x267   : > { %v13549_v20 = vadd.f32 %v3828_v49, %v3550_v4  ;;  %v10719_v47 = vpop.f32.mrf.mxu0  ;;  %11051 = vmatprep.subr.bf16.mxu1 %v11962_v1  ;;  %v5757_v49 = vor.u32 %v5756_v33, %v5753_v30  ;;  %v6385_v33 = vshll.u32 %v11792_v44, 16 }
 0x268   : > { %v3518_v21 = vpop.f32.mrf.mxu1 }
 0x269   : > { %v3551_v26 = vadd.f32 %v3518_v21, %v13355_v39  ;;  %v3839_v57 = vpop.f32.mrf.mxu0  ;;  %v5758_v15 = vsel %vm1295_vm4, %v5748_v14, %v5757_v49  ;;  %v11793_v21 = vld [vmem:[%s12023_s27 + $0x1c] sm:$0xff]  }
 0x26a   : > { %v10664_v32 = vpop.f32.mrf.mxu1  ;;  %11052 = vmatpush3.bf16.msra.mxu1 %v11787_v48  ;;  %v6390_v54 = vshrl.u32 %v11793_v21, 16 }
 0x26b   : > { %v13557_v25 = vadd.f32 %v3831_v56, %v3551_v26  ;;  %v10720_v40 = vpop.f32.mrf.mxu0  ;;  %11141 = vmatprep.subr.bf16.mxu1 %v11962_v1  ;;  %v5762_v56 = vrot.slane %v5760_v60, 1 }
 0x26c   : > { %v3523_v55 = vpop.f32.mrf.mxu1  ;;  %10966 = vmatmul.mubr.bf16.gmra.mxu1 %v5385_v28  ;;  %v6393_v40 = vshll.u32 %v11793_v21, 16 }
 0x26d   : > { %v3552_v39 = vadd.f32 %v3523_v55, %v13363_v3  ;;  %10969 = vmatprep.mubr.msk.bf16.mxu1 %vm11963_vm0, %v11962_v1  ;;  %v3844_v46 = vpop.f32.mrf.mxu0  ;;  %11022 = vmatmul.mubr.bf16.gmra.mxu0 %v5749_v27  ;;  %v5766_v8 = vor.u32 %v5765_v62, %v5762_v56  ;;  %v6382_v27 = vshrl.u32 %v11792_v44, 16  ;;  %v11797_v44 = vld [vmem:[%s12023_s27 + $0x2c] sm:$0xff]  }
 0x26e   : > { %v10667_v53 = vpop.f32.mrf.mxu1  ;;  %11025 = vmatprep.mubr.msk.bf16.mxu0 %vm11963_vm0, %v11962_v1 }
 0x26f   : > { %v13565_v11 = vadd.f32 %v3836_v52, %v3552_v39  ;;  %v10723_v42 = vpop.f32.mrf.mxu0  ;;  %v5767_v47 = vsel %vm1295_vm4, %v5757_v49, %v5766_v8  ;;  %v6384_v49 = vrot.slane %v6382_v27, 2 }
 0x270   : > { %v3526_v29 = vpop.f32.mrf.mxu1  ;;  %v6387_v42 = vrot.slane %v6385_v33, 3  ;;  %v6408_v33 = vshrl.u32 %v11797_v44, 16 }
 0x271   : > { %v3553_v3 = vadd.f32 %v3526_v29, %v13371_v10  ;;  %v3847_v51 = vpop.f32.mrf.mxu0  ;;  %v5388_v10 = vrot.slane %v11773_v58, 1  ;;  %v6392_v29 = vrot.slane %v6390_v54, 2  ;;  %v6411_v54 = vshll.u32 %v11797_v44, 16 }
 0x272   : > { %v10668_v59 = vpop.f32.mrf.mxu1 }
 0x273   : > { %v13571_v63 = vadd.f32 %v3839_v57, %v3553_v3  ;;  %v10724_v2 = vpop.f32.mrf.mxu0  ;;  %v6395_v3 = vrot.slane %v6393_v40, 3 }
 0x274   : > { %v3531_v43 = vpop.f32.mrf.mxu1  ;;  %10970 = vmatmul.mubr.bf16.gmra.mxu1 %v5387_v5  ;;  %v11795_v5 = vld [vmem:[%s12023_s27 + $0x24] sm:$0xff]  }
 0x275   : > { %v3554_v45 = vadd.f32 %v3531_v43, %v13378_v16  ;;  %10973 = vmatprep.mubr.msk.bf16.mxu1 %vm11963_vm0, %v11962_v1  ;;  %v4485_v17 = vpop.f32.mrf.mxu0  ;;  %11026 = vmatmul.mubr.bf16.gmra.mxu0 %v5758_v15  ;;  %v5389_v16 = vsel %vm981_vm1, %v5386_v9, %v5388_v10  ;;  %v6396_v43 = vor.u32 %v6395_v3, %v6392_v29  ;;  %v11799_v29 = vld [vmem:[%s12023_s27 + $0x34] sm:$0xff]  }
 0x276   : > { %v10671_v37 = vpop.f32.mrf.mxu1  ;;  %11029 = vmatprep.mubr.msk.bf16.mxu0 %vm11963_vm0, %v11962_v1  ;;  %v11802_v3 = vld [vmem:[%s14513_s1 + $0x4f8] sm:$0xff]  }
 0x277   : > { %v13578_v22 = vadd.f32 %v3844_v46, %v3554_v45  ;;  %v10795_v4 = vpop.f32.mrf.mxu0  ;;  %v5391_v46 = vsel %vm981_vm1, %v5388_v10, %v5390_v12  ;;  %v6399_v45 = vshrl.u32 %v11795_v5, 16  ;;  %v6402_v10 = vshll.u32 %v11795_v5, 16 }
 0x278   : > { %v3534_v52 = vpop.f32.mrf.mxu1 }
 0x279   : > { %v3555_v0 = vadd.f32 %v3534_v52, %v3296_v31  ;;  %v4488_v14 = vpop.f32.mrf.mxu0  ;;  %v11789_v52 = vld [vmem:[%s12023_s27 + $0x14] sm:$0xfc]   ;;  %v6404_v41 = vrot.slane %v6402_v10, 3 }
 0x27a   : > { %v10672_v48 = vpop.f32.mrf.mxu1 }
 0x27b   : > { %3573 = vst [vmem:[#allocation2 + $0x60] sm:$0xf] %v3555_v0  ;;  %v10796_v26 = vpop.f32.mrf.mxu0  ;;  %v13610_v0 = vld [vmem:[%s12023_s27 + $0x1c] sm:$0xff]  }
 0x27c   : > { %v4166_v28 = vpop.f32.mrf.mxu1  ;;  %10974 = vmatmul.mubr.bf16.gmra.mxu1 %v5389_v16  ;;  %v11806_v48 = vld [vmem:[%s14513_s1 + $0x538] sm:$0xff]  }
 0x27d   : > { %v4237_v57 = vadd.f32 %v4166_v28, %v13390_v61  ;;  %10977 = vmatprep.mubr.msk.bf16.mxu1 %vm11963_vm0, %v11962_v1  ;;  %v4493_v32 = vpop.f32.mrf.mxu0  ;;  %11030 = vmatmul.mubr.bf16.gmra.mxu0 %v5767_v47  ;;  %v6064_v28 = vrot.slane %v11789_v52, 2 }
 0x27e   : > { %v10743_v30 = vpop.f32.mrf.mxu1  ;;  %11033 = vmatprep.mubr.msk.bf16.mxu0 %vm11963_vm0, %v11962_v1 }
 0x27f   : > { %v13593_v55 = vadd.f32 %v4485_v17, %v4237_v57  ;;  %v10799_v39 = vpop.f32.mrf.mxu0  ;;  %v6065_v57 = vrot.slane %v13610_v0, 2 }
 0x280   : > { %v4169_v61 = vpop.f32.mrf.mxu1 }
 0x281   : > { %v4238_v9 = vadd.f32 %v4169_v61, %v13397_v23  ;;  %v4496_v53 = vpop.f32.mrf.mxu0 }
 0x282   : > { %v3609_v60 = vld [vmem:[#allocation2 + $0x60] sm:$0xf]  ;;  %v10744_v34 = vpop.f32.mrf.mxu1 }
 0x283   : > { %v3868_v58 = vadd.f32 %v3847_v51, %v3609_v60  ;;  %v13598_v59 = vadd.f32 %v4488_v14, %v4238_v9  ;;  %v10800_v15 = vpop.f32.mrf.mxu0  ;;  %v6388_v51 = vor.u32 %v6387_v42, %v6384_v49  ;;  %v6401_v14 = vrot.slane %v6399_v45, 2 }
 0x284   : > { %v4174_v56 = vpop.f32.mrf.mxu1  ;;  %10978 = vmatmul.mubr.bf16.gmra.mxu1 %v5391_v46  ;;  %v6066_v9 = vsel %vm1672_vm3, %v6064_v28, %v6065_v57  ;;  %v6410_v34 = vrot.slane %v6408_v33, 2  ;;  %v6413_v42 = vrot.slane %v6411_v54, 3  ;;  %v6420_v45 = vshll.u32 %v11799_v29, 16 }
 0x285   : > { %3886 = vst [vmem:[#allocation2 + $0x60] sm:$0xf] %v3868_v58  ;;  %v4239_v23 = vadd.f32 %v4174_v56, %v13404_v13  ;;  %10981 = vmatprep.mubr.msk.bf16.mxu1 %vm11963_vm0, %v11962_v1  ;;  %v4501_v62 = vpop.f32.mrf.mxu0  ;;  %11034 = vmatmul.mubr.bf16.gmra.mxu0 %v5766_v8  ;;  %v6397_v16 = vsel %vm3989_vm7, %v6388_v51, %v6396_v43 }
 0x286   : > { %v10747_v2 = vpop.f32.mrf.mxu1  ;;  %11105 = vmatprep.mubr.msk.bf16.mxu0 %vm11963_vm0, %v11962_v1  ;;  %v6405_v30 = vor.u32 %v6404_v41, %v6401_v14  ;;  %v6414_v51 = vor.u32 %v6413_v42, %v6410_v34  ;;  %v6422_v44 = vrot.slane %v6420_v45, 3 }
 0x287   : > { %v13605_v17 = vadd.f32 %v4493_v32, %v4239_v23  ;;  %v10803_v37 = vpop.f32.mrf.mxu0 }
 0x288   : > { %v4177_v4 = vpop.f32.mrf.mxu1  ;;  %v6406_v60 = vsel %vm3989_vm7, %v6396_v43, %v6405_v30  ;;  %v6417_v43 = vshrl.u32 %v11799_v29, 16  ;;  %v6415_v14 = vsel %vm3989_vm7, %v6405_v30, %v6414_v51 }
 0x289   : > { %v4240_v13 = vadd.f32 %v4177_v4, %v13417_v24  ;;  %v4504_v31 = vpop.f32.mrf.mxu0  ;;  %v11815_v4 = vld [vmem:[%s14513_s1 + $0x520] sm:$0xff]  }
 0x28a   : > { %v10748_v8 = vpop.f32.mrf.mxu1  ;;  %v6419_v41 = vrot.slane %v6417_v43, 2 }
 0x28b   : > { %v13617_v47 = vadd.f32 %v4496_v53, %v4240_v13  ;;  %v10804_v21 = vpop.f32.mrf.mxu0  ;;  %v13634_v53 = vld [vmem:[%s12023_s27 + $0x24] sm:$0xff]   ;;  %v13666_v8 = vld [vmem:[%s12023_s27 + $0x2c] sm:$0xff]  }
 0x28c   : > { %v4182_v26 = vpop.f32.mrf.mxu1  ;;  %10982 = vmatmul.mubr.bf16.gmra.mxu1 %v5390_v12  ;;  %v6067_v23 = vrot.slane %v13634_v53, 2  ;;  %v11808_v21 = vld [vmem:[%s14513_s1 + $0x4e8] sm:$0xff]   ;;  %v6423_v33 = vor.u32 %v6422_v44, %v6419_v41 }
 0x28d   : > { %v4241_v24 = vadd.f32 %v4182_v26, %v13428_v18  ;;  %11053 = vmatprep.mubr.msk.bf16.mxu1 %vm11963_vm0, %v11962_v1  ;;  %v4509_v32 = vpop.f32.mrf.mxu0  ;;  %11106 = vmatmul.mubr.bf16.vlgmr.msra.gmra.mxu0 %v6397_v16  ;;  %v11809_v18 = vld [vmem:[%s14513_s1 + $0x530] sm:$0xff]  }
 0x28e   : > { %v10751_v27 = vpop.f32.mrf.mxu1  ;;  %11109 = vmatprep.mubr.msk.bf16.mxu0 %vm11963_vm0, %v11962_v1  ;;  %11194 = vmatpush3.bf16.msra.mxu0 %v11806_v48  ;;  %v6068_v52 = vsel %vm1672_vm3, %v6065_v57, %v6067_v23  ;;  %v11801_v48 = vld [vmem:[%s12023_s27 + $0x3c] sm:$0xff]   ;;  %v6424_v42 = vsel %vm3989_vm7, %v6414_v51, %v6423_v33 }
 0x28f   : > { %v13628_v12 = vadd.f32 %v4501_v62, %v4241_v24  ;;  %v10807_v40 = vpop.f32.mrf.mxu0  ;;  %11195 = vmatprep.subr.bf16.mxu0 %v11962_v1  ;;  %v6426_v54 = vshrl.u32 %v11801_v48, 16 }
 0x290   : > { %v4185_v39 = vpop.f32.mrf.mxu1 }
 0x291   : > { %v4242_v61 = vadd.f32 %v4185_v39, %v13441_v6  ;;  %v4512_v46 = vpop.f32.mrf.mxu0  ;;  %v11812_v6 = vld [vmem:[%s14513_s1 + $0x528] sm:$0xff]   ;;  %v6428_v29 = vrot.slane %v6426_v54, 2 }
 0x292   : > { %v10752_v49 = vpop.f32.mrf.mxu1  ;;  %11196 = vmatpush3.bf16.msra.mxu0 %v11809_v18  ;;  %v6429_v18 = vshll.u32 %v11801_v48, 16 }
 0x293   : > { %v13641_v5 = vadd.f32 %v4504_v31, %v4242_v61  ;;  %v10808_v58 = vpop.f32.mrf.mxu0  ;;  %11197 = vmatprep.subr.bf16.mxu0 %v11962_v1  ;;  %v11820_v61 = vld [vmem:[%s14513_s1 + $0x510] sm:$0xff]  }
 0x294   : > { %v4190_v15 = vpop.f32.mrf.mxu1  ;;  %11054 = vmatmul.mubr.bf16.vlgmr.msra.gmra.mxu1 %v6066_v9  ;;  %v11804_v58 = vld [vmem:[%s12023_s27 + $0x44] sm:$0xff]  }
 0x295   : > { %v4243_v56 = vadd.f32 %v4190_v15, %v13456_v36  ;;  %11057 = vmatprep.mubr.msk.bf16.mxu1 %vm11963_vm0, %v11962_v1  ;;  %v4517_v62 = vpop.f32.mrf.mxu0  ;;  %11110 = vmatmul.mubr.bf16.gmra.mxu0 %v6406_v60  ;;  %v11805_v36 = vld [vmem:[%s14513_s1 + $0x4f0] sm:$0xff]  }
 0x296   : > { %v10755_v2 = vpop.f32.mrf.mxu1  ;;  %11113 = vmatprep.mubr.msk.bf16.mxu0 %vm11963_vm0, %v11962_v1  ;;  %11142 = vmatpush3.bf16.msra.mxu1 %v11802_v3  ;;  %v13699_v60 = vld [vmem:[%s12023_s27 + $0x34] sm:$0xff]   ;;  %v6431_v3 = vrot.slane %v6429_v18, 3 }
 0x297   : > { %v13656_v10 = vadd.f32 %v4509_v32, %v4243_v56  ;;  %v10811_v37 = vpop.f32.mrf.mxu0  ;;  %11143 = vmatprep.subr.bf16.mxu1 %v11962_v1  ;;  %11198 = vmatpush3.bf16.msra.mxu0 %v11812_v6  ;;  %v6069_v32 = vrot.slane %v13666_v8, 2  ;;  %v11814_v6 = vld [vmem:[%s14513_s1 + $0x4d8] sm:$0xff]   ;;  %v6071_v2 = vrot.slane %v13699_v60, 2  ;;  %v11803_v60 = vld [vmem:[%s12023_s27 + $0x44] sm:$0xff]  }
 0x298   : > { %v4193_v13 = vpop.f32.mrf.mxu1  ;;  %11199 = vmatprep.subr.bf16.mxu0 %v11962_v1  ;;  %v6432_v45 = vor.u32 %v6431_v3, %v6428_v29  ;;  %v6438_v37 = vshll.u32 %v11804_v58, 16 }
 0x299   : > { %v4244_v31 = vadd.f32 %v4193_v13, %v13473_v50  ;;  %v4520_v0 = vpop.f32.mrf.mxu0  ;;  %v11818_v50 = vld [vmem:[%s14513_s1 + $0x518] sm:$0xff]   ;;  %v6070_v53 = vsel %vm1672_vm3, %v6067_v23, %v6069_v32  ;;  %v6072_v8 = vsel %vm1672_vm3, %v6069_v32, %v6071_v2 }
 0x29a   : > { %v10756_v16 = vpop.f32.mrf.mxu1  ;;  %11144 = vmatpush3.bf16.msra.mxu1 %v11805_v36  ;;  %v6435_v36 = vshrl.u32 %v11804_v58, 16  ;;  %v6433_v44 = vsel %vm3989_vm7, %v6423_v33, %v6432_v45  ;;  %v11816_v58 = vld [vmem:[%s12023_s27 + $0x54] sm:$0xff]  }
 0x29b   : > { %v13673_v26 = vadd.f32 %v4512_v46, %v4244_v31  ;;  %v10812_v24 = vpop.f32.mrf.mxu0  ;;  %11145 = vmatprep.subr.bf16.mxu1 %v11962_v1  ;;  %11200 = vmatpush3.bf16.msra.mxu0 %v11815_v4  ;;  %v11826_v31 = vld [vmem:[%s14513_s1 + $0x500] sm:$0xff]  }
 0x29c   : > { %v4198_v28 = vpop.f32.mrf.mxu1  ;;  %11058 = vmatmul.mubr.bf16.gmra.mxu1 %v6068_v52  ;;  %11201 = vmatprep.subr.bf16.mxu0 %v11962_v1  ;;  %v6437_v48 = vrot.slane %v6435_v36, 2  ;;  %v11810_v24 = vld [vmem:[%s12023_s27 + $0x4c] sm:$0xff]  }
 0x29d   : > { %v4245_v57 = vadd.f32 %v4198_v28, %v13489_v19  ;;  %11061 = vmatprep.mubr.msk.bf16.mxu1 %vm11963_vm0, %v11962_v1  ;;  %v4525_v27 = vpop.f32.mrf.mxu0  ;;  %11114 = vmatmul.mubr.bf16.gmra.mxu0 %v6415_v14  ;;  %v11811_v19 = vld [vmem:[%s14513_s1 + $0x4e0] sm:$0xff]   ;;  %v6444_v18 = vshrl.u32 %v11810_v24, 16 }
 0x29e   : > { %v10759_v30 = vpop.f32.mrf.mxu1  ;;  %11117 = vmatprep.mubr.msk.bf16.mxu0 %vm11963_vm0, %v11962_v1  ;;  %11146 = vmatpush3.bf16.msra.mxu1 %v11808_v21  ;;  %v11800_v14 = vld [vmem:[%s12023_s27 + $0x3c] sm:$0xff]   ;;  %v6440_v21 = vrot.slane %v6438_v37, 3 }
 0x29f   : > { %v13689_v40 = vadd.f32 %v4517_v62, %v4245_v57  ;;  %v10815_v39 = vpop.f32.mrf.mxu0  ;;  %11147 = vmatprep.subr.bf16.mxu1 %v11962_v1  ;;  %11202 = vmatpush3.bf16.msra.mxu0 %v11818_v50  ;;  %v11819_v50 = vld [vmem:[%s14513_s1 + $0x4c8] sm:$0xff]   ;;  %v6446_v29 = vrot.slane %v6444_v18, 2 }
 0x2a0   : > { %v4201_v9 = vpop.f32.mrf.mxu1  ;;  %11203 = vmatprep.subr.bf16.mxu0 %v11962_v1  ;;  %v6441_v54 = vor.u32 %v6440_v21, %v6437_v48 }
 0x2a1   : > { %v4246_v46 = vadd.f32 %v4201_v9, %v13506_v38  ;;  %v4528_v49 = vpop.f32.mrf.mxu0  ;;  %v11823_v38 = vld [vmem:[%s14513_s1 + $0x508] sm:$0xff]  }
 0x2a2   : > { %v10760_v34 = vpop.f32.mrf.mxu1  ;;  %11148 = vmatpush3.bf16.msra.mxu1 %v11811_v19  ;;  %v6447_v19 = vshll.u32 %v11810_v24, 16 }
 0x2a3   : > { %v13706_v15 = vadd.f32 %v4520_v0, %v4246_v46  ;;  %v10816_v56 = vpop.f32.mrf.mxu0  ;;  %11149 = vmatprep.subr.bf16.mxu1 %v11962_v1  ;;  %11204 = vmatpush3.bf16.msra.mxu0 %v11820_v61 }
 0x2a4   : > { %v4206_v23 = vpop.f32.mrf.mxu1  ;;  %11062 = vmatmul.mubr.bf16.gmra.mxu1 %v6070_v53  ;;  %11205 = vmatprep.subr.bf16.mxu0 %v11962_v1  ;;  %v6449_v3 = vrot.slane %v6447_v19, 3  ;;  %v11813_v19 = vld [vmem:[%s12023_s27 + $0x54] sm:$0xff]  }
 0x2a5   : > { %v4247_v62 = vadd.f32 %v4206_v23, %v13522_v35  ;;  %11065 = vmatprep.mubr.msk.bf16.mxu1 %vm11963_vm0, %v11962_v1  ;;  %v4533_v51 = vpop.f32.mrf.mxu0  ;;  %11118 = vmatmul.mubr.bf16.gmra.mxu0 %v6424_v42  ;;  %v11817_v35 = vld [vmem:[%s14513_s1 + $0x4d0] sm:$0xff]   ;;  %v6442_v42 = vsel %vm3989_vm7, %v6432_v45, %v6441_v54  ;;  %v6075_v23 = vrot.slane %v11803_v60, 2  ;;  %v6456_v45 = vshll.u32 %v11816_v58, 16 }
 0x2a6   : > { %v10763_v43 = vpop.f32.mrf.mxu1  ;;  %11121 = vmatprep.mubr.msk.bf16.mxu0 %vm11963_vm0, %v11962_v1  ;;  %11150 = vmatpush3.bf16.msra.mxu1 %v11814_v6  ;;  %v6079_v60 = vrot.slane %v11813_v19, 2 }
 0x2a7   : > { %v13722_v4 = vadd.f32 %v4525_v27, %v4247_v62  ;;  %v10819_v13 = vpop.f32.mrf.mxu0  ;;  %11151 = vmatprep.subr.bf16.mxu1 %v11962_v1  ;;  %11206 = vmatpush3.bf16.msra.mxu0 %v11823_v38  ;;  %v6073_v27 = vrot.slane %v11800_v14, 2  ;;  %v6453_v43 = vshrl.u32 %v11816_v58, 16  ;;  %v6458_v14 = vrot.slane %v6456_v45, 3 }
 0x2a8   : > { %v4209_v52 = vpop.f32.mrf.mxu1  ;;  %11207 = vmatprep.subr.bf16.mxu0 %v11962_v1 }
 0x2a9   : > { %v4248_v0 = vadd.f32 %v4209_v52, %v13537_v7  ;;  %v4536_v16 = vpop.f32.mrf.mxu0  ;;  %v6074_v53 = vsel %vm1672_vm3, %v6071_v2, %v6073_v27  ;;  %v6076_v13 = vsel %vm1672_vm3, %v6073_v27, %v6075_v23  ;;  %v11807_v52 = vld [vmem:[%s12023_s27 + $0x4c] sm:$0xff]  }
 0x2aa   : > { %v10764_v41 = vpop.f32.mrf.mxu1  ;;  %11152 = vmatpush3.bf16.msra.mxu1 %v11817_v35 }
 0x2ab   : > { %v13737_v28 = vadd.f32 %v4528_v49, %v4248_v0  ;;  %v10820_v57 = vpop.f32.mrf.mxu0  ;;  %11153 = vmatprep.subr.bf16.mxu1 %v11962_v1  ;;  %11208 = vmatpush3.bf16.msra.mxu0 %v11826_v31 }
 0x2ac   : > { %v4214_v7 = vpop.f32.mrf.mxu1  ;;  %11066 = vmatmul.mubr.bf16.gmra.mxu1 %v6072_v8  ;;  %11297 = vmatprep.subr.bf16.mxu0 %v11962_v1 }
 0x2ad   : > { %v4249_v32 = vadd.f32 %v4214_v7, %v13549_v20  ;;  %11069 = vmatprep.mubr.msk.bf16.mxu1 %vm11963_vm0, %v11962_v1  ;;  %v4541_v30 = vpop.f32.mrf.mxu0  ;;  %11122 = vmatmul.mubr.bf16.gmra.mxu0 %v6433_v44  ;;  %v11822_v20 = vld [vmem:[%s14513_s1 + $0x4c0] sm:$0xff]   ;;  %v11821_v7 = vld [vmem:[%s12023_s27 + $0x5c] ss:$0 sps:$4 sm:$0x11]  }
 0x2ae   : > { %v10767_v33 = vpop.f32.mrf.mxu1  ;;  %11125 = vmatprep.mubr.msk.bf16.mxu0 %vm11963_vm0, %v11962_v1  ;;  %11154 = vmatpush3.bf16.msra.mxu1 %v11819_v50 }
 0x2af   : > { %v13749_v39 = vadd.f32 %v4533_v51, %v4249_v32  ;;  %v10823_v61 = vpop.f32.mrf.mxu0  ;;  %11155 = vmatprep.subr.bf16.mxu1 %v11962_v1  ;;  %v6450_v51 = vor.u32 %v6449_v3, %v6446_v29 }
 0x2b0   : > { %v4217_v9 = vpop.f32.mrf.mxu1 }
 0x2b1   : > { %v4250_v46 = vadd.f32 %v4217_v9, %v13557_v25  ;;  %v4544_v49 = vpop.f32.mrf.mxu0  ;;  %v6451_v8 = vsel %vm3989_vm7, %v6441_v54, %v6450_v51  ;;  %v6462_v9 = vshll.u32 %v11821_v7, 16 }
 0x2b2   : > { %v10768_v34 = vpop.f32.mrf.mxu1  ;;  %11156 = vmatpush3.bf16.msra.mxu1 %v11822_v20 }
 0x2b3   : > { %v13757_v6 = vadd.f32 %v4536_v16, %v4250_v46  ;;  %v10824_v56 = vpop.f32.mrf.mxu0  ;;  %11245 = vmatprep.subr.bf16.mxu1 %v11962_v1  ;;  %v6455_v16 = vrot.slane %v6453_v43, 2  ;;  %v6464_v29 = vrot.slane %v6462_v9, 3 }
 0x2b4   : > { %v4222_v38 = vpop.f32.mrf.mxu1  ;;  %11070 = vmatmul.mubr.bf16.gmra.mxu1 %v6074_v53 }
 0x2b5   : > { %v4251_v25 = vadd.f32 %v4222_v38, %v13565_v11  ;;  %11073 = vmatprep.mubr.msk.bf16.mxu1 %vm11963_vm0, %v11962_v1  ;;  %v4549_v62 = vpop.f32.mrf.mxu0  ;;  %11126 = vmatmul.mubr.bf16.gmra.mxu0 %v6442_v42  ;;  %v6459_v57 = vor.u32 %v6458_v14, %v6455_v16  ;;  %v11824_v16 = vld [vmem:[%s12023_s27 + $0x14] sm:$0xf8]   ;;  %v11825_v14 = vld [vmem:[%s12023_s27 + $0x1c] sm:$0xff]  }
 0x2b6   : > { %v10771_v2 = vpop.f32.mrf.mxu1  ;;  %11129 = vmatprep.mubr.msk.bf16.mxu0 %vm11963_vm0, %v11962_v1 }
 0x2b7   : > { %v13765_v36 = vadd.f32 %v4541_v30, %v4251_v25  ;;  %v10827_v37 = vpop.f32.mrf.mxu0  ;;  %v3923_v30 = vld [vmem:[#allocation2 + $0x60] sm:$0xf]  ;;  %v6460_v61 = vsel %vm3989_vm7, %v6450_v51, %v6459_v57  ;;  %v6465_v2 = vsel %vm3989_vm7, %v6459_v57, %v6464_v29  ;;  %v6767_v57 = vrot.slane %v11825_v14, 3 }
 0x2b8   : > { %v4225_v35 = vpop.f32.mrf.mxu1  ;;  %v11845_v14 = vld [vmem:[%s14513_s1 + $0x560] sm:$0xff]  }
 0x2b9   : > { %v4252_v11 = vadd.f32 %v4225_v35, %v13571_v63  ;;  %v4552_v31 = vpop.f32.mrf.mxu0  ;;  %v6077_v63 = vrot.slane %v11807_v52, 2 }
 0x2ba   : > { %v10772_v0 = vpop.f32.mrf.mxu1 }
 0x2bb   : > { %v13771_v41 = vadd.f32 %v4544_v49, %v4252_v11  ;;  %v10828_v44 = vpop.f32.mrf.mxu0  ;;  %v6080_v25 = vsel %vm1672_vm3, %v6077_v63, %v6079_v60 }
 0x2bc   : > { %v4230_v48 = vpop.f32.mrf.mxu1  ;;  %11074 = vmatmul.mubr.bf16.gmra.mxu1 %v6076_v13  ;;  %v11827_v44 = vld [vmem:[%s12023_s27 + $0x1c] sm:$0xff]  }
 0x2bd   : > { %v4253_v21 = vadd.f32 %v4230_v48, %v13578_v22  ;;  %11077 = vmatprep.mubr.msk.bf16.mxu1 %vm11963_vm0, %v11962_v1  ;;  %v5170_v24 = vpop.f32.mrf.mxu0  ;;  %11130 = vmatmul.mubr.bf16.gmra.mxu0 %v6451_v8  ;;  %v6078_v22 = vsel %vm1672_vm3, %v6075_v23, %v6077_v63  ;;  %v11840_v48 = vld [vmem:[%s14513_s1 + $0x5b8] sm:$0xff]  }
 0x2be   : > { %v10775_v50 = vpop.f32.mrf.mxu1  ;;  %11133 = vmatprep.mubr.msk.bf16.mxu0 %vm11963_vm0, %v11962_v1 }
 0x2bf   : > { %v13779_v32 = vadd.f32 %v4549_v62, %v4253_v21  ;;  %v10899_v27 = vpop.f32.mrf.mxu0 }
 0x2c0   : > { %v4233_v33 = vpop.f32.mrf.mxu1 }
 0x2c1   : > { %v4254_v54 = vadd.f32 %v4233_v33, %v3923_v30  ;;  %v5173_v18 = vpop.f32.mrf.mxu0  ;;  %v11843_v30 = vld [vmem:[%s14513_s1 + $0x5b0] sm:$0xff]  }
 0x2c2   : > { %v10776_v20 = vpop.f32.mrf.mxu1 }
 0x2c3   : > { %4272 = vst [vmem:[#allocation2 + $0x60] sm:$0xf] %v4254_v54  ;;  %v10900_v46 = vpop.f32.mrf.mxu0  ;;  %v11828_v20 = vld [vmem:[%s12023_s27 + $0x24] sm:$0xff]  }
 0x2c4   : > { %v4874_v53 = vpop.f32.mrf.mxu1  ;;  %11078 = vmatmul.mubr.bf16.gmra.mxu1 %v6078_v22  ;;  %v11836_v46 = vld [vmem:[%s14513_s1 + $0x578] sm:$0xff]  }
 0x2c5   : > { %v4945_v49 = vadd.f32 %v4874_v53, %v13593_v55  ;;  %11081 = vmatprep.mubr.msk.bf16.mxu1 %vm11963_vm0, %v11962_v1  ;;  %v5178_v34 = vpop.f32.mrf.mxu0  ;;  %11134 = vmatmul.mubr.bf16.gmra.mxu0 %v6460_v61  ;;  %v11829_v61 = vld [vmem:[%s12023_s27 + $0x24] sm:$0xff]  }
 0x2c6   : > { %v10847_v42 = vpop.f32.mrf.mxu1  ;;  %11137 = vmatprep.mubr.msk.bf16.mxu0 %vm11963_vm0, %v11962_v1 }
 0x2c7   : > { %v13789_v3 = vadd.f32 %v5170_v24, %v4945_v49  ;;  %v10903_v58 = vpop.f32.mrf.mxu0  ;;  %v6769_v42 = vrot.slane %v11828_v20, 3 }
 0x2c8   : > { %v4877_v56 = vpop.f32.mrf.mxu1 }
 0x2c9   : > { %v4946_v38 = vadd.f32 %v4877_v56, %v13598_v59  ;;  %v5181_v55 = vpop.f32.mrf.mxu0  ;;  %v11839_v56 = vld [vmem:[%s14513_s1 + $0x570] sm:$0xff]  }
 0x2ca   : > { %v4309_v23 = vld [vmem:[#allocation2 + $0x60] sm:$0xf]  ;;  %v10848_v62 = vpop.f32.mrf.mxu1 }
 0x2cb   : > { %v4573_v51 = vadd.f32 %v4552_v31, %v4309_v23  ;;  %v13794_v43 = vadd.f32 %v5173_v18, %v4946_v38  ;;  %v10904_v45 = vpop.f32.mrf.mxu0  ;;  %v6770_v62 = vsel %vm1990_vm6, %v6767_v57, %v6769_v42 }
 0x2cc   : > { %v4882_v37 = vpop.f32.mrf.mxu1  ;;  %11082 = vmatmul.mubr.bf16.gmra.mxu1 %v6080_v25  ;;  %v11849_v25 = vld [vmem:[%s14513_s1 + $0x5a0] sm:$0xff]   ;;  %v11831_v45 = vld [vmem:[%s12023_s27 + $0x2c] sm:$0xff]  }
 0x2cd   : > { %4591 = vst [vmem:[#allocation2 + $0x60] sm:$0xf] %v4573_v51  ;;  %v4947_v35 = vadd.f32 %v4882_v37, %v13605_v17  ;;  %11085 = vmatprep.mubr.msk.bf16.mxu1 %vm11963_vm0, %v11962_v1  ;;  %v5186_v59 = vpop.f32.mrf.mxu0  ;;  %11138 = vmatmul.mubr.bf16.gmra.mxu0 %v6465_v2  ;;  %v13854_v51 = vld [vmem:[%s12023_s27 + $0x2c] sm:$0xff]  }
 0x2ce   : > { %v10851_v11 = vpop.f32.mrf.mxu1  ;;  %11209 = vmatprep.mubr.msk.bf16.mxu0 %vm11963_vm0, %v11962_v1 }
 0x2cf   : > { %v13801_v13 = vadd.f32 %v5178_v34, %v4947_v35  ;;  %v10907_v31 = vpop.f32.mrf.mxu0  ;;  %v11842_v35 = vld [vmem:[%s14513_s1 + $0x568] sm:$0xff]  }
 0x2d0   : > { %v4885_v52 = vpop.f32.mrf.mxu1 }
 0x2d1   : > { %v4948_v0 = vadd.f32 %v4885_v52, %v13617_v47  ;;  %v5189_v8 = vpop.f32.mrf.mxu0  ;;  %v6766_v47 = vrot.slane %v11824_v16, 3 }
 0x2d2   : > { %v10852_v17 = vpop.f32.mrf.mxu1 }
 0x2d3   : > { %v13810_v21 = vadd.f32 %v5181_v55, %v4948_v0  ;;  %v10908_v63 = vpop.f32.mrf.mxu0  ;;  %v6768_v18 = vsel %vm1990_vm6, %v6766_v47, %v6767_v57  ;;  %v6771_v0 = vrot.slane %v13854_v51, 3  ;;  %v11855_v17 = vld [vmem:[%s14513_s1 + $0x590] sm:$0xff]   ;;  %v11857_v51 = vld [vmem:[%s14513_s1 + $0x540] sm:$0xff]  }
 0x2d4   : > { %v4890_v24 = vpop.f32.mrf.mxu1  ;;  %11086 = vmatmul.mubr.bf16.gmra.mxu1 %v6079_v60  ;;  %v11832_v47 = vld [vmem:[%s12023_s27 + $0x34] sm:$0xff]  }
 0x2d5   : > { %v4949_v50 = vadd.f32 %v4890_v24, %v13628_v12  ;;  %11157 = vmatprep.mubr.msk.bf16.mxu1 %vm11963_vm0, %v11962_v1  ;;  %v5194_v7 = vpop.f32.mrf.mxu0  ;;  %11210 = vmatmul.mubr.bf16.vlgmr.msra.gmra.mxu0 %v11827_v44  ;;  %v6772_v24 = vsel %vm1990_vm6, %v6769_v42, %v6771_v0  ;;  %v11833_v57 = vld [vmem:[%s12023_s27 + $0x34] sm:$0xff]   ;;  %v11834_v42 = vld [vmem:[%s12023_s27 + $0x3c] sm:$0xff]  }
 0x2d6   : > { %v10855_v27 = vpop.f32.mrf.mxu1  ;;  %11213 = vmatprep.mubr.msk.bf16.mxu0 %vm11963_vm0, %v11962_v1  ;;  %11298 = vmatpush3.bf16.msra.mxu0 %v11840_v48 }
 0x2d7   : > { %v13820_v33 = vadd.f32 %v5186_v59, %v4949_v50  ;;  %v10911_v12 = vpop.f32.mrf.mxu0  ;;  %11299 = vmatprep.subr.bf16.mxu0 %v11962_v1  ;;  %v11848_v27 = vld [vmem:[%s14513_s1 + $0x558] sm:$0xff]  }
 0x2d8   : > { %v4893_v54 = vpop.f32.mrf.mxu1 }
 0x2d9   : > { %v4950_v22 = vadd.f32 %v4893_v54, %v13641_v5  ;;  %v5197_v19 = vpop.f32.mrf.mxu0  ;;  %v11846_v5 = vld [vmem:[%s14513_s1 + $0x5a8] sm:$0xff]  }
 0x2da   : > { %v10856_v9 = vpop.f32.mrf.mxu1  ;;  %11300 = vmatpush3.bf16.msra.mxu0 %v11843_v30 }
 0x2db   : > { %v13830_v53 = vadd.f32 %v5189_v8, %v4950_v22  ;;  %v10912_v49 = vpop.f32.mrf.mxu0  ;;  %11301 = vmatprep.subr.bf16.mxu0 %v11962_v1 }
 0x2dc   : > { %v4898_v60 = vpop.f32.mrf.mxu1  ;;  %11158 = vmatmul.mubr.bf16.vlgmr.msra.gmra.mxu1 %v6768_v18  ;;  %v6773_v18 = vrot.slane %v11832_v47, 3 }
 0x2dd   : > { %v4951_v34 = vadd.f32 %v4898_v60, %v13656_v10  ;;  %11161 = vmatprep.mubr.msk.bf16.mxu1 %vm11963_vm0, %v11962_v1  ;;  %v5202_v29 = vpop.f32.mrf.mxu0  ;;  %11214 = vmatmul.mubr.bf16.gmra.mxu0 %v11829_v61  ;;  %v11851_v61 = vld [vmem:[%s14513_s1 + $0x550] sm:$0xff]  }
 0x2de   : > { %v10859_v58 = vpop.f32.mrf.mxu1  ;;  %11217 = vmatprep.mubr.msk.bf16.mxu0 %vm11963_vm0, %v11962_v1  ;;  %11246 = vmatpush3.bf16.msra.mxu1 %v11836_v46  ;;  %v11861_v46 = vld [vmem:[%s14513_s1 + $0x580] sm:$0xff]   ;;  %v6774_v60 = vsel %vm1990_vm6, %v6771_v0, %v6773_v18 }
 0x2df   : > { %v13844_v38 = vadd.f32 %v5194_v7, %v4951_v34  ;;  %v10915_v10 = vpop.f32.mrf.mxu0  ;;  %11247 = vmatprep.subr.bf16.mxu1 %v11962_v1  ;;  %11302 = vmatpush3.bf16.msra.mxu0 %v11846_v5 }
 0x2e0   : > { %v4901_v55 = vpop.f32.mrf.mxu1  ;;  %11303 = vmatprep.subr.bf16.mxu0 %v11962_v1 }
 0x2e1   : > { %v4952_v23 = vadd.f32 %v4901_v55, %v13673_v26  ;;  %v5205_v2 = vpop.f32.mrf.mxu0  ;;  %v11852_v26 = vld [vmem:[%s14513_s1 + $0x598] sm:$0xff]  }
 0x2e2   : > { %v10860_v37 = vpop.f32.mrf.mxu1  ;;  %11248 = vmatpush3.bf16.msra.mxu1 %v11839_v56  ;;  %v11854_v56 = vld [vmem:[%s14513_s1 + $0x548] sm:$0xff]  }
 0x2e3   : > { %v13860_v59 = vadd.f32 %v5197_v19, %v4952_v23  ;;  %v10916_v11 = vpop.f32.mrf.mxu0  ;;  %11249 = vmatprep.subr.bf16.mxu1 %v11962_v1  ;;  %11304 = vmatpush3.bf16.msra.mxu0 %v11849_v25  ;;  %v6775_v23 = vrot.slane %v11834_v42, 3  ;;  %v11850_v42 = vld [vmem:[%s12023_s27 + $0x54] sm:$0xff]  }
 0x2e4   : > { %v4906_v31 = vpop.f32.mrf.mxu1  ;;  %11162 = vmatmul.mubr.bf16.gmra.mxu1 %v6770_v62  ;;  %11305 = vmatprep.subr.bf16.mxu0 %v11962_v1 }
 0x2e5   : > { %v4953_v52 = vadd.f32 %v4906_v31, %v13689_v40  ;;  %11165 = vmatprep.mubr.msk.bf16.mxu1 %vm11963_vm0, %v11962_v1  ;;  %v5210_v8 = vpop.f32.mrf.mxu0  ;;  %11218 = vmatmul.mubr.bf16.gmra.mxu0 %v11831_v45  ;;  %v6776_v11 = vsel %vm1990_vm6, %v6773_v18, %v6775_v23  ;;  %v11837_v31 = vld [vmem:[%s12023_s27 + $0x44] sm:$0xff]  }
 0x2e6   : > { %v10863_v16 = vpop.f32.mrf.mxu1  ;;  %11221 = vmatprep.mubr.msk.bf16.mxu0 %vm11963_vm0, %v11962_v1  ;;  %11250 = vmatpush3.bf16.msra.mxu1 %v11842_v35 }
 0x2e7   : > { %v13876_v44 = vadd.f32 %v5202_v29, %v4953_v52  ;;  %v10919_v40 = vpop.f32.mrf.mxu0  ;;  %11251 = vmatprep.subr.bf16.mxu1 %v11962_v1  ;;  %11306 = vmatpush3.bf16.msra.mxu0 %v11852_v26  ;;  %v11835_v29 = vld [vmem:[%s12023_s27 + $0x3c] sm:$0xff]   ;;  %v11838_v52 = vld [vmem:[%s12023_s27 + $0x44] sm:$0xff]  }
 0x2e8   : > { %v4909_v48 = vpop.f32.mrf.mxu1  ;;  %11307 = vmatprep.subr.bf16.mxu0 %v11962_v1 }
 0x2e9   : > { %v4954_v63 = vadd.f32 %v4909_v48, %v13706_v15  ;;  %v5213_v50 = vpop.f32.mrf.mxu0  ;;  %v11858_v15 = vld [vmem:[%s14513_s1 + $0x588] sm:$0xff]  }
 0x2ea   : > { %v10864_v7 = vpop.f32.mrf.mxu1  ;;  %11252 = vmatpush3.bf16.msra.mxu1 %v11845_v14 }
 0x2eb   : > { %v13890_v30 = vadd.f32 %v5205_v2, %v4954_v63  ;;  %v10920_v12 = vpop.f32.mrf.mxu0  ;;  %11253 = vmatprep.subr.bf16.mxu1 %v11962_v1  ;;  %11308 = vmatpush3.bf16.msra.mxu0 %v11855_v17 }
 0x2ec   : > { %v4914_v54 = vpop.f32.mrf.mxu1  ;;  %11166 = vmatmul.mubr.bf16.gmra.mxu1 %v6772_v24  ;;  %11309 = vmatprep.subr.bf16.mxu0 %v11962_v1 }
 0x2ed   : > { %v4955_v22 = vadd.f32 %v4914_v54, %v13722_v4  ;;  %11169 = vmatprep.mubr.msk.bf16.mxu1 %vm11963_vm0, %v11962_v1  ;;  %v5218_v19 = vpop.f32.mrf.mxu0  ;;  %11222 = vmatmul.mubr.bf16.gmra.mxu0 %v11833_v57 }
 0x2ee   : > { %v10867_v20 = vpop.f32.mrf.mxu1  ;;  %11225 = vmatprep.mubr.msk.bf16.mxu0 %vm11963_vm0, %v11962_v1  ;;  %11254 = vmatpush3.bf16.msra.mxu1 %v11848_v27  ;;  %v11844_v27 = vld [vmem:[%s12023_s27 + $0x4c] sm:$0xff]  }
 0x2ef   : > { %v13905_v9 = vadd.f32 %v5210_v8, %v4955_v22  ;;  %v10923_v4 = vpop.f32.mrf.mxu0  ;;  %11255 = vmatprep.subr.bf16.mxu1 %v11962_v1  ;;  %11310 = vmatpush3.bf16.msra.mxu0 %v11858_v15 }
 0x2f0   : > { %v4917_v49 = vpop.f32.mrf.mxu1  ;;  %11311 = vmatprep.subr.bf16.mxu0 %v11962_v1 }
 0x2f1   : > { %v4956_v5 = vadd.f32 %v4917_v49, %v13737_v28  ;;  %v5221_v34 = vpop.f32.mrf.mxu0 }
 0x2f2   : > { %v10868_v58 = vpop.f32.mrf.mxu1  ;;  %11256 = vmatpush3.bf16.msra.mxu1 %v11851_v61 }
 0x2f3   : > { %v13919_v10 = vadd.f32 %v5213_v50, %v4956_v5  ;;  %v10924_v25 = vpop.f32.mrf.mxu0  ;;  %11257 = vmatprep.subr.bf16.mxu1 %v11962_v1  ;;  %11312 = vmatpush3.bf16.msra.mxu0 %v11861_v46  ;;  %v4628_v46 = vld [vmem:[#allocation2 + $0x60] sm:$0xf] }
 0x2f4   : > { %v4922_v55 = vpop.f32.mrf.mxu1  ;;  %11170 = vmatmul.mubr.bf16.gmra.mxu1 %v6774_v60  ;;  %11401 = vmatprep.subr.bf16.mxu0 %v11962_v1 }
 0x2f5   : > { %v4957_v28 = vadd.f32 %v4922_v55, %v13749_v39  ;;  %11173 = vmatprep.mubr.msk.bf16.mxu1 %vm11963_vm0, %v11962_v1  ;;  %v5226_v62 = vpop.f32.mrf.mxu0  ;;  %11226 = vmatmul.mubr.bf16.gmra.mxu0 %v11835_v29 }
 0x2f6   : > { %v10871_v2 = vpop.f32.mrf.mxu1  ;;  %11229 = vmatprep.mubr.msk.bf16.mxu0 %vm11963_vm0, %v11962_v1  ;;  %11258 = vmatpush3.bf16.msra.mxu1 %v11854_v56 }
 0x2f7   : > { %v13931_v45 = vadd.f32 %v5218_v19, %v4957_v28  ;;  %v10927_v39 = vpop.f32.mrf.mxu0  ;;  %11259 = vmatprep.subr.bf16.mxu1 %v11962_v1 }
 0x2f8   : > { %v4925_v37 = vpop.f32.mrf.mxu1  ;;  %v11853_v39 = vld [vmem:[%s12023_s27 + $0x5c] ss:$0 sps:$4 sm:$0x11]  }
 0x2f9   : > { %v4958_v35 = vadd.f32 %v4925_v37, %v13757_v6  ;;  %v5229_v26 = vpop.f32.mrf.mxu0  ;;  %v6777_v6 = vrot.slane %v11837_v31, 3 }
 0x2fa   : > { %v10872_v0 = vpop.f32.mrf.mxu1  ;;  %11260 = vmatpush3.bf16.msra.mxu1 %v11857_v51 }
 0x2fb   : > { %v13938_v8 = vadd.f32 %v5221_v34, %v4958_v35  ;;  %v10928_v16 = vpop.f32.mrf.mxu0  ;;  %11349 = vmatprep.subr.bf16.mxu1 %v11962_v1  ;;  %v6778_v57 = vsel %vm1990_vm6, %v6775_v23, %v6777_v6  ;;  %v11862_v0 = vld [vmem:[%s12023_s27 + $0x1c] sm:$0xfe]  }
 0x2fc   : > { %v4930_v14 = vpop.f32.mrf.mxu1  ;;  %11174 = vmatmul.mubr.bf16.gmra.mxu1 %v6776_v11  ;;  %v11856_v11 = vld [vmem:[%s12023_s27 + $0x5c] sm:$0x3f]   ;;  %v11863_v16 = vld [vmem:[%s12023_s27 + $0x24] sm:$0xff]  }
 0x2fd   : > { %v4959_v40 = vadd.f32 %v4930_v14, %v13765_v36  ;;  %11177 = vmatprep.mubr.msk.bf16.mxu1 %vm11963_vm0, %v11962_v1  ;;  %v5234_v17 = vpop.f32.mrf.mxu0  ;;  %11230 = vmatmul.mubr.bf16.gmra.mxu0 %v11838_v52  ;;  %v11841_v36 = vld [vmem:[%s12023_s27 + $0x4c] sm:$0xff]  }
 0x2fe   : > { %v10875_v48 = vpop.f32.mrf.mxu1  ;;  %11233 = vmatprep.mubr.msk.bf16.mxu0 %vm11963_vm0, %v11962_v1  ;;  %v6779_v19 = vrot.slane %v11841_v36, 3  ;;  %v7745_v36 = vrot.slane %v11863_v16, 1  ;;  %v11882_v16 = vld [vmem:[%s14513_s1 + $0x628] sm:$0xff]  }
 0x2ff   : > { %v13946_v63 = vadd.f32 %v5226_v62, %v4959_v40  ;;  %v10931_v24 = vpop.f32.mrf.mxu0  ;;  %v6783_v48 = vrot.slane %v11853_v39, 3 }
 0x300   : > { %v4933_v50 = vpop.f32.mrf.mxu1  ;;  %v6780_v60 = vsel %vm1990_vm6, %v6777_v6, %v6779_v19 }
 0x301   : > { %v4960_v47 = vadd.f32 %v4933_v50, %v13771_v41  ;;  %v5237_v7 = vpop.f32.mrf.mxu0  ;;  %v11860_v50 = vld [vmem:[%s12023_s27 + $0x24] sm:$0xff]  }
 0x302   : > { %v10876_v12 = vpop.f32.mrf.mxu1 }
 0x303   : > { %v13952_v15 = vadd.f32 %v5229_v26, %v4960_v47  ;;  %v10932_v54 = vpop.f32.mrf.mxu0  ;;  %v11859_v26 = vld [vmem:[%s12023_s27 + $0x1c] sm:$0xff]  }
 0x304   : > { %v4938_v22 = vpop.f32.mrf.mxu1  ;;  %11178 = vmatmul.mubr.bf16.gmra.mxu1 %v6778_v57  ;;  %v7380_v47 = vshll.u32 %v11859_v26, 16 }
 0x305   : > { %v4961_v18 = vadd.f32 %v4938_v22, %v13779_v32  ;;  %11181 = vmatprep.mubr.msk.bf16.mxu1 %vm11963_vm0, %v11962_v1  ;;  %v5859_v41 = vpop.f32.mrf.mxu0  ;;  %11234 = vmatmul.mubr.bf16.gmra.mxu0 %v11844_v27  ;;  %v11847_v32 = vld [vmem:[%s12023_s27 + $0x54] sm:$0xff]  }
 0x306   : > { %v10879_v20 = vpop.f32.mrf.mxu1  ;;  %11237 = vmatprep.mubr.msk.bf16.mxu0 %vm11963_vm0, %v11962_v1  ;;  %v6781_v55 = vrot.slane %v11847_v32, 3 }
 0x307   : > { %v13959_v61 = vadd.f32 %v5234_v17, %v4961_v18  ;;  %v11003_v4 = vpop.f32.mrf.mxu0  ;;  %v7385_v20 = vshll.u32 %v11860_v50, 16 }
 0x308   : > { %v4941_v49 = vpop.f32.mrf.mxu1 }
 0x309   : > { %v4962_v5 = vadd.f32 %v4941_v49, %v4628_v46  ;;  %v5862_v34 = vpop.f32.mrf.mxu0  ;;  %v13992_v49 = vld [vmem:[%s12023_s27 + $0x2c] sm:$0xff]  }
 0x30a   : > { %v10880_v29 = vpop.f32.mrf.mxu1 }
 0x30b   : > { %4980 = vst [vmem:[#allocation2 + $0x60] sm:$0xf] %v4962_v5  ;;  %v11004_v58 = vpop.f32.mrf.mxu0  ;;  %v11876_v5 = vld [vmem:[%s14513_s1 + $0x638] sm:$0xff]   ;;  %v7387_v29 = vrot.slane %v7385_v20, 1 }
 0x30c   : > { %v5483_v56 = vpop.f32.mrf.mxu1  ;;  %11182 = vmatmul.mubr.bf16.gmra.mxu1 %v6780_v60 }
 0x30d   : > { %v5554_v25 = vadd.f32 %v5483_v56, %v13789_v3  ;;  %11185 = vmatprep.mubr.msk.bf16.mxu1 %vm11963_vm0, %v11962_v1  ;;  %v5867_v28 = vpop.f32.mrf.mxu0  ;;  %11238 = vmatmul.mubr.bf16.gmra.mxu0 %v11850_v42  ;;  %v6782_v3 = vsel %vm1990_vm6, %v6779_v19, %v6781_v55  ;;  %v7378_v19 = vshrl.u32 %v11859_v26, 16  ;;  %v14003_v56 = vld [vmem:[%s12023_s27 + $0x2c] sm:$0xff]  }
 0x30e   : > { %v10951_v23 = vpop.f32.mrf.mxu1  ;;  %11241 = vmatprep.mubr.msk.bf16.mxu0 %vm11963_vm0, %v11962_v1 }
 0x30f   : > { %v13969_v62 = vadd.f32 %v5859_v41, %v5554_v25  ;;  %v11007_v2 = vpop.f32.mrf.mxu0  ;;  %v7382_v41 = vrot.slane %v7380_v47, 1 }
 0x310   : > { %v5486_v51 = vpop.f32.mrf.mxu1 }
 0x311   : > { %v5555_v37 = vadd.f32 %v5486_v51, %v13794_v43  ;;  %v5870_v35 = vpop.f32.mrf.mxu0  ;;  %v7383_v42 = vor.u32 %v7382_v41, %v7378_v19 }
 0x312   : > { %v5016_v31 = vld [vmem:[#allocation2 + $0x60] sm:$0xf]  ;;  %v10952_v52 = vpop.f32.mrf.mxu1 }
 0x313   : > { %v5258_v14 = vadd.f32 %v5237_v7, %v5016_v31  ;;  %v13978_v40 = vadd.f32 %v5862_v34, %v5555_v37  ;;  %v11008_v6 = vpop.f32.mrf.mxu0  ;;  %v7744_v7 = vrot.slane %v11862_v0, 1  ;;  %v7388_v39 = vsel %vm613_vm2, %v7383_v42, %v7387_v29  ;;  %v14019_v31 = vld [vmem:[%s12023_s27 + $0x34] sm:$0xff]  }
 0x314   : > { %v5491_v17 = vpop.f32.mrf.mxu1  ;;  %11186 = vmatmul.mubr.bf16.gmra.mxu1 %v6782_v3  ;;  %v7389_v3 = vshrl.u32 %v11860_v50, 16  ;;  %v11872_v52 = vld [vmem:[%s14513_s1 + $0x5f8] sm:$0xff]   ;;  %v7749_v47 = vrot.slane %v14019_v31, 1  ;;  %v14092_v31 = vld [vmem:[%s12023_s27 + $0x44] sm:$0xff]  }
 0x315   : > { %5276 = vst [vmem:[#allocation2 + $0x60] sm:$0xf] %v5258_v14  ;;  %v5556_v43 = vadd.f32 %v5491_v17, %v13801_v13  ;;  %11189 = vmatprep.mubr.msk.bf16.mxu1 %vm11963_vm0, %v11962_v1  ;;  %v5875_v24 = vpop.f32.mrf.mxu0  ;;  %11242 = vmatmul.mubr.bf16.gmra.mxu0 %v11856_v11  ;;  %v6784_v13 = vsel %vm1990_vm6, %v6781_v55, %v6783_v48  ;;  %v7747_v55 = vrot.slane %v13992_v49, 1 }
 0x316   : > { %v10955_v57 = vpop.f32.mrf.mxu1  ;;  %11313 = vmatprep.mubr.msk.bf16.mxu0 %vm11963_vm0, %v11962_v1  ;;  %v7746_v46 = vsel %vm981_vm1, %v7744_v7, %v7745_v36  ;;  %v7391_v17 = vor.u32 %v7389_v3, %v7387_v29 }
 0x317   : > { %v13986_v27 = vadd.f32 %v5867_v28, %v5556_v43  ;;  %v11011_v12 = vpop.f32.mrf.mxu0  ;;  %v7748_v26 = vsel %vm981_vm1, %v7745_v36, %v7747_v55  ;;  %v11885_v36 = vld [vmem:[%s14513_s1 + $0x620] sm:$0xff]   ;;  %v7750_v20 = vsel %vm981_vm1, %v7747_v55, %v7749_v47 }
 0x318   : > { %v5494_v54 = vpop.f32.mrf.mxu1 }
 0x319   : > { %v5557_v22 = vadd.f32 %v5494_v54, %v13810_v21  ;;  %v5878_v18 = vpop.f32.mrf.mxu0 }
 0x31a   : > { %v10956_v4 = vpop.f32.mrf.mxu1 }
 0x31b   : > { %v13997_v60 = vadd.f32 %v5870_v35, %v5557_v22  ;;  %v11012_v34 = vpop.f32.mrf.mxu0  ;;  %v7393_v35 = vshll.u32 %v14003_v56, 16  ;;  %v14055_v4 = vld [vmem:[%s12023_s27 + $0x3c] sm:$0xff]  }
 0x31c   : > { %v5499_v32 = vpop.f32.mrf.mxu1  ;;  %11190 = vmatmul.mubr.bf16.gmra.mxu1 %v6784_v13 }
 0x31d   : > { %v5558_v21 = vadd.f32 %v5499_v32, %v13820_v33  ;;  %11261 = vmatprep.mubr.msk.bf16.mxu1 %vm11963_vm0, %v11962_v1  ;;  %v5883_v58 = vpop.f32.mrf.mxu0  ;;  %11314 = vmatmul.mubr.bf16.vlgmr.msra.gmra.mxu0 %v7746_v46  ;;  %v11879_v33 = vld [vmem:[%s14513_s1 + $0x630] sm:$0xff]   ;;  %v7395_v48 = vrot.slane %v7393_v35, 1  ;;  %v11878_v46 = vld [vmem:[%s14513_s1 + $0x5e8] sm:$0xff]  }
 0x31e   : > { %v10959_v25 = vpop.f32.mrf.mxu1  ;;  %11317 = vmatprep.mubr.msk.bf16.mxu0 %vm11963_vm0, %v11962_v1  ;;  %11402 = vmatpush3.bf16.msra.mxu0 %v11876_v5  ;;  %v11888_v5 = vld [vmem:[%s14513_s1 + $0x618] sm:$0xff]  }
 0x31f   : > { %v14011_v28 = vadd.f32 %v5875_v24, %v5558_v21  ;;  %v11015_v23 = vpop.f32.mrf.mxu0  ;;  %11403 = vmatprep.subr.bf16.mxu0 %v11962_v1  ;;  %v14034_v24 = vld [vmem:[%s12023_s27 + $0x34] sm:$0xff]   ;;  %v7396_v13 = vsel %vm613_vm2, %v7391_v17, %v7395_v48  ;;  %v7751_v25 = vrot.slane %v14055_v4, 1  ;;  %v11874_v4 = vld [vmem:[%s12023_s27 + $0x4c] sm:$0xff]  }
 0x320   : > { %v5502_v2 = vpop.f32.mrf.mxu1  ;;  %v7401_v19 = vshll.u32 %v14034_v24, 16  ;;  %v11890_v23 = vld [vmem:[%s14513_s1 + $0x610] sm:$0xff]   ;;  %v7405_v3 = vshrl.u32 %v14034_v24, 16  ;;  %v11870_v24 = vld [vmem:[%s12023_s27 + $0x44] sm:$0xff]  }
 0x321   : > { %v5559_v51 = vadd.f32 %v5502_v2, %v13830_v53  ;;  %v5886_v37 = vpop.f32.mrf.mxu0 }
 0x322   : > { %v10960_v11 = vpop.f32.mrf.mxu1  ;;  %11404 = vmatpush3.bf16.msra.mxu0 %v11879_v33  ;;  %v7403_v42 = vrot.slane %v7401_v19, 1  ;;  %v7417_v19 = vshll.u32 %v11870_v24, 16 }
 0x323   : > { %v14024_v0 = vadd.f32 %v5878_v18, %v5559_v51  ;;  %v11016_v53 = vpop.f32.mrf.mxu0  ;;  %11405 = vmatprep.subr.bf16.mxu0 %v11962_v1  ;;  %v7397_v18 = vshrl.u32 %v14003_v56, 16 }
 0x324   : > { %v5507_v14 = vpop.f32.mrf.mxu1  ;;  %11262 = vmatmul.mubr.bf16.vlgmr.msra.gmra.mxu1 %v7388_v39  ;;  %v7407_v17 = vor.u32 %v7405_v3, %v7403_v42 }
 0x325   : > { %v5560_v6 = vadd.f32 %v5507_v14, %v13844_v38  ;;  %11265 = vmatprep.mubr.msk.bf16.mxu1 %vm11963_vm0, %v11962_v1  ;;  %v5891_v43 = vpop.f32.mrf.mxu0  ;;  %11318 = vmatmul.mubr.bf16.gmra.mxu0 %v7748_v26  ;;  %v11875_v38 = vld [vmem:[%s14513_s1 + $0x5f0] sm:$0xff]   ;;  %v7399_v21 = vor.u32 %v7397_v18, %v7395_v48  ;;  %v7752_v26 = vsel %vm981_vm1, %v7749_v47, %v7751_v25  ;;  %v7753_v47 = vrot.slane %v14092_v31, 1 }
 0x326   : > { %v10963_v50 = vpop.f32.mrf.mxu1  ;;  %11321 = vmatprep.mubr.msk.bf16.mxu0 %vm11963_vm0, %v11962_v1  ;;  %11350 = vmatpush3.bf16.msra.mxu1 %v11872_v52  ;;  %v11884_v52 = vld [vmem:[%s14513_s1 + $0x5d8] sm:$0xff]  }
 0x327   : > { %v14042_v57 = vadd.f32 %v5883_v58, %v5560_v6  ;;  %v11019_v7 = vpop.f32.mrf.mxu0  ;;  %11351 = vmatprep.subr.bf16.mxu1 %v11962_v1  ;;  %11406 = vmatpush3.bf16.msra.mxu0 %v11882_v16  ;;  %v14071_v58 = vld [vmem:[%s12023_s27 + $0x3c] sm:$0xff]   ;;  %v7404_v39 = vsel %vm613_vm2, %v7399_v21, %v7403_v42  ;;  %v11892_v16 = vld [vmem:[%s14513_s1 + $0x608] sm:$0xff]   ;;  %v7419_v21 = vrot.slane %v7417_v19, 1 }
 0x328   : > { %v5510_v12 = vpop.f32.mrf.mxu1  ;;  %11407 = vmatprep.subr.bf16.mxu0 %v11962_v1  ;;  %v7409_v35 = vshll.u32 %v14071_v58, 16  ;;  %v7413_v18 = vshrl.u32 %v14071_v58, 16 }
 0x329   : > { %v5561_v54 = vadd.f32 %v5510_v12, %v13860_v59  ;;  %v5894_v22 = vpop.f32.mrf.mxu0 }
 0x32a   : > { %v10964_v41 = vpop.f32.mrf.mxu1  ;;  %11352 = vmatpush3.bf16.msra.mxu1 %v11875_v38  ;;  %v7411_v48 = vrot.slane %v7409_v35, 1 }
 0x32b   : > { %v14060_v49 = vadd.f32 %v5886_v37, %v5561_v54  ;;  %v11020_v59 = vpop.f32.mrf.mxu0  ;;  %11353 = vmatprep.subr.bf16.mxu1 %v11962_v1  ;;  %11408 = vmatpush3.bf16.msra.mxu0 %v11885_v36  ;;  %v11895_v36 = vld [vmem:[%s14513_s1 + $0x600] sm:$0xff]  }
 0x32c   : > { %v5515_v34 = vpop.f32.mrf.mxu1  ;;  %11266 = vmatmul.mubr.bf16.gmra.mxu1 %v7396_v13  ;;  %11409 = vmatprep.subr.bf16.mxu0 %v11962_v1  ;;  %v7412_v13 = vsel %vm613_vm2, %v7407_v17, %v7411_v48 }
 0x32d   : > { %v5562_v32 = vadd.f32 %v5515_v34, %v13876_v44  ;;  %11269 = vmatprep.mubr.msk.bf16.mxu1 %vm11963_vm0, %v11962_v1  ;;  %v5899_v29 = vpop.f32.mrf.mxu0  ;;  %11322 = vmatmul.mubr.bf16.gmra.mxu0 %v7750_v20  ;;  %v11881_v44 = vld [vmem:[%s14513_s1 + $0x5e0] sm:$0xff]   ;;  %v7754_v20 = vsel %vm981_vm1, %v7751_v25, %v7753_v47 }
 0x32e   : > { %v10967_v56 = vpop.f32.mrf.mxu1  ;;  %11325 = vmatprep.mubr.msk.bf16.mxu0 %vm11963_vm0, %v11962_v1  ;;  %11354 = vmatpush3.bf16.msra.mxu1 %v11878_v46  ;;  %v11889_v46 = vld [vmem:[%s14513_s1 + $0x5c8] sm:$0xff]   ;;  %v11891_v25 = vld [vmem:[%s14513_s1 + $0x5c0] sm:$0xff]  }
 0x32f   : > { %v14079_v55 = vadd.f32 %v5891_v43, %v5562_v32  ;;  %v11023_v33 = vpop.f32.mrf.mxu0  ;;  %11355 = vmatprep.subr.bf16.mxu1 %v11962_v1  ;;  %11410 = vmatpush3.bf16.msra.mxu0 %v11888_v5  ;;  %v7415_v32 = vor.u32 %v7413_v18, %v7411_v48  ;;  %v7755_v56 = vrot.slane %v11874_v4, 1 }
 0x330   : > { %v5518_v2 = vpop.f32.mrf.mxu1  ;;  %11411 = vmatprep.subr.bf16.mxu0 %v11962_v1 }
 0x331   : > { %v5563_v51 = vadd.f32 %v5518_v2, %v13890_v30  ;;  %v5902_v37 = vpop.f32.mrf.mxu0  ;;  %v7420_v2 = vsel %vm613_vm2, %v7415_v32, %v7419_v21  ;;  %v7756_v35 = vsel %vm981_vm1, %v7753_v47, %v7755_v56 }
 0x332   : > { %v10968_v11 = vpop.f32.mrf.mxu1  ;;  %11356 = vmatpush3.bf16.msra.mxu1 %v11881_v44 }
 0x333   : > { %v14097_v53 = vadd.f32 %v5894_v22, %v5563_v51  ;;  %v11024_v30 = vpop.f32.mrf.mxu0  ;;  %11357 = vmatprep.subr.bf16.mxu1 %v11962_v1  ;;  %11412 = vmatpush3.bf16.msra.mxu0 %v11890_v23  ;;  %v11880_v11 = vld [vmem:[%s12023_s27 + $0x54] sm:$0xff]  }
 0x334   : > { %v5523_v14 = vpop.f32.mrf.mxu1  ;;  %11270 = vmatmul.mubr.bf16.gmra.mxu1 %v7404_v39  ;;  %11413 = vmatprep.subr.bf16.mxu0 %v11962_v1  ;;  %v7421_v39 = vshrl.u32 %v11870_v24, 16  ;;  %v7757_v48 = vrot.slane %v11880_v11, 1 }
 0x335   : > { %v5564_v6 = vadd.f32 %v5523_v14, %v13905_v9  ;;  %11273 = vmatprep.mubr.msk.bf16.mxu1 %vm11963_vm0, %v11962_v1  ;;  %v5907_v43 = vpop.f32.mrf.mxu0  ;;  %11326 = vmatmul.mubr.bf16.gmra.mxu0 %v7752_v26  ;;  %v11887_v9 = vld [vmem:[%s14513_s1 + $0x5d0] sm:$0xff]  }
 0x336   : > { %v10971_v50 = vpop.f32.mrf.mxu1  ;;  %11329 = vmatprep.mubr.msk.bf16.mxu0 %vm11963_vm0, %v11962_v1  ;;  %11358 = vmatpush3.bf16.msra.mxu1 %v11884_v52 }
 0x337   : > { %v14114_v38 = vadd.f32 %v5899_v29, %v5564_v6  ;;  %v11027_v7 = vpop.f32.mrf.mxu0  ;;  %11359 = vmatprep.subr.bf16.mxu1 %v11962_v1  ;;  %11414 = vmatpush3.bf16.msra.mxu0 %v11892_v16  ;;  %v11873_v29 = vld [vmem:[%s12023_s27 + $0x4c] sm:$0xff]   ;;  %v11877_v6 = vld [vmem:[%s12023_s27 + $0x54] sm:$0xff]  }
 0x338   : > { %v5526_v12 = vpop.f32.mrf.mxu1  ;;  %11415 = vmatprep.subr.bf16.mxu0 %v11962_v1  ;;  %v7429_v7 = vshrl.u32 %v11873_v29, 16 }
 0x339   : > { %v5565_v54 = vadd.f32 %v5526_v12, %v13919_v10  ;;  %v5910_v22 = vpop.f32.mrf.mxu0 }
 0x33a   : > { %v10972_v41 = vpop.f32.mrf.mxu1  ;;  %11360 = vmatpush3.bf16.msra.mxu1 %v11887_v9 }
 0x33b   : > { %v14129_v59 = vadd.f32 %v5902_v37, %v5565_v54  ;;  %v11028_v5 = vpop.f32.mrf.mxu0  ;;  %11361 = vmatprep.subr.bf16.mxu1 %v11962_v1  ;;  %11416 = vmatpush3.bf16.msra.mxu0 %v11895_v36  ;;  %v7425_v37 = vshll.u32 %v11873_v29, 16  ;;  %v7433_v36 = vshll.u32 %v11877_v6, 16  ;;  %v7758_v54 = vsel %vm981_vm1, %v7755_v56, %v7757_v48 }
 0x33c   : > { %v5531_v10 = vpop.f32.mrf.mxu1  ;;  %11274 = vmatmul.mubr.bf16.gmra.mxu1 %v7412_v13  ;;  %v11886_v13 = vld [vmem:[%s12023_s27 + $0x5c] sm:$0x7f]   ;;  %v7437_v56 = vshrl.u32 %v11877_v6, 16 }
 0x33d   : > { %v5566_v34 = vadd.f32 %v5531_v10, %v13931_v45  ;;  %11277 = vmatprep.mubr.msk.bf16.mxu1 %vm11963_vm0, %v11962_v1  ;;  %v5915_v42 = vpop.f32.mrf.mxu0  ;;  %11330 = vmatmul.mubr.bf16.gmra.mxu0 %v7754_v20  ;;  %v7427_v16 = vrot.slane %v7425_v37, 1  ;;  %v7435_v20 = vrot.slane %v7433_v36, 1  ;;  %v7759_v10 = vrot.slane %v11886_v13, 1 }
 0x33e   : > { %v10975_v58 = vpop.f32.mrf.mxu1  ;;  %11333 = vmatprep.mubr.msk.bf16.mxu0 %vm11963_vm0, %v11962_v1  ;;  %11362 = vmatpush3.bf16.msra.mxu1 %v11889_v46  ;;  %v11883_v46 = vld [vmem:[%s12023_s27 + $0x5c] sm:$0x7f]  }
 0x33f   : > { %v14141_v45 = vadd.f32 %v5907_v43, %v5566_v34  ;;  %v11031_v44 = vpop.f32.mrf.mxu0  ;;  %11363 = vmatprep.subr.bf16.mxu1 %v11962_v1  ;;  %v7445_v36 = vshrl.u32 %v11883_v46, 16 }
 0x340   : > { %v5534_v33 = vpop.f32.mrf.mxu1 }
 0x341   : > { %v5567_v23 = vadd.f32 %v5534_v33, %v13938_v8  ;;  %v5918_v51 = vpop.f32.mrf.mxu0  ;;  %v7423_v8 = vor.u32 %v7421_v39, %v7419_v21  ;;  %v5312_v21 = vld [vmem:[#allocation2 + $0x60] sm:$0xf]  ;;  %v7760_v33 = vsel %vm981_vm1, %v7757_v48, %v7759_v10  ;;  %v7439_v39 = vor.u32 %v7437_v56, %v7435_v20 }
 0x342   : > { %v10976_v3 = vpop.f32.mrf.mxu1  ;;  %11364 = vmatpush3.bf16.msra.mxu1 %v11891_v25  ;;  %v7441_v25 = vshll.u32 %v11883_v46, 16  ;;  %v11896_v48 = vld [vmem:[%s12023_s27 + $0x1c] sm:$0xfc]  }
 0x343   : > { %v14148_v26 = vadd.f32 %v5910_v22, %v5567_v23  ;;  %v11032_v31 = vpop.f32.mrf.mxu0  ;;  %v7428_v47 = vsel %vm613_vm2, %v7423_v8, %v7427_v16 }
 0x344   : > { %v5539_v52 = vpop.f32.mrf.mxu1  ;;  %11278 = vmatmul.mubr.bf16.gmra.mxu1 %v7420_v2  ;;  %v7443_v37 = vrot.slane %v7441_v25, 1  ;;  %v11899_v25 = vld [vmem:[%s12023_s27 + $0x2c] sm:$0xff]  }
 0x345   : > { %v5568_v30 = vadd.f32 %v5539_v52, %v13946_v63  ;;  %11281 = vmatprep.mubr.msk.bf16.mxu1 %vm11963_vm0, %v11962_v1  ;;  %v5923_v14 = vpop.f32.mrf.mxu0  ;;  %11334 = vmatmul.mubr.bf16.gmra.mxu0 %v7756_v35 }
 0x346   : > { %v10979_v17 = vpop.f32.mrf.mxu1  ;;  %11337 = vmatprep.mubr.msk.bf16.mxu0 %vm11963_vm0, %v11962_v1  ;;  %v7444_v8 = vsel %vm613_vm2, %v7439_v39, %v7443_v37 }
 0x347   : > { %v14156_v43 = vadd.f32 %v5915_v42, %v5568_v30  ;;  %v11035_v24 = vpop.f32.mrf.mxu0  ;;  %v11893_v30 = vld [vmem:[%s12023_s27 + $0x1c] sm:$0xfe]  }
 0x348   : > { %v5542_v50 = vpop.f32.mrf.mxu1  ;;  %v11897_v24 = vld [vmem:[%s12023_s27 + $0x24] sm:$0xff]  }
 0x349   : > { %v5569_v63 = vadd.f32 %v5542_v50, %v13952_v15  ;;  %v5926_v9 = vpop.f32.mrf.mxu0  ;;  %v7431_v15 = vor.u32 %v7429_v7, %v7427_v16 }
 0x34a   : > { %v10980_v12 = vpop.f32.mrf.mxu1 }
 0x34b   : > { %v14162_v22 = vadd.f32 %v5918_v51, %v5569_v63  ;;  %v11036_v18 = vpop.f32.mrf.mxu0  ;;  %v8058_v12 = vshrl.u32 %v11893_v30, 16 }
 0x34c   : > { %v5547_v19 = vpop.f32.mrf.mxu1  ;;  %11282 = vmatmul.mubr.bf16.gmra.mxu1 %v7428_v47 }
 0x34d   : > { %v5570_v41 = vadd.f32 %v5547_v19, %v13959_v61  ;;  %11285 = vmatprep.mubr.msk.bf16.mxu1 %vm11963_vm0, %v11962_v1  ;;  %v6557_v4 = vpop.f32.mrf.mxu0  ;;  %11338 = vmatmul.mubr.bf16.gmra.mxu0 %v7758_v54  ;;  %v7436_v61 = vsel %vm613_vm2, %v7431_v15, %v7435_v20  ;;  %v8061_v54 = vshll.u32 %v11893_v30, 16  ;;  %v8434_v15 = vrot.slane %v11897_v24, 2 }
 0x34e   : > { %v10983_v5 = vpop.f32.mrf.mxu1  ;;  %11341 = vmatprep.mubr.msk.bf16.mxu0 %vm11963_vm0, %v11962_v1 }
 0x34f   : > { %v14170_v34 = vadd.f32 %v5923_v14, %v5570_v41  ;;  %v11107_v32 = vpop.f32.mrf.mxu0  ;;  %v11894_v14 = vld [vmem:[%s12023_s27 + $0x24] sm:$0xff]   ;;  %v8433_v41 = vrot.slane %v11896_v48, 2  ;;  %v8060_v5 = vrot.slane %v8058_v12, 1 }
 0x350   : > { %v5550_v42 = vpop.f32.mrf.mxu1  ;;  %v8066_v18 = vshrl.u32 %v11894_v14, 16  ;;  %v8069_v19 = vshll.u32 %v11894_v14, 16  ;;  %v8063_v32 = vrot.slane %v8061_v54, 2 }
 0x351   : > { %v5571_v29 = vadd.f32 %v5550_v42, %v5312_v21  ;;  %v6560_v58 = vpop.f32.mrf.mxu0  ;;  %v8435_v56 = vsel %vm1672_vm3, %v8433_v41, %v8434_v15 }
 0x352   : > { %v10984_v44 = vpop.f32.mrf.mxu1  ;;  %v8068_v42 = vrot.slane %v8066_v18, 1 }
 0x353   : > { %5589 = vst [vmem:[#allocation2 + $0x60] sm:$0xf] %v5571_v29  ;;  %v11108_v23 = vpop.f32.mrf.mxu0  ;;  %v8071_v29 = vrot.slane %v8069_v19, 2 }
 0x354   : > { %v6172_v2 = vpop.f32.mrf.mxu1  ;;  %11286 = vmatmul.mubr.bf16.gmra.mxu1 %v7436_v61  ;;  %v11898_v61 = vld [vmem:[%s12023_s27 + $0x2c] sm:$0xff]  }
 0x355   : > { %v6243_v51 = vadd.f32 %v6172_v2, %v13969_v62  ;;  %11289 = vmatprep.mubr.msk.bf16.mxu1 %vm11963_vm0, %v11962_v1  ;;  %v6565_v3 = vpop.f32.mrf.mxu0  ;;  %11342 = vmatmul.mubr.bf16.gmra.mxu0 %v7760_v33  ;;  %v8064_v2 = vor.u32 %v8063_v32, %v8060_v5  ;;  %v11902_v32 = vld [vmem:[%s12023_s27 + $0x3c] sm:$0xff]  }
 0x356   : > { %v11055_v35 = vpop.f32.mrf.mxu1  ;;  %11345 = vmatprep.mubr.msk.bf16.mxu0 %vm11963_vm0, %v11962_v1 }
 0x357   : > { %v14179_v11 = vadd.f32 %v6557_v4, %v6243_v51  ;;  %v11111_v31 = vpop.f32.mrf.mxu0 }
 0x358   : > { %v6175_v52 = vpop.f32.mrf.mxu1  ;;  %v8436_v31 = vrot.slane %v11899_v25, 2 }
 0x359   : > { %v6244_v62 = vadd.f32 %v6175_v52, %v13978_v40  ;;  %v6568_v16 = vpop.f32.mrf.mxu0 }
 0x35a   : > { %v5625_v6 = vld [vmem:[#allocation2 + $0x60] sm:$0xf]  ;;  %v11056_v17 = vpop.f32.mrf.mxu1  ;;  %v8437_v24 = vsel %vm1672_vm3, %v8434_v15, %v8436_v31 }
 0x35b   : > { %v5947_v50 = vadd.f32 %v5926_v9, %v5625_v6  ;;  %v14187_v63 = vadd.f32 %v6560_v58, %v6244_v62  ;;  %v11112_v47 = vpop.f32.mrf.mxu0  ;;  %v11900_v17 = vld [vmem:[%s12023_s27 + $0x34] sm:$0xff]  }
 0x35c   : > { %v6180_v7 = vpop.f32.mrf.mxu1  ;;  %11290 = vmatmul.mubr.bf16.gmra.mxu1 %v7444_v8 }
 0x35d   : > { %5965 = vst [vmem:[#allocation2 + $0x60] sm:$0xf] %v5947_v50  ;;  %v6245_v40 = vadd.f32 %v6180_v7, %v13986_v27  ;;  %11293 = vmatprep.mubr.msk.bf16.mxu1 %vm11963_vm0, %v11962_v1  ;;  %v6573_v13 = vpop.f32.mrf.mxu0  ;;  %11346 = vmatmul.mubr.bf16.gmra.mxu0 %v7759_v10  ;;  %v7447_v27 = vor.u32 %v7445_v36, %v7443_v37  ;;  %v8075_v37 = vshrl.u32 %v11898_v61, 16  ;;  %v11901_v50 = vld [vmem:[%s12023_s27 + $0x34] sm:$0xff]  }
 0x35e   : > { %v11059_v9 = vpop.f32.mrf.mxu1  ;;  %11417 = vmatprep.mubr.msk.bf16.mxu0 %vm11963_vm0, %v11962_v1  ;;  %v8438_v19 = vrot.slane %v11901_v50, 2 }
 0x35f   : > { %v14194_v20 = vadd.f32 %v6565_v3, %v6245_v40  ;;  %v11115_v4 = vpop.f32.mrf.mxu0  ;;  %v8078_v3 = vshll.u32 %v11898_v61, 16  ;;  %v8077_v14 = vrot.slane %v8075_v37, 1  ;;  %v8084_v40 = vshrl.u32 %v11900_v17, 16 }
 0x360   : > { %v6183_v46 = vpop.f32.mrf.mxu1 }
 0x361   : > { %v6246_v21 = vadd.f32 %v6183_v46, %v13997_v60  ;;  %v6576_v10 = vpop.f32.mrf.mxu0  ;;  %v8072_v60 = vor.u32 %v8071_v29, %v8068_v42  ;;  %v8080_v6 = vrot.slane %v8078_v3, 2  ;;  %v11903_v42 = vld [vmem:[%s12023_s27 + $0x3c] sm:$0xff]  }
 0x362   : > { %v11060_v58 = vpop.f32.mrf.mxu1 }
 0x363   : > { %v14200_v44 = vadd.f32 %v6568_v16, %v6246_v21  ;;  %v11116_v33 = vpop.f32.mrf.mxu0  ;;  %v8073_v8 = vsel %vm1295_vm4, %v8064_v2, %v8072_v60 }
 0x364   : > { %v6188_v23 = vpop.f32.mrf.mxu1  ;;  %11294 = vmatmul.mubr.bf16.gmra.mxu1 %v7447_v27  ;;  %v8086_v27 = vrot.slane %v8084_v40, 1  ;;  %v8093_v33 = vshrl.u32 %v11902_v32, 16 }
 0x365   : > { %v6247_v51 = vadd.f32 %v6188_v23, %v14011_v28  ;;  %11365 = vmatprep.mubr.msk.bf16.mxu1 %vm11963_vm0, %v11962_v1  ;;  %v6581_v39 = vpop.f32.mrf.mxu0  ;;  %11418 = vmatmul.mubr.bf16.vlgmr.msra.gmra.mxu0 %v8435_v56  ;;  %v8096_v23 = vshll.u32 %v11902_v32, 16 }
 0x366   : > { %v11063_v35 = vpop.f32.mrf.mxu1  ;;  %11421 = vmatprep.mubr.msk.bf16.mxu0 %vm11963_vm0, %v11962_v1 }
 0x367   : > { %v14207_v52 = vadd.f32 %v6573_v13, %v6247_v51  ;;  %v11119_v30 = vpop.f32.mrf.mxu0  ;;  %v8087_v13 = vshll.u32 %v11900_v17, 16  ;;  %v8440_v51 = vrot.slane %v11903_v42, 2 }
 0x368   : > { %v6191_v62 = vpop.f32.mrf.mxu1  ;;  %v8098_v30 = vrot.slane %v8096_v23, 2 }
 0x369   : > { %v6248_v28 = vadd.f32 %v6191_v62, %v14024_v0  ;;  %v6584_v16 = vpop.f32.mrf.mxu0  ;;  %v8081_v0 = vor.u32 %v8080_v6, %v8077_v14  ;;  %v8089_v5 = vrot.slane %v8087_v13, 2  ;;  %v11904_v62 = vld [vmem:[%s12023_s27 + $0x44] sm:$0xff]  }
 0x36a   : > { %v11064_v48 = vpop.f32.mrf.mxu1  ;;  %v8102_v50 = vshrl.u32 %v11904_v62, 16 }
 0x36b   : > { %v14214_v47 = vadd.f32 %v6576_v10, %v6248_v28  ;;  %v11120_v7 = vpop.f32.mrf.mxu0  ;;  %v8082_v4 = vsel %vm1295_vm4, %v8072_v60, %v8081_v0  ;;  %v8439_v10 = vsel %vm1672_vm3, %v8436_v31, %v8438_v19  ;;  %v8095_v31 = vrot.slane %v8093_v33, 1 }
 0x36c   : > { %v6196_v36 = vpop.f32.mrf.mxu1  ;;  %11366 = vmatmul.mubr.bf16.vlgmr.msra.gmra.mxu1 %v8073_v8  ;;  %v8441_v8 = vsel %vm1672_vm3, %v8438_v19, %v8440_v51  ;;  %v8105_v7 = vshll.u32 %v11904_v62, 16  ;;  %v8104_v19 = vrot.slane %v8102_v50, 1 }
 0x36d   : > { %v6249_v12 = vadd.f32 %v6196_v36, %v14042_v57  ;;  %11369 = vmatprep.mubr.msk.bf16.mxu1 %vm11963_vm0, %v11962_v1  ;;  %v6589_v54 = vpop.f32.mrf.mxu0  ;;  %11422 = vmatmul.mubr.bf16.gmra.mxu0 %v8437_v24 }
 0x36e   : > { %v11067_v18 = vpop.f32.mrf.mxu1  ;;  %11425 = vmatprep.mubr.msk.bf16.mxu0 %vm11963_vm0, %v11962_v1 }
 0x36f   : > { %v14221_v9 = vadd.f32 %v6581_v39, %v6249_v12  ;;  %v11123_v41 = vpop.f32.mrf.mxu0 }
 0x370   : > { %v6199_v15 = vpop.f32.mrf.mxu1  ;;  %v8107_v41 = vrot.slane %v8105_v7, 2 }
 0x371   : > { %v6250_v57 = vadd.f32 %v6199_v15, %v14060_v49  ;;  %v6592_v46 = vpop.f32.mrf.mxu0  ;;  %v8090_v49 = vor.u32 %v8089_v5, %v8086_v27  ;;  %v11906_v15 = vld [vmem:[%s12023_s27 + $0x4c] sm:$0xff]  }
 0x372   : > { %v11068_v21 = vpop.f32.mrf.mxu1  ;;  %v8111_v42 = vshrl.u32 %v11906_v15, 16 }
 0x373   : > { %v14228_v29 = vadd.f32 %v6584_v16, %v6250_v57  ;;  %v11124_v61 = vpop.f32.mrf.mxu0  ;;  %v8091_v3 = vsel %vm1295_vm4, %v8081_v0, %v8090_v49  ;;  %v11905_v16 = vld [vmem:[%s12023_s27 + $0x44] sm:$0xff]  }
 0x374   : > { %v6204_v58 = vpop.f32.mrf.mxu1  ;;  %11370 = vmatmul.mubr.bf16.gmra.mxu1 %v8082_v4  ;;  %v8442_v12 = vrot.slane %v11905_v16, 2  ;;  %v8114_v61 = vshll.u32 %v11906_v15, 16 }
 0x375   : > { %v6251_v56 = vadd.f32 %v6204_v58, %v14079_v55  ;;  %11373 = vmatprep.mubr.msk.bf16.mxu1 %vm11963_vm0, %v11962_v1  ;;  %v6597_v25 = vpop.f32.mrf.mxu0  ;;  %11426 = vmatmul.mubr.bf16.gmra.mxu0 %v8439_v10 }
 0x376   : > { %v11071_v2 = vpop.f32.mrf.mxu1  ;;  %11429 = vmatprep.mubr.msk.bf16.mxu0 %vm11963_vm0, %v11962_v1  ;;  %v8443_v4 = vsel %vm1672_vm3, %v8440_v51, %v8442_v12  ;;  %v8113_v51 = vrot.slane %v8111_v42, 1  ;;  %v6001_v42 = vld [vmem:[#allocation2 + $0x60] sm:$0xf] }
 0x377   : > { %v14235_v60 = vadd.f32 %v6589_v54, %v6251_v56  ;;  %v11127_v39 = vpop.f32.mrf.mxu0 }
 0x378   : > { %v6207_v37 = vpop.f32.mrf.mxu1  ;;  %v8116_v39 = vrot.slane %v8114_v61, 2 }
 0x379   : > { %v6252_v55 = vadd.f32 %v6207_v37, %v14097_v53  ;;  %v6600_v35 = vpop.f32.mrf.mxu0  ;;  %v8099_v53 = vor.u32 %v8098_v30, %v8095_v31  ;;  %v11908_v37 = vld [vmem:[%s12023_s27 + $0x54] sm:$0xff]  }
 0x37a   : > { %v11072_v28 = vpop.f32.mrf.mxu1  ;;  %v8120_v16 = vshrl.u32 %v11908_v37, 16 }
 0x37b   : > { %v14242_v14 = vadd.f32 %v6592_v46, %v6252_v55  ;;  %v11128_v6 = vpop.f32.mrf.mxu0  ;;  %v8100_v13 = vsel %vm1295_vm4, %v8090_v49, %v8099_v53  ;;  %v11907_v46 = vld [vmem:[%s12023_s27 + $0x4c] sm:$0xff]  }
 0x37c   : > { %v6212_v17 = vpop.f32.mrf.mxu1  ;;  %11374 = vmatmul.mubr.bf16.gmra.mxu1 %v8091_v3  ;;  %v8444_v56 = vrot.slane %v11907_v46, 2  ;;  %v8123_v6 = vshll.u32 %v11908_v37, 16 }
 0x37d   : > { %v6253_v48 = vadd.f32 %v6212_v17, %v14114_v38  ;;  %11377 = vmatprep.mubr.msk.bf16.mxu1 %vm11963_vm0, %v11962_v1  ;;  %v6605_v24 = vpop.f32.mrf.mxu0  ;;  %11430 = vmatmul.mubr.bf16.gmra.mxu0 %v8441_v8 }
 0x37e   : > { %v11075_v36 = vpop.f32.mrf.mxu1  ;;  %11433 = vmatprep.mubr.msk.bf16.mxu0 %vm11963_vm0, %v11962_v1  ;;  %v8445_v3 = vsel %vm1672_vm3, %v8442_v12, %v8444_v56  ;;  %v8122_v12 = vrot.slane %v8120_v16, 1 }
 0x37f   : > { %v14249_v0 = vadd.f32 %v6597_v25, %v6253_v48  ;;  %v11131_v54 = vpop.f32.mrf.mxu0 }
 0x380   : > { %v6215_v40 = vpop.f32.mrf.mxu1  ;;  %v8125_v54 = vrot.slane %v8123_v6, 2 }
 0x381   : > { %v6254_v38 = vadd.f32 %v6215_v40, %v14129_v59  ;;  %v6608_v18 = vpop.f32.mrf.mxu0  ;;  %v8108_v59 = vor.u32 %v8107_v41, %v8104_v19  ;;  %v11910_v40 = vld [vmem:[%s12023_s27 + $0x5c] sm:$0xff]  }
 0x382   : > { %v11076_v57 = vpop.f32.mrf.mxu1  ;;  %v8129_v46 = vshrl.u32 %v11910_v40, 16 }
 0x383   : > { %v14256_v27 = vadd.f32 %v6600_v35, %v6254_v38  ;;  %v11132_v5 = vpop.f32.mrf.mxu0  ;;  %v8109_v23 = vsel %vm1295_vm4, %v8099_v53, %v8108_v59  ;;  %v11909_v35 = vld [vmem:[%s12023_s27 + $0x54] sm:$0xff]  }
 0x384   : > { %v6220_v32 = vpop.f32.mrf.mxu1  ;;  %11378 = vmatmul.mubr.bf16.gmra.mxu1 %v8100_v13  ;;  %v8446_v48 = vrot.slane %v11909_v35, 2  ;;  %v8132_v5 = vshll.u32 %v11910_v40, 16 }
 0x385   : > { %v6255_v21 = vadd.f32 %v6220_v32, %v14141_v45  ;;  %11381 = vmatprep.mubr.msk.bf16.mxu1 %vm11963_vm0, %v11962_v1  ;;  %v6613_v10 = vpop.f32.mrf.mxu0  ;;  %11434 = vmatmul.mubr.bf16.gmra.mxu0 %v8443_v4 }
 0x386   : > { %v11079_v58 = vpop.f32.mrf.mxu1  ;;  %11437 = vmatprep.mubr.msk.bf16.mxu0 %vm11963_vm0, %v11962_v1  ;;  %v8447_v13 = vsel %vm1672_vm3, %v8444_v56, %v8446_v48 }
 0x387   : > { %v14263_v49 = vadd.f32 %v6605_v24, %v6255_v21  ;;  %v11135_v25 = vpop.f32.mrf.mxu0 }
 0x388   : > { %v6223_v33 = vpop.f32.mrf.mxu1  ;;  %v8131_v25 = vrot.slane %v8129_v46, 1 }
 0x389   : > { %v6256_v45 = vadd.f32 %v6223_v33, %v14148_v26  ;;  %v6616_v2 = vpop.f32.mrf.mxu0  ;;  %v8117_v26 = vor.u32 %v8116_v39, %v8113_v51  ;;  %v8134_v33 = vrot.slane %v8132_v5, 2 }
 0x38a   : > { %v11080_v55 = vpop.f32.mrf.mxu1 }
 0x38b   : > { %v14270_v31 = vadd.f32 %v6608_v18, %v6256_v45  ;;  %v11136_v30 = vpop.f32.mrf.mxu0  ;;  %v8118_v7 = vsel %vm1295_vm4, %v8108_v59, %v8117_v26  ;;  %v11911_v18 = vld [vmem:[%s12023_s27 + $0x5c] sm:$0xff]   ;;  %v8135_v37 = vor.u32 %v8134_v33, %v8131_v25 }
 0x38c   : > { %v6228_v62 = vpop.f32.mrf.mxu1  ;;  %11382 = vmatmul.mubr.bf16.gmra.mxu1 %v8109_v23  ;;  %v8448_v21 = vrot.slane %v11911_v18, 2 }
 0x38d   : > { %v6257_v28 = vadd.f32 %v6228_v62, %v14156_v43  ;;  %11385 = vmatprep.mubr.msk.bf16.mxu1 %vm11963_vm0, %v11962_v1  ;;  %v6621_v8 = vpop.f32.mrf.mxu0  ;;  %11438 = vmatmul.mubr.bf16.gmra.mxu0 %v8445_v3 }
 0x38e   : > { %v11083_v17 = vpop.f32.mrf.mxu1  ;;  %11441 = vmatprep.mubr.msk.bf16.mxu0 %vm11963_vm0, %v11962_v1  ;;  %v8449_v23 = vsel %vm1672_vm3, %v8446_v48, %v8448_v21 }
 0x38f   : > { %v14277_v53 = vadd.f32 %v6613_v10, %v6257_v28  ;;  %v11139_v24 = vpop.f32.mrf.mxu0 }
 0x390   : > { %v6231_v50 = vpop.f32.mrf.mxu1 }
 0x391   : > { %v6258_v43 = vadd.f32 %v6231_v50, %v14162_v22  ;;  %v6624_v36 = vpop.f32.mrf.mxu0  ;;  %v8126_v22 = vor.u32 %v8125_v54, %v8122_v12 }
 0x392   : > { %v11084_v38 = vpop.f32.mrf.mxu1 }
 0x393   : > { %v14284_v19 = vadd.f32 %v6616_v2, %v6258_v43  ;;  %v11140_v41 = vpop.f32.mrf.mxu0 }
 0x394   : > { %v6236_v15 = vpop.f32.mrf.mxu1  ;;  %11386 = vmatmul.mubr.bf16.gmra.mxu1 %v8118_v7 }
 0x395   : > { %v6259_v57 = vadd.f32 %v6236_v15, %v14170_v34  ;;  %11389 = vmatprep.mubr.msk.bf16.mxu1 %vm11963_vm0, %v11962_v1  ;;  %v7172_v4 = vpop.f32.mrf.mxu0  ;;  %11442 = vmatmul.mubr.bf16.gmra.mxu0 %v8447_v13  ;;  %v8127_v34 = vsel %vm1295_vm4, %v8117_v26, %v8126_v22  ;;  %v8136_v26 = vsel %vm1295_vm4, %v8126_v22, %v8135_v37 }
 0x396   : > { %v11087_v32 = vpop.f32.mrf.mxu1  ;;  %11445 = vmatprep.mubr.msk.bf16.mxu0 %vm11963_vm0, %v11962_v1 }
 0x397   : > { %v14291_v59 = vadd.f32 %v6621_v8, %v6259_v57  ;;  %v11211_v10 = vpop.f32.mrf.mxu0 }
 0x398   : > { %v6239_v61 = vpop.f32.mrf.mxu1 }
 0x399   : > { %v6260_v58 = vadd.f32 %v6239_v61, %v6001_v42  ;;  %v7175_v56 = vpop.f32.mrf.mxu0 }
 0x39a   : > { %v11088_v45 = vpop.f32.mrf.mxu1 }
 0x39b   : > { %6278 = vst [vmem:[#allocation2 + $0x60] sm:$0xf] %v6260_v58  ;;  %v11212_v2 = vpop.f32.mrf.mxu0 }
 0x39c   : > { %v6876_v51 = vpop.f32.mrf.mxu1  ;;  %11390 = vmatmul.mubr.bf16.gmra.mxu1 %v8127_v34 }
 0x39d   : > { %v6947_v39 = vadd.f32 %v6876_v51, %v14179_v11  ;;  %11393 = vmatprep.mubr.msk.bf16.mxu1 %vm11963_vm0, %v11962_v1  ;;  %v7180_v55 = vpop.f32.mrf.mxu0  ;;  %11446 = vmatmul.mubr.bf16.gmra.mxu0 %v8449_v23 }
 0x39e   : > { %v11159_v3 = vpop.f32.mrf.mxu1  ;;  %11449 = vmatprep.mubr.msk.bf16.mxu0 %vm11963_vm0, %v11962_v1 }
 0x39f   : > { %v14300_v35 = vadd.f32 %v7172_v4, %v6947_v39  ;;  %v11215_v30 = vpop.f32.mrf.mxu0 }
 0x3a0   : > { %v6879_v62 = vpop.f32.mrf.mxu1 }
 0x3a1   : > { %v6948_v28 = vadd.f32 %v6879_v62, %v14187_v63  ;;  %v7183_v8 = vpop.f32.mrf.mxu0 }
 0x3a2   : > { %v6315_v11 = vld [vmem:[#allocation2 + $0x60] sm:$0xf]  ;;  %v11160_v16 = vpop.f32.mrf.mxu1 }
 0x3a3   : > { %v6645_v6 = vadd.f32 %v6624_v36, %v6315_v11  ;;  %v14304_v17 = vadd.f32 %v7175_v56, %v6948_v28  ;;  %v11216_v48 = vpop.f32.mrf.mxu0 }
 0x3a4   : > { %v6884_v24 = vpop.f32.mrf.mxu1  ;;  %11394 = vmatmul.mubr.bf16.gmra.mxu1 %v8136_v26 }
 0x3a5   : > { %6663 = vst [vmem:[#allocation2 + $0x60] sm:$0xf] %v6645_v6  ;;  %v6949_v50 = vadd.f32 %v6884_v24, %v14194_v20  ;;  %11397 = vmatprep.mubr.msk.bf16.mxu1 %vm11963_vm0, %v11962_v1  ;;  %v7188_v43 = vpop.f32.mrf.mxu0  ;;  %11450 = vmatmul.mubr.bf16.gmra.mxu0 %v8448_v21 }
 0x3a6   : > { %v11163_v63 = vpop.f32.mrf.mxu1 }
 0x3a7   : > { %v14309_v7 = vadd.f32 %v7180_v55, %v6949_v50  ;;  %v11219_v12 = vpop.f32.mrf.mxu0 }
 0x3a8   : > { %v6887_v54 = vpop.f32.mrf.mxu1 }
 0x3a9   : > { %v6950_v36 = vadd.f32 %v6887_v54, %v14200_v44  ;;  %v7191_v40 = vpop.f32.mrf.mxu0 }
 0x3aa   : > { %v11164_v38 = vpop.f32.mrf.mxu1 }
 0x3ab   : > { %v14312_v13 = vadd.f32 %v7183_v8, %v6950_v36  ;;  %v11220_v18 = vpop.f32.mrf.mxu0 }
 0x3ac   : > { %v6892_v41 = vpop.f32.mrf.mxu1  ;;  %11398 = vmatmul.mubr.bf16.gmra.mxu1 %v8135_v37 }
 0x3ad   : > { %v6951_v20 = vadd.f32 %v6892_v41, %v14207_v52  ;;  %v7196_v15 = vpop.f32.mrf.mxu0 }
 0x3ae   : > { %v11167_v1 = vpop.f32.mrf.mxu1 }
 0x3af   : > { %v14315_v57 = vadd.f32 %v7188_v43, %v6951_v20  ;;  %v11223_v22 = vpop.f32.mrf.mxu0 }
 0x3b0   : > { %v6895_v4 = vpop.f32.mrf.mxu1 }
 0x3b1   : > { %v6952_v46 = vadd.f32 %v6895_v4, %v14214_v47  ;;  %v7199_v5 = vpop.f32.mrf.mxu0 }
 0x3b2   : > { %v11168_v32 = vpop.f32.mrf.mxu1 }
 0x3b3   : > { %v14318_v44 = vadd.f32 %v7191_v40, %v6952_v46  ;;  %v11224_v21 = vpop.f32.mrf.mxu0 }
 0x3b4   : > { %v6900_v10 = vpop.f32.mrf.mxu1 }
 0x3b5   : > { %v6953_v42 = vadd.f32 %v6900_v10, %v14221_v9  ;;  %v7204_v61 = vpop.f32.mrf.mxu0 }
 0x3b6   : > { %v11171_v58 = vpop.f32.mrf.mxu1 }
 0x3b7   : > { %v14321_v34 = vadd.f32 %v7196_v15, %v6953_v42  ;;  %v11227_v52 = vpop.f32.mrf.mxu0 }
 0x3b8   : > { %v6903_v56 = vpop.f32.mrf.mxu1 }
 0x3b9   : > { %v6954_v25 = vadd.f32 %v6903_v56, %v14228_v29  ;;  %v7207_v33 = vpop.f32.mrf.mxu0 }
 0x3ba   : > { %v11172_v45 = vpop.f32.mrf.mxu1 }
 0x3bb   : > { %v14324_v23 = vadd.f32 %v7199_v5, %v6954_v25  ;;  %v11228_v47 = vpop.f32.mrf.mxu0 }
 0x3bc   : > { %v6908_v2 = vpop.f32.mrf.mxu1 }
 0x3bd   : > { %v6955_v51 = vadd.f32 %v6908_v2, %v14235_v60  ;;  %v7212_v39 = vpop.f32.mrf.mxu0  ;;  %v6700_v2 = vld [vmem:[#allocation2 + $0x60] sm:$0xf] }
 0x3be   : > { %v11175_v37 = vpop.f32.mrf.mxu1 }
 0x3bf   : > { %v14327_v55 = vadd.f32 %v7204_v61, %v6955_v51  ;;  %v11231_v9 = vpop.f32.mrf.mxu0 }
 0x3c0   : > { %v6911_v3 = vpop.f32.mrf.mxu1 }
 0x3c1   : > { %v6956_v30 = vadd.f32 %v6911_v3, %v14242_v14  ;;  %v7215_v62 = vpop.f32.mrf.mxu0 }
 0x3c2   : > { %v11176_v28 = vpop.f32.mrf.mxu1 }
 0x3c3   : > { %v14330_v26 = vadd.f32 %v7207_v33, %v6956_v30  ;;  %v11232_v29 = vpop.f32.mrf.mxu0 }
 0x3c4   : > { %v6916_v8 = vpop.f32.mrf.mxu1 }
 0x3c5   : > { %v6957_v11 = vadd.f32 %v6916_v8, %v14249_v0  ;;  %v7220_v16 = vpop.f32.mrf.mxu0 }
 0x3c6   : > { %v11179_v6 = vpop.f32.mrf.mxu1 }
 0x3c7   : > { %v14333_v48 = vadd.f32 %v7212_v39, %v6957_v11  ;;  %v11235_v60 = vpop.f32.mrf.mxu0 }
 0x3c8   : > { %v6919_v24 = vpop.f32.mrf.mxu1 }
 0x3c9   : > { %v6958_v50 = vadd.f32 %v6919_v24, %v14256_v27  ;;  %v7223_v43 = vpop.f32.mrf.mxu0 }
 0x3ca   : > { %v11180_v63 = vpop.f32.mrf.mxu1 }
 0x3cb   : > { %v14336_v12 = vadd.f32 %v7215_v62, %v6958_v50  ;;  %v11236_v14 = vpop.f32.mrf.mxu0 }
 0x3cc   : > { %v6924_v54 = vpop.f32.mrf.mxu1 }
 0x3cd   : > { %v6959_v36 = vadd.f32 %v6924_v54, %v14263_v49  ;;  %v7228_v40 = vpop.f32.mrf.mxu0 }
 0x3ce   : > { %v11183_v38 = vpop.f32.mrf.mxu1 }
 0x3cf   : > { %v14339_v18 = vadd.f32 %v7220_v16, %v6959_v36  ;;  %v11239_v0 = vpop.f32.mrf.mxu0 }
 0x3d0   : > { %v6927_v41 = vpop.f32.mrf.mxu1 }
 0x3d1   : > { %v6960_v20 = vadd.f32 %v6927_v41, %v14270_v31  ;;  %v7231_v15 = vpop.f32.mrf.mxu0 }
 0x3d2   : > { %v11184_v1 = vpop.f32.mrf.mxu1 }
 0x3d3   : > { %v14342_v22 = vadd.f32 %v7223_v43, %v6960_v20  ;;  %v11240_v27 = vpop.f32.mrf.mxu0 }
 0x3d4   : > { %v6932_v4 = vpop.f32.mrf.mxu1 }
 0x3d5   : > { %v6961_v46 = vadd.f32 %v6932_v4, %v14277_v53  ;;  %v7236_v5 = vpop.f32.mrf.mxu0 }
 0x3d6   : > { %v11187_v32 = vpop.f32.mrf.mxu1 }
 0x3d7   : > { %v14345_v21 = vadd.f32 %v7228_v40, %v6961_v46  ;;  %v11243_v49 = vpop.f32.mrf.mxu0 }
 0x3d8   : > { %v6935_v10 = vpop.f32.mrf.mxu1 }
 0x3d9   : > { %v6962_v42 = vadd.f32 %v6935_v10, %v14284_v19  ;;  %v7239_v61 = vpop.f32.mrf.mxu0 }
 0x3da   : > { %v11188_v58 = vpop.f32.mrf.mxu1 }
 0x3db   : > { %v14348_v52 = vadd.f32 %v7231_v15, %v6962_v42  ;;  %v11244_v31 = vpop.f32.mrf.mxu0 }
 0x3dc   : > { %v6940_v56 = vpop.f32.mrf.mxu1 }
 0x3dd   : > { %v6963_v25 = vadd.f32 %v6940_v56, %v14291_v59  ;;  %v7852_v33 = vpop.f32.mrf.mxu0 }
 0x3de   : > { %v11191_v45 = vpop.f32.mrf.mxu1 }
 0x3df   : > { %v14351_v47 = vadd.f32 %v7236_v5, %v6963_v25  ;;  %v11315_v53 = vpop.f32.mrf.mxu0 }
 0x3e0   : > { %v6943_v51 = vpop.f32.mrf.mxu1 }
 0x3e1   : > { %v6964_v39 = vadd.f32 %v6943_v51, %v6700_v2  ;;  %v7855_v37 = vpop.f32.mrf.mxu0 }
 0x3e2   : > { %v11192_v9 = vpop.f32.mrf.mxu1 }
 0x3e3   : > { %6982 = vst [vmem:[#allocation2 + $0x60] sm:$0xf] %v6964_v39  ;;  %v11316_v19 = vpop.f32.mrf.mxu0 }
 0x3e4   : > { %v7539_v3 = vpop.f32.mrf.mxu1 }
 0x3e5   : > { %v7610_v30 = vadd.f32 %v7539_v3, %v14300_v35  ;;  %v7860_v62 = vpop.f32.mrf.mxu0 }
 0x3e6   : > { %v11263_v28 = vpop.f32.mrf.mxu1 }
 0x3e7   : > { %v14354_v29 = vadd.f32 %v7852_v33, %v7610_v30  ;;  %v11319_v59 = vpop.f32.mrf.mxu0  ;;  %v11964_v33 = vmov 0  }
 0x3e8   : > { %v7542_v8 = vpop.f32.mrf.mxu1  ;;  %8751 = vmatprep.subr.bf16.mxu0 %v11964_v33 }
 0x3e9   : > { %v7611_v11 = vadd.f32 %v7542_v8, %v14304_v17  ;;  %v7863_v16 = vpop.f32.mrf.mxu0 }
 0x3ea   : > { %v7018_v6 = vld [vmem:[#allocation2 + $0x60] sm:$0xf]  ;;  %v11264_v60 = vpop.f32.mrf.mxu1 }
 0x3eb   : > { %v7260_v24 = vadd.f32 %v7239_v61, %v7018_v6  ;;  %v14357_v50 = vadd.f32 %v7855_v37, %v7611_v11  ;;  %v11320_v43 = vpop.f32.mrf.mxu0 }
 0x3ec   : > { %v7547_v63 = vpop.f32.mrf.mxu1 }
 0x3ed   : > { %7278 = vst [vmem:[#allocation2 + $0x60] sm:$0xf] %v7260_v24  ;;  %v7612_v14 = vadd.f32 %v7547_v63, %v14309_v7  ;;  %v7868_v35 = vpop.f32.mrf.mxu0 }
 0x3ee   : > { %v11267_v54 = vpop.f32.mrf.mxu1 }
 0x3ef   : > { %v14360_v36 = vadd.f32 %v7860_v62, %v7612_v14  ;;  %v11323_v40 = vpop.f32.mrf.mxu0 }
 0x3f0   : > { %v7550_v38 = vpop.f32.mrf.mxu1 }
 0x3f1   : > { %v7613_v0 = vadd.f32 %v7550_v38, %v14312_v13  ;;  %v7871_v17 = vpop.f32.mrf.mxu0 }
 0x3f2   : > { %v11268_v41 = vpop.f32.mrf.mxu1 }
 0x3f3   : > { %v14363_v20 = vadd.f32 %v7863_v16, %v7613_v0  ;;  %v11324_v15 = vpop.f32.mrf.mxu0 }
 0x3f4   : > { %v7555_v1 = vpop.f32.mrf.mxu1 }
 0x3f5   : > { %v7614_v27 = vadd.f32 %v7555_v1, %v14315_v57  ;;  %v7876_v4 = vpop.f32.mrf.mxu0 }
 0x3f6   : > { %v11271_v46 = vpop.f32.mrf.mxu1 }
 0x3f7   : > { %v14366_v5 = vadd.f32 %v7868_v35, %v7614_v27  ;;  %v11327_v7 = vpop.f32.mrf.mxu0 }
 0x3f8   : > { %v7558_v32 = vpop.f32.mrf.mxu1 }
 0x3f9   : > { %v7615_v49 = vadd.f32 %v7558_v32, %v14318_v44  ;;  %v7879_v10 = vpop.f32.mrf.mxu0 }
 0x3fa   : > { %v11272_v42 = vpop.f32.mrf.mxu1 }
 0x3fb   : > { %v14369_v61 = vadd.f32 %v7871_v17, %v7615_v49  ;;  %v11328_v13 = vpop.f32.mrf.mxu0 }
 0x3fc   : > { %v7563_v58 = vpop.f32.mrf.mxu1 }
 0x3fd   : > { %v7616_v31 = vadd.f32 %v7563_v58, %v14321_v34  ;;  %v7884_v56 = vpop.f32.mrf.mxu0 }
 0x3fe   : > { %v11275_v25 = vpop.f32.mrf.mxu1 }
 0x3ff   : > { %v14373_v57 = vadd.f32 %v7876_v4, %v7616_v31  ;;  %v11331_v45 = vpop.f32.mrf.mxu0  ;;  %v11914_v31 = vld [vmem:[%s14515_s3 + $0x4] ss:$8 sps:$4 sm:$0xff]  }
 0x400   : > { %v7566_v53 = vpop.f32.mrf.mxu1  ;;  %9705 = vmatprep.mubr.msk.bf16.mxu0 %vm8740_vm8, %v11914_v31 }
 0x401   : > { %v7617_v2 = vadd.f32 %v7566_v53, %v14324_v23  ;;  %v7887_v44 = vpop.f32.mrf.mxu0 }
 0x402   : > { %v11276_v51 = vpop.f32.mrf.mxu1 }
 0x403   : > { %v14376_v39 = vadd.f32 %v7879_v10, %v7617_v2  ;;  %v11332_v37 = vpop.f32.mrf.mxu0 }
 0x404   : > { %v7571_v9 = vpop.f32.mrf.mxu1 }
 0x405   : > { %v7618_v19 = vadd.f32 %v7571_v9, %v14327_v55  ;;  %v7892_v34 = vpop.f32.mrf.mxu0 }
 0x406   : > { %v11279_v3 = vpop.f32.mrf.mxu1 }
 0x407   : > { %v14379_v30 = vadd.f32 %v7884_v56, %v7618_v19  ;;  %v11335_v62 = vpop.f32.mrf.mxu0 }
 0x408   : > { %v7574_v28 = vpop.f32.mrf.mxu1 }
 0x409   : > { %v7619_v59 = vadd.f32 %v7574_v28, %v14330_v26  ;;  %v7895_v8 = vpop.f32.mrf.mxu0 }
 0x40a   : > { %v11280_v11 = vpop.f32.mrf.mxu1 }
 0x40b   : > { %v14382_v16 = vadd.f32 %v7887_v44, %v7619_v59  ;;  %v11336_v23 = vpop.f32.mrf.mxu0 }
 0x40c   : > { %v7579_v6 = vpop.f32.mrf.mxu1 }
 0x40d   : > { %v7620_v60 = vadd.f32 %v7579_v6, %v14333_v48  ;;  %v7900_v24 = vpop.f32.mrf.mxu0 }
 0x40e   : > { %v11283_v43 = vpop.f32.mrf.mxu1 }
 0x40f   : > { %v14385_v63 = vadd.f32 %v7892_v34, %v7620_v60  ;;  %v11339_v55 = vpop.f32.mrf.mxu0  ;;  %v7314_v34 = vld [vmem:[#allocation2 + $0x60] sm:$0xf] }
 0x410   : > { %v7582_v14 = vpop.f32.mrf.mxu1 }
 0x411   : > { %v7621_v35 = vadd.f32 %v7582_v14, %v14336_v12  ;;  %v7903_v54 = vpop.f32.mrf.mxu0 }
 0x412   : > { %v11284_v40 = vpop.f32.mrf.mxu1 }
 0x413   : > { %v14388_v38 = vadd.f32 %v7895_v8, %v7621_v35  ;;  %v11340_v26 = vpop.f32.mrf.mxu0 }
 0x414   : > { %v7587_v0 = vpop.f32.mrf.mxu1 }
 0x415   : > { %v7622_v17 = vadd.f32 %v7587_v0, %v14339_v18  ;;  %v7908_v41 = vpop.f32.mrf.mxu0 }
 0x416   : > { %v11287_v15 = vpop.f32.mrf.mxu1 }
 0x417   : > { %v14391_v1 = vadd.f32 %v7900_v24, %v7622_v17  ;;  %v11343_v48 = vpop.f32.mrf.mxu0 }
 0x418   : > { %v7590_v27 = vpop.f32.mrf.mxu1 }
 0x419   : > { %v7623_v4 = vadd.f32 %v7590_v27, %v14342_v22  ;;  %v7911_v46 = vpop.f32.mrf.mxu0 }
 0x41a   : > { %v11288_v7 = vpop.f32.mrf.mxu1 }
 0x41b   : > { %v14394_v32 = vadd.f32 %v7903_v54, %v7623_v4  ;;  %v11344_v12 = vpop.f32.mrf.mxu0 }
 0x41c   : > { %v7595_v49 = vpop.f32.mrf.mxu1 }
 0x41d   : > { %v7624_v10 = vadd.f32 %v7595_v49, %v14345_v21  ;;  %v7916_v42 = vpop.f32.mrf.mxu0 }
 0x41e   : > { %v11291_v13 = vpop.f32.mrf.mxu1 }
 0x41f   : > { %v14397_v58 = vadd.f32 %v7908_v41, %v7624_v10  ;;  %v11347_v18 = vpop.f32.mrf.mxu0 }
 0x420   : > { %v7598_v56 = vpop.f32.mrf.mxu1 }
 0x421   : > { %v7625_v22 = vadd.f32 %v7598_v56, %v14348_v52  ;;  %v7919_v25 = vpop.f32.mrf.mxu0 }
 0x422   : > { %v11292_v45 = vpop.f32.mrf.mxu1 }
 0x423   : > { %v14404_v53 = vadd.f32 %v7911_v46, %v7625_v22  ;;  %v11348_v21 = vpop.f32.mrf.mxu0 }
 0x424   : > { %v7603_v2 = vpop.f32.mrf.mxu1 }
 0x425   : > { %v7626_v44 = vadd.f32 %v7603_v2, %v14351_v47  ;;  %v8541_v51 = vpop.f32.mrf.mxu0  ;;  %v14413_v47 = vld [vmem:[%s14514_s2] ss:$0 sm:$0xff] }
 0x426   : > { %v11295_v37 = vpop.f32.mrf.mxu1 }
 0x427   : > { %v14407_v9 = vadd.f32 %v7916_v42, %v7626_v44  ;;  %v11419_v19 = vpop.f32.mrf.mxu0 }
 0x428   : > { %v7606_v3 = vpop.f32.mrf.mxu1 }
 0x429   : > { %v7627_v62 = vadd.f32 %v7606_v3, %v7314_v34  ;;  %v8544_v28 = vpop.f32.mrf.mxu0 }
 0x42a   : > { %v11296_v52 = vpop.f32.mrf.mxu1 }
 0x42b   : > { %7645 = vst [vmem:[#allocation2 + $0x60] sm:$0xf] %v7627_v62  ;;  %v11420_v59 = vpop.f32.mrf.mxu0 }
 0x42c   : > { %v8228_v8 = vpop.f32.mrf.mxu1 }
 0x42d   : > { %v8299_v11 = vadd.f32 %v8228_v8, %v14354_v29  ;;  %v8549_v23 = vpop.f32.mrf.mxu0 }
 0x42e   : > { %v11367_v6 = vpop.f32.mrf.mxu1 }
 0x42f   : > { %v8612_v60 = vadd.f32 %v8541_v51, %v8299_v11  ;;  %v11423_v24 = vpop.f32.mrf.mxu0 }
 0x430   : > { %v8231_v43 = vpop.f32.mrf.mxu1 }
 0x431   : > { %v8300_v55 = vadd.f32 %v8231_v43, %v14357_v50  ;;  %v8552_v14 = vpop.f32.mrf.mxu0  ;;  %v8673_v40 = vadd.f32 %v14413_v47, %v8612_v60 }
 0x432   : > { %v7681_v35 = vld [vmem:[#allocation2 + $0x60] sm:$0xf]  ;;  %v11368_v54 = vpop.f32.mrf.mxu1 }
 0x433   : > { %v7940_v26 = vadd.f32 %v7919_v25, %v7681_v35  ;;  %v8613_v0 = vadd.f32 %v8544_v28, %v8300_v55  ;;  %v11424_v29 = vpop.f32.mrf.mxu0  ;;  %11918 = vtanh.f32 %v8673_v40 }
 0x434   : > { %v8236_v17 = vpop.f32.mrf.mxu1 }
 0x435   : > { %7958 = vst [vmem:[#allocation2 + $0x60] sm:$0xf] %v7940_v26  ;;  %v8301_v41 = vadd.f32 %v8236_v17, %v14360_v36  ;;  %v8557_v15 = vpop.f32.mrf.mxu0  ;;  %v8674_v48 = vadd.f32 %v14413_v47, %v8613_v0 }
 0x436   : > { %v11371_v27 = vpop.f32.mrf.mxu1 }
 0x437   : > { %v8614_v4 = vadd.f32 %v8549_v23, %v8301_v41  ;;  %v11427_v46 = vpop.f32.mrf.mxu0  ;;  %11920 = vtanh.f32 %v8674_v48 }
 0x438   : > { %v8239_v50 = vpop.f32.mrf.mxu1 }
 0x439   : > { %v8302_v7 = vadd.f32 %v8239_v50, %v14363_v20  ;;  %v8560_v12 = vpop.f32.mrf.mxu0  ;;  %v8675_v10 = vadd.f32 %v14413_v47, %v8614_v4 }
 0x43a   : > { %v11372_v49 = vpop.f32.mrf.mxu1 }
 0x43b   : > { %v8615_v42 = vadd.f32 %v8552_v14, %v8302_v7  ;;  %v11428_v13 = vpop.f32.mrf.mxu0  ;;  %11922 = vtanh.f32 %v8675_v10 }
 0x43c   : > { %v8244_v18 = vpop.f32.mrf.mxu1 }
 0x43d   : > { %v8303_v36 = vadd.f32 %v8244_v18, %v14366_v5  ;;  %v8565_v31 = vpop.f32.mrf.mxu0  ;;  %v8676_v56 = vadd.f32 %v14413_v47, %v8615_v42 }
 0x43e   : > { %v11375_v22 = vpop.f32.mrf.mxu1 }
 0x43f   : > { %v8616_v25 = vadd.f32 %v8557_v15, %v8303_v36  ;;  %v11431_v45 = vpop.f32.mrf.mxu0  ;;  %11924 = vtanh.f32 %v8676_v56 }
 0x440   : > { %v8247_v21 = vpop.f32.mrf.mxu1  ;;  %v14425_v37 = vpop.eup %11918 }
 0x441   : > { %v8304_v20 = vadd.f32 %v8247_v21, %v14369_v61  ;;  %v8568_v2 = vpop.f32.mrf.mxu0  ;;  %v8677_v51 = vadd.f32 %v14413_v47, %v8616_v25 }
 0x442   : > { %v11376_v44 = vpop.f32.mrf.mxu1 }
 0x443   : > { %v8617_v19 = vadd.f32 %v8560_v12, %v8304_v20  ;;  %v11432_v34 = vpop.f32.mrf.mxu0  ;;  %11926 = vtanh.f32 %v8677_v51 }
 0x444   : > { %v14427_v5 = vpop.eup %11920  ;;  %v8252_v3 = vpop.f32.mrf.mxu1 }
 0x445   : > { %v8305_v62 = vadd.f32 %v8252_v3, %v14373_v57  ;;  %v8573_v28 = vpop.f32.mrf.mxu0  ;;  %v8678_v52 = vadd.f32 %v14413_v47, %v8617_v19  ;;  %v8713_v59 = vpack.c.bf16 %v14427_v5, %v14425_v37  ;;  %v11917_v37 = vld [vmem:[%s14515_s3 + $0x10] ss:$8 sps:$4 sm:$0xff]  }
 0x446   : > { %v11379_v61 = vpop.f32.mrf.mxu1 }
 0x447   : > { %v8618_v8 = vadd.f32 %v8565_v31, %v8305_v62  ;;  %v11435_v11 = vpop.f32.mrf.mxu0  ;;  %11928 = vtanh.f32 %v8678_v52 }
 0x448   : > { %v8255_v23 = vpop.f32.mrf.mxu1  ;;  %v14435_v55 = vpop.eup %11922 }
 0x449   : > { %v8306_v6 = vadd.f32 %v8255_v23, %v14376_v39  ;;  %v8576_v60 = vpop.f32.mrf.mxu0  ;;  %v8679_v43 = vadd.f32 %v14413_v47, %v8618_v8 }
 0x44a   : > { %v11380_v24 = vpop.f32.mrf.mxu1 }
 0x44b   : > { %v8619_v57 = vadd.f32 %v8568_v2, %v8306_v6  ;;  %v11436_v14 = vpop.f32.mrf.mxu0  ;;  %11930 = vtanh.f32 %v8679_v43 }
 0x44c   : > { %v14437_v35 = vpop.eup %11924  ;;  %v8260_v54 = vpop.f32.mrf.mxu1 }
 0x44d   : > { %v8307_v40 = vadd.f32 %v8260_v54, %v14379_v30  ;;  %v8581_v26 = vpop.f32.mrf.mxu0  ;;  %v8680_v0 = vadd.f32 %v14413_v47, %v8619_v57  ;;  %v8714_v29 = vpack.c.bf16 %v14437_v35, %v14435_v55  ;;  %v11915_v55 = vld [vmem:[%s14515_s3 + $0x14] ss:$8 sps:$4 sm:$0xff]  }
 0x44e   : > { %v11383_v39 = vpop.f32.mrf.mxu1 }
 0x44f   : > { %v8620_v17 = vadd.f32 %v8573_v28, %v8307_v40  ;;  %v11439_v41 = vpop.f32.mrf.mxu0  ;;  %11932 = vtanh.f32 %v8680_v0 }
 0x450   : > { %v8263_v15 = vpop.f32.mrf.mxu1  ;;  %v14445_v50 = vpop.eup %11926 }
 0x451   : > { %v8308_v48 = vadd.f32 %v8263_v15, %v14382_v16  ;;  %v8584_v27 = vpop.f32.mrf.mxu0  ;;  %v8681_v46 = vadd.f32 %v14413_v47, %v8620_v17 }
 0x452   : > { %v11384_v4 = vpop.f32.mrf.mxu1 }
 0x453   : > { %v8621_v30 = vadd.f32 %v8576_v60, %v8308_v48  ;;  %v11440_v7 = vpop.f32.mrf.mxu0  ;;  %11934 = vtanh.f32 %v8681_v46 }
 0x454   : > { %v14447_v12 = vpop.eup %11928  ;;  %v8268_v49 = vpop.f32.mrf.mxu1 }
 0x455   : > { %v8309_v10 = vadd.f32 %v8268_v49, %v14385_v63  ;;  %v8589_v42 = vpop.f32.mrf.mxu0  ;;  %v8682_v13 = vadd.f32 %v14413_v47, %v8621_v30  ;;  %v8715_v18 = vpack.c.bf16 %v14447_v12, %v14445_v50  ;;  %v11912_v12 = vld [vmem:[%s14515_s3] ss:$8 sps:$4 sm:$0xff]  }
 0x456   : > { %v11387_v16 = vpop.f32.mrf.mxu1 }
 0x457   : > { %v8622_v36 = vadd.f32 %v8581_v26, %v8309_v10  ;;  %v11443_v31 = vpop.f32.mrf.mxu0  ;;  %11936 = vtanh.f32 %v8682_v13 }
 0x458   : > { %v8271_v56 = vpop.f32.mrf.mxu1  ;;  %v14455_v20 = vpop.eup %11930 }
 0x459   : > { %v8310_v22 = vadd.f32 %v8271_v56, %v14388_v38  ;;  %v8592_v25 = vpop.f32.mrf.mxu0  ;;  %v8683_v21 = vadd.f32 %v14413_v47, %v8622_v36  ;;  %v7994_v36 = vld [vmem:[#allocation2 + $0x60] sm:$0xf] }
 0x45a   : > { %v11388_v45 = vpop.f32.mrf.mxu1 }
 0x45b   : > { %v8623_v63 = vadd.f32 %v8584_v27, %v8310_v22  ;;  %v11444_v2 = vpop.f32.mrf.mxu0  ;;  %11938 = vtanh.f32 %v8683_v21 }
 0x45c   : > { %v14457_v44 = vpop.eup %11932  ;;  %v8276_v51 = vpop.f32.mrf.mxu1 }
 0x45d   : > { %v8311_v19 = vadd.f32 %v8276_v51, %v14391_v1  ;;  %v8597_v34 = vpop.f32.mrf.mxu0  ;;  %v8684_v3 = vadd.f32 %v14413_v47, %v8623_v63  ;;  %v8716_v62 = vpack.c.bf16 %v14457_v44, %v14455_v20 }
 0x45e   : > { %v11391_v38 = vpop.f32.mrf.mxu1 }
 0x45f   : > { %v8624_v28 = vadd.f32 %v8589_v42, %v8311_v19  ;;  %v11447_v52 = vpop.f32.mrf.mxu0  ;;  %11940 = vtanh.f32 %v8684_v3 }
 0x460   : > { %v8279_v61 = vpop.f32.mrf.mxu1  ;;  %v11935_v60 = vpop.eup %11934 }
 0x461   : > { %v8312_v8 = vadd.f32 %v8279_v61, %v14394_v32  ;;  %v8600_v11 = vpop.f32.mrf.mxu0  ;;  %v8685_v6 = vadd.f32 %v14413_v47, %v8624_v28 }
 0x462   : > { %v11392_v23 = vpop.f32.mrf.mxu1 }
 0x463   : > { %v8625_v1 = vadd.f32 %v8592_v25, %v8312_v8  ;;  %v11448_v24 = vpop.f32.mrf.mxu0  ;;  %11942 = vtanh.f32 %v8685_v6 }
 0x464   : > { %v11937_v43 = vpop.eup %11936  ;;  %v8284_v57 = vpop.f32.mrf.mxu1 }
 0x465   : > { %v8313_v14 = vadd.f32 %v8284_v57, %v14397_v58  ;;  %v8605_v54 = vpop.f32.mrf.mxu0  ;;  %v8686_v40 = vadd.f32 %v14413_v47, %v8625_v1  ;;  %v8717_v26 = vpack.c.bf16 %v11937_v43, %v11935_v60 }
 0x466   : > { %v11395_v0 = vpop.f32.mrf.mxu1 }
 0x467   : > { %v8626_v39 = vadd.f32 %v8597_v34, %v8313_v14  ;;  %v11451_v17 = vpop.f32.mrf.mxu0  ;;  %11944 = vtanh.f32 %v8686_v40 }
 0x468   : > { %v8287_v32 = vpop.f32.mrf.mxu1  ;;  %v11939_v4 = vpop.eup %11938 }
 0x469   : > { %v8314_v41 = vadd.f32 %v8287_v32, %v14404_v53  ;;  %v8608_v15 = vpop.f32.mrf.mxu0  ;;  %v8687_v27 = vadd.f32 %v14413_v47, %v8626_v39 }
 0x46a   : > { %v11396_v48 = vpop.f32.mrf.mxu1 }
 0x46b   : > { %v8627_v46 = vadd.f32 %v8600_v11, %v8314_v41  ;;  %v11452_v30 = vpop.f32.mrf.mxu0  ;;  %11946 = vtanh.f32 %v8687_v27 }
 0x46c   : > { %v11941_v58 = vpop.eup %11940  ;;  %v8292_v7 = vpop.f32.mrf.mxu1 }
 0x46d   : > { %v8315_v49 = vadd.f32 %v8292_v7, %v14407_v9  ;;  %v8688_v10 = vadd.f32 %v14413_v47, %v8627_v46  ;;  %v8718_v42 = vpack.c.bf16 %v11941_v58, %v11939_v4 }
 0x46e   : > { %v11399_v13 = vpop.f32.mrf.mxu1 }
 0x46f   : > { %v8628_v16 = vadd.f32 %v8605_v54, %v8315_v49  ;;  %11948 = vtanh.f32 %v8688_v10 }
 0x470   : > { %v8295_v53 = vpop.f32.mrf.mxu1  ;;  %v11943_v22 = vpop.eup %11942 }
 0x471   : > { %v8316_v31 = vadd.f32 %v8295_v53, %v7994_v36  ;;  %v8689_v3 = vadd.f32 %v14413_v47, %v8628_v16 }
 0x472   : > { %v11400_v56 = vpop.f32.mrf.mxu1 }
 0x473   : > { %8334 = vst [vmem:[#allocation2 + $0x60] sm:$0xf] %v8316_v31 }
 0x474   : > { %v11945_v25 = vpop.eup %11944 }
 0x475   : > { %v8719_v45 = vpack.c.bf16 %v11945_v25, %v11943_v22 }
 0x478   : > { %v11947_v63 = vpop.eup %11946 }
 0x47a   : > { %v8370_v21 = vld [vmem:[#allocation2 + $0x60] sm:$0xf] }
 0x47b   : > { %v8629_v2 = vadd.f32 %v8608_v15, %v8370_v21 }
 0x47c   : > { %v11949_v51 = vpop.eup %11948 }
 0x47d   : > { %8647 = vst [vmem:[#allocation2 + $0x60] sm:$0xf] %v8629_v2  ;;  %v8720_v9 = vpack.c.bf16 %v11949_v51, %v11947_v63 }
 0x47f   : > { %8752 = vmatpush1.bf16.msra.mxu0 %v8720_v9 }
 0x480   : > { %8753 = vmatprep.subr.bf16.mxu0 %v11964_v33 }
 0x483   : > { %8754 = vmatpush1.bf16.msra.mxu0 %v8719_v45 }
 0x484   : > { %8755 = vmatprep.subr.bf16.mxu0 %v11964_v33  ;;  %v8665_v19 = vld [vmem:[#allocation2 + $0x60] sm:$0xf] }
 0x485   : > { %v8690_v34 = vadd.f32 %v14413_v47, %v8665_v19 }
 0x487   : > { %8756 = vmatpush1.bf16.msra.mxu0 %v8718_v42  ;;  %11950 = vtanh.f32 %v8690_v34 }
 0x488   : > { %8757 = vmatprep.subr.bf16.mxu0 %v11964_v33  ;;  %11952 = vtanh.f32 %v8689_v3 }
 0x48b   : > { %8758 = vmatpush1.bf16.msra.mxu0 %v8717_v26 }
 0x48c   : > { %8759 = vmatprep.subr.bf16.mxu0 %v11964_v33 }
 0x48f   : > { %8760 = vmatpush1.bf16.msra.mxu0 %v8716_v62 }
 0x490   : > { %8761 = vmatprep.subr.bf16.mxu0 %v11964_v33 }
 0x493   : > { %8762 = vmatpush1.bf16.msra.mxu0 %v8715_v18 }
 0x494   : > { %8763 = vmatprep.subr.bf16.mxu0 %v11964_v33  ;;  %v11951_v38 = vpop.eup %11950 }
 0x495   : > { %v11953_v47 = vpop.eup %11952 }
 0x496   : > { %v8721_v28 = vpack.c.bf16 %v11951_v38, %v11953_v47 }
 0x497   : > { %8764 = vmatpush1.bf16.msra.mxu0 %v8714_v29 }
 0x498   : > { %8765 = vmatprep.subr.bf16.mxu0 %v11964_v33  ;;  %v8749_v50 = vsel %vm1672_vm3, %v8721_v28, 0 }
 0x49b   : > { %8766 = vmatpush1.bf16.msra.mxu0 %v8713_v59 }
 0x49c   : > { %8781 = vmatprep.subr.bf16.mxu0 %v11964_v33 }
 0x49f   : > { %8782 = vmatpush2.bf16.msra.mxu0 %v8749_v50 }
 0x4a2   : > { %8784 = vmatmul.mubr.bf16.vlgmr.msra.gmra.mxu0 %v11912_v12 }
 0x4a3   : > { %9706 = vmatprep.mubr.msk.bf16.mxu0 %vm8740_vm8, %v11915_v55 }
 0x4aa   : > { %8792 = vmatmul.mubr.bf16.gmra.mxu0 %v11917_v37 }
 0x562   : > { %v8785_v33 = vpop.f32.mrf.mxu0 }
 0x564   : > { %v8787_v5 = vpop.f32.mrf.mxu0 }
 0x566   : > { %v8788_v59 = vpop.f32.mrf.mxu0 }
 0x567   : > { %v9720_v35 = vpack.c.bf16 %v8788_v59, %v8785_v33 }
 0x568   : > { %v8790_v29 = vpop.f32.mrf.mxu0 }
 0x569   : > { %9721 = vst [vmem:[%s199_s20] sm:$0xff] %v9720_v35  }
 0x56a   : > { %v8793_v18 = vpop.f32.mrf.mxu0 }
 0x56c   : > { %v8795_v20 = vpop.f32.mrf.mxu0 }
 0x56e   : > { %v8796_v44 = vpop.f32.mrf.mxu0 }
 0x56f   : > { %v9725_v62 = vpack.c.bf16 %v8796_v44, %v8793_v18 }
 0x570   : > { %v8798_v52 = vpop.f32.mrf.mxu0 }
 0x571   : > { %9727 = vst [vmem:[%s199_s20 + $0x8] sm:$0xff] %v9725_v62  }
 0x572 PF: > { %s14_s15 = sadd.s32 1, %s11960_s15  }
 0x573   : > { %p11_p5 = scmp.ge.s32.totalorder %s14_s15, 4  }
 0x575   :  { %13 = sbr.rel (!%p11_p5) target bundleno = 1 (0x1), region = 90 }

</bundles_post_ra>
